<compile_context>
chip_gen: v5e
topology: v5e:2x2
jax: 0.10.0
libtpu: 0.0.40
codegen_flags: <defaults>
</compile_context>

<pallas_src>
import jax
import jax.numpy as jnp
from jax import lax
from jax.experimental import pallas as pl
from jax.experimental.pallas import tpu as pltpu

C = 960                          # channels (== groups, depthwise)
CP = 1024                        # channels padded to a multiple of 128
CB = CP // 2                     # channel block per grid step (512 = 4 lane groups)
H = W = 14                       # input spatial
K = 5                            # kernel size
S = 2                            # stride
P = 2                            # padding
HO = (H + 2 * P - K) // S + 1    # 7
WO = (W + 2 * P - K) // S + 1    # 7
HP = H + 2 * P                   # 18 (padded height)
WHALF = (W + 2 * P) // 2         # 9 columns per parity after deinterleave


def dwconv_kernel(xe_ref, xo_ref, w_ref, o_ref):
    """Depthwise 5x5 / stride-2 conv on one channel block.

    xe_ref: (HP, WHALF, CB)  even-numbered padded columns, channels-last
    xo_ref: (HP, WHALF, CB)  odd-numbered padded columns
    w_ref:  (K*K, 1, CB)     per-channel taps, tap index kh*K + kw on leading dim
    o_ref:  (HO, WO, CB)
    """
    cb = o_ref.shape[-1]
    for kh in range(K):
        # Hoisted sublane-broadcast of the 5 taps of this kernel row; reused by
        # all 7 output rows below (JAX does not CSE broadcast_in_dim, so do it
        # explicitly, once per kh).
        w0 = jnp.broadcast_to(w_ref[K * kh + 0], (WO, cb))   # kw = 0 (even cols)
        w1 = jnp.broadcast_to(w_ref[K * kh + 1], (WO, cb))   # kw = 1 (odd  cols)
        w2 = jnp.broadcast_to(w_ref[K * kh + 2], (WO, cb))   # kw = 2 (even cols)
        w3 = jnp.broadcast_to(w_ref[K * kh + 3], (WO, cb))   # kw = 3 (odd  cols)
        w4 = jnp.broadcast_to(w_ref[K * kh + 4], (WO, cb))   # kw = 4 (even cols)
        for oh in range(HO):
            r = 2 * oh + kh                 # static leading-dim index (free)
            ev = xe_ref[r]                  # (WHALF, CB) dense row, even columns
            od = xo_ref[r]                  # (WHALF, CB) dense row, odd columns
            contrib = (ev[0:WO] * w0
                       + od[0:WO] * w1
                       + ev[1:WO + 1] * w2
                       + od[1:WO + 1] * w3
                       + ev[2:WO + 2] * w4)          # (WO, CB), lane-dense
            if kh == 0:
                o_ref[oh] = contrib
            else:
                o_ref[oh] = o_ref[oh] + contrib


def depthwise_conv2d(x_nchw, weight):
    """x_nchw: (1, C, H, W) f32; weight: (C, 1, K, K) f32 (PyTorch layout)."""
    n, c, h, w = x_nchw.shape
    assert (n, c, h, w) == (1, C, H, W)

    # ---- plain-JAX glue: layout, halo/channel padding, column deinterleave ----
    # TODO(synk): if the surrounding model can supply/consume channels-last
    # activations directly, the NCHW<->HWC transposes here can be dropped.
    x_hwc = jnp.transpose(x_nchw[0], (1, 2, 0))                   # (14, 14, C)
    x_hwc = jnp.pad(x_hwc, ((P, P), (P, P), (0, CP - C)))         # (18, 18, CP)
    x_even = x_hwc[:, 0::2, :]                                    # (18, 9, CP)
    x_odd = x_hwc[:, 1::2, :]                                     # (18, 9, CP)

    w_hwc = jnp.transpose(weight[:, 0, :, :], (1, 2, 0))          # (5, 5, C)
    w_hwc = jnp.pad(w_hwc, ((0, 0), (0, 0), (0, CP - C)))         # (5, 5, CP)
    w_taps = w_hwc.reshape(K * K, 1, CP)                          # (25, 1, CP)

    out_hwc = pl.pallas_call(
        dwconv_kernel,
        out_shape=jax.ShapeDtypeStruct((HO, WO, CP), x_nchw.dtype),
        grid=(CP // CB,),                                          # 2 channel blocks
        in_specs=[
            pl.BlockSpec((HP, WHALF, CB), lambda cidx: (0, 0, cidx)),
            pl.BlockSpec((HP, WHALF, CB), lambda cidx: (0, 0, cidx)),
            pl.BlockSpec((K * K, 1, CB), lambda cidx: (0, 0, cidx)),
        ],
        out_specs=pl.BlockSpec((HO, WO, CB), lambda cidx: (0, 0, cidx)),
        compiler_params=pltpu.CompilerParams(
            dimension_semantics=("parallel",)),
    )(x_even, x_odd, w_taps)

    out_hwc = out_hwc[:, :, :C]                                    # (7, 7, C)
    return jnp.transpose(out_hwc, (2, 0, 1))[None]                 # (1, C, 7, 7)


def reference_conv2d(x_nchw, weight):
    """Pure-JAX reference: grouped conv identical to the PyTorch module."""
    return lax.conv_general_dilated(
        x_nchw, weight,
        window_strides=(S, S),
        padding=((P, P), (P, P)),
        dimension_numbers=("NCHW", "OIHW", "NCHW"),
        feature_group_count=C,
    )


if __name__ == "__main__":
    key = jax.random.PRNGKey(0)
    kx, kw = jax.random.split(key)
    # Module-consistent shapes: input (1, 960, 14, 14), depthwise weight (960, 1, 5, 5)
    x = jax.random.normal(kx, (1, C, H, W), dtype=jnp.float32)
    wgt = 0.1 * jax.random.normal(kw, (C, 1, K, K), dtype=jnp.float32)

    fn = jax.jit(depthwise_conv2d)
    out = jax.block_until_ready(fn(x, wgt))

    ref = jax.block_until_ready(reference_conv2d(x, wgt))
    assert out.shape == (1, C, HO, WO), out.shape
    assert jnp.allclose(out, ref, atol=1e-4, rtol=1e-4), "mismatch vs reference conv"

    print("KERNEL_OK")
</pallas_src>

<mosaic_0001>
module attributes {stable_mosaic.version = 11 : i64} {
  func.func @dwconv_kernel(%arg0: i32, %arg1: memref<18x9x512xf32, #tpu.memory_space<vmem>>, %arg2: memref<18x9x512xf32, #tpu.memory_space<vmem>>, %arg3: memref<25x1x512xf32, #tpu.memory_space<vmem>>, %arg4: memref<7x7x512xf32, #tpu.memory_space<vmem>>) attributes {dimension_semantics = [#tpu.dimension_semantics<parallel>], iteration_bounds = array<i64: 2>, scalar_prefetch = 0 : i64, scratch_operands = 0 : i64, tpu.core_type = #tpu.core_type<tc>, window_params = [{transform_indices = @transform_0, window_bounds = array<i64: 18, 9, 512>}, {transform_indices = @transform_1, window_bounds = array<i64: 18, 9, 512>}, {transform_indices = @transform_2, window_bounds = array<i64: 25, 1, 512>}, {transform_indices = @transform_3, window_bounds = array<i64: 7, 7, 512>}]} {
    %c0 = arith.constant 0 : index
    %c0_0 = arith.constant 0 : index
    %c0_1 = arith.constant 0 : index
    %0 = vector.load %arg3[%c0, %c0_0, %c0_1] : memref<25x1x512xf32, #tpu.memory_space<vmem>>, vector<1x1x512xf32>
    %1 = vector.shape_cast %0 : vector<1x1x512xf32> to vector<1x512xf32>
    %2 = vector.shape_cast %1 : vector<1x512xf32> to vector<1x512xf32>
    %3 = vector.broadcast %2 : vector<1x512xf32> to vector<7x512xf32>
    %c1 = arith.constant 1 : index
    %c0_2 = arith.constant 0 : index
    %c0_3 = arith.constant 0 : index
    %4 = vector.load %arg3[%c1, %c0_2, %c0_3] : memref<25x1x512xf32, #tpu.memory_space<vmem>>, vector<1x1x512xf32>
    %5 = vector.shape_cast %4 : vector<1x1x512xf32> to vector<1x512xf32>
    %6 = vector.shape_cast %5 : vector<1x512xf32> to vector<1x512xf32>
    %7 = vector.broadcast %6 : vector<1x512xf32> to vector<7x512xf32>
    %c2 = arith.constant 2 : index
    %c0_4 = arith.constant 0 : index
    %c0_5 = arith.constant 0 : index
    %8 = vector.load %arg3[%c2, %c0_4, %c0_5] : memref<25x1x512xf32, #tpu.memory_space<vmem>>, vector<1x1x512xf32>
    %9 = vector.shape_cast %8 : vector<1x1x512xf32> to vector<1x512xf32>
    %10 = vector.shape_cast %9 : vector<1x512xf32> to vector<1x512xf32>
    %11 = vector.broadcast %10 : vector<1x512xf32> to vector<7x512xf32>
    %c3 = arith.constant 3 : index
    %c0_6 = arith.constant 0 : index
    %c0_7 = arith.constant 0 : index
    %12 = vector.load %arg3[%c3, %c0_6, %c0_7] : memref<25x1x512xf32, #tpu.memory_space<vmem>>, vector<1x1x512xf32>
    %13 = vector.shape_cast %12 : vector<1x1x512xf32> to vector<1x512xf32>
    %14 = vector.shape_cast %13 : vector<1x512xf32> to vector<1x512xf32>
    %15 = vector.broadcast %14 : vector<1x512xf32> to vector<7x512xf32>
    %c4 = arith.constant 4 : index
    %c0_8 = arith.constant 0 : index
    %c0_9 = arith.constant 0 : index
    %16 = vector.load %arg3[%c4, %c0_8, %c0_9] : memref<25x1x512xf32, #tpu.memory_space<vmem>>, vector<1x1x512xf32>
    %17 = vector.shape_cast %16 : vector<1x1x512xf32> to vector<1x512xf32>
    %18 = vector.shape_cast %17 : vector<1x512xf32> to vector<1x512xf32>
    %19 = vector.broadcast %18 : vector<1x512xf32> to vector<7x512xf32>
    %c0_10 = arith.constant 0 : index
    %c0_11 = arith.constant 0 : index
    %c0_12 = arith.constant 0 : index
    %20 = vector.load %arg1[%c0_10, %c0_11, %c0_12] : memref<18x9x512xf32, #tpu.memory_space<vmem>>, vector<1x9x512xf32>
    %21 = vector.shape_cast %20 : vector<1x9x512xf32> to vector<9x512xf32>
    %c0_13 = arith.constant 0 : index
    %c0_14 = arith.constant 0 : index
    %c0_15 = arith.constant 0 : index
    %22 = vector.load %arg2[%c0_13, %c0_14, %c0_15] : memref<18x9x512xf32, #tpu.memory_space<vmem>>, vector<1x9x512xf32>
    %23 = vector.shape_cast %22 : vector<1x9x512xf32> to vector<9x512xf32>
    %24 = vector.extract_strided_slice %21 {offsets = [0, 0], sizes = [7, 512], strides = [1, 1]} : vector<9x512xf32> to vector<7x512xf32>
    %25 = arith.mulf %24, %3 : vector<7x512xf32>
    %26 = vector.extract_strided_slice %23 {offsets = [0, 0], sizes = [7, 512], strides = [1, 1]} : vector<9x512xf32> to vector<7x512xf32>
    %27 = arith.mulf %26, %7 : vector<7x512xf32>
    %28 = arith.addf %25, %27 : vector<7x512xf32>
    %29 = vector.extract_strided_slice %21 {offsets = [1, 0], sizes = [7, 512], strides = [1, 1]} : vector<9x512xf32> to vector<7x512xf32>
    %30 = arith.mulf %29, %11 : vector<7x512xf32>
    %31 = arith.addf %28, %30 : vector<7x512xf32>
    %32 = vector.extract_strided_slice %23 {offsets = [1, 0], sizes = [7, 512], strides = [1, 1]} : vector<9x512xf32> to vector<7x512xf32>
    %33 = arith.mulf %32, %15 : vector<7x512xf32>
    %34 = arith.addf %31, %33 : vector<7x512xf32>
    %35 = vector.extract_strided_slice %21 {offsets = [2, 0], sizes = [7, 512], strides = [1, 1]} : vector<9x512xf32> to vector<7x512xf32>
    %36 = arith.mulf %35, %19 : vector<7x512xf32>
    %37 = arith.addf %34, %36 : vector<7x512xf32>
    %c0_16 = arith.constant 0 : index
    %c0_17 = arith.constant 0 : index
    %c0_18 = arith.constant 0 : index
    %38 = vector.load %arg4[%c0_16, %c0_17, %c0_18] : memref<7x7x512xf32, #tpu.memory_space<vmem>>, vector<1x7x512xf32>
    %39 = vector.shape_cast %38 : vector<1x7x512xf32> to vector<7x512xf32>
    %40 = vector.shape_cast %37 : vector<7x512xf32> to vector<1x7x512xf32>
    tpu.vector_store %arg4[%c0_16, %c0_17, %c0_18], %40 {strides = array<i32>} : memref<7x7x512xf32, #tpu.memory_space<vmem>>, vector<1x7x512xf32>,
    %c2_19 = arith.constant 2 : index
    %c0_20 = arith.constant 0 : index
    %c0_21 = arith.constant 0 : index
    %41 = vector.load %arg1[%c2_19, %c0_20, %c0_21] : memref<18x9x512xf32, #tpu.memory_space<vmem>>, vector<1x9x512xf32>
    %42 = vector.shape_cast %41 : vector<1x9x512xf32> to vector<9x512xf32>
    %c2_22 = arith.constant 2 : index
    %c0_23 = arith.constant 0 : index
    %c0_24 = arith.constant 0 : index
    %43 = vector.load %arg2[%c2_22, %c0_23, %c0_24] : memref<18x9x512xf32, #tpu.memory_space<vmem>>, vector<1x9x512xf32>
    %44 = vector.shape_cast %43 : vector<1x9x512xf32> to vector<9x512xf32>
    %45 = vector.extract_strided_slice %42 {offsets = [0, 0], sizes = [7, 512], strides = [1, 1]} : vector<9x512xf32> to vector<7x512xf32>
    %46 = arith.mulf %45, %3 : vector<7x512xf32>
    %47 = vector.extract_strided_slice %44 {offsets = [0, 0], sizes = [7, 512], strides = [1, 1]} : vector<9x512xf32> to vector<7x512xf32>
    %48 = arith.mulf %47, %7 : vector<7x512xf32>
    %49 = arith.addf %46, %48 : vector<7x512xf32>
    %50 = vector.extract_strided_slice %42 {offsets = [1, 0], sizes = [7, 512], strides = [1, 1]} : vector<9x512xf32> to vector<7x512xf32>
    %51 = arith.mulf %50, %11 : vector<7x512xf32>
    %52 = arith.addf %49, %51 : vector<7x512xf32>
    %53 = vector.extract_strided_slice %44 {offsets = [1, 0], sizes = [7, 512], strides = [1, 1]} : vector<9x512xf32> to vector<7x512xf32>
    %54 = arith.mulf %53, %15 : vector<7x512xf32>
    %55 = arith.addf %52, %54 : vector<7x512xf32>
    %56 = vector.extract_strided_slice %42 {offsets = [2, 0], sizes = [7, 512], strides = [1, 1]} : vector<9x512xf32> to vector<7x512xf32>
    %57 = arith.mulf %56, %19 : vector<7x512xf32>
    %58 = arith.addf %55, %57 : vector<7x512xf32>
    %c1_25 = arith.constant 1 : index
    %c0_26 = arith.constant 0 : index
    %c0_27 = arith.constant 0 : index
    %59 = vector.load %arg4[%c1_25, %c0_26, %c0_27] : memref<7x7x512xf32, #tpu.memory_space<vmem>>, vector<1x7x512xf32>
    %60 = vector.shape_cast %59 : vector<1x7x512xf32> to vector<7x512xf32>
    %61 = vector.shape_cast %58 : vector<7x512xf32> to vector<1x7x512xf32>
    tpu.vector_store %arg4[%c1_25, %c0_26, %c0_27], %61 {strides = array<i32>} : memref<7x7x512xf32, #tpu.memory_space<vmem>>, vector<1x7x512xf32>,
    %c4_28 = arith.constant 4 : index
    %c0_29 = arith.constant 0 : index
    %c0_30 = arith.constant 0 : index
    %62 = vector.load %arg1[%c4_28, %c0_29, %c0_30] : memref<18x9x512xf32, #tpu.memory_space<vmem>>, vector<1x9x512xf32>
    %63 = vector.shape_cast %62 : vector<1x9x512xf32> to vector<9x512xf32>
    %c4_31 = arith.constant 4 : index
    %c0_32 = arith.constant 0 : index
    %c0_33 = arith.constant 0 : index
    %64 = vector.load %arg2[%c4_31, %c0_32, %c0_33] : memref<18x9x512xf32, #tpu.memory_space<vmem>>, vector<1x9x512xf32>
    %65 = vector.shape_cast %64 : vector<1x9x512xf32> to vector<9x512xf32>
    %66 = vector.extract_strided_slice %63 {offsets = [0, 0], sizes = [7, 512], strides = [1, 1]} : vector<9x512xf32> to vector<7x512xf32>
    %67 = arith.mulf %66, %3 : vector<7x512xf32>
    %68 = vector.extract_strided_slice %65 {offsets = [0, 0], sizes = [7, 512], strides = [1, 1]} : vector<9x512xf32> to vector<7x512xf32>
    %69 = arith.mulf %68, %7 : vector<7x512xf32>
    %70 = arith.addf %67, %69 : vector<7x512xf32>
    %71 = vector.extract_strided_slice %63 {offsets = [1, 0], sizes = [7, 512], strides = [1, 1]} : vector<9x512xf32> to vector<7x512xf32>
    %72 = arith.mulf %71, %11 : vector<7x512xf32>
    %73 = arith.addf %70, %72 : vector<7x512xf32>
    %74 = vector.extract_strided_slice %65 {offsets = [1, 0], sizes = [7, 512], strides = [1, 1]} : vector<9x512xf32> to vector<7x512xf32>
    %75 = arith.mulf %74, %15 : vector<7x512xf32>
    %76 = arith.addf %73, %75 : vector<7x512xf32>
    %77 = vector.extract_strided_slice %63 {offsets = [2, 0], sizes = [7, 512], strides = [1, 1]} : vector<9x512xf32> to vector<7x512xf32>
    %78 = arith.mulf %77, %19 : vector<7x512xf32>
    %79 = arith.addf %76, %78 : vector<7x512xf32>
    %c2_34 = arith.constant 2 : index
    %c0_35 = arith.constant 0 : index
    %c0_36 = arith.constant 0 : index
    %80 = vector.load %arg4[%c2_34, %c0_35, %c0_36] : memref<7x7x512xf32, #tpu.memory_space<vmem>>, vector<1x7x512xf32>
    %81 = vector.shape_cast %80 : vector<1x7x512xf32> to vector<7x512xf32>
    %82 = vector.shape_cast %79 : vector<7x512xf32> to vector<1x7x512xf32>
    tpu.vector_store %arg4[%c2_34, %c0_35, %c0_36], %82 {strides = array<i32>} : memref<7x7x512xf32, #tpu.memory_space<vmem>>, vector<1x7x512xf32>,
    %c6 = arith.constant 6 : index
    %c0_37 = arith.constant 0 : index
    %c0_38 = arith.constant 0 : index
    %83 = vector.load %arg1[%c6, %c0_37, %c0_38] : memref<18x9x512xf32, #tpu.memory_space<vmem>>, vector<1x9x512xf32>
    %84 = vector.shape_cast %83 : vector<1x9x512xf32> to vector<9x512xf32>
    %c6_39 = arith.constant 6 : index
    %c0_40 = arith.constant 0 : index
    %c0_41 = arith.constant 0 : index
    %85 = vector.load %arg2[%c6_39, %c0_40, %c0_41] : memref<18x9x512xf32, #tpu.memory_space<vmem>>, vector<1x9x512xf32>
    %86 = vector.shape_cast %85 : vector<1x9x512xf32> to vector<9x512xf32>
    %87 = vector.extract_strided_slice %84 {offsets = [0, 0], sizes = [7, 512], strides = [1, 1]} : vector<9x512xf32> to vector<7x512xf32>
    %88 = arith.mulf %87, %3 : vector<7x512xf32>
    %89 = vector.extract_strided_slice %86 {offsets = [0, 0], sizes = [7, 512], strides = [1, 1]} : vector<9x512xf32> to vector<7x512xf32>
    %90 = arith.mulf %89, %7 : vector<7x512xf32>
    %91 = arith.addf %88, %90 : vector<7x512xf32>
    %92 = vector.extract_strided_slice %84 {offsets = [1, 0], sizes = [7, 512], strides = [1, 1]} : vector<9x512xf32> to vector<7x512xf32>
    %93 = arith.mulf %92, %11 : vector<7x512xf32>
    %94 = arith.addf %91, %93 : vector<7x512xf32>
    %95 = vector.extract_strided_slice %86 {offsets = [1, 0], sizes = [7, 512], strides = [1, 1]} : vector<9x512xf32> to vector<7x512xf32>
    %96 = arith.mulf %95, %15 : vector<7x512xf32>
    %97 = arith.addf %94, %96 : vector<7x512xf32>
    %98 = vector.extract_strided_slice %84 {offsets = [2, 0], sizes = [7, 512], strides = [1, 1]} : vector<9x512xf32> to vector<7x512xf32>
    %99 = arith.mulf %98, %19 : vector<7x512xf32>
    %100 = arith.addf %97, %99 : vector<7x512xf32>
    %c3_42 = arith.constant 3 : index
    %c0_43 = arith.constant 0 : index
    %c0_44 = arith.constant 0 : index
    %101 = vector.load %arg4[%c3_42, %c0_43, %c0_44] : memref<7x7x512xf32, #tpu.memory_space<vmem>>, vector<1x7x512xf32>
    %102 = vector.shape_cast %101 : vector<1x7x512xf32> to vector<7x512xf32>
    %103 = vector.shape_cast %100 : vector<7x512xf32> to vector<1x7x512xf32>
    tpu.vector_store %arg4[%c3_42, %c0_43, %c0_44], %103 {strides = array<i32>} : memref<7x7x512xf32, #tpu.memory_space<vmem>>, vector<1x7x512xf32>,
    %c8 = arith.constant 8 : index
    %c0_45 = arith.constant 0 : index
    %c0_46 = arith.constant 0 : index
    %104 = vector.load %arg1[%c8, %c0_45, %c0_46] : memref<18x9x512xf32, #tpu.memory_space<vmem>>, vector<1x9x512xf32>
    %105 = vector.shape_cast %104 : vector<1x9x512xf32> to vector<9x512xf32>
    %c8_47 = arith.constant 8 : index
    %c0_48 = arith.constant 0 : index
    %c0_49 = arith.constant 0 : index
    %106 = vector.load %arg2[%c8_47, %c0_48, %c0_49] : memref<18x9x512xf32, #tpu.memory_space<vmem>>, vector<1x9x512xf32>
    %107 = vector.shape_cast %106 : vector<1x9x512xf32> to vector<9x512xf32>
    %108 = vector.extract_strided_slice %105 {offsets = [0, 0], sizes = [7, 512], strides = [1, 1]} : vector<9x512xf32> to vector<7x512xf32>
    %109 = arith.mulf %108, %3 : vector<7x512xf32>
    %110 = vector.extract_strided_slice %107 {offsets = [0, 0], sizes = [7, 512], strides = [1, 1]} : vector<9x512xf32> to vector<7x512xf32>
    %111 = arith.mulf %110, %7 : vector<7x512xf32>
    %112 = arith.addf %109, %111 : vector<7x512xf32>
    %113 = vector.extract_strided_slice %105 {offsets = [1, 0], sizes = [7, 512], strides = [1, 1]} : vector<9x512xf32> to vector<7x512xf32>
    %114 = arith.mulf %113, %11 : vector<7x512xf32>
    %115 = arith.addf %112, %114 : vector<7x512xf32>
    %116 = vector.extract_strided_slice %107 {offsets = [1, 0], sizes = [7, 512], strides = [1, 1]} : vector<9x512xf32> to vector<7x512xf32>
    %117 = arith.mulf %116, %15 : vector<7x512xf32>
    %118 = arith.addf %115, %117 : vector<7x512xf32>
    %119 = vector.extract_strided_slice %105 {offsets = [2, 0], sizes = [7, 512], strides = [1, 1]} : vector<9x512xf32> to vector<7x512xf32>
    %120 = arith.mulf %119, %19 : vector<7x512xf32>
    %121 = arith.addf %118, %120 : vector<7x512xf32>
    %c4_50 = arith.constant 4 : index
    %c0_51 = arith.constant 0 : index
    %c0_52 = arith.constant 0 : index
    %122 = vector.load %arg4[%c4_50, %c0_51, %c0_52] : memref<7x7x512xf32, #tpu.memory_space<vmem>>, vector<1x7x512xf32>
    %123 = vector.shape_cast %122 : vector<1x7x512xf32> to vector<7x512xf32>
    %124 = vector.shape_cast %121 : vector<7x512xf32> to vector<1x7x512xf32>
    tpu.vector_store %arg4[%c4_50, %c0_51, %c0_52], %124 {strides = array<i32>} : memref<7x7x512xf32, #tpu.memory_space<vmem>>, vector<1x7x512xf32>,
    %c10 = arith.constant 10 : index
    %c0_53 = arith.constant 0 : index
    %c0_54 = arith.constant 0 : index
    %125 = vector.load %arg1[%c10, %c0_53, %c0_54] : memref<18x9x512xf32, #tpu.memory_space<vmem>>, vector<1x9x512xf32>
    %126 = vector.shape_cast %125 : vector<1x9x512xf32> to vector<9x512xf32>
    %c10_55 = arith.constant 10 : index
    %c0_56 = arith.constant 0 : index
    %c0_57 = arith.constant 0 : index
    %127 = vector.load %arg2[%c10_55, %c0_56, %c0_57] : memref<18x9x512xf32, #tpu.memory_space<vmem>>, vector<1x9x512xf32>
    %128 = vector.shape_cast %127 : vector<1x9x512xf32> to vector<9x512xf32>
    %129 = vector.extract_strided_slice %126 {offsets = [0, 0], sizes = [7, 512], strides = [1, 1]} : vector<9x512xf32> to vector<7x512xf32>
    %130 = arith.mulf %129, %3 : vector<7x512xf32>
    %131 = vector.extract_strided_slice %128 {offsets = [0, 0], sizes = [7, 512], strides = [1, 1]} : vector<9x512xf32> to vector<7x512xf32>
    %132 = arith.mulf %131, %7 : vector<7x512xf32>
    %133 = arith.addf %130, %132 : vector<7x512xf32>
    %134 = vector.extract_strided_slice %126 {offsets = [1, 0], sizes = [7, 512], strides = [1, 1]} : vector<9x512xf32> to vector<7x512xf32>
    %135 = arith.mulf %134, %11 : vector<7x512xf32>
    %136 = arith.addf %133, %135 : vector<7x512xf32>
    %137 = vector.extract_strided_slice %128 {offsets = [1, 0], sizes = [7, 512], strides = [1, 1]} : vector<9x512xf32> to vector<7x512xf32>
    %138 = arith.mulf %137, %15 : vector<7x512xf32>
    %139 = arith.addf %136, %138 : vector<7x512xf32>
    %140 = vector.extract_strided_slice %126 {offsets = [2, 0], sizes = [7, 512], strides = [1, 1]} : vector<9x512xf32> to vector<7x512xf32>
    %141 = arith.mulf %140, %19 : vector<7x512xf32>
    %142 = arith.addf %139, %141 : vector<7x512xf32>
    %c5 = arith.constant 5 : index
    %c0_58 = arith.constant 0 : index
    %c0_59 = arith.constant 0 : index
    %143 = vector.load %arg4[%c5, %c0_58, %c0_59] : memref<7x7x512xf32, #tpu.memory_space<vmem>>, vector<1x7x512xf32>
    %144 = vector.shape_cast %143 : vector<1x7x512xf32> to vector<7x512xf32>
    %145 = vector.shape_cast %142 : vector<7x512xf32> to vector<1x7x512xf32>
    tpu.vector_store %arg4[%c5, %c0_58, %c0_59], %145 {strides = array<i32>} : memref<7x7x512xf32, #tpu.memory_space<vmem>>, vector<1x7x512xf32>,
    %c12 = arith.constant 12 : index
    %c0_60 = arith.constant 0 : index
    %c0_61 = arith.constant 0 : index
    %146 = vector.load %arg1[%c12, %c0_60, %c0_61] : memref<18x9x512xf32, #tpu.memory_space<vmem>>, vector<1x9x512xf32>
    %147 = vector.shape_cast %146 : vector<1x9x512xf32> to vector<9x512xf32>
    %c12_62 = arith.constant 12 : index
    %c0_63 = arith.constant 0 : index
    %c0_64 = arith.constant 0 : index
    %148 = vector.load %arg2[%c12_62, %c0_63, %c0_64] : memref<18x9x512xf32, #tpu.memory_space<vmem>>, vector<1x9x512xf32>
    %149 = vector.shape_cast %148 : vector<1x9x512xf32> to vector<9x512xf32>
    %150 = vector.extract_strided_slice %147 {offsets = [0, 0], sizes = [7, 512], strides = [1, 1]} : vector<9x512xf32> to vector<7x512xf32>
    %151 = arith.mulf %150, %3 : vector<7x512xf32>
    %152 = vector.extract_strided_slice %149 {offsets = [0, 0], sizes = [7, 512], strides = [1, 1]} : vector<9x512xf32> to vector<7x512xf32>
    %153 = arith.mulf %152, %7 : vector<7x512xf32>
    %154 = arith.addf %151, %153 : vector<7x512xf32>
    %155 = vector.extract_strided_slice %147 {offsets = [1, 0], sizes = [7, 512], strides = [1, 1]} : vector<9x512xf32> to vector<7x512xf32>
    %156 = arith.mulf %155, %11 : vector<7x512xf32>
    %157 = arith.addf %154, %156 : vector<7x512xf32>
    %158 = vector.extract_strided_slice %149 {offsets = [1, 0], sizes = [7, 512], strides = [1, 1]} : vector<9x512xf32> to vector<7x512xf32>
    %159 = arith.mulf %158, %15 : vector<7x512xf32>
    %160 = arith.addf %157, %159 : vector<7x512xf32>
    %161 = vector.extract_strided_slice %147 {offsets = [2, 0], sizes = [7, 512], strides = [1, 1]} : vector<9x512xf32> to vector<7x512xf32>
    %162 = arith.mulf %161, %19 : vector<7x512xf32>
    %163 = arith.addf %160, %162 : vector<7x512xf32>
    %c6_65 = arith.constant 6 : index
    %c0_66 = arith.constant 0 : index
    %c0_67 = arith.constant 0 : index
    %164 = vector.load %arg4[%c6_65, %c0_66, %c0_67] : memref<7x7x512xf32, #tpu.memory_space<vmem>>, vector<1x7x512xf32>
    %165 = vector.shape_cast %164 : vector<1x7x512xf32> to vector<7x512xf32>
    %166 = vector.shape_cast %163 : vector<7x512xf32> to vector<1x7x512xf32>
    tpu.vector_store %arg4[%c6_65, %c0_66, %c0_67], %166 {strides = array<i32>} : memref<7x7x512xf32, #tpu.memory_space<vmem>>, vector<1x7x512xf32>,
    %c5_68 = arith.constant 5 : index
    %c0_69 = arith.constant 0 : index
    %c0_70 = arith.constant 0 : index
    %167 = vector.load %arg3[%c5_68, %c0_69, %c0_70] : memref<25x1x512xf32, #tpu.memory_space<vmem>>, vector<1x1x512xf32>
    %168 = vector.shape_cast %167 : vector<1x1x512xf32> to vector<1x512xf32>
    %169 = vector.shape_cast %168 : vector<1x512xf32> to vector<1x512xf32>
    %170 = vector.broadcast %169 : vector<1x512xf32> to vector<7x512xf32>
    %c6_71 = arith.constant 6 : index
    %c0_72 = arith.constant 0 : index
    %c0_73 = arith.constant 0 : index
    %171 = vector.load %arg3[%c6_71, %c0_72, %c0_73] : memref<25x1x512xf32, #tpu.memory_space<vmem>>, vector<1x1x512xf32>
    %172 = vector.shape_cast %171 : vector<1x1x512xf32> to vector<1x512xf32>
    %173 = vector.shape_cast %172 : vector<1x512xf32> to vector<1x512xf32>
    %174 = vector.broadcast %173 : vector<1x512xf32> to vector<7x512xf32>
    %c7 = arith.constant 7 : index
    %c0_74 = arith.constant 0 : index
    %c0_75 = arith.constant 0 : index
    %175 = vector.load %arg3[%c7, %c0_74, %c0_75] : memref<25x1x512xf32, #tpu.memory_space<vmem>>, vector<1x1x512xf32>
    %176 = vector.shape_cast %175 : vector<1x1x512xf32> to vector<1x512xf32>
    %177 = vector.shape_cast %176 : vector<1x512xf32> to vector<1x512xf32>
    %178 = vector.broadcast %177 : vector<1x512xf32> to vector<7x512xf32>
    %c8_76 = arith.constant 8 : index
    %c0_77 = arith.constant 0 : index
    %c0_78 = arith.constant 0 : index
    %179 = vector.load %arg3[%c8_76, %c0_77, %c0_78] : memref<25x1x512xf32, #tpu.memory_space<vmem>>, vector<1x1x512xf32>
    %180 = vector.shape_cast %179 : vector<1x1x512xf32> to vector<1x512xf32>
    %181 = vector.shape_cast %180 : vector<1x512xf32> to vector<1x512xf32>
    %182 = vector.broadcast %181 : vector<1x512xf32> to vector<7x512xf32>
    %c9 = arith.constant 9 : index
    %c0_79 = arith.constant 0 : index
    %c0_80 = arith.constant 0 : index
    %183 = vector.load %arg3[%c9, %c0_79, %c0_80] : memref<25x1x512xf32, #tpu.memory_space<vmem>>, vector<1x1x512xf32>
    %184 = vector.shape_cast %183 : vector<1x1x512xf32> to vector<1x512xf32>
    %185 = vector.shape_cast %184 : vector<1x512xf32> to vector<1x512xf32>
    %186 = vector.broadcast %185 : vector<1x512xf32> to vector<7x512xf32>
    %c1_81 = arith.constant 1 : index
    %c0_82 = arith.constant 0 : index
    %c0_83 = arith.constant 0 : index
    %187 = vector.load %arg1[%c1_81, %c0_82, %c0_83] : memref<18x9x512xf32, #tpu.memory_space<vmem>>, vector<1x9x512xf32>
    %188 = vector.shape_cast %187 : vector<1x9x512xf32> to vector<9x512xf32>
    %c1_84 = arith.constant 1 : index
    %c0_85 = arith.constant 0 : index
    %c0_86 = arith.constant 0 : index
    %189 = vector.load %arg2[%c1_84, %c0_85, %c0_86] : memref<18x9x512xf32, #tpu.memory_space<vmem>>, vector<1x9x512xf32>
    %190 = vector.shape_cast %189 : vector<1x9x512xf32> to vector<9x512xf32>
    %191 = vector.extract_strided_slice %188 {offsets = [0, 0], sizes = [7, 512], strides = [1, 1]} : vector<9x512xf32> to vector<7x512xf32>
    %192 = arith.mulf %191, %170 : vector<7x512xf32>
    %193 = vector.extract_strided_slice %190 {offsets = [0, 0], sizes = [7, 512], strides = [1, 1]} : vector<9x512xf32> to vector<7x512xf32>
    %194 = arith.mulf %193, %174 : vector<7x512xf32>
    %195 = arith.addf %192, %194 : vector<7x512xf32>
    %196 = vector.extract_strided_slice %188 {offsets = [1, 0], sizes = [7, 512], strides = [1, 1]} : vector<9x512xf32> to vector<7x512xf32>
    %197 = arith.mulf %196, %178 : vector<7x512xf32>
    %198 = arith.addf %195, %197 : vector<7x512xf32>
    %199 = vector.extract_strided_slice %190 {offsets = [1, 0], sizes = [7, 512], strides = [1, 1]} : vector<9x512xf32> to vector<7x512xf32>
    %200 = arith.mulf %199, %182 : vector<7x512xf32>
    %201 = arith.addf %198, %200 : vector<7x512xf32>
    %202 = vector.extract_strided_slice %188 {offsets = [2, 0], sizes = [7, 512], strides = [1, 1]} : vector<9x512xf32> to vector<7x512xf32>
    %203 = arith.mulf %202, %186 : vector<7x512xf32>
    %204 = arith.addf %201, %203 : vector<7x512xf32>
    %c0_87 = arith.constant 0 : index
    %c0_88 = arith.constant 0 : index
    %c0_89 = arith.constant 0 : index
    %205 = vector.load %arg4[%c0_87, %c0_88, %c0_89] : memref<7x7x512xf32, #tpu.memory_space<vmem>>, vector<1x7x512xf32>
    %206 = vector.shape_cast %205 : vector<1x7x512xf32> to vector<7x512xf32>
    %207 = arith.addf %206, %204 : vector<7x512xf32>
    %c0_90 = arith.constant 0 : index
    %c0_91 = arith.constant 0 : index
    %c0_92 = arith.constant 0 : index
    %208 = vector.load %arg4[%c0_90, %c0_91, %c0_92] : memref<7x7x512xf32, #tpu.memory_space<vmem>>, vector<1x7x512xf32>
    %209 = vector.shape_cast %208 : vector<1x7x512xf32> to vector<7x512xf32>
    %210 = vector.shape_cast %207 : vector<7x512xf32> to vector<1x7x512xf32>
    tpu.vector_store %arg4[%c0_90, %c0_91, %c0_92], %210 {strides = array<i32>} : memref<7x7x512xf32, #tpu.memory_space<vmem>>, vector<1x7x512xf32>,
    %c3_93 = arith.constant 3 : index
    %c0_94 = arith.constant 0 : index
    %c0_95 = arith.constant 0 : index
    %211 = vector.load %arg1[%c3_93, %c0_94, %c0_95] : memref<18x9x512xf32, #tpu.memory_space<vmem>>, vector<1x9x512xf32>
    %212 = vector.shape_cast %211 : vector<1x9x512xf32> to vector<9x512xf32>
    %c3_96 = arith.constant 3 : index
    %c0_97 = arith.constant 0 : index
    %c0_98 = arith.constant 0 : index
    %213 = vector.load %arg2[%c3_96, %c0_97, %c0_98] : memref<18x9x512xf32, #tpu.memory_space<vmem>>, vector<1x9x512xf32>
    %214 = vector.shape_cast %213 : vector<1x9x512xf32> to vector<9x512xf32>
    %215 = vector.extract_strided_slice %212 {offsets = [0, 0], sizes = [7, 512], strides = [1, 1]} : vector<9x512xf32> to vector<7x512xf32>
    %216 = arith.mulf %215, %170 : vector<7x512xf32>
    %217 = vector.extract_strided_slice %214 {offsets = [0, 0], sizes = [7, 512], strides = [1, 1]} : vector<9x512xf32> to vector<7x512xf32>
    %218 = arith.mulf %217, %174 : vector<7x512xf32>
    %219 = arith.addf %216, %218 : vector<7x512xf32>
    %220 = vector.extract_strided_slice %212 {offsets = [1, 0], sizes = [7, 512], strides = [1, 1]} : vector<9x512xf32> to vector<7x512xf32>
    %221 = arith.mulf %220, %178 : vector<7x512xf32>
    %222 = arith.addf %219, %221 : vector<7x512xf32>
    %223 = vector.extract_strided_slice %214 {offsets = [1, 0], sizes = [7, 512], strides = [1, 1]} : vector<9x512xf32> to vector<7x512xf32>
    %224 = arith.mulf %223, %182 : vector<7x512xf32>
    %225 = arith.addf %222, %224 : vector<7x512xf32>
    %226 = vector.extract_strided_slice %212 {offsets = [2, 0], sizes = [7, 512], strides = [1, 1]} : vector<9x512xf32> to vector<7x512xf32>
    %227 = arith.mulf %226, %186 : vector<7x512xf32>
    %228 = arith.addf %225, %227 : vector<7x512xf32>
    %c1_99 = arith.constant 1 : index
    %c0_100 = arith.constant 0 : index
    %c0_101 = arith.constant 0 : index
    %229 = vector.load %arg4[%c1_99, %c0_100, %c0_101] : memref<7x7x512xf32, #tpu.memory_space<vmem>>, vector<1x7x512xf32>
    %230 = vector.shape_cast %229 : vector<1x7x512xf32> to vector<7x512xf32>
    %231 = arith.addf %230, %228 : vector<7x512xf32>
    %c1_102 = arith.constant 1 : index
    %c0_103 = arith.constant 0 : index
    %c0_104 = arith.constant 0 : index
    %232 = vector.load %arg4[%c1_102, %c0_103, %c0_104] : memref<7x7x512xf32, #tpu.memory_space<vmem>>, vector<1x7x512xf32>
    %233 = vector.shape_cast %232 : vector<1x7x512xf32> to vector<7x512xf32>
    %234 = vector.shape_cast %231 : vector<7x512xf32> to vector<1x7x512xf32>
    tpu.vector_store %arg4[%c1_102, %c0_103, %c0_104], %234 {strides = array<i32>} : memref<7x7x512xf32, #tpu.memory_space<vmem>>, vector<1x7x512xf32>,
    %c5_105 = arith.constant 5 : index
    %c0_106 = arith.constant 0 : index
    %c0_107 = arith.constant 0 : index
    %235 = vector.load %arg1[%c5_105, %c0_106, %c0_107] : memref<18x9x512xf32, #tpu.memory_space<vmem>>, vector<1x9x512xf32>
    %236 = vector.shape_cast %235 : vector<1x9x512xf32> to vector<9x512xf32>
    %c5_108 = arith.constant 5 : index
    %c0_109 = arith.constant 0 : index
    %c0_110 = arith.constant 0 : index
    %237 = vector.load %arg2[%c5_108, %c0_109, %c0_110] : memref<18x9x512xf32, #tpu.memory_space<vmem>>, vector<1x9x512xf32>
    %238 = vector.shape_cast %237 : vector<1x9x512xf32> to vector<9x512xf32>
    %239 = vector.extract_strided_slice %236 {offsets = [0, 0], sizes = [7, 512], strides = [1, 1]} : vector<9x512xf32> to vector<7x512xf32>
    %240 = arith.mulf %239, %170 : vector<7x512xf32>
    %241 = vector.extract_strided_slice %238 {offsets = [0, 0], sizes = [7, 512], strides = [1, 1]} : vector<9x512xf32> to vector<7x512xf32>
    %242 = arith.mulf %241, %174 : vector<7x512xf32>
    %243 = arith.addf %240, %242 : vector<7x512xf32>
    %244 = vector.extract_strided_slice %236 {offsets = [1, 0], sizes = [7, 512], strides = [1, 1]} : vector<9x512xf32> to vector<7x512xf32>
    %245 = arith.mulf %244, %178 : vector<7x512xf32>
    %246 = arith.addf %243, %245 : vector<7x512xf32>
    %247 = vector.extract_strided_slice %238 {offsets = [1, 0], sizes = [7, 512], strides = [1, 1]} : vector<9x512xf32> to vector<7x512xf32>
    %248 = arith.mulf %247, %182 : vector<7x512xf32>
    %249 = arith.addf %246, %248 : vector<7x512xf32>
    %250 = vector.extract_strided_slice %236 {offsets = [2, 0], sizes = [7, 512], strides = [1, 1]} : vector<9x512xf32> to vector<7x512xf32>
    %251 = arith.mulf %250, %186 : vector<7x512xf32>
    %252 = arith.addf %249, %251 : vector<7x512xf32>
    %c2_111 = arith.constant 2 : index
    %c0_112 = arith.constant 0 : index
    %c0_113 = arith.constant 0 : index
    %253 = vector.load %arg4[%c2_111, %c0_112, %c0_113] : memref<7x7x512xf32, #tpu.memory_space<vmem>>, vector<1x7x512xf32>
    %254 = vector.shape_cast %253 : vector<1x7x512xf32> to vector<7x512xf32>
    %255 = arith.addf %254, %252 : vector<7x512xf32>
    %c2_114 = arith.constant 2 : index
    %c0_115 = arith.constant 0 : index
    %c0_116 = arith.constant 0 : index
    %256 = vector.load %arg4[%c2_114, %c0_115, %c0_116] : memref<7x7x512xf32, #tpu.memory_space<vmem>>, vector<1x7x512xf32>
    %257 = vector.shape_cast %256 : vector<1x7x512xf32> to vector<7x512xf32>
    %258 = vector.shape_cast %255 : vector<7x512xf32> to vector<1x7x512xf32>
    tpu.vector_store %arg4[%c2_114, %c0_115, %c0_116], %258 {strides = array<i32>} : memref<7x7x512xf32, #tpu.memory_space<vmem>>, vector<1x7x512xf32>,
    %c7_117 = arith.constant 7 : index
    %c0_118 = arith.constant 0 : index
    %c0_119 = arith.constant 0 : index
    %259 = vector.load %arg1[%c7_117, %c0_118, %c0_119] : memref<18x9x512xf32, #tpu.memory_space<vmem>>, vector<1x9x512xf32>
    %260 = vector.shape_cast %259 : vector<1x9x512xf32> to vector<9x512xf32>
    %c7_120 = arith.constant 7 : index
    %c0_121 = arith.constant 0 : index
    %c0_122 = arith.constant 0 : index
    %261 = vector.load %arg2[%c7_120, %c0_121, %c0_122] : memref<18x9x512xf32, #tpu.memory_space<vmem>>, vector<1x9x512xf32>
    %262 = vector.shape_cast %261 : vector<1x9x512xf32> to vector<9x512xf32>
    %263 = vector.extract_strided_slice %260 {offsets = [0, 0], sizes = [7, 512], strides = [1, 1]} : vector<9x512xf32> to vector<7x512xf32>
    %264 = arith.mulf %263, %170 : vector<7x512xf32>
    %265 = vector.extract_strided_slice %262 {offsets = [0, 0], sizes = [7, 512], strides = [1, 1]} : vector<9x512xf32> to vector<7x512xf32>
    %266 = arith.mulf %265, %174 : vector<7x512xf32>
    %267 = arith.addf %264, %266 : vector<7x512xf32>
    %268 = vector.extract_strided_slice %260 {offsets = [1, 0], sizes = [7, 512], strides = [1, 1]} : vector<9x512xf32> to vector<7x512xf32>
    %269 = arith.mulf %268, %178 : vector<7x512xf32>
    %270 = arith.addf %267, %269 : vector<7x512xf32>
    %271 = vector.extract_strided_slice %262 {offsets = [1, 0], sizes = [7, 512], strides = [1, 1]} : vector<9x512xf32> to vector<7x512xf32>
    %272 = arith.mulf %271, %182 : vector<7x512xf32>
    %273 = arith.addf %270, %272 : vector<7x512xf32>
    %274 = vector.extract_strided_slice %260 {offsets = [2, 0], sizes = [7, 512], strides = [1, 1]} : vector<9x512xf32> to vector<7x512xf32>
    %275 = arith.mulf %274, %186 : vector<7x512xf32>
    %276 = arith.addf %273, %275 : vector<7x512xf32>
    %c3_123 = arith.constant 3 : index
    %c0_124 = arith.constant 0 : index
    %c0_125 = arith.constant 0 : index
    %277 = vector.load %arg4[%c3_123, %c0_124, %c0_125] : memref<7x7x512xf32, #tpu.memory_space<vmem>>, vector<1x7x512xf32>
    %278 = vector.shape_cast %277 : vector<1x7x512xf32> to vector<7x512xf32>
    %279 = arith.addf %278, %276 : vector<7x512xf32>
    %c3_126 = arith.constant 3 : index
    %c0_127 = arith.constant 0 : index
    %c0_128 = arith.constant 0 : index
    %280 = vector.load %arg4[%c3_126, %c0_127, %c0_128] : memref<7x7x512xf32, #tpu.memory_space<vmem>>, vector<1x7x512xf32>
    %281 = vector.shape_cast %280 : vector<1x7x512xf32> to vector<7x512xf32>
    %282 = vector.shape_cast %279 : vector<7x512xf32> to vector<1x7x512xf32>
    tpu.vector_store %arg4[%c3_126, %c0_127, %c0_128], %282 {strides = array<i32>} : memref<7x7x512xf32, #tpu.memory_space<vmem>>, vector<1x7x512xf32>,
    %c9_129 = arith.constant 9 : index
    %c0_130 = arith.constant 0 : index
    %c0_131 = arith.constant 0 : index
    %283 = vector.load %arg1[%c9_129, %c0_130, %c0_131] : memref<18x9x512xf32, #tpu.memory_space<vmem>>, vector<1x9x512xf32>
    %284 = vector.shape_cast %283 : vector<1x9x512xf32> to vector<9x512xf32>
    %c9_132 = arith.constant 9 : index
    %c0_133 = arith.constant 0 : index
    %c0_134 = arith.constant 0 : index
    %285 = vector.load %arg2[%c9_132, %c0_133, %c0_134] : memref<18x9x512xf32, #tpu.memory_space<vmem>>, vector<1x9x512xf32>
    %286 = vector.shape_cast %285 : vector<1x9x512xf32> to vector<9x512xf32>
    %287 = vector.extract_strided_slice %284 {offsets = [0, 0], sizes = [7, 512], strides = [1, 1]} : vector<9x512xf32> to vector<7x512xf32>
    %288 = arith.mulf %287, %170 : vector<7x512xf32>
    %289 = vector.extract_strided_slice %286 {offsets = [0, 0], sizes = [7, 512], strides = [1, 1]} : vector<9x512xf32> to vector<7x512xf32>
    %290 = arith.mulf %289, %174 : vector<7x512xf32>
    %291 = arith.addf %288, %290 : vector<7x512xf32>
    %292 = vector.extract_strided_slice %284 {offsets = [1, 0], sizes = [7, 512], strides = [1, 1]} : vector<9x512xf32> to vector<7x512xf32>
    %293 = arith.mulf %292, %178 : vector<7x512xf32>
    %294 = arith.addf %291, %293 : vector<7x512xf32>
    %295 = vector.extract_strided_slice %286 {offsets = [1, 0], sizes = [7, 512], strides = [1, 1]} : vector<9x512xf32> to vector<7x512xf32>
    %296 = arith.mulf %295, %182 : vector<7x512xf32>
    %297 = arith.addf %294, %296 : vector<7x512xf32>
    %298 = vector.extract_strided_slice %284 {offsets = [2, 0], sizes = [7, 512], strides = [1, 1]} : vector<9x512xf32> to vector<7x512xf32>
    %299 = arith.mulf %298, %186 : vector<7x512xf32>
    %300 = arith.addf %297, %299 : vector<7x512xf32>
    %c4_135 = arith.constant 4 : index
    %c0_136 = arith.constant 0 : index
    %c0_137 = arith.constant 0 : index
    %301 = vector.load %arg4[%c4_135, %c0_136, %c0_137] : memref<7x7x512xf32, #tpu.memory_space<vmem>>, vector<1x7x512xf32>
    %302 = vector.shape_cast %301 : vector<1x7x512xf32> to vector<7x512xf32>
    %303 = arith.addf %302, %300 : vector<7x512xf32>
    %c4_138 = arith.constant 4 : index
    %c0_139 = arith.constant 0 : index
    %c0_140 = arith.constant 0 : index
    %304 = vector.load %arg4[%c4_138, %c0_139, %c0_140] : memref<7x7x512xf32, #tpu.memory_space<vmem>>, vector<1x7x512xf32>
    %305 = vector.shape_cast %304 : vector<1x7x512xf32> to vector<7x512xf32>
    %306 = vector.shape_cast %303 : vector<7x512xf32> to vector<1x7x512xf32>
    tpu.vector_store %arg4[%c4_138, %c0_139, %c0_140], %306 {strides = array<i32>} : memref<7x7x512xf32, #tpu.memory_space<vmem>>, vector<1x7x512xf32>,
    %c11 = arith.constant 11 : index
    %c0_141 = arith.constant 0 : index
    %c0_142 = arith.constant 0 : index
    %307 = vector.load %arg1[%c11, %c0_141, %c0_142] : memref<18x9x512xf32, #tpu.memory_space<vmem>>, vector<1x9x512xf32>
    %308 = vector.shape_cast %307 : vector<1x9x512xf32> to vector<9x512xf32>
    %c11_143 = arith.constant 11 : index
    %c0_144 = arith.constant 0 : index
    %c0_145 = arith.constant 0 : index
    %309 = vector.load %arg2[%c11_143, %c0_144, %c0_145] : memref<18x9x512xf32, #tpu.memory_space<vmem>>, vector<1x9x512xf32>
    %310 = vector.shape_cast %309 : vector<1x9x512xf32> to vector<9x512xf32>
    %311 = vector.extract_strided_slice %308 {offsets = [0, 0], sizes = [7, 512], strides = [1, 1]} : vector<9x512xf32> to vector<7x512xf32>
    %312 = arith.mulf %311, %170 : vector<7x512xf32>
    %313 = vector.extract_strided_slice %310 {offsets = [0, 0], sizes = [7, 512], strides = [1, 1]} : vector<9x512xf32> to vector<7x512xf32>
    %314 = arith.mulf %313, %174 : vector<7x512xf32>
    %315 = arith.addf %312, %314 : vector<7x512xf32>
    %316 = vector.extract_strided_slice %308 {offsets = [1, 0], sizes = [7, 512], strides = [1, 1]} : vector<9x512xf32> to vector<7x512xf32>
    %317 = arith.mulf %316, %178 : vector<7x512xf32>
    %318 = arith.addf %315, %317 : vector<7x512xf32>
    %319 = vector.extract_strided_slice %310 {offsets = [1, 0], sizes = [7, 512], strides = [1, 1]} : vector<9x512xf32> to vector<7x512xf32>
    %320 = arith.mulf %319, %182 : vector<7x512xf32>
    %321 = arith.addf %318, %320 : vector<7x512xf32>
    %322 = vector.extract_strided_slice %308 {offsets = [2, 0], sizes = [7, 512], strides = [1, 1]} : vector<9x512xf32> to vector<7x512xf32>
    %323 = arith.mulf %322, %186 : vector<7x512xf32>
    %324 = arith.addf %321, %323 : vector<7x512xf32>
    %c5_146 = arith.constant 5 : index
    %c0_147 = arith.constant 0 : index
    %c0_148 = arith.constant 0 : index
    %325 = vector.load %arg4[%c5_146, %c0_147, %c0_148] : memref<7x7x512xf32, #tpu.memory_space<vmem>>, vector<1x7x512xf32>
    %326 = vector.shape_cast %325 : vector<1x7x512xf32> to vector<7x512xf32>
    %327 = arith.addf %326, %324 : vector<7x512xf32>
    %c5_149 = arith.constant 5 : index
    %c0_150 = arith.constant 0 : index
    %c0_151 = arith.constant 0 : index
    %328 = vector.load %arg4[%c5_149, %c0_150, %c0_151] : memref<7x7x512xf32, #tpu.memory_space<vmem>>, vector<1x7x512xf32>
    %329 = vector.shape_cast %328 : vector<1x7x512xf32> to vector<7x512xf32>
    %330 = vector.shape_cast %327 : vector<7x512xf32> to vector<1x7x512xf32>
    tpu.vector_store %arg4[%c5_149, %c0_150, %c0_151], %330 {strides = array<i32>} : memref<7x7x512xf32, #tpu.memory_space<vmem>>, vector<1x7x512xf32>,
    %c13 = arith.constant 13 : index
    %c0_152 = arith.constant 0 : index
    %c0_153 = arith.constant 0 : index
    %331 = vector.load %arg1[%c13, %c0_152, %c0_153] : memref<18x9x512xf32, #tpu.memory_space<vmem>>, vector<1x9x512xf32>
    %332 = vector.shape_cast %331 : vector<1x9x512xf32> to vector<9x512xf32>
    %c13_154 = arith.constant 13 : index
    %c0_155 = arith.constant 0 : index
    %c0_156 = arith.constant 0 : index
    %333 = vector.load %arg2[%c13_154, %c0_155, %c0_156] : memref<18x9x512xf32, #tpu.memory_space<vmem>>, vector<1x9x512xf32>
    %334 = vector.shape_cast %333 : vector<1x9x512xf32> to vector<9x512xf32>
    %335 = vector.extract_strided_slice %332 {offsets = [0, 0], sizes = [7, 512], strides = [1, 1]} : vector<9x512xf32> to vector<7x512xf32>
    %336 = arith.mulf %335, %170 : vector<7x512xf32>
    %337 = vector.extract_strided_slice %334 {offsets = [0, 0], sizes = [7, 512], strides = [1, 1]} : vector<9x512xf32> to vector<7x512xf32>
    %338 = arith.mulf %337, %174 : vector<7x512xf32>
    %339 = arith.addf %336, %338 : vector<7x512xf32>
    %340 = vector.extract_strided_slice %332 {offsets = [1, 0], sizes = [7, 512], strides = [1, 1]} : vector<9x512xf32> to vector<7x512xf32>
    %341 = arith.mulf %340, %178 : vector<7x512xf32>
    %342 = arith.addf %339, %341 : vector<7x512xf32>
    %343 = vector.extract_strided_slice %334 {offsets = [1, 0], sizes = [7, 512], strides = [1, 1]} : vector<9x512xf32> to vector<7x512xf32>
    %344 = arith.mulf %343, %182 : vector<7x512xf32>
    %345 = arith.addf %342, %344 : vector<7x512xf32>
    %346 = vector.extract_strided_slice %332 {offsets = [2, 0], sizes = [7, 512], strides = [1, 1]} : vector<9x512xf32> to vector<7x512xf32>
    %347 = arith.mulf %346, %186 : vector<7x512xf32>
    %348 = arith.addf %345, %347 : vector<7x512xf32>
    %c6_157 = arith.constant 6 : index
    %c0_158 = arith.constant 0 : index
    %c0_159 = arith.constant 0 : index
    %349 = vector.load %arg4[%c6_157, %c0_158, %c0_159] : memref<7x7x512xf32, #tpu.memory_space<vmem>>, vector<1x7x512xf32>
    %350 = vector.shape_cast %349 : vector<1x7x512xf32> to vector<7x512xf32>
    %351 = arith.addf %350, %348 : vector<7x512xf32>
    %c6_160 = arith.constant 6 : index
    %c0_161 = arith.constant 0 : index
    %c0_162 = arith.constant 0 : index
    %352 = vector.load %arg4[%c6_160, %c0_161, %c0_162] : memref<7x7x512xf32, #tpu.memory_space<vmem>>, vector<1x7x512xf32>
    %353 = vector.shape_cast %352 : vector<1x7x512xf32> to vector<7x512xf32>
    %354 = vector.shape_cast %351 : vector<7x512xf32> to vector<1x7x512xf32>
    tpu.vector_store %arg4[%c6_160, %c0_161, %c0_162], %354 {strides = array<i32>} : memref<7x7x512xf32, #tpu.memory_space<vmem>>, vector<1x7x512xf32>,
    %c10_163 = arith.constant 10 : index
    %c0_164 = arith.constant 0 : index
    %c0_165 = arith.constant 0 : index
    %355 = vector.load %arg3[%c10_163, %c0_164, %c0_165] : memref<25x1x512xf32, #tpu.memory_space<vmem>>, vector<1x1x512xf32>
    %356 = vector.shape_cast %355 : vector<1x1x512xf32> to vector<1x512xf32>
    %357 = vector.shape_cast %356 : vector<1x512xf32> to vector<1x512xf32>
    %358 = vector.broadcast %357 : vector<1x512xf32> to vector<7x512xf32>
    %c11_166 = arith.constant 11 : index
    %c0_167 = arith.constant 0 : index
    %c0_168 = arith.constant 0 : index
    %359 = vector.load %arg3[%c11_166, %c0_167, %c0_168] : memref<25x1x512xf32, #tpu.memory_space<vmem>>, vector<1x1x512xf32>
    %360 = vector.shape_cast %359 : vector<1x1x512xf32> to vector<1x512xf32>
    %361 = vector.shape_cast %360 : vector<1x512xf32> to vector<1x512xf32>
    %362 = vector.broadcast %361 : vector<1x512xf32> to vector<7x512xf32>
    %c12_169 = arith.constant 12 : index
    %c0_170 = arith.constant 0 : index
    %c0_171 = arith.constant 0 : index
    %363 = vector.load %arg3[%c12_169, %c0_170, %c0_171] : memref<25x1x512xf32, #tpu.memory_space<vmem>>, vector<1x1x512xf32>
    %364 = vector.shape_cast %363 : vector<1x1x512xf32> to vector<1x512xf32>
    %365 = vector.shape_cast %364 : vector<1x512xf32> to vector<1x512xf32>
    %366 = vector.broadcast %365 : vector<1x512xf32> to vector<7x512xf32>
    %c13_172 = arith.constant 13 : index
    %c0_173 = arith.constant 0 : index
    %c0_174 = arith.constant 0 : index
    %367 = vector.load %arg3[%c13_172, %c0_173, %c0_174] : memref<25x1x512xf32, #tpu.memory_space<vmem>>, vector<1x1x512xf32>
    %368 = vector.shape_cast %367 : vector<1x1x512xf32> to vector<1x512xf32>
    %369 = vector.shape_cast %368 : vector<1x512xf32> to vector<1x512xf32>
    %370 = vector.broadcast %369 : vector<1x512xf32> to vector<7x512xf32>
    %c14 = arith.constant 14 : index
    %c0_175 = arith.constant 0 : index
    %c0_176 = arith.constant 0 : index
    %371 = vector.load %arg3[%c14, %c0_175, %c0_176] : memref<25x1x512xf32, #tpu.memory_space<vmem>>, vector<1x1x512xf32>
    %372 = vector.shape_cast %371 : vector<1x1x512xf32> to vector<1x512xf32>
    %373 = vector.shape_cast %372 : vector<1x512xf32> to vector<1x512xf32>
    %374 = vector.broadcast %373 : vector<1x512xf32> to vector<7x512xf32>
    %c2_177 = arith.constant 2 : index
    %c0_178 = arith.constant 0 : index
    %c0_179 = arith.constant 0 : index
    %375 = vector.load %arg1[%c2_177, %c0_178, %c0_179] : memref<18x9x512xf32, #tpu.memory_space<vmem>>, vector<1x9x512xf32>
    %376 = vector.shape_cast %375 : vector<1x9x512xf32> to vector<9x512xf32>
    %c2_180 = arith.constant 2 : index
    %c0_181 = arith.constant 0 : index
    %c0_182 = arith.constant 0 : index
    %377 = vector.load %arg2[%c2_180, %c0_181, %c0_182] : memref<18x9x512xf32, #tpu.memory_space<vmem>>, vector<1x9x512xf32>
    %378 = vector.shape_cast %377 : vector<1x9x512xf32> to vector<9x512xf32>
    %379 = vector.extract_strided_slice %376 {offsets = [0, 0], sizes = [7, 512], strides = [1, 1]} : vector<9x512xf32> to vector<7x512xf32>
    %380 = arith.mulf %379, %358 : vector<7x512xf32>
    %381 = vector.extract_strided_slice %378 {offsets = [0, 0], sizes = [7, 512], strides = [1, 1]} : vector<9x512xf32> to vector<7x512xf32>
    %382 = arith.mulf %381, %362 : vector<7x512xf32>
    %383 = arith.addf %380, %382 : vector<7x512xf32>
    %384 = vector.extract_strided_slice %376 {offsets = [1, 0], sizes = [7, 512], strides = [1, 1]} : vector<9x512xf32> to vector<7x512xf32>
    %385 = arith.mulf %384, %366 : vector<7x512xf32>
    %386 = arith.addf %383, %385 : vector<7x512xf32>
    %387 = vector.extract_strided_slice %378 {offsets = [1, 0], sizes = [7, 512], strides = [1, 1]} : vector<9x512xf32> to vector<7x512xf32>
    %388 = arith.mulf %387, %370 : vector<7x512xf32>
    %389 = arith.addf %386, %388 : vector<7x512xf32>
    %390 = vector.extract_strided_slice %376 {offsets = [2, 0], sizes = [7, 512], strides = [1, 1]} : vector<9x512xf32> to vector<7x512xf32>
    %391 = arith.mulf %390, %374 : vector<7x512xf32>
    %392 = arith.addf %389, %391 : vector<7x512xf32>
    %c0_183 = arith.constant 0 : index
    %c0_184 = arith.constant 0 : index
    %c0_185 = arith.constant 0 : index
    %393 = vector.load %arg4[%c0_183, %c0_184, %c0_185] : memref<7x7x512xf32, #tpu.memory_space<vmem>>, vector<1x7x512xf32>
    %394 = vector.shape_cast %393 : vector<1x7x512xf32> to vector<7x512xf32>
    %395 = arith.addf %394, %392 : vector<7x512xf32>
    %c0_186 = arith.constant 0 : index
    %c0_187 = arith.constant 0 : index
    %c0_188 = arith.constant 0 : index
    %396 = vector.load %arg4[%c0_186, %c0_187, %c0_188] : memref<7x7x512xf32, #tpu.memory_space<vmem>>, vector<1x7x512xf32>
    %397 = vector.shape_cast %396 : vector<1x7x512xf32> to vector<7x512xf32>
    %398 = vector.shape_cast %395 : vector<7x512xf32> to vector<1x7x512xf32>
    tpu.vector_store %arg4[%c0_186, %c0_187, %c0_188], %398 {strides = array<i32>} : memref<7x7x512xf32, #tpu.memory_space<vmem>>, vector<1x7x512xf32>,
    %c4_189 = arith.constant 4 : index
    %c0_190 = arith.constant 0 : index
    %c0_191 = arith.constant 0 : index
    %399 = vector.load %arg1[%c4_189, %c0_190, %c0_191] : memref<18x9x512xf32, #tpu.memory_space<vmem>>, vector<1x9x512xf32>
    %400 = vector.shape_cast %399 : vector<1x9x512xf32> to vector<9x512xf32>
    %c4_192 = arith.constant 4 : index
    %c0_193 = arith.constant 0 : index
    %c0_194 = arith.constant 0 : index
    %401 = vector.load %arg2[%c4_192, %c0_193, %c0_194] : memref<18x9x512xf32, #tpu.memory_space<vmem>>, vector<1x9x512xf32>
    %402 = vector.shape_cast %401 : vector<1x9x512xf32> to vector<9x512xf32>
    %403 = vector.extract_strided_slice %400 {offsets = [0, 0], sizes = [7, 512], strides = [1, 1]} : vector<9x512xf32> to vector<7x512xf32>
    %404 = arith.mulf %403, %358 : vector<7x512xf32>
    %405 = vector.extract_strided_slice %402 {offsets = [0, 0], sizes = [7, 512], strides = [1, 1]} : vector<9x512xf32> to vector<7x512xf32>
    %406 = arith.mulf %405, %362 : vector<7x512xf32>
    %407 = arith.addf %404, %406 : vector<7x512xf32>
    %408 = vector.extract_strided_slice %400 {offsets = [1, 0], sizes = [7, 512], strides = [1, 1]} : vector<9x512xf32> to vector<7x512xf32>
    %409 = arith.mulf %408, %366 : vector<7x512xf32>
    %410 = arith.addf %407, %409 : vector<7x512xf32>
    %411 = vector.extract_strided_slice %402 {offsets = [1, 0], sizes = [7, 512], strides = [1, 1]} : vector<9x512xf32> to vector<7x512xf32>
    %412 = arith.mulf %411, %370 : vector<7x512xf32>
    %413 = arith.addf %410, %412 : vector<7x512xf32>
    %414 = vector.extract_strided_slice %400 {offsets = [2, 0], sizes = [7, 512], strides = [1, 1]} : vector<9x512xf32> to vector<7x512xf32>
    %415 = arith.mulf %414, %374 : vector<7x512xf32>
    %416 = arith.addf %413, %415 : vector<7x512xf32>
    %c1_195 = arith.constant 1 : index
    %c0_196 = arith.constant 0 : index
    %c0_197 = arith.constant 0 : index
    %417 = vector.load %arg4[%c1_195, %c0_196, %c0_197] : memref<7x7x512xf32, #tpu.memory_space<vmem>>, vector<1x7x512xf32>
    %418 = vector.shape_cast %417 : vector<1x7x512xf32> to vector<7x512xf32>
    %419 = arith.addf %418, %416 : vector<7x512xf32>
    %c1_198 = arith.constant 1 : index
    %c0_199 = arith.constant 0 : index
    %c0_200 = arith.constant 0 : index
    %420 = vector.load %arg4[%c1_198, %c0_199, %c0_200] : memref<7x7x512xf32, #tpu.memory_space<vmem>>, vector<1x7x512xf32>
    %421 = vector.shape_cast %420 : vector<1x7x512xf32> to vector<7x512xf32>
    %422 = vector.shape_cast %419 : vector<7x512xf32> to vector<1x7x512xf32>
    tpu.vector_store %arg4[%c1_198, %c0_199, %c0_200], %422 {strides = array<i32>} : memref<7x7x512xf32, #tpu.memory_space<vmem>>, vector<1x7x512xf32>,
    %c6_201 = arith.constant 6 : index
    %c0_202 = arith.constant 0 : index
    %c0_203 = arith.constant 0 : index
    %423 = vector.load %arg1[%c6_201, %c0_202, %c0_203] : memref<18x9x512xf32, #tpu.memory_space<vmem>>, vector<1x9x512xf32>
    %424 = vector.shape_cast %423 : vector<1x9x512xf32> to vector<9x512xf32>
    %c6_204 = arith.constant 6 : index
    %c0_205 = arith.constant 0 : index
    %c0_206 = arith.constant 0 : index
    %425 = vector.load %arg2[%c6_204, %c0_205, %c0_206] : memref<18x9x512xf32, #tpu.memory_space<vmem>>, vector<1x9x512xf32>
    %426 = vector.shape_cast %425 : vector<1x9x512xf32> to vector<9x512xf32>
    %427 = vector.extract_strided_slice %424 {offsets = [0, 0], sizes = [7, 512], strides = [1, 1]} : vector<9x512xf32> to vector<7x512xf32>
    %428 = arith.mulf %427, %358 : vector<7x512xf32>
    %429 = vector.extract_strided_slice %426 {offsets = [0, 0], sizes = [7, 512], strides = [1, 1]} : vector<9x512xf32> to vector<7x512xf32>
    %430 = arith.mulf %429, %362 : vector<7x512xf32>
    %431 = arith.addf %428, %430 : vector<7x512xf32>
    %432 = vector.extract_strided_slice %424 {offsets = [1, 0], sizes = [7, 512], strides = [1, 1]} : vector<9x512xf32> to vector<7x512xf32>
    %433 = arith.mulf %432, %366 : vector<7x512xf32>
    %434 = arith.addf %431, %433 : vector<7x512xf32>
    %435 = vector.extract_strided_slice %426 {offsets = [1, 0], sizes = [7, 512], strides = [1, 1]} : vector<9x512xf32> to vector<7x512xf32>
    %436 = arith.mulf %435, %370 : vector<7x512xf32>
    %437 = arith.addf %434, %436 : vector<7x512xf32>
    %438 = vector.extract_strided_slice %424 {offsets = [2, 0], sizes = [7, 512], strides = [1, 1]} : vector<9x512xf32> to vector<7x512xf32>
    %439 = arith.mulf %438, %374 : vector<7x512xf32>
    %440 = arith.addf %437, %439 : vector<7x512xf32>
    %c2_207 = arith.constant 2 : index
    %c0_208 = arith.constant 0 : index
    %c0_209 = arith.constant 0 : index
    %441 = vector.load %arg4[%c2_207, %c0_208, %c0_209] : memref<7x7x512xf32, #tpu.memory_space<vmem>>, vector<1x7x512xf32>
    %442 = vector.shape_cast %441 : vector<1x7x512xf32> to vector<7x512xf32>
    %443 = arith.addf %442, %440 : vector<7x512xf32>
    %c2_210 = arith.constant 2 : index
    %c0_211 = arith.constant 0 : index
    %c0_212 = arith.constant 0 : index
    %444 = vector.load %arg4[%c2_210, %c0_211, %c0_212] : memref<7x7x512xf32, #tpu.memory_space<vmem>>, vector<1x7x512xf32>
    %445 = vector.shape_cast %444 : vector<1x7x512xf32> to vector<7x512xf32>
    %446 = vector.shape_cast %443 : vector<7x512xf32> to vector<1x7x512xf32>
    tpu.vector_store %arg4[%c2_210, %c0_211, %c0_212], %446 {strides = array<i32>} : memref<7x7x512xf32, #tpu.memory_space<vmem>>, vector<1x7x512xf32>,
    %c8_213 = arith.constant 8 : index
    %c0_214 = arith.constant 0 : index
    %c0_215 = arith.constant 0 : index
    %447 = vector.load %arg1[%c8_213, %c0_214, %c0_215] : memref<18x9x512xf32, #tpu.memory_space<vmem>>, vector<1x9x512xf32>
    %448 = vector.shape_cast %447 : vector<1x9x512xf32> to vector<9x512xf32>
    %c8_216 = arith.constant 8 : index
    %c0_217 = arith.constant 0 : index
    %c0_218 = arith.constant 0 : index
    %449 = vector.load %arg2[%c8_216, %c0_217, %c0_218] : memref<18x9x512xf32, #tpu.memory_space<vmem>>, vector<1x9x512xf32>
    %450 = vector.shape_cast %449 : vector<1x9x512xf32> to vector<9x512xf32>
    %451 = vector.extract_strided_slice %448 {offsets = [0, 0], sizes = [7, 512], strides = [1, 1]} : vector<9x512xf32> to vector<7x512xf32>
    %452 = arith.mulf %451, %358 : vector<7x512xf32>
    %453 = vector.extract_strided_slice %450 {offsets = [0, 0], sizes = [7, 512], strides = [1, 1]} : vector<9x512xf32> to vector<7x512xf32>
    %454 = arith.mulf %453, %362 : vector<7x512xf32>
    %455 = arith.addf %452, %454 : vector<7x512xf32>
    %456 = vector.extract_strided_slice %448 {offsets = [1, 0], sizes = [7, 512], strides = [1, 1]} : vector<9x512xf32> to vector<7x512xf32>
    %457 = arith.mulf %456, %366 : vector<7x512xf32>
    %458 = arith.addf %455, %457 : vector<7x512xf32>
    %459 = vector.extract_strided_slice %450 {offsets = [1, 0], sizes = [7, 512], strides = [1, 1]} : vector<9x512xf32> to vector<7x512xf32>
    %460 = arith.mulf %459, %370 : vector<7x512xf32>
    %461 = arith.addf %458, %460 : vector<7x512xf32>
    %462 = vector.extract_strided_slice %448 {offsets = [2, 0], sizes = [7, 512], strides = [1, 1]} : vector<9x512xf32> to vector<7x512xf32>
    %463 = arith.mulf %462, %374 : vector<7x512xf32>
    %464 = arith.addf %461, %463 : vector<7x512xf32>
    %c3_219 = arith.constant 3 : index
    %c0_220 = arith.constant 0 : index
    %c0_221 = arith.constant 0 : index
    %465 = vector.load %arg4[%c3_219, %c0_220, %c0_221] : memref<7x7x512xf32, #tpu.memory_space<vmem>>, vector<1x7x512xf32>
    %466 = vector.shape_cast %465 : vector<1x7x512xf32> to vector<7x512xf32>
    %467 = arith.addf %466, %464 : vector<7x512xf32>
    %c3_222 = arith.constant 3 : index
    %c0_223 = arith.constant 0 : index
    %c0_224 = arith.constant 0 : index
    %468 = vector.load %arg4[%c3_222, %c0_223, %c0_224] : memref<7x7x512xf32, #tpu.memory_space<vmem>>, vector<1x7x512xf32>
    %469 = vector.shape_cast %468 : vector<1x7x512xf32> to vector<7x512xf32>
    %470 = vector.shape_cast %467 : vector<7x512xf32> to vector<1x7x512xf32>
    tpu.vector_store %arg4[%c3_222, %c0_223, %c0_224], %470 {strides = array<i32>} : memref<7x7x512xf32, #tpu.memory_space<vmem>>, vector<1x7x512xf32>,
    %c10_225 = arith.constant 10 : index
    %c0_226 = arith.constant 0 : index
    %c0_227 = arith.constant 0 : index
    %471 = vector.load %arg1[%c10_225, %c0_226, %c0_227] : memref<18x9x512xf32, #tpu.memory_space<vmem>>, vector<1x9x512xf32>
    %472 = vector.shape_cast %471 : vector<1x9x512xf32> to vector<9x512xf32>
    %c10_228 = arith.constant 10 : index
    %c0_229 = arith.constant 0 : index
    %c0_230 = arith.constant 0 : index
    %473 = vector.load %arg2[%c10_228, %c0_229, %c0_230] : memref<18x9x512xf32, #tpu.memory_space<vmem>>, vector<1x9x512xf32>
    %474 = vector.shape_cast %473 : vector<1x9x512xf32> to vector<9x512xf32>
    %475 = vector.extract_strided_slice %472 {offsets = [0, 0], sizes = [7, 512], strides = [1, 1]} : vector<9x512xf32> to vector<7x512xf32>
    %476 = arith.mulf %475, %358 : vector<7x512xf32>
    %477 = vector.extract_strided_slice %474 {offsets = [0, 0], sizes = [7, 512], strides = [1, 1]} : vector<9x512xf32> to vector<7x512xf32>
    %478 = arith.mulf %477, %362 : vector<7x512xf32>
    %479 = arith.addf %476, %478 : vector<7x512xf32>
    %480 = vector.extract_strided_slice %472 {offsets = [1, 0], sizes = [7, 512], strides = [1, 1]} : vector<9x512xf32> to vector<7x512xf32>
    %481 = arith.mulf %480, %366 : vector<7x512xf32>
    %482 = arith.addf %479, %481 : vector<7x512xf32>
    %483 = vector.extract_strided_slice %474 {offsets = [1, 0], sizes = [7, 512], strides = [1, 1]} : vector<9x512xf32> to vector<7x512xf32>
    %484 = arith.mulf %483, %370 : vector<7x512xf32>
    %485 = arith.addf %482, %484 : vector<7x512xf32>
    %486 = vector.extract_strided_slice %472 {offsets = [2, 0], sizes = [7, 512], strides = [1, 1]} : vector<9x512xf32> to vector<7x512xf32>
    %487 = arith.mulf %486, %374 : vector<7x512xf32>
    %488 = arith.addf %485, %487 : vector<7x512xf32>
    %c4_231 = arith.constant 4 : index
    %c0_232 = arith.constant 0 : index
    %c0_233 = arith.constant 0 : index
    %489 = vector.load %arg4[%c4_231, %c0_232, %c0_233] : memref<7x7x512xf32, #tpu.memory_space<vmem>>, vector<1x7x512xf32>
    %490 = vector.shape_cast %489 : vector<1x7x512xf32> to vector<7x512xf32>
    %491 = arith.addf %490, %488 : vector<7x512xf32>
    %c4_234 = arith.constant 4 : index
    %c0_235 = arith.constant 0 : index
    %c0_236 = arith.constant 0 : index
    %492 = vector.load %arg4[%c4_234, %c0_235, %c0_236] : memref<7x7x512xf32, #tpu.memory_space<vmem>>, vector<1x7x512xf32>
    %493 = vector.shape_cast %492 : vector<1x7x512xf32> to vector<7x512xf32>
    %494 = vector.shape_cast %491 : vector<7x512xf32> to vector<1x7x512xf32>
    tpu.vector_store %arg4[%c4_234, %c0_235, %c0_236], %494 {strides = array<i32>} : memref<7x7x512xf32, #tpu.memory_space<vmem>>, vector<1x7x512xf32>,
    %c12_237 = arith.constant 12 : index
    %c0_238 = arith.constant 0 : index
    %c0_239 = arith.constant 0 : index
    %495 = vector.load %arg1[%c12_237, %c0_238, %c0_239] : memref<18x9x512xf32, #tpu.memory_space<vmem>>, vector<1x9x512xf32>
    %496 = vector.shape_cast %495 : vector<1x9x512xf32> to vector<9x512xf32>
    %c12_240 = arith.constant 12 : index
    %c0_241 = arith.constant 0 : index
    %c0_242 = arith.constant 0 : index
    %497 = vector.load %arg2[%c12_240, %c0_241, %c0_242] : memref<18x9x512xf32, #tpu.memory_space<vmem>>, vector<1x9x512xf32>
    %498 = vector.shape_cast %497 : vector<1x9x512xf32> to vector<9x512xf32>
    %499 = vector.extract_strided_slice %496 {offsets = [0, 0], sizes = [7, 512], strides = [1, 1]} : vector<9x512xf32> to vector<7x512xf32>
    %500 = arith.mulf %499, %358 : vector<7x512xf32>
    %501 = vector.extract_strided_slice %498 {offsets = [0, 0], sizes = [7, 512], strides = [1, 1]} : vector<9x512xf32> to vector<7x512xf32>
    %502 = arith.mulf %501, %362 : vector<7x512xf32>
    %503 = arith.addf %500, %502 : vector<7x512xf32>
    %504 = vector.extract_strided_slice %496 {offsets = [1, 0], sizes = [7, 512], strides = [1, 1]} : vector<9x512xf32> to vector<7x512xf32>
    %505 = arith.mulf %504, %366 : vector<7x512xf32>
    %506 = arith.addf %503, %505 : vector<7x512xf32>
    %507 = vector.extract_strided_slice %498 {offsets = [1, 0], sizes = [7, 512], strides = [1, 1]} : vector<9x512xf32> to vector<7x512xf32>
    %508 = arith.mulf %507, %370 : vector<7x512xf32>
    %509 = arith.addf %506, %508 : vector<7x512xf32>
    %510 = vector.extract_strided_slice %496 {offsets = [2, 0], sizes = [7, 512], strides = [1, 1]} : vector<9x512xf32> to vector<7x512xf32>
    %511 = arith.mulf %510, %374 : vector<7x512xf32>
    %512 = arith.addf %509, %511 : vector<7x512xf32>
    %c5_243 = arith.constant 5 : index
    %c0_244 = arith.constant 0 : index
    %c0_245 = arith.constant 0 : index
    %513 = vector.load %arg4[%c5_243, %c0_244, %c0_245] : memref<7x7x512xf32, #tpu.memory_space<vmem>>, vector<1x7x512xf32>
    %514 = vector.shape_cast %513 : vector<1x7x512xf32> to vector<7x512xf32>
    %515 = arith.addf %514, %512 : vector<7x512xf32>
    %c5_246 = arith.constant 5 : index
    %c0_247 = arith.constant 0 : index
    %c0_248 = arith.constant 0 : index
    %516 = vector.load %arg4[%c5_246, %c0_247, %c0_248] : memref<7x7x512xf32, #tpu.memory_space<vmem>>, vector<1x7x512xf32>
    %517 = vector.shape_cast %516 : vector<1x7x512xf32> to vector<7x512xf32>
    %518 = vector.shape_cast %515 : vector<7x512xf32> to vector<1x7x512xf32>
    tpu.vector_store %arg4[%c5_246, %c0_247, %c0_248], %518 {strides = array<i32>} : memref<7x7x512xf32, #tpu.memory_space<vmem>>, vector<1x7x512xf32>,
    %c14_249 = arith.constant 14 : index
    %c0_250 = arith.constant 0 : index
    %c0_251 = arith.constant 0 : index
    %519 = vector.load %arg1[%c14_249, %c0_250, %c0_251] : memref<18x9x512xf32, #tpu.memory_space<vmem>>, vector<1x9x512xf32>
    %520 = vector.shape_cast %519 : vector<1x9x512xf32> to vector<9x512xf32>
    %c14_252 = arith.constant 14 : index
    %c0_253 = arith.constant 0 : index
    %c0_254 = arith.constant 0 : index
    %521 = vector.load %arg2[%c14_252, %c0_253, %c0_254] : memref<18x9x512xf32, #tpu.memory_space<vmem>>, vector<1x9x512xf32>
    %522 = vector.shape_cast %521 : vector<1x9x512xf32> to vector<9x512xf32>
    %523 = vector.extract_strided_slice %520 {offsets = [0, 0], sizes = [7, 512], strides = [1, 1]} : vector<9x512xf32> to vector<7x512xf32>
    %524 = arith.mulf %523, %358 : vector<7x512xf32>
    %525 = vector.extract_strided_slice %522 {offsets = [0, 0], sizes = [7, 512], strides = [1, 1]} : vector<9x512xf32> to vector<7x512xf32>
    %526 = arith.mulf %525, %362 : vector<7x512xf32>
    %527 = arith.addf %524, %526 : vector<7x512xf32>
    %528 = vector.extract_strided_slice %520 {offsets = [1, 0], sizes = [7, 512], strides = [1, 1]} : vector<9x512xf32> to vector<7x512xf32>
    %529 = arith.mulf %528, %366 : vector<7x512xf32>
    %530 = arith.addf %527, %529 : vector<7x512xf32>
    %531 = vector.extract_strided_slice %522 {offsets = [1, 0], sizes = [7, 512], strides = [1, 1]} : vector<9x512xf32> to vector<7x512xf32>
    %532 = arith.mulf %531, %370 : vector<7x512xf32>
    %533 = arith.addf %530, %532 : vector<7x512xf32>
    %534 = vector.extract_strided_slice %520 {offsets = [2, 0], sizes = [7, 512], strides = [1, 1]} : vector<9x512xf32> to vector<7x512xf32>
    %535 = arith.mulf %534, %374 : vector<7x512xf32>
    %536 = arith.addf %533, %535 : vector<7x512xf32>
    %c6_255 = arith.constant 6 : index
    %c0_256 = arith.constant 0 : index
    %c0_257 = arith.constant 0 : index
    %537 = vector.load %arg4[%c6_255, %c0_256, %c0_257] : memref<7x7x512xf32, #tpu.memory_space<vmem>>, vector<1x7x512xf32>
    %538 = vector.shape_cast %537 : vector<1x7x512xf32> to vector<7x512xf32>
    %539 = arith.addf %538, %536 : vector<7x512xf32>
    %c6_258 = arith.constant 6 : index
    %c0_259 = arith.constant 0 : index
    %c0_260 = arith.constant 0 : index
    %540 = vector.load %arg4[%c6_258, %c0_259, %c0_260] : memref<7x7x512xf32, #tpu.memory_space<vmem>>, vector<1x7x512xf32>
    %541 = vector.shape_cast %540 : vector<1x7x512xf32> to vector<7x512xf32>
    %542 = vector.shape_cast %539 : vector<7x512xf32> to vector<1x7x512xf32>
    tpu.vector_store %arg4[%c6_258, %c0_259, %c0_260], %542 {strides = array<i32>} : memref<7x7x512xf32, #tpu.memory_space<vmem>>, vector<1x7x512xf32>,
    %c15 = arith.constant 15 : index
    %c0_261 = arith.constant 0 : index
    %c0_262 = arith.constant 0 : index
    %543 = vector.load %arg3[%c15, %c0_261, %c0_262] : memref<25x1x512xf32, #tpu.memory_space<vmem>>, vector<1x1x512xf32>
    %544 = vector.shape_cast %543 : vector<1x1x512xf32> to vector<1x512xf32>
    %545 = vector.shape_cast %544 : vector<1x512xf32> to vector<1x512xf32>
    %546 = vector.broadcast %545 : vector<1x512xf32> to vector<7x512xf32>
    %c16 = arith.constant 16 : index
    %c0_263 = arith.constant 0 : index
    %c0_264 = arith.constant 0 : index
    %547 = vector.load %arg3[%c16, %c0_263, %c0_264] : memref<25x1x512xf32, #tpu.memory_space<vmem>>, vector<1x1x512xf32>
    %548 = vector.shape_cast %547 : vector<1x1x512xf32> to vector<1x512xf32>
    %549 = vector.shape_cast %548 : vector<1x512xf32> to vector<1x512xf32>
    %550 = vector.broadcast %549 : vector<1x512xf32> to vector<7x512xf32>
    %c17 = arith.constant 17 : index
    %c0_265 = arith.constant 0 : index
    %c0_266 = arith.constant 0 : index
    %551 = vector.load %arg3[%c17, %c0_265, %c0_266] : memref<25x1x512xf32, #tpu.memory_space<vmem>>, vector<1x1x512xf32>
    %552 = vector.shape_cast %551 : vector<1x1x512xf32> to vector<1x512xf32>
    %553 = vector.shape_cast %552 : vector<1x512xf32> to vector<1x512xf32>
    %554 = vector.broadcast %553 : vector<1x512xf32> to vector<7x512xf32>
    %c18 = arith.constant 18 : index
    %c0_267 = arith.constant 0 : index
    %c0_268 = arith.constant 0 : index
    %555 = vector.load %arg3[%c18, %c0_267, %c0_268] : memref<25x1x512xf32, #tpu.memory_space<vmem>>, vector<1x1x512xf32>
    %556 = vector.shape_cast %555 : vector<1x1x512xf32> to vector<1x512xf32>
    %557 = vector.shape_cast %556 : vector<1x512xf32> to vector<1x512xf32>
    %558 = vector.broadcast %557 : vector<1x512xf32> to vector<7x512xf32>
    %c19 = arith.constant 19 : index
    %c0_269 = arith.constant 0 : index
    %c0_270 = arith.constant 0 : index
    %559 = vector.load %arg3[%c19, %c0_269, %c0_270] : memref<25x1x512xf32, #tpu.memory_space<vmem>>, vector<1x1x512xf32>
    %560 = vector.shape_cast %559 : vector<1x1x512xf32> to vector<1x512xf32>
    %561 = vector.shape_cast %560 : vector<1x512xf32> to vector<1x512xf32>
    %562 = vector.broadcast %561 : vector<1x512xf32> to vector<7x512xf32>
    %c3_271 = arith.constant 3 : index
    %c0_272 = arith.constant 0 : index
    %c0_273 = arith.constant 0 : index
    %563 = vector.load %arg1[%c3_271, %c0_272, %c0_273] : memref<18x9x512xf32, #tpu.memory_space<vmem>>, vector<1x9x512xf32>
    %564 = vector.shape_cast %563 : vector<1x9x512xf32> to vector<9x512xf32>
    %c3_274 = arith.constant 3 : index
    %c0_275 = arith.constant 0 : index
    %c0_276 = arith.constant 0 : index
    %565 = vector.load %arg2[%c3_274, %c0_275, %c0_276] : memref<18x9x512xf32, #tpu.memory_space<vmem>>, vector<1x9x512xf32>
    %566 = vector.shape_cast %565 : vector<1x9x512xf32> to vector<9x512xf32>
    %567 = vector.extract_strided_slice %564 {offsets = [0, 0], sizes = [7, 512], strides = [1, 1]} : vector<9x512xf32> to vector<7x512xf32>
    %568 = arith.mulf %567, %546 : vector<7x512xf32>
    %569 = vector.extract_strided_slice %566 {offsets = [0, 0], sizes = [7, 512], strides = [1, 1]} : vector<9x512xf32> to vector<7x512xf32>
    %570 = arith.mulf %569, %550 : vector<7x512xf32>
    %571 = arith.addf %568, %570 : vector<7x512xf32>
    %572 = vector.extract_strided_slice %564 {offsets = [1, 0], sizes = [7, 512], strides = [1, 1]} : vector<9x512xf32> to vector<7x512xf32>
    %573 = arith.mulf %572, %554 : vector<7x512xf32>
    %574 = arith.addf %571, %573 : vector<7x512xf32>
    %575 = vector.extract_strided_slice %566 {offsets = [1, 0], sizes = [7, 512], strides = [1, 1]} : vector<9x512xf32> to vector<7x512xf32>
    %576 = arith.mulf %575, %558 : vector<7x512xf32>
    %577 = arith.addf %574, %576 : vector<7x512xf32>
    %578 = vector.extract_strided_slice %564 {offsets = [2, 0], sizes = [7, 512], strides = [1, 1]} : vector<9x512xf32> to vector<7x512xf32>
    %579 = arith.mulf %578, %562 : vector<7x512xf32>
    %580 = arith.addf %577, %579 : vector<7x512xf32>
    %c0_277 = arith.constant 0 : index
    %c0_278 = arith.constant 0 : index
    %c0_279 = arith.constant 0 : index
    %581 = vector.load %arg4[%c0_277, %c0_278, %c0_279] : memref<7x7x512xf32, #tpu.memory_space<vmem>>, vector<1x7x512xf32>
    %582 = vector.shape_cast %581 : vector<1x7x512xf32> to vector<7x512xf32>
    %583 = arith.addf %582, %580 : vector<7x512xf32>
    %c0_280 = arith.constant 0 : index
    %c0_281 = arith.constant 0 : index
    %c0_282 = arith.constant 0 : index
    %584 = vector.load %arg4[%c0_280, %c0_281, %c0_282] : memref<7x7x512xf32, #tpu.memory_space<vmem>>, vector<1x7x512xf32>
    %585 = vector.shape_cast %584 : vector<1x7x512xf32> to vector<7x512xf32>
    %586 = vector.shape_cast %583 : vector<7x512xf32> to vector<1x7x512xf32>
    tpu.vector_store %arg4[%c0_280, %c0_281, %c0_282], %586 {strides = array<i32>} : memref<7x7x512xf32, #tpu.memory_space<vmem>>, vector<1x7x512xf32>,
    %c5_283 = arith.constant 5 : index
    %c0_284 = arith.constant 0 : index
    %c0_285 = arith.constant 0 : index
    %587 = vector.load %arg1[%c5_283, %c0_284, %c0_285] : memref<18x9x512xf32, #tpu.memory_space<vmem>>, vector<1x9x512xf32>
    %588 = vector.shape_cast %587 : vector<1x9x512xf32> to vector<9x512xf32>
    %c5_286 = arith.constant 5 : index
    %c0_287 = arith.constant 0 : index
    %c0_288 = arith.constant 0 : index
    %589 = vector.load %arg2[%c5_286, %c0_287, %c0_288] : memref<18x9x512xf32, #tpu.memory_space<vmem>>, vector<1x9x512xf32>
    %590 = vector.shape_cast %589 : vector<1x9x512xf32> to vector<9x512xf32>
    %591 = vector.extract_strided_slice %588 {offsets = [0, 0], sizes = [7, 512], strides = [1, 1]} : vector<9x512xf32> to vector<7x512xf32>
    %592 = arith.mulf %591, %546 : vector<7x512xf32>
    %593 = vector.extract_strided_slice %590 {offsets = [0, 0], sizes = [7, 512], strides = [1, 1]} : vector<9x512xf32> to vector<7x512xf32>
    %594 = arith.mulf %593, %550 : vector<7x512xf32>
    %595 = arith.addf %592, %594 : vector<7x512xf32>
    %596 = vector.extract_strided_slice %588 {offsets = [1, 0], sizes = [7, 512], strides = [1, 1]} : vector<9x512xf32> to vector<7x512xf32>
    %597 = arith.mulf %596, %554 : vector<7x512xf32>
    %598 = arith.addf %595, %597 : vector<7x512xf32>
    %599 = vector.extract_strided_slice %590 {offsets = [1, 0], sizes = [7, 512], strides = [1, 1]} : vector<9x512xf32> to vector<7x512xf32>
    %600 = arith.mulf %599, %558 : vector<7x512xf32>
    %601 = arith.addf %598, %600 : vector<7x512xf32>
    %602 = vector.extract_strided_slice %588 {offsets = [2, 0], sizes = [7, 512], strides = [1, 1]} : vector<9x512xf32> to vector<7x512xf32>
    %603 = arith.mulf %602, %562 : vector<7x512xf32>
    %604 = arith.addf %601, %603 : vector<7x512xf32>
    %c1_289 = arith.constant 1 : index
    %c0_290 = arith.constant 0 : index
    %c0_291 = arith.constant 0 : index
    %605 = vector.load %arg4[%c1_289, %c0_290, %c0_291] : memref<7x7x512xf32, #tpu.memory_space<vmem>>, vector<1x7x512xf32>
    %606 = vector.shape_cast %605 : vector<1x7x512xf32> to vector<7x512xf32>
    %607 = arith.addf %606, %604 : vector<7x512xf32>
    %c1_292 = arith.constant 1 : index
    %c0_293 = arith.constant 0 : index
    %c0_294 = arith.constant 0 : index
    %608 = vector.load %arg4[%c1_292, %c0_293, %c0_294] : memref<7x7x512xf32, #tpu.memory_space<vmem>>, vector<1x7x512xf32>
    %609 = vector.shape_cast %608 : vector<1x7x512xf32> to vector<7x512xf32>
    %610 = vector.shape_cast %607 : vector<7x512xf32> to vector<1x7x512xf32>
    tpu.vector_store %arg4[%c1_292, %c0_293, %c0_294], %610 {strides = array<i32>} : memref<7x7x512xf32, #tpu.memory_space<vmem>>, vector<1x7x512xf32>,
    %c7_295 = arith.constant 7 : index
    %c0_296 = arith.constant 0 : index
    %c0_297 = arith.constant 0 : index
    %611 = vector.load %arg1[%c7_295, %c0_296, %c0_297] : memref<18x9x512xf32, #tpu.memory_space<vmem>>, vector<1x9x512xf32>
    %612 = vector.shape_cast %611 : vector<1x9x512xf32> to vector<9x512xf32>
    %c7_298 = arith.constant 7 : index
    %c0_299 = arith.constant 0 : index
    %c0_300 = arith.constant 0 : index
    %613 = vector.load %arg2[%c7_298, %c0_299, %c0_300] : memref<18x9x512xf32, #tpu.memory_space<vmem>>, vector<1x9x512xf32>
    %614 = vector.shape_cast %613 : vector<1x9x512xf32> to vector<9x512xf32>
    %615 = vector.extract_strided_slice %612 {offsets = [0, 0], sizes = [7, 512], strides = [1, 1]} : vector<9x512xf32> to vector<7x512xf32>
    %616 = arith.mulf %615, %546 : vector<7x512xf32>
    %617 = vector.extract_strided_slice %614 {offsets = [0, 0], sizes = [7, 512], strides = [1, 1]} : vector<9x512xf32> to vector<7x512xf32>
    %618 = arith.mulf %617, %550 : vector<7x512xf32>
    %619 = arith.addf %616, %618 : vector<7x512xf32>
    %620 = vector.extract_strided_slice %612 {offsets = [1, 0], sizes = [7, 512], strides = [1, 1]} : vector<9x512xf32> to vector<7x512xf32>
    %621 = arith.mulf %620, %554 : vector<7x512xf32>
    %622 = arith.addf %619, %621 : vector<7x512xf32>
    %623 = vector.extract_strided_slice %614 {offsets = [1, 0], sizes = [7, 512], strides = [1, 1]} : vector<9x512xf32> to vector<7x512xf32>
    %624 = arith.mulf %623, %558 : vector<7x512xf32>
    %625 = arith.addf %622, %624 : vector<7x512xf32>
    %626 = vector.extract_strided_slice %612 {offsets = [2, 0], sizes = [7, 512], strides = [1, 1]} : vector<9x512xf32> to vector<7x512xf32>
    %627 = arith.mulf %626, %562 : vector<7x512xf32>
    %628 = arith.addf %625, %627 : vector<7x512xf32>
    %c2_301 = arith.constant 2 : index
    %c0_302 = arith.constant 0 : index
    %c0_303 = arith.constant 0 : index
    %629 = vector.load %arg4[%c2_301, %c0_302, %c0_303] : memref<7x7x512xf32, #tpu.memory_space<vmem>>, vector<1x7x512xf32>
    %630 = vector.shape_cast %629 : vector<1x7x512xf32> to vector<7x512xf32>
    %631 = arith.addf %630, %628 : vector<7x512xf32>
    %c2_304 = arith.constant 2 : index
    %c0_305 = arith.constant 0 : index
    %c0_306 = arith.constant 0 : index
    %632 = vector.load %arg4[%c2_304, %c0_305, %c0_306] : memref<7x7x512xf32, #tpu.memory_space<vmem>>, vector<1x7x512xf32>
    %633 = vector.shape_cast %632 : vector<1x7x512xf32> to vector<7x512xf32>
    %634 = vector.shape_cast %631 : vector<7x512xf32> to vector<1x7x512xf32>
    tpu.vector_store %arg4[%c2_304, %c0_305, %c0_306], %634 {strides = array<i32>} : memref<7x7x512xf32, #tpu.memory_space<vmem>>, vector<1x7x512xf32>,
    %c9_307 = arith.constant 9 : index
    %c0_308 = arith.constant 0 : index
    %c0_309 = arith.constant 0 : index
    %635 = vector.load %arg1[%c9_307, %c0_308, %c0_309] : memref<18x9x512xf32, #tpu.memory_space<vmem>>, vector<1x9x512xf32>
    %636 = vector.shape_cast %635 : vector<1x9x512xf32> to vector<9x512xf32>
    %c9_310 = arith.constant 9 : index
    %c0_311 = arith.constant 0 : index
    %c0_312 = arith.constant 0 : index
    %637 = vector.load %arg2[%c9_310, %c0_311, %c0_312] : memref<18x9x512xf32, #tpu.memory_space<vmem>>, vector<1x9x512xf32>
    %638 = vector.shape_cast %637 : vector<1x9x512xf32> to vector<9x512xf32>
    %639 = vector.extract_strided_slice %636 {offsets = [0, 0], sizes = [7, 512], strides = [1, 1]} : vector<9x512xf32> to vector<7x512xf32>
    %640 = arith.mulf %639, %546 : vector<7x512xf32>
    %641 = vector.extract_strided_slice %638 {offsets = [0, 0], sizes = [7, 512], strides = [1, 1]} : vector<9x512xf32> to vector<7x512xf32>
    %642 = arith.mulf %641, %550 : vector<7x512xf32>
    %643 = arith.addf %640, %642 : vector<7x512xf32>
    %644 = vector.extract_strided_slice %636 {offsets = [1, 0], sizes = [7, 512], strides = [1, 1]} : vector<9x512xf32> to vector<7x512xf32>
    %645 = arith.mulf %644, %554 : vector<7x512xf32>
    %646 = arith.addf %643, %645 : vector<7x512xf32>
    %647 = vector.extract_strided_slice %638 {offsets = [1, 0], sizes = [7, 512], strides = [1, 1]} : vector<9x512xf32> to vector<7x512xf32>
    %648 = arith.mulf %647, %558 : vector<7x512xf32>
    %649 = arith.addf %646, %648 : vector<7x512xf32>
    %650 = vector.extract_strided_slice %636 {offsets = [2, 0], sizes = [7, 512], strides = [1, 1]} : vector<9x512xf32> to vector<7x512xf32>
    %651 = arith.mulf %650, %562 : vector<7x512xf32>
    %652 = arith.addf %649, %651 : vector<7x512xf32>
    %c3_313 = arith.constant 3 : index
    %c0_314 = arith.constant 0 : index
    %c0_315 = arith.constant 0 : index
    %653 = vector.load %arg4[%c3_313, %c0_314, %c0_315] : memref<7x7x512xf32, #tpu.memory_space<vmem>>, vector<1x7x512xf32>
    %654 = vector.shape_cast %653 : vector<1x7x512xf32> to vector<7x512xf32>
    %655 = arith.addf %654, %652 : vector<7x512xf32>
    %c3_316 = arith.constant 3 : index
    %c0_317 = arith.constant 0 : index
    %c0_318 = arith.constant 0 : index
    %656 = vector.load %arg4[%c3_316, %c0_317, %c0_318] : memref<7x7x512xf32, #tpu.memory_space<vmem>>, vector<1x7x512xf32>
    %657 = vector.shape_cast %656 : vector<1x7x512xf32> to vector<7x512xf32>
    %658 = vector.shape_cast %655 : vector<7x512xf32> to vector<1x7x512xf32>
    tpu.vector_store %arg4[%c3_316, %c0_317, %c0_318], %658 {strides = array<i32>} : memref<7x7x512xf32, #tpu.memory_space<vmem>>, vector<1x7x512xf32>,
    %c11_319 = arith.constant 11 : index
    %c0_320 = arith.constant 0 : index
    %c0_321 = arith.constant 0 : index
    %659 = vector.load %arg1[%c11_319, %c0_320, %c0_321] : memref<18x9x512xf32, #tpu.memory_space<vmem>>, vector<1x9x512xf32>
    %660 = vector.shape_cast %659 : vector<1x9x512xf32> to vector<9x512xf32>
    %c11_322 = arith.constant 11 : index
    %c0_323 = arith.constant 0 : index
    %c0_324 = arith.constant 0 : index
    %661 = vector.load %arg2[%c11_322, %c0_323, %c0_324] : memref<18x9x512xf32, #tpu.memory_space<vmem>>, vector<1x9x512xf32>
    %662 = vector.shape_cast %661 : vector<1x9x512xf32> to vector<9x512xf32>
    %663 = vector.extract_strided_slice %660 {offsets = [0, 0], sizes = [7, 512], strides = [1, 1]} : vector<9x512xf32> to vector<7x512xf32>
    %664 = arith.mulf %663, %546 : vector<7x512xf32>
    %665 = vector.extract_strided_slice %662 {offsets = [0, 0], sizes = [7, 512], strides = [1, 1]} : vector<9x512xf32> to vector<7x512xf32>
    %666 = arith.mulf %665, %550 : vector<7x512xf32>
    %667 = arith.addf %664, %666 : vector<7x512xf32>
    %668 = vector.extract_strided_slice %660 {offsets = [1, 0], sizes = [7, 512], strides = [1, 1]} : vector<9x512xf32> to vector<7x512xf32>
    %669 = arith.mulf %668, %554 : vector<7x512xf32>
    %670 = arith.addf %667, %669 : vector<7x512xf32>
    %671 = vector.extract_strided_slice %662 {offsets = [1, 0], sizes = [7, 512], strides = [1, 1]} : vector<9x512xf32> to vector<7x512xf32>
    %672 = arith.mulf %671, %558 : vector<7x512xf32>
    %673 = arith.addf %670, %672 : vector<7x512xf32>
    %674 = vector.extract_strided_slice %660 {offsets = [2, 0], sizes = [7, 512], strides = [1, 1]} : vector<9x512xf32> to vector<7x512xf32>
    %675 = arith.mulf %674, %562 : vector<7x512xf32>
    %676 = arith.addf %673, %675 : vector<7x512xf32>
    %c4_325 = arith.constant 4 : index
    %c0_326 = arith.constant 0 : index
    %c0_327 = arith.constant 0 : index
    %677 = vector.load %arg4[%c4_325, %c0_326, %c0_327] : memref<7x7x512xf32, #tpu.memory_space<vmem>>, vector<1x7x512xf32>
    %678 = vector.shape_cast %677 : vector<1x7x512xf32> to vector<7x512xf32>
    %679 = arith.addf %678, %676 : vector<7x512xf32>
    %c4_328 = arith.constant 4 : index
    %c0_329 = arith.constant 0 : index
    %c0_330 = arith.constant 0 : index
    %680 = vector.load %arg4[%c4_328, %c0_329, %c0_330] : memref<7x7x512xf32, #tpu.memory_space<vmem>>, vector<1x7x512xf32>
    %681 = vector.shape_cast %680 : vector<1x7x512xf32> to vector<7x512xf32>
    %682 = vector.shape_cast %679 : vector<7x512xf32> to vector<1x7x512xf32>
    tpu.vector_store %arg4[%c4_328, %c0_329, %c0_330], %682 {strides = array<i32>} : memref<7x7x512xf32, #tpu.memory_space<vmem>>, vector<1x7x512xf32>,
    %c13_331 = arith.constant 13 : index
    %c0_332 = arith.constant 0 : index
    %c0_333 = arith.constant 0 : index
    %683 = vector.load %arg1[%c13_331, %c0_332, %c0_333] : memref<18x9x512xf32, #tpu.memory_space<vmem>>, vector<1x9x512xf32>
    %684 = vector.shape_cast %683 : vector<1x9x512xf32> to vector<9x512xf32>
    %c13_334 = arith.constant 13 : index
    %c0_335 = arith.constant 0 : index
    %c0_336 = arith.constant 0 : index
    %685 = vector.load %arg2[%c13_334, %c0_335, %c0_336] : memref<18x9x512xf32, #tpu.memory_space<vmem>>, vector<1x9x512xf32>
    %686 = vector.shape_cast %685 : vector<1x9x512xf32> to vector<9x512xf32>
    %687 = vector.extract_strided_slice %684 {offsets = [0, 0], sizes = [7, 512], strides = [1, 1]} : vector<9x512xf32> to vector<7x512xf32>
    %688 = arith.mulf %687, %546 : vector<7x512xf32>
    %689 = vector.extract_strided_slice %686 {offsets = [0, 0], sizes = [7, 512], strides = [1, 1]} : vector<9x512xf32> to vector<7x512xf32>
    %690 = arith.mulf %689, %550 : vector<7x512xf32>
    %691 = arith.addf %688, %690 : vector<7x512xf32>
    %692 = vector.extract_strided_slice %684 {offsets = [1, 0], sizes = [7, 512], strides = [1, 1]} : vector<9x512xf32> to vector<7x512xf32>
    %693 = arith.mulf %692, %554 : vector<7x512xf32>
    %694 = arith.addf %691, %693 : vector<7x512xf32>
    %695 = vector.extract_strided_slice %686 {offsets = [1, 0], sizes = [7, 512], strides = [1, 1]} : vector<9x512xf32> to vector<7x512xf32>
    %696 = arith.mulf %695, %558 : vector<7x512xf32>
    %697 = arith.addf %694, %696 : vector<7x512xf32>
    %698 = vector.extract_strided_slice %684 {offsets = [2, 0], sizes = [7, 512], strides = [1, 1]} : vector<9x512xf32> to vector<7x512xf32>
    %699 = arith.mulf %698, %562 : vector<7x512xf32>
    %700 = arith.addf %697, %699 : vector<7x512xf32>
    %c5_337 = arith.constant 5 : index
    %c0_338 = arith.constant 0 : index
    %c0_339 = arith.constant 0 : index
    %701 = vector.load %arg4[%c5_337, %c0_338, %c0_339] : memref<7x7x512xf32, #tpu.memory_space<vmem>>, vector<1x7x512xf32>
    %702 = vector.shape_cast %701 : vector<1x7x512xf32> to vector<7x512xf32>
    %703 = arith.addf %702, %700 : vector<7x512xf32>
    %c5_340 = arith.constant 5 : index
    %c0_341 = arith.constant 0 : index
    %c0_342 = arith.constant 0 : index
    %704 = vector.load %arg4[%c5_340, %c0_341, %c0_342] : memref<7x7x512xf32, #tpu.memory_space<vmem>>, vector<1x7x512xf32>
    %705 = vector.shape_cast %704 : vector<1x7x512xf32> to vector<7x512xf32>
    %706 = vector.shape_cast %703 : vector<7x512xf32> to vector<1x7x512xf32>
    tpu.vector_store %arg4[%c5_340, %c0_341, %c0_342], %706 {strides = array<i32>} : memref<7x7x512xf32, #tpu.memory_space<vmem>>, vector<1x7x512xf32>,
    %c15_343 = arith.constant 15 : index
    %c0_344 = arith.constant 0 : index
    %c0_345 = arith.constant 0 : index
    %707 = vector.load %arg1[%c15_343, %c0_344, %c0_345] : memref<18x9x512xf32, #tpu.memory_space<vmem>>, vector<1x9x512xf32>
    %708 = vector.shape_cast %707 : vector<1x9x512xf32> to vector<9x512xf32>
    %c15_346 = arith.constant 15 : index
    %c0_347 = arith.constant 0 : index
    %c0_348 = arith.constant 0 : index
    %709 = vector.load %arg2[%c15_346, %c0_347, %c0_348] : memref<18x9x512xf32, #tpu.memory_space<vmem>>, vector<1x9x512xf32>
    %710 = vector.shape_cast %709 : vector<1x9x512xf32> to vector<9x512xf32>
    %711 = vector.extract_strided_slice %708 {offsets = [0, 0], sizes = [7, 512], strides = [1, 1]} : vector<9x512xf32> to vector<7x512xf32>
    %712 = arith.mulf %711, %546 : vector<7x512xf32>
    %713 = vector.extract_strided_slice %710 {offsets = [0, 0], sizes = [7, 512], strides = [1, 1]} : vector<9x512xf32> to vector<7x512xf32>
    %714 = arith.mulf %713, %550 : vector<7x512xf32>
    %715 = arith.addf %712, %714 : vector<7x512xf32>
    %716 = vector.extract_strided_slice %708 {offsets = [1, 0], sizes = [7, 512], strides = [1, 1]} : vector<9x512xf32> to vector<7x512xf32>
    %717 = arith.mulf %716, %554 : vector<7x512xf32>
    %718 = arith.addf %715, %717 : vector<7x512xf32>
    %719 = vector.extract_strided_slice %710 {offsets = [1, 0], sizes = [7, 512], strides = [1, 1]} : vector<9x512xf32> to vector<7x512xf32>
    %720 = arith.mulf %719, %558 : vector<7x512xf32>
    %721 = arith.addf %718, %720 : vector<7x512xf32>
    %722 = vector.extract_strided_slice %708 {offsets = [2, 0], sizes = [7, 512], strides = [1, 1]} : vector<9x512xf32> to vector<7x512xf32>
    %723 = arith.mulf %722, %562 : vector<7x512xf32>
    %724 = arith.addf %721, %723 : vector<7x512xf32>
    %c6_349 = arith.constant 6 : index
    %c0_350 = arith.constant 0 : index
    %c0_351 = arith.constant 0 : index
    %725 = vector.load %arg4[%c6_349, %c0_350, %c0_351] : memref<7x7x512xf32, #tpu.memory_space<vmem>>, vector<1x7x512xf32>
    %726 = vector.shape_cast %725 : vector<1x7x512xf32> to vector<7x512xf32>
    %727 = arith.addf %726, %724 : vector<7x512xf32>
    %c6_352 = arith.constant 6 : index
    %c0_353 = arith.constant 0 : index
    %c0_354 = arith.constant 0 : index
    %728 = vector.load %arg4[%c6_352, %c0_353, %c0_354] : memref<7x7x512xf32, #tpu.memory_space<vmem>>, vector<1x7x512xf32>
    %729 = vector.shape_cast %728 : vector<1x7x512xf32> to vector<7x512xf32>
    %730 = vector.shape_cast %727 : vector<7x512xf32> to vector<1x7x512xf32>
    tpu.vector_store %arg4[%c6_352, %c0_353, %c0_354], %730 {strides = array<i32>} : memref<7x7x512xf32, #tpu.memory_space<vmem>>, vector<1x7x512xf32>,
    %c20 = arith.constant 20 : index
    %c0_355 = arith.constant 0 : index
    %c0_356 = arith.constant 0 : index
    %731 = vector.load %arg3[%c20, %c0_355, %c0_356] : memref<25x1x512xf32, #tpu.memory_space<vmem>>, vector<1x1x512xf32>
    %732 = vector.shape_cast %731 : vector<1x1x512xf32> to vector<1x512xf32>
    %733 = vector.shape_cast %732 : vector<1x512xf32> to vector<1x512xf32>
    %734 = vector.broadcast %733 : vector<1x512xf32> to vector<7x512xf32>
    %c21 = arith.constant 21 : index
    %c0_357 = arith.constant 0 : index
    %c0_358 = arith.constant 0 : index
    %735 = vector.load %arg3[%c21, %c0_357, %c0_358] : memref<25x1x512xf32, #tpu.memory_space<vmem>>, vector<1x1x512xf32>
    %736 = vector.shape_cast %735 : vector<1x1x512xf32> to vector<1x512xf32>
    %737 = vector.shape_cast %736 : vector<1x512xf32> to vector<1x512xf32>
    %738 = vector.broadcast %737 : vector<1x512xf32> to vector<7x512xf32>
    %c22 = arith.constant 22 : index
    %c0_359 = arith.constant 0 : index
    %c0_360 = arith.constant 0 : index
    %739 = vector.load %arg3[%c22, %c0_359, %c0_360] : memref<25x1x512xf32, #tpu.memory_space<vmem>>, vector<1x1x512xf32>
    %740 = vector.shape_cast %739 : vector<1x1x512xf32> to vector<1x512xf32>
    %741 = vector.shape_cast %740 : vector<1x512xf32> to vector<1x512xf32>
    %742 = vector.broadcast %741 : vector<1x512xf32> to vector<7x512xf32>
    %c23 = arith.constant 23 : index
    %c0_361 = arith.constant 0 : index
    %c0_362 = arith.constant 0 : index
    %743 = vector.load %arg3[%c23, %c0_361, %c0_362] : memref<25x1x512xf32, #tpu.memory_space<vmem>>, vector<1x1x512xf32>
    %744 = vector.shape_cast %743 : vector<1x1x512xf32> to vector<1x512xf32>
    %745 = vector.shape_cast %744 : vector<1x512xf32> to vector<1x512xf32>
    %746 = vector.broadcast %745 : vector<1x512xf32> to vector<7x512xf32>
    %c24 = arith.constant 24 : index
    %c0_363 = arith.constant 0 : index
    %c0_364 = arith.constant 0 : index
    %747 = vector.load %arg3[%c24, %c0_363, %c0_364] : memref<25x1x512xf32, #tpu.memory_space<vmem>>, vector<1x1x512xf32>
    %748 = vector.shape_cast %747 : vector<1x1x512xf32> to vector<1x512xf32>
    %749 = vector.shape_cast %748 : vector<1x512xf32> to vector<1x512xf32>
    %750 = vector.broadcast %749 : vector<1x512xf32> to vector<7x512xf32>
    %c4_365 = arith.constant 4 : index
    %c0_366 = arith.constant 0 : index
    %c0_367 = arith.constant 0 : index
    %751 = vector.load %arg1[%c4_365, %c0_366, %c0_367] : memref<18x9x512xf32, #tpu.memory_space<vmem>>, vector<1x9x512xf32>
    %752 = vector.shape_cast %751 : vector<1x9x512xf32> to vector<9x512xf32>
    %c4_368 = arith.constant 4 : index
    %c0_369 = arith.constant 0 : index
    %c0_370 = arith.constant 0 : index
    %753 = vector.load %arg2[%c4_368, %c0_369, %c0_370] : memref<18x9x512xf32, #tpu.memory_space<vmem>>, vector<1x9x512xf32>
    %754 = vector.shape_cast %753 : vector<1x9x512xf32> to vector<9x512xf32>
    %755 = vector.extract_strided_slice %752 {offsets = [0, 0], sizes = [7, 512], strides = [1, 1]} : vector<9x512xf32> to vector<7x512xf32>
    %756 = arith.mulf %755, %734 : vector<7x512xf32>
    %757 = vector.extract_strided_slice %754 {offsets = [0, 0], sizes = [7, 512], strides = [1, 1]} : vector<9x512xf32> to vector<7x512xf32>
    %758 = arith.mulf %757, %738 : vector<7x512xf32>
    %759 = arith.addf %756, %758 : vector<7x512xf32>
    %760 = vector.extract_strided_slice %752 {offsets = [1, 0], sizes = [7, 512], strides = [1, 1]} : vector<9x512xf32> to vector<7x512xf32>
    %761 = arith.mulf %760, %742 : vector<7x512xf32>
    %762 = arith.addf %759, %761 : vector<7x512xf32>
    %763 = vector.extract_strided_slice %754 {offsets = [1, 0], sizes = [7, 512], strides = [1, 1]} : vector<9x512xf32> to vector<7x512xf32>
    %764 = arith.mulf %763, %746 : vector<7x512xf32>
    %765 = arith.addf %762, %764 : vector<7x512xf32>
    %766 = vector.extract_strided_slice %752 {offsets = [2, 0], sizes = [7, 512], strides = [1, 1]} : vector<9x512xf32> to vector<7x512xf32>
    %767 = arith.mulf %766, %750 : vector<7x512xf32>
    %768 = arith.addf %765, %767 : vector<7x512xf32>
    %c0_371 = arith.constant 0 : index
    %c0_372 = arith.constant 0 : index
    %c0_373 = arith.constant 0 : index
    %769 = vector.load %arg4[%c0_371, %c0_372, %c0_373] : memref<7x7x512xf32, #tpu.memory_space<vmem>>, vector<1x7x512xf32>
    %770 = vector.shape_cast %769 : vector<1x7x512xf32> to vector<7x512xf32>
    %771 = arith.addf %770, %768 : vector<7x512xf32>
    %c0_374 = arith.constant 0 : index
    %c0_375 = arith.constant 0 : index
    %c0_376 = arith.constant 0 : index
    %772 = vector.load %arg4[%c0_374, %c0_375, %c0_376] : memref<7x7x512xf32, #tpu.memory_space<vmem>>, vector<1x7x512xf32>
    %773 = vector.shape_cast %772 : vector<1x7x512xf32> to vector<7x512xf32>
    %774 = vector.shape_cast %771 : vector<7x512xf32> to vector<1x7x512xf32>
    tpu.vector_store %arg4[%c0_374, %c0_375, %c0_376], %774 {strides = array<i32>} : memref<7x7x512xf32, #tpu.memory_space<vmem>>, vector<1x7x512xf32>,
    %c6_377 = arith.constant 6 : index
    %c0_378 = arith.constant 0 : index
    %c0_379 = arith.constant 0 : index
    %775 = vector.load %arg1[%c6_377, %c0_378, %c0_379] : memref<18x9x512xf32, #tpu.memory_space<vmem>>, vector<1x9x512xf32>
    %776 = vector.shape_cast %775 : vector<1x9x512xf32> to vector<9x512xf32>
    %c6_380 = arith.constant 6 : index
    %c0_381 = arith.constant 0 : index
    %c0_382 = arith.constant 0 : index
    %777 = vector.load %arg2[%c6_380, %c0_381, %c0_382] : memref<18x9x512xf32, #tpu.memory_space<vmem>>, vector<1x9x512xf32>
    %778 = vector.shape_cast %777 : vector<1x9x512xf32> to vector<9x512xf32>
    %779 = vector.extract_strided_slice %776 {offsets = [0, 0], sizes = [7, 512], strides = [1, 1]} : vector<9x512xf32> to vector<7x512xf32>
    %780 = arith.mulf %779, %734 : vector<7x512xf32>
    %781 = vector.extract_strided_slice %778 {offsets = [0, 0], sizes = [7, 512], strides = [1, 1]} : vector<9x512xf32> to vector<7x512xf32>
    %782 = arith.mulf %781, %738 : vector<7x512xf32>
    %783 = arith.addf %780, %782 : vector<7x512xf32>
    %784 = vector.extract_strided_slice %776 {offsets = [1, 0], sizes = [7, 512], strides = [1, 1]} : vector<9x512xf32> to vector<7x512xf32>
    %785 = arith.mulf %784, %742 : vector<7x512xf32>
    %786 = arith.addf %783, %785 : vector<7x512xf32>
    %787 = vector.extract_strided_slice %778 {offsets = [1, 0], sizes = [7, 512], strides = [1, 1]} : vector<9x512xf32> to vector<7x512xf32>
    %788 = arith.mulf %787, %746 : vector<7x512xf32>
    %789 = arith.addf %786, %788 : vector<7x512xf32>
    %790 = vector.extract_strided_slice %776 {offsets = [2, 0], sizes = [7, 512], strides = [1, 1]} : vector<9x512xf32> to vector<7x512xf32>
    %791 = arith.mulf %790, %750 : vector<7x512xf32>
    %792 = arith.addf %789, %791 : vector<7x512xf32>
    %c1_383 = arith.constant 1 : index
    %c0_384 = arith.constant 0 : index
    %c0_385 = arith.constant 0 : index
    %793 = vector.load %arg4[%c1_383, %c0_384, %c0_385] : memref<7x7x512xf32, #tpu.memory_space<vmem>>, vector<1x7x512xf32>
    %794 = vector.shape_cast %793 : vector<1x7x512xf32> to vector<7x512xf32>
    %795 = arith.addf %794, %792 : vector<7x512xf32>
    %c1_386 = arith.constant 1 : index
    %c0_387 = arith.constant 0 : index
    %c0_388 = arith.constant 0 : index
    %796 = vector.load %arg4[%c1_386, %c0_387, %c0_388] : memref<7x7x512xf32, #tpu.memory_space<vmem>>, vector<1x7x512xf32>
    %797 = vector.shape_cast %796 : vector<1x7x512xf32> to vector<7x512xf32>
    %798 = vector.shape_cast %795 : vector<7x512xf32> to vector<1x7x512xf32>
    tpu.vector_store %arg4[%c1_386, %c0_387, %c0_388], %798 {strides = array<i32>} : memref<7x7x512xf32, #tpu.memory_space<vmem>>, vector<1x7x512xf32>,
    %c8_389 = arith.constant 8 : index
    %c0_390 = arith.constant 0 : index
    %c0_391 = arith.constant 0 : index
    %799 = vector.load %arg1[%c8_389, %c0_390, %c0_391] : memref<18x9x512xf32, #tpu.memory_space<vmem>>, vector<1x9x512xf32>
    %800 = vector.shape_cast %799 : vector<1x9x512xf32> to vector<9x512xf32>
    %c8_392 = arith.constant 8 : index
    %c0_393 = arith.constant 0 : index
    %c0_394 = arith.constant 0 : index
    %801 = vector.load %arg2[%c8_392, %c0_393, %c0_394] : memref<18x9x512xf32, #tpu.memory_space<vmem>>, vector<1x9x512xf32>
    %802 = vector.shape_cast %801 : vector<1x9x512xf32> to vector<9x512xf32>
    %803 = vector.extract_strided_slice %800 {offsets = [0, 0], sizes = [7, 512], strides = [1, 1]} : vector<9x512xf32> to vector<7x512xf32>
    %804 = arith.mulf %803, %734 : vector<7x512xf32>
    %805 = vector.extract_strided_slice %802 {offsets = [0, 0], sizes = [7, 512], strides = [1, 1]} : vector<9x512xf32> to vector<7x512xf32>
    %806 = arith.mulf %805, %738 : vector<7x512xf32>
    %807 = arith.addf %804, %806 : vector<7x512xf32>
    %808 = vector.extract_strided_slice %800 {offsets = [1, 0], sizes = [7, 512], strides = [1, 1]} : vector<9x512xf32> to vector<7x512xf32>
    %809 = arith.mulf %808, %742 : vector<7x512xf32>
    %810 = arith.addf %807, %809 : vector<7x512xf32>
    %811 = vector.extract_strided_slice %802 {offsets = [1, 0], sizes = [7, 512], strides = [1, 1]} : vector<9x512xf32> to vector<7x512xf32>
    %812 = arith.mulf %811, %746 : vector<7x512xf32>
    %813 = arith.addf %810, %812 : vector<7x512xf32>
    %814 = vector.extract_strided_slice %800 {offsets = [2, 0], sizes = [7, 512], strides = [1, 1]} : vector<9x512xf32> to vector<7x512xf32>
    %815 = arith.mulf %814, %750 : vector<7x512xf32>
    %816 = arith.addf %813, %815 : vector<7x512xf32>
    %c2_395 = arith.constant 2 : index
    %c0_396 = arith.constant 0 : index
    %c0_397 = arith.constant 0 : index
    %817 = vector.load %arg4[%c2_395, %c0_396, %c0_397] : memref<7x7x512xf32, #tpu.memory_space<vmem>>, vector<1x7x512xf32>
    %818 = vector.shape_cast %817 : vector<1x7x512xf32> to vector<7x512xf32>
    %819 = arith.addf %818, %816 : vector<7x512xf32>
    %c2_398 = arith.constant 2 : index
    %c0_399 = arith.constant 0 : index
    %c0_400 = arith.constant 0 : index
    %820 = vector.load %arg4[%c2_398, %c0_399, %c0_400] : memref<7x7x512xf32, #tpu.memory_space<vmem>>, vector<1x7x512xf32>
    %821 = vector.shape_cast %820 : vector<1x7x512xf32> to vector<7x512xf32>
    %822 = vector.shape_cast %819 : vector<7x512xf32> to vector<1x7x512xf32>
    tpu.vector_store %arg4[%c2_398, %c0_399, %c0_400], %822 {strides = array<i32>} : memref<7x7x512xf32, #tpu.memory_space<vmem>>, vector<1x7x512xf32>,
    %c10_401 = arith.constant 10 : index
    %c0_402 = arith.constant 0 : index
    %c0_403 = arith.constant 0 : index
    %823 = vector.load %arg1[%c10_401, %c0_402, %c0_403] : memref<18x9x512xf32, #tpu.memory_space<vmem>>, vector<1x9x512xf32>
    %824 = vector.shape_cast %823 : vector<1x9x512xf32> to vector<9x512xf32>
    %c10_404 = arith.constant 10 : index
    %c0_405 = arith.constant 0 : index
    %c0_406 = arith.constant 0 : index
    %825 = vector.load %arg2[%c10_404, %c0_405, %c0_406] : memref<18x9x512xf32, #tpu.memory_space<vmem>>, vector<1x9x512xf32>
    %826 = vector.shape_cast %825 : vector<1x9x512xf32> to vector<9x512xf32>
    %827 = vector.extract_strided_slice %824 {offsets = [0, 0], sizes = [7, 512], strides = [1, 1]} : vector<9x512xf32> to vector<7x512xf32>
    %828 = arith.mulf %827, %734 : vector<7x512xf32>
    %829 = vector.extract_strided_slice %826 {offsets = [0, 0], sizes = [7, 512], strides = [1, 1]} : vector<9x512xf32> to vector<7x512xf32>
    %830 = arith.mulf %829, %738 : vector<7x512xf32>
    %831 = arith.addf %828, %830 : vector<7x512xf32>
    %832 = vector.extract_strided_slice %824 {offsets = [1, 0], sizes = [7, 512], strides = [1, 1]} : vector<9x512xf32> to vector<7x512xf32>
    %833 = arith.mulf %832, %742 : vector<7x512xf32>
    %834 = arith.addf %831, %833 : vector<7x512xf32>
    %835 = vector.extract_strided_slice %826 {offsets = [1, 0], sizes = [7, 512], strides = [1, 1]} : vector<9x512xf32> to vector<7x512xf32>
    %836 = arith.mulf %835, %746 : vector<7x512xf32>
    %837 = arith.addf %834, %836 : vector<7x512xf32>
    %838 = vector.extract_strided_slice %824 {offsets = [2, 0], sizes = [7, 512], strides = [1, 1]} : vector<9x512xf32> to vector<7x512xf32>
    %839 = arith.mulf %838, %750 : vector<7x512xf32>
    %840 = arith.addf %837, %839 : vector<7x512xf32>
    %c3_407 = arith.constant 3 : index
    %c0_408 = arith.constant 0 : index
    %c0_409 = arith.constant 0 : index
    %841 = vector.load %arg4[%c3_407, %c0_408, %c0_409] : memref<7x7x512xf32, #tpu.memory_space<vmem>>, vector<1x7x512xf32>
    %842 = vector.shape_cast %841 : vector<1x7x512xf32> to vector<7x512xf32>
    %843 = arith.addf %842, %840 : vector<7x512xf32>
    %c3_410 = arith.constant 3 : index
    %c0_411 = arith.constant 0 : index
    %c0_412 = arith.constant 0 : index
    %844 = vector.load %arg4[%c3_410, %c0_411, %c0_412] : memref<7x7x512xf32, #tpu.memory_space<vmem>>, vector<1x7x512xf32>
    %845 = vector.shape_cast %844 : vector<1x7x512xf32> to vector<7x512xf32>
    %846 = vector.shape_cast %843 : vector<7x512xf32> to vector<1x7x512xf32>
    tpu.vector_store %arg4[%c3_410, %c0_411, %c0_412], %846 {strides = array<i32>} : memref<7x7x512xf32, #tpu.memory_space<vmem>>, vector<1x7x512xf32>,
    %c12_413 = arith.constant 12 : index
    %c0_414 = arith.constant 0 : index
    %c0_415 = arith.constant 0 : index
    %847 = vector.load %arg1[%c12_413, %c0_414, %c0_415] : memref<18x9x512xf32, #tpu.memory_space<vmem>>, vector<1x9x512xf32>
    %848 = vector.shape_cast %847 : vector<1x9x512xf32> to vector<9x512xf32>
    %c12_416 = arith.constant 12 : index
    %c0_417 = arith.constant 0 : index
    %c0_418 = arith.constant 0 : index
    %849 = vector.load %arg2[%c12_416, %c0_417, %c0_418] : memref<18x9x512xf32, #tpu.memory_space<vmem>>, vector<1x9x512xf32>
    %850 = vector.shape_cast %849 : vector<1x9x512xf32> to vector<9x512xf32>
    %851 = vector.extract_strided_slice %848 {offsets = [0, 0], sizes = [7, 512], strides = [1, 1]} : vector<9x512xf32> to vector<7x512xf32>
    %852 = arith.mulf %851, %734 : vector<7x512xf32>
    %853 = vector.extract_strided_slice %850 {offsets = [0, 0], sizes = [7, 512], strides = [1, 1]} : vector<9x512xf32> to vector<7x512xf32>
    %854 = arith.mulf %853, %738 : vector<7x512xf32>
    %855 = arith.addf %852, %854 : vector<7x512xf32>
    %856 = vector.extract_strided_slice %848 {offsets = [1, 0], sizes = [7, 512], strides = [1, 1]} : vector<9x512xf32> to vector<7x512xf32>
    %857 = arith.mulf %856, %742 : vector<7x512xf32>
    %858 = arith.addf %855, %857 : vector<7x512xf32>
    %859 = vector.extract_strided_slice %850 {offsets = [1, 0], sizes = [7, 512], strides = [1, 1]} : vector<9x512xf32> to vector<7x512xf32>
    %860 = arith.mulf %859, %746 : vector<7x512xf32>
    %861 = arith.addf %858, %860 : vector<7x512xf32>
    %862 = vector.extract_strided_slice %848 {offsets = [2, 0], sizes = [7, 512], strides = [1, 1]} : vector<9x512xf32> to vector<7x512xf32>
    %863 = arith.mulf %862, %750 : vector<7x512xf32>
    %864 = arith.addf %861, %863 : vector<7x512xf32>
    %c4_419 = arith.constant 4 : index
    %c0_420 = arith.constant 0 : index
    %c0_421 = arith.constant 0 : index
    %865 = vector.load %arg4[%c4_419, %c0_420, %c0_421] : memref<7x7x512xf32, #tpu.memory_space<vmem>>, vector<1x7x512xf32>
    %866 = vector.shape_cast %865 : vector<1x7x512xf32> to vector<7x512xf32>
    %867 = arith.addf %866, %864 : vector<7x512xf32>
    %c4_422 = arith.constant 4 : index
    %c0_423 = arith.constant 0 : index
    %c0_424 = arith.constant 0 : index
    %868 = vector.load %arg4[%c4_422, %c0_423, %c0_424] : memref<7x7x512xf32, #tpu.memory_space<vmem>>, vector<1x7x512xf32>
    %869 = vector.shape_cast %868 : vector<1x7x512xf32> to vector<7x512xf32>
    %870 = vector.shape_cast %867 : vector<7x512xf32> to vector<1x7x512xf32>
    tpu.vector_store %arg4[%c4_422, %c0_423, %c0_424], %870 {strides = array<i32>} : memref<7x7x512xf32, #tpu.memory_space<vmem>>, vector<1x7x512xf32>,
    %c14_425 = arith.constant 14 : index
    %c0_426 = arith.constant 0 : index
    %c0_427 = arith.constant 0 : index
    %871 = vector.load %arg1[%c14_425, %c0_426, %c0_427] : memref<18x9x512xf32, #tpu.memory_space<vmem>>, vector<1x9x512xf32>
    %872 = vector.shape_cast %871 : vector<1x9x512xf32> to vector<9x512xf32>
    %c14_428 = arith.constant 14 : index
    %c0_429 = arith.constant 0 : index
    %c0_430 = arith.constant 0 : index
    %873 = vector.load %arg2[%c14_428, %c0_429, %c0_430] : memref<18x9x512xf32, #tpu.memory_space<vmem>>, vector<1x9x512xf32>
    %874 = vector.shape_cast %873 : vector<1x9x512xf32> to vector<9x512xf32>
    %875 = vector.extract_strided_slice %872 {offsets = [0, 0], sizes = [7, 512], strides = [1, 1]} : vector<9x512xf32> to vector<7x512xf32>
    %876 = arith.mulf %875, %734 : vector<7x512xf32>
    %877 = vector.extract_strided_slice %874 {offsets = [0, 0], sizes = [7, 512], strides = [1, 1]} : vector<9x512xf32> to vector<7x512xf32>
    %878 = arith.mulf %877, %738 : vector<7x512xf32>
    %879 = arith.addf %876, %878 : vector<7x512xf32>
    %880 = vector.extract_strided_slice %872 {offsets = [1, 0], sizes = [7, 512], strides = [1, 1]} : vector<9x512xf32> to vector<7x512xf32>
    %881 = arith.mulf %880, %742 : vector<7x512xf32>
    %882 = arith.addf %879, %881 : vector<7x512xf32>
    %883 = vector.extract_strided_slice %874 {offsets = [1, 0], sizes = [7, 512], strides = [1, 1]} : vector<9x512xf32> to vector<7x512xf32>
    %884 = arith.mulf %883, %746 : vector<7x512xf32>
    %885 = arith.addf %882, %884 : vector<7x512xf32>
    %886 = vector.extract_strided_slice %872 {offsets = [2, 0], sizes = [7, 512], strides = [1, 1]} : vector<9x512xf32> to vector<7x512xf32>
    %887 = arith.mulf %886, %750 : vector<7x512xf32>
    %888 = arith.addf %885, %887 : vector<7x512xf32>
    %c5_431 = arith.constant 5 : index
    %c0_432 = arith.constant 0 : index
    %c0_433 = arith.constant 0 : index
    %889 = vector.load %arg4[%c5_431, %c0_432, %c0_433] : memref<7x7x512xf32, #tpu.memory_space<vmem>>, vector<1x7x512xf32>
    %890 = vector.shape_cast %889 : vector<1x7x512xf32> to vector<7x512xf32>
    %891 = arith.addf %890, %888 : vector<7x512xf32>
    %c5_434 = arith.constant 5 : index
    %c0_435 = arith.constant 0 : index
    %c0_436 = arith.constant 0 : index
    %892 = vector.load %arg4[%c5_434, %c0_435, %c0_436] : memref<7x7x512xf32, #tpu.memory_space<vmem>>, vector<1x7x512xf32>
    %893 = vector.shape_cast %892 : vector<1x7x512xf32> to vector<7x512xf32>
    %894 = vector.shape_cast %891 : vector<7x512xf32> to vector<1x7x512xf32>
    tpu.vector_store %arg4[%c5_434, %c0_435, %c0_436], %894 {strides = array<i32>} : memref<7x7x512xf32, #tpu.memory_space<vmem>>, vector<1x7x512xf32>,
    %c16_437 = arith.constant 16 : index
    %c0_438 = arith.constant 0 : index
    %c0_439 = arith.constant 0 : index
    %895 = vector.load %arg1[%c16_437, %c0_438, %c0_439] : memref<18x9x512xf32, #tpu.memory_space<vmem>>, vector<1x9x512xf32>
    %896 = vector.shape_cast %895 : vector<1x9x512xf32> to vector<9x512xf32>
    %c16_440 = arith.constant 16 : index
    %c0_441 = arith.constant 0 : index
    %c0_442 = arith.constant 0 : index
    %897 = vector.load %arg2[%c16_440, %c0_441, %c0_442] : memref<18x9x512xf32, #tpu.memory_space<vmem>>, vector<1x9x512xf32>
    %898 = vector.shape_cast %897 : vector<1x9x512xf32> to vector<9x512xf32>
    %899 = vector.extract_strided_slice %896 {offsets = [0, 0], sizes = [7, 512], strides = [1, 1]} : vector<9x512xf32> to vector<7x512xf32>
    %900 = arith.mulf %899, %734 : vector<7x512xf32>
    %901 = vector.extract_strided_slice %898 {offsets = [0, 0], sizes = [7, 512], strides = [1, 1]} : vector<9x512xf32> to vector<7x512xf32>
    %902 = arith.mulf %901, %738 : vector<7x512xf32>
    %903 = arith.addf %900, %902 : vector<7x512xf32>
    %904 = vector.extract_strided_slice %896 {offsets = [1, 0], sizes = [7, 512], strides = [1, 1]} : vector<9x512xf32> to vector<7x512xf32>
    %905 = arith.mulf %904, %742 : vector<7x512xf32>
    %906 = arith.addf %903, %905 : vector<7x512xf32>
    %907 = vector.extract_strided_slice %898 {offsets = [1, 0], sizes = [7, 512], strides = [1, 1]} : vector<9x512xf32> to vector<7x512xf32>
    %908 = arith.mulf %907, %746 : vector<7x512xf32>
    %909 = arith.addf %906, %908 : vector<7x512xf32>
    %910 = vector.extract_strided_slice %896 {offsets = [2, 0], sizes = [7, 512], strides = [1, 1]} : vector<9x512xf32> to vector<7x512xf32>
    %911 = arith.mulf %910, %750 : vector<7x512xf32>
    %912 = arith.addf %909, %911 : vector<7x512xf32>
    %c6_443 = arith.constant 6 : index
    %c0_444 = arith.constant 0 : index
    %c0_445 = arith.constant 0 : index
    %913 = vector.load %arg4[%c6_443, %c0_444, %c0_445] : memref<7x7x512xf32, #tpu.memory_space<vmem>>, vector<1x7x512xf32>
    %914 = vector.shape_cast %913 : vector<1x7x512xf32> to vector<7x512xf32>
    %915 = arith.addf %914, %912 : vector<7x512xf32>
    %c6_446 = arith.constant 6 : index
    %c0_447 = arith.constant 0 : index
    %c0_448 = arith.constant 0 : index
    %916 = vector.load %arg4[%c6_446, %c0_447, %c0_448] : memref<7x7x512xf32, #tpu.memory_space<vmem>>, vector<1x7x512xf32>
    %917 = vector.shape_cast %916 : vector<1x7x512xf32> to vector<7x512xf32>
    %918 = vector.shape_cast %915 : vector<7x512xf32> to vector<1x7x512xf32>
    tpu.vector_store %arg4[%c6_446, %c0_447, %c0_448], %918 {strides = array<i32>} : memref<7x7x512xf32, #tpu.memory_space<vmem>>, vector<1x7x512xf32>,
    return
  }
  func.func @transform_0(%arg0: i32) -> (i32, i32, i32) {
    %c0_i32 = arith.constant 0 : i32
    %c0_i32_0 = arith.constant 0 : i32
    %c0_i32_1 = arith.constant 0 : i32
    return %c0_i32, %c0_i32_0, %arg0 : i32, i32, i32
  }
  func.func @transform_1(%arg0: i32) -> (i32, i32, i32) {
    %c0_i32 = arith.constant 0 : i32
    %c0_i32_0 = arith.constant 0 : i32
    %c0_i32_1 = arith.constant 0 : i32
    return %c0_i32, %c0_i32_0, %arg0 : i32, i32, i32
  }
  func.func @transform_2(%arg0: i32) -> (i32, i32, i32) {
    %c0_i32 = arith.constant 0 : i32
    %c0_i32_0 = arith.constant 0 : i32
    %c0_i32_1 = arith.constant 0 : i32
    return %c0_i32, %c0_i32_0, %arg0 : i32, i32, i32
  }
  func.func @transform_3(%arg0: i32) -> (i32, i32, i32) {
    %c0_i32 = arith.constant 0 : i32
    %c0_i32_0 = arith.constant 0 : i32
    %c0_i32_1 = arith.constant 0 : i32
    return %c0_i32, %c0_i32_0, %arg0 : i32, i32, i32
  }
}

</mosaic_0001>

<bundles_post_ra>
// kernel: depthwise_conv2d.1
= control target key start
LH: loop header
LB: loop body
LE: loop exit
PB: predicated region body
PF: predicated region fallthrough
CT: control target
= control target key end

     0   :  { %s6049_s12 = smov 0   ;;  %s6051_s13 = smov 0   ;;  %s8867_s0 = inlined_call_operand.vmem [shape: f32[18,9,1024], index: 0, kind: input, shape index: {}]   ;;  %s8868_s1 = inlined_call_operand.vmem [shape: f32[18,9,1024], index: 1, kind: input, shape index: {}]   ;;  %s8869_s2 = inlined_call_operand.vmem [shape: f32[25,1,1024], index: 2, kind: input, shape index: {}]   ;;  %s8870_s3 = inlined_call_operand.vmem [shape: f32[7,7,1024], index: 3, kind: output, shape index: {}]  }
   0x1   :  { %s6053_s14 = smov 0  }
   0x2 LB: > { %s5310_s15 = sadd.s32 4294967295, %s6027_s14   ;;  %s6066_s16 = sadd.s32 1, %s6027_s14   ;;  %s6027_s14 = sphi %s6053_s14, %s8875_s14   ;;  %s6023_s13 = sphi %s6051_s13, %s8874_s13   ;;  %s6019_s12 = sphi %s6049_s12, %s8873_s12  }
   0x3   : > { %s17_s17 = ssub.s32 %s6027_s14, %s6066_s16  ;;  %s20_s18 = sadd.s32 1, %s6023_s13 }
   0x4   : > { %p18_p0 = scmp.eq.s32.totalorder %s17_s17, 0  ;;  %p27_p1 = scmp.ne.s32.totalorder %s6023_s13, %s6019_s12 }
   0x5   : > { %p28_p2 = scmp.eq.s32.totalorder %s6027_s14, 0  ;;  %p109_p3 = scmp.eq.s32.totalorder %s5310_s15, 1 }
   0x6   : > { %s6077_s19 = scalar_select %p18_p0, %s6023_s13, %s20_s18  }
   0x7   : > { %p6079_p4 = por %p28_p2, %p27_p1  ;;  %p6083_p5 = por %p109_p3, %p27_p1 }
   0x8   : > { %p5313_p6 = scmp.ge.s32.totalorder %s6027_s14, 2 }
   0xa   : > { %131 = sbr.rel (%p5313_p6) target bundleno = 341 (0x155), region = 16 }
   0xf   : > { %134 = sbr.rel (!%p6079_p4) target bundleno = 163 (0xa3), region = 20  ;;  %s136_s22 = sand.u32 (%p6079_p4), 1, %s6023_s13  }
  0x10   : > { %s5972_s23 = sshll.u32 (%p6079_p4), %s6027_s14, 5  ;;  %s5975_s24 = smul.u32 (%p6079_p4), 1152, %s136_s22 }
  0x11   : > { %s6095_s27 = scalar_lea.vmem (%p6079_p4), %s8867_s0, %s5972_s23 }
  0x12   : > { %v154_v0 = vld [vmem:[%s6095_s27] sm:$0xff] (%p6079_p4)  ;;  %v156_v1 = vld [vmem:[%s6095_s27 + $0x8] sm:$0xff] (%p6079_p4)  ;;  %v158_v2 = vld [vmem:[%s6095_s27 + $0x10] sm:$0xff] (%p6079_p4)  ;;  %s6100_s28 = scalar_lea.vmem (%p6079_p4), [#allocation2], %s5975_s24 }
  0x13   : > { %155 = vst [vmem:[%s6100_s28] sm:$0xff] (%p6079_p4), %v154_v0  ;;  %v160_v3 = vld [vmem:[%s6095_s27 + $0x18] sm:$0xff] (%p6079_p4)  ;;  %v162_v4 = vld [vmem:[%s6095_s27 + $0x40] sm:$0xff] (%p6079_p4)  ;;  %v164_v5 = vld [vmem:[%s6095_s27 + $0x48] sm:$0xff] (%p6079_p4) }
  0x14   : > { %157 = vst [vmem:[%s6100_s28 + $0x8] sm:$0xff] %v156_v1  ;;  %v166_v6 = vld [vmem:[%s6095_s27 + $0x50] sm:$0xff]  ;;  %v168_v7 = vld [vmem:[%s6095_s27 + $0x58] sm:$0xff]  ;;  %v170_v8 = vld [vmem:[%s6095_s27 + $0x80] sm:$0xff] }
  0x15   : > { %159 = vst [vmem:[%s6100_s28 + $0x10] sm:$0xff] %v158_v2  ;;  %v172_v9 = vld [vmem:[%s6095_s27 + $0x88] sm:$0xff]  ;;  %v174_v10 = vld [vmem:[%s6095_s27 + $0x90] sm:$0xff]  ;;  %v176_v11 = vld [vmem:[%s6095_s27 + $0x98] sm:$0xff] }
  0x16   : > { %161 = vst [vmem:[%s6100_s28 + $0x18] sm:$0xff] %v160_v3  ;;  %v178_v12 = vld [vmem:[%s6095_s27 + $0xc0] sm:$0xff]  ;;  %v180_v13 = vld [vmem:[%s6095_s27 + $0xc8] sm:$0xff]  ;;  %v182_v14 = vld [vmem:[%s6095_s27 + $0xd0] sm:$0xff] }
  0x17   : > { %163 = vst [vmem:[%s6100_s28 + $0x20] sm:$0xff] %v162_v4  ;;  %v184_v15 = vld [vmem:[%s6095_s27 + $0xd8] sm:$0xff]  ;;  %v186_v16 = vld [vmem:[%s6095_s27 + $0x100] sm:$0xff]  ;;  %v188_v17 = vld [vmem:[%s6095_s27 + $0x108] sm:$0xff] }
  0x18   : > { %165 = vst [vmem:[%s6100_s28 + $0x28] sm:$0xff] %v164_v5  ;;  %v190_v18 = vld [vmem:[%s6095_s27 + $0x110] sm:$0xff]  ;;  %v192_v19 = vld [vmem:[%s6095_s27 + $0x118] sm:$0xff]  ;;  %v194_v20 = vld [vmem:[%s6095_s27 + $0x140] sm:$0xff] }
  0x19   : > { %167 = vst [vmem:[%s6100_s28 + $0x30] sm:$0xff] %v166_v6  ;;  %v196_v21 = vld [vmem:[%s6095_s27 + $0x148] sm:$0xff]  ;;  %v198_v22 = vld [vmem:[%s6095_s27 + $0x150] sm:$0xff]  ;;  %v200_v23 = vld [vmem:[%s6095_s27 + $0x158] sm:$0xff] }
  0x1a   : > { %169 = vst [vmem:[%s6100_s28 + $0x38] sm:$0xff] %v168_v7  ;;  %v202_v24 = vld [vmem:[%s6095_s27 + $0x180] sm:$0xff]  ;;  %v204_v25 = vld [vmem:[%s6095_s27 + $0x188] sm:$0xff]  ;;  %v206_v26 = vld [vmem:[%s6095_s27 + $0x190] sm:$0xff] }
  0x1b   : > { %171 = vst [vmem:[%s6100_s28 + $0x40] sm:$0xff] %v170_v8  ;;  %v208_v27 = vld [vmem:[%s6095_s27 + $0x198] sm:$0xff]  ;;  %v210_v28 = vld [vmem:[%s6095_s27 + $0x1c0] sm:$0xff]  ;;  %v212_v29 = vld [vmem:[%s6095_s27 + $0x1c8] sm:$0xff] }
  0x1c   : > { %173 = vst [vmem:[%s6100_s28 + $0x48] sm:$0xff] %v172_v9  ;;  %v214_v30 = vld [vmem:[%s6095_s27 + $0x1d0] sm:$0xff]  ;;  %v216_v31 = vld [vmem:[%s6095_s27 + $0x1d8] sm:$0xff]  ;;  %v218_v32 = vld [vmem:[%s6095_s27 + $0x200] sm:$0xff] }
  0x1d   : > { %175 = vst [vmem:[%s6100_s28 + $0x50] sm:$0xff] %v174_v10  ;;  %v220_v33 = vld [vmem:[%s6095_s27 + $0x208] sm:$0xff]  ;;  %v222_v34 = vld [vmem:[%s6095_s27 + $0x210] sm:$0xff]  ;;  %v224_v35 = vld [vmem:[%s6095_s27 + $0x218] sm:$0xff] }
  0x1e   : > { %177 = vst [vmem:[%s6100_s28 + $0x58] sm:$0xff] %v176_v11  ;;  %v226_v36 = vld [vmem:[%s6095_s27 + $0x240] sm:$0xff]  ;;  %v228_v37 = vld [vmem:[%s6095_s27 + $0x248] sm:$0xff]  ;;  %v230_v38 = vld [vmem:[%s6095_s27 + $0x250] sm:$0xff] }
  0x1f   : > { %179 = vst [vmem:[%s6100_s28 + $0x60] sm:$0xff] %v178_v12  ;;  %v232_v39 = vld [vmem:[%s6095_s27 + $0x258] sm:$0xff]  ;;  %v234_v40 = vld [vmem:[%s6095_s27 + $0x280] sm:$0xff]  ;;  %v236_v41 = vld [vmem:[%s6095_s27 + $0x288] sm:$0xff] }
  0x20   : > { %181 = vst [vmem:[%s6100_s28 + $0x68] sm:$0xff] %v180_v13  ;;  %v238_v42 = vld [vmem:[%s6095_s27 + $0x290] sm:$0xff]  ;;  %v240_v43 = vld [vmem:[%s6095_s27 + $0x298] sm:$0xff]  ;;  %v242_v44 = vld [vmem:[%s6095_s27 + $0x2c0] sm:$0xff] }
  0x21   : > { %183 = vst [vmem:[%s6100_s28 + $0x70] sm:$0xff] %v182_v14  ;;  %v244_v45 = vld [vmem:[%s6095_s27 + $0x2c8] sm:$0xff]  ;;  %v246_v46 = vld [vmem:[%s6095_s27 + $0x2d0] sm:$0xff]  ;;  %v248_v47 = vld [vmem:[%s6095_s27 + $0x2d8] sm:$0xff] }
  0x22   : > { %185 = vst [vmem:[%s6100_s28 + $0x78] sm:$0xff] %v184_v15  ;;  %v250_v48 = vld [vmem:[%s6095_s27 + $0x300] sm:$0xff]  ;;  %v252_v49 = vld [vmem:[%s6095_s27 + $0x308] sm:$0xff]  ;;  %v254_v50 = vld [vmem:[%s6095_s27 + $0x310] sm:$0xff] }
  0x23   : > { %187 = vst [vmem:[%s6100_s28 + $0x80] sm:$0xff] %v186_v16  ;;  %v256_v51 = vld [vmem:[%s6095_s27 + $0x318] sm:$0xff]  ;;  %v258_v52 = vld [vmem:[%s6095_s27 + $0x340] sm:$0xff]  ;;  %v260_v53 = vld [vmem:[%s6095_s27 + $0x348] sm:$0xff] }
  0x24   : > { %189 = vst [vmem:[%s6100_s28 + $0x88] sm:$0xff] %v188_v17  ;;  %v262_v54 = vld [vmem:[%s6095_s27 + $0x350] sm:$0xff]  ;;  %v264_v55 = vld [vmem:[%s6095_s27 + $0x358] sm:$0xff]  ;;  %v266_v56 = vld [vmem:[%s6095_s27 + $0x380] sm:$0xff] }
  0x25   : > { %191 = vst [vmem:[%s6100_s28 + $0x90] sm:$0xff] %v190_v18  ;;  %v268_v57 = vld [vmem:[%s6095_s27 + $0x388] sm:$0xff]  ;;  %v270_v58 = vld [vmem:[%s6095_s27 + $0x390] sm:$0xff]  ;;  %v272_v59 = vld [vmem:[%s6095_s27 + $0x398] sm:$0xff] }
  0x26   : > { %193 = vst [vmem:[%s6100_s28 + $0x98] sm:$0xff] %v192_v19  ;;  %v274_v60 = vld [vmem:[%s6095_s27 + $0x3c0] sm:$0xff]  ;;  %v276_v61 = vld [vmem:[%s6095_s27 + $0x3c8] sm:$0xff]  ;;  %v278_v62 = vld [vmem:[%s6095_s27 + $0x3d0] sm:$0xff] }
  0x27   : > { %195 = vst [vmem:[%s6100_s28 + $0xa0] sm:$0xff] %v194_v20  ;;  %v280_v63 = vld [vmem:[%s6095_s27 + $0x3d8] sm:$0xff]  ;;  %v282_v0 = vld [vmem:[%s6095_s27 + $0x400] sm:$0xff]  ;;  %v284_v1 = vld [vmem:[%s6095_s27 + $0x408] sm:$0xff] }
  0x28   : > { %197 = vst [vmem:[%s6100_s28 + $0xa8] sm:$0xff] %v196_v21  ;;  %v286_v2 = vld [vmem:[%s6095_s27 + $0x410] sm:$0xff]  ;;  %v288_v3 = vld [vmem:[%s6095_s27 + $0x418] sm:$0xff]  ;;  %v290_v4 = vld [vmem:[%s6095_s27 + $0x440] sm:$0xff] }
  0x29   : > { %199 = vst [vmem:[%s6100_s28 + $0xb0] sm:$0xff] %v198_v22  ;;  %v292_v5 = vld [vmem:[%s6095_s27 + $0x448] sm:$0xff]  ;;  %v294_v6 = vld [vmem:[%s6095_s27 + $0x450] sm:$0xff]  ;;  %v296_v7 = vld [vmem:[%s6095_s27 + $0x458] sm:$0xff] }
  0x2a   : > { %201 = vst [vmem:[%s6100_s28 + $0xb8] sm:$0xff] %v200_v23  ;;  %v298_v8 = vld [vmem:[%s6095_s27 + $0x480] sm:$0xff]  ;;  %v300_v9 = vld [vmem:[%s6095_s27 + $0x488] sm:$0xff]  ;;  %v302_v10 = vld [vmem:[%s6095_s27 + $0x490] sm:$0xff] }
  0x2b   : > { %203 = vst [vmem:[%s6100_s28 + $0xc0] sm:$0xff] %v202_v24  ;;  %v304_v11 = vld [vmem:[%s6095_s27 + $0x498] sm:$0xff]  ;;  %v306_v12 = vld [vmem:[%s6095_s27 + $0x4c0] sm:$0xff]  ;;  %v308_v13 = vld [vmem:[%s6095_s27 + $0x4c8] sm:$0xff] }
  0x2c   : > { %205 = vst [vmem:[%s6100_s28 + $0xc8] sm:$0xff] %v204_v25  ;;  %v310_v14 = vld [vmem:[%s6095_s27 + $0x4d0] sm:$0xff]  ;;  %v312_v15 = vld [vmem:[%s6095_s27 + $0x4d8] sm:$0xff]  ;;  %v314_v16 = vld [vmem:[%s6095_s27 + $0x500] sm:$0xff] }
  0x2d   : > { %207 = vst [vmem:[%s6100_s28 + $0xd0] sm:$0xff] %v206_v26  ;;  %v316_v17 = vld [vmem:[%s6095_s27 + $0x508] sm:$0xff]  ;;  %v318_v18 = vld [vmem:[%s6095_s27 + $0x510] sm:$0xff]  ;;  %v320_v19 = vld [vmem:[%s6095_s27 + $0x518] sm:$0xff] }
  0x2e   : > { %209 = vst [vmem:[%s6100_s28 + $0xd8] sm:$0xff] %v208_v27  ;;  %v322_v20 = vld [vmem:[%s6095_s27 + $0x540] sm:$0xff]  ;;  %v324_v21 = vld [vmem:[%s6095_s27 + $0x548] sm:$0xff]  ;;  %v326_v22 = vld [vmem:[%s6095_s27 + $0x550] sm:$0xff] }
  0x2f   : > { %211 = vst [vmem:[%s6100_s28 + $0xe0] sm:$0xff] %v210_v28  ;;  %v328_v23 = vld [vmem:[%s6095_s27 + $0x558] sm:$0xff]  ;;  %v330_v24 = vld [vmem:[%s6095_s27 + $0x580] sm:$0xff]  ;;  %v332_v25 = vld [vmem:[%s6095_s27 + $0x588] sm:$0xff] }
  0x30   : > { %213 = vst [vmem:[%s6100_s28 + $0xe8] sm:$0xff] %v212_v29  ;;  %v334_v26 = vld [vmem:[%s6095_s27 + $0x590] sm:$0xff]  ;;  %v336_v27 = vld [vmem:[%s6095_s27 + $0x598] sm:$0xff]  ;;  %v338_v28 = vld [vmem:[%s6095_s27 + $0x5c0] sm:$0xff] }
  0x31   : > { %215 = vst [vmem:[%s6100_s28 + $0xf0] sm:$0xff] %v214_v30  ;;  %v340_v29 = vld [vmem:[%s6095_s27 + $0x5c8] sm:$0xff]  ;;  %v342_v30 = vld [vmem:[%s6095_s27 + $0x5d0] sm:$0xff] }
  0x32   : > { %217 = vst [vmem:[%s6100_s28 + $0xf8] sm:$0xff] %v216_v31  ;;  %v344_v31 = vld [vmem:[%s6095_s27 + $0x5d8] sm:$0xff] }
  0x33   : > { %219 = vst [vmem:[%s6100_s28 + $0x100] sm:$0xff] %v218_v32  ;;  %v346_v32 = vld [vmem:[%s6095_s27 + $0x600] sm:$0xff] }
  0x34   : > { %221 = vst [vmem:[%s6100_s28 + $0x108] sm:$0xff] %v220_v33  ;;  %v348_v33 = vld [vmem:[%s6095_s27 + $0x608] sm:$0xff] }
  0x35   : > { %223 = vst [vmem:[%s6100_s28 + $0x110] sm:$0xff] %v222_v34  ;;  %v350_v34 = vld [vmem:[%s6095_s27 + $0x610] sm:$0xff] }
  0x36   : > { %225 = vst [vmem:[%s6100_s28 + $0x118] sm:$0xff] %v224_v35  ;;  %v352_v35 = vld [vmem:[%s6095_s27 + $0x618] sm:$0xff] }
  0x37   : > { %227 = vst [vmem:[%s6100_s28 + $0x120] sm:$0xff] %v226_v36  ;;  %v354_v36 = vld [vmem:[%s6095_s27 + $0x640] sm:$0xff] }
  0x38   : > { %229 = vst [vmem:[%s6100_s28 + $0x128] sm:$0xff] %v228_v37  ;;  %v356_v37 = vld [vmem:[%s6095_s27 + $0x648] sm:$0xff] }
  0x39   : > { %231 = vst [vmem:[%s6100_s28 + $0x130] sm:$0xff] %v230_v38  ;;  %v358_v38 = vld [vmem:[%s6095_s27 + $0x650] sm:$0xff] }
  0x3a   : > { %233 = vst [vmem:[%s6100_s28 + $0x138] sm:$0xff] %v232_v39  ;;  %v360_v39 = vld [vmem:[%s6095_s27 + $0x658] sm:$0xff] }
  0x3b   : > { %235 = vst [vmem:[%s6100_s28 + $0x140] sm:$0xff] %v234_v40  ;;  %v362_v40 = vld [vmem:[%s6095_s27 + $0x680] sm:$0xff] }
  0x3c   : > { %237 = vst [vmem:[%s6100_s28 + $0x148] sm:$0xff] %v236_v41  ;;  %v364_v41 = vld [vmem:[%s6095_s27 + $0x688] sm:$0xff] }
  0x3d   : > { %239 = vst [vmem:[%s6100_s28 + $0x150] sm:$0xff] %v238_v42  ;;  %v366_v42 = vld [vmem:[%s6095_s27 + $0x690] sm:$0xff] }
  0x3e   : > { %241 = vst [vmem:[%s6100_s28 + $0x158] sm:$0xff] %v240_v43  ;;  %v368_v43 = vld [vmem:[%s6095_s27 + $0x698] sm:$0xff] }
  0x3f   : > { %243 = vst [vmem:[%s6100_s28 + $0x160] sm:$0xff] %v242_v44  ;;  %v370_v44 = vld [vmem:[%s6095_s27 + $0x6c0] sm:$0xff] }
  0x40   : > { %245 = vst [vmem:[%s6100_s28 + $0x168] sm:$0xff] %v244_v45  ;;  %v372_v45 = vld [vmem:[%s6095_s27 + $0x6c8] sm:$0xff] }
  0x41   : > { %247 = vst [vmem:[%s6100_s28 + $0x170] sm:$0xff] %v246_v46  ;;  %v374_v46 = vld [vmem:[%s6095_s27 + $0x6d0] sm:$0xff] }
  0x42   : > { %249 = vst [vmem:[%s6100_s28 + $0x178] sm:$0xff] %v248_v47  ;;  %v376_v47 = vld [vmem:[%s6095_s27 + $0x6d8] sm:$0xff] }
  0x43   : > { %251 = vst [vmem:[%s6100_s28 + $0x180] sm:$0xff] %v250_v48  ;;  %v378_v48 = vld [vmem:[%s6095_s27 + $0x700] sm:$0xff] }
  0x44   : > { %253 = vst [vmem:[%s6100_s28 + $0x188] sm:$0xff] %v252_v49  ;;  %v380_v49 = vld [vmem:[%s6095_s27 + $0x708] sm:$0xff] }
  0x45   : > { %255 = vst [vmem:[%s6100_s28 + $0x190] sm:$0xff] %v254_v50  ;;  %v382_v50 = vld [vmem:[%s6095_s27 + $0x710] sm:$0xff] }
  0x46   : > { %257 = vst [vmem:[%s6100_s28 + $0x198] sm:$0xff] %v256_v51  ;;  %v384_v51 = vld [vmem:[%s6095_s27 + $0x718] sm:$0xff] }
  0x47   : > { %259 = vst [vmem:[%s6100_s28 + $0x1a0] sm:$0xff] %v258_v52  ;;  %v386_v52 = vld [vmem:[%s6095_s27 + $0x740] sm:$0xff] }
  0x48   : > { %261 = vst [vmem:[%s6100_s28 + $0x1a8] sm:$0xff] %v260_v53  ;;  %v388_v53 = vld [vmem:[%s6095_s27 + $0x748] sm:$0xff] }
  0x49   : > { %263 = vst [vmem:[%s6100_s28 + $0x1b0] sm:$0xff] %v262_v54  ;;  %v390_v54 = vld [vmem:[%s6095_s27 + $0x750] sm:$0xff] }
  0x4a   : > { %265 = vst [vmem:[%s6100_s28 + $0x1b8] sm:$0xff] %v264_v55  ;;  %v392_v55 = vld [vmem:[%s6095_s27 + $0x758] sm:$0xff] }
  0x4b   : > { %267 = vst [vmem:[%s6100_s28 + $0x1c0] sm:$0xff] %v266_v56  ;;  %v394_v56 = vld [vmem:[%s6095_s27 + $0x780] sm:$0xff] }
  0x4c   : > { %269 = vst [vmem:[%s6100_s28 + $0x1c8] sm:$0xff] %v268_v57  ;;  %v396_v57 = vld [vmem:[%s6095_s27 + $0x788] sm:$0xff] }
  0x4d   : > { %271 = vst [vmem:[%s6100_s28 + $0x1d0] sm:$0xff] %v270_v58  ;;  %v398_v58 = vld [vmem:[%s6095_s27 + $0x790] sm:$0xff] }
  0x4e   : > { %273 = vst [vmem:[%s6100_s28 + $0x1d8] sm:$0xff] %v272_v59  ;;  %v400_v59 = vld [vmem:[%s6095_s27 + $0x798] sm:$0xff] }
  0x4f   : > { %275 = vst [vmem:[%s6100_s28 + $0x1e0] sm:$0xff] %v274_v60  ;;  %v402_v60 = vld [vmem:[%s6095_s27 + $0x7c0] sm:$0xff] }
  0x50   : > { %277 = vst [vmem:[%s6100_s28 + $0x1e8] sm:$0xff] %v276_v61  ;;  %v404_v61 = vld [vmem:[%s6095_s27 + $0x7c8] sm:$0xff] }
  0x51   : > { %279 = vst [vmem:[%s6100_s28 + $0x1f0] sm:$0xff] %v278_v62  ;;  %v406_v62 = vld [vmem:[%s6095_s27 + $0x7d0] sm:$0xff] }
  0x52   : > { %281 = vst [vmem:[%s6100_s28 + $0x1f8] sm:$0xff] %v280_v63  ;;  %v408_v63 = vld [vmem:[%s6095_s27 + $0x7d8] sm:$0xff] }
  0x53   : > { %283 = vst [vmem:[%s6100_s28 + $0x200] sm:$0xff] %v282_v0  ;;  %v410_v0 = vld [vmem:[%s6095_s27 + $0x800] sm:$0xff] }
  0x54   : > { %285 = vst [vmem:[%s6100_s28 + $0x208] sm:$0xff] %v284_v1  ;;  %v412_v1 = vld [vmem:[%s6095_s27 + $0x808] sm:$0xff] }
  0x55   : > { %287 = vst [vmem:[%s6100_s28 + $0x210] sm:$0xff] %v286_v2  ;;  %v414_v2 = vld [vmem:[%s6095_s27 + $0x810] sm:$0xff] }
  0x56   : > { %289 = vst [vmem:[%s6100_s28 + $0x218] sm:$0xff] %v288_v3  ;;  %v416_v3 = vld [vmem:[%s6095_s27 + $0x818] sm:$0xff] }
  0x57   : > { %291 = vst [vmem:[%s6100_s28 + $0x220] sm:$0xff] %v290_v4  ;;  %v418_v4 = vld [vmem:[%s6095_s27 + $0x840] sm:$0xff] }
  0x58   : > { %293 = vst [vmem:[%s6100_s28 + $0x228] sm:$0xff] %v292_v5  ;;  %v420_v5 = vld [vmem:[%s6095_s27 + $0x848] sm:$0xff] }
  0x59   : > { %295 = vst [vmem:[%s6100_s28 + $0x230] sm:$0xff] %v294_v6  ;;  %v422_v6 = vld [vmem:[%s6095_s27 + $0x850] sm:$0xff] }
  0x5a   : > { %297 = vst [vmem:[%s6100_s28 + $0x238] sm:$0xff] %v296_v7  ;;  %v424_v7 = vld [vmem:[%s6095_s27 + $0x858] sm:$0xff] }
  0x5b   : > { %299 = vst [vmem:[%s6100_s28 + $0x240] sm:$0xff] %v298_v8  ;;  %v426_v8 = vld [vmem:[%s6095_s27 + $0x880] sm:$0xff] }
  0x5c   : > { %301 = vst [vmem:[%s6100_s28 + $0x248] sm:$0xff] %v300_v9  ;;  %v428_v9 = vld [vmem:[%s6095_s27 + $0x888] sm:$0xff] }
  0x5d   : > { %303 = vst [vmem:[%s6100_s28 + $0x250] sm:$0xff] %v302_v10  ;;  %v430_v10 = vld [vmem:[%s6095_s27 + $0x890] sm:$0xff] }
  0x5e   : > { %305 = vst [vmem:[%s6100_s28 + $0x258] sm:$0xff] %v304_v11  ;;  %v432_v11 = vld [vmem:[%s6095_s27 + $0x898] sm:$0xff] }
  0x5f   : > { %307 = vst [vmem:[%s6100_s28 + $0x260] sm:$0xff] %v306_v12  ;;  %v434_v12 = vld [vmem:[%s6095_s27 + $0x8c0] sm:$0xff] }
  0x60   : > { %309 = vst [vmem:[%s6100_s28 + $0x268] sm:$0xff] %v308_v13  ;;  %v436_v13 = vld [vmem:[%s6095_s27 + $0x8c8] sm:$0xff] }
  0x61   : > { %311 = vst [vmem:[%s6100_s28 + $0x270] sm:$0xff] %v310_v14  ;;  %v438_v14 = vld [vmem:[%s6095_s27 + $0x8d0] sm:$0xff] }
  0x62   : > { %313 = vst [vmem:[%s6100_s28 + $0x278] sm:$0xff] %v312_v15  ;;  %v440_v15 = vld [vmem:[%s6095_s27 + $0x8d8] sm:$0xff] }
  0x63   : > { %315 = vst [vmem:[%s6100_s28 + $0x280] sm:$0xff] %v314_v16 }
  0x64   : > { %317 = vst [vmem:[%s6100_s28 + $0x288] sm:$0xff] %v316_v17 }
  0x65   : > { %319 = vst [vmem:[%s6100_s28 + $0x290] sm:$0xff] %v318_v18 }
  0x66   : > { %321 = vst [vmem:[%s6100_s28 + $0x298] sm:$0xff] %v320_v19 }
  0x67   : > { %323 = vst [vmem:[%s6100_s28 + $0x2a0] sm:$0xff] %v322_v20 }
  0x68   : > { %325 = vst [vmem:[%s6100_s28 + $0x2a8] sm:$0xff] %v324_v21 }
  0x69   : > { %327 = vst [vmem:[%s6100_s28 + $0x2b0] sm:$0xff] %v326_v22 }
  0x6a   : > { %329 = vst [vmem:[%s6100_s28 + $0x2b8] sm:$0xff] %v328_v23 }
  0x6b   : > { %331 = vst [vmem:[%s6100_s28 + $0x2c0] sm:$0xff] %v330_v24 }
  0x6c   : > { %333 = vst [vmem:[%s6100_s28 + $0x2c8] sm:$0xff] %v332_v25 }
  0x6d   : > { %335 = vst [vmem:[%s6100_s28 + $0x2d0] sm:$0xff] %v334_v26 }
  0x6e   : > { %337 = vst [vmem:[%s6100_s28 + $0x2d8] sm:$0xff] %v336_v27 }
  0x6f   : > { %339 = vst [vmem:[%s6100_s28 + $0x2e0] sm:$0xff] %v338_v28 }
  0x70   : > { %341 = vst [vmem:[%s6100_s28 + $0x2e8] sm:$0xff] %v340_v29 }
  0x71   : > { %343 = vst [vmem:[%s6100_s28 + $0x2f0] sm:$0xff] %v342_v30 }
  0x72   : > { %345 = vst [vmem:[%s6100_s28 + $0x2f8] sm:$0xff] %v344_v31 }
  0x73   : > { %347 = vst [vmem:[%s6100_s28 + $0x300] sm:$0xff] %v346_v32 }
  0x74   : > { %349 = vst [vmem:[%s6100_s28 + $0x308] sm:$0xff] %v348_v33 }
  0x75   : > { %351 = vst [vmem:[%s6100_s28 + $0x310] sm:$0xff] %v350_v34 }
  0x76   : > { %353 = vst [vmem:[%s6100_s28 + $0x318] sm:$0xff] %v352_v35 }
  0x77   : > { %355 = vst [vmem:[%s6100_s28 + $0x320] sm:$0xff] %v354_v36 }
  0x78   : > { %357 = vst [vmem:[%s6100_s28 + $0x328] sm:$0xff] %v356_v37 }
  0x79   : > { %359 = vst [vmem:[%s6100_s28 + $0x330] sm:$0xff] %v358_v38 }
  0x7a   : > { %361 = vst [vmem:[%s6100_s28 + $0x338] sm:$0xff] %v360_v39 }
  0x7b   : > { %363 = vst [vmem:[%s6100_s28 + $0x340] sm:$0xff] %v362_v40 }
  0x7c   : > { %365 = vst [vmem:[%s6100_s28 + $0x348] sm:$0xff] %v364_v41 }
  0x7d   : > { %367 = vst [vmem:[%s6100_s28 + $0x350] sm:$0xff] %v366_v42 }
  0x7e   : > { %369 = vst [vmem:[%s6100_s28 + $0x358] sm:$0xff] %v368_v43 }
  0x7f   : > { %371 = vst [vmem:[%s6100_s28 + $0x360] sm:$0xff] %v370_v44 }
  0x80   : > { %373 = vst [vmem:[%s6100_s28 + $0x368] sm:$0xff] %v372_v45 }
  0x81   : > { %375 = vst [vmem:[%s6100_s28 + $0x370] sm:$0xff] %v374_v46 }
  0x82   : > { %377 = vst [vmem:[%s6100_s28 + $0x378] sm:$0xff] %v376_v47 }
  0x83   : > { %379 = vst [vmem:[%s6100_s28 + $0x380] sm:$0xff] %v378_v48 }
  0x84   : > { %381 = vst [vmem:[%s6100_s28 + $0x388] sm:$0xff] %v380_v49 }
  0x85   : > { %383 = vst [vmem:[%s6100_s28 + $0x390] sm:$0xff] %v382_v50 }
  0x86   : > { %385 = vst [vmem:[%s6100_s28 + $0x398] sm:$0xff] %v384_v51 }
  0x87   : > { %387 = vst [vmem:[%s6100_s28 + $0x3a0] sm:$0xff] %v386_v52 }
  0x88   : > { %389 = vst [vmem:[%s6100_s28 + $0x3a8] sm:$0xff] %v388_v53 }
  0x89   : > { %391 = vst [vmem:[%s6100_s28 + $0x3b0] sm:$0xff] %v390_v54 }
  0x8a   : > { %393 = vst [vmem:[%s6100_s28 + $0x3b8] sm:$0xff] %v392_v55 }
  0x8b   : > { %395 = vst [vmem:[%s6100_s28 + $0x3c0] sm:$0xff] %v394_v56 }
  0x8c   : > { %397 = vst [vmem:[%s6100_s28 + $0x3c8] sm:$0xff] %v396_v57 }
  0x8d   : > { %399 = vst [vmem:[%s6100_s28 + $0x3d0] sm:$0xff] %v398_v58 }
  0x8e   : > { %401 = vst [vmem:[%s6100_s28 + $0x3d8] sm:$0xff] %v400_v59 }
  0x8f   : > { %403 = vst [vmem:[%s6100_s28 + $0x3e0] sm:$0xff] %v402_v60 }
  0x90   : > { %405 = vst [vmem:[%s6100_s28 + $0x3e8] sm:$0xff] %v404_v61 }
  0x91   : > { %407 = vst [vmem:[%s6100_s28 + $0x3f0] sm:$0xff] %v406_v62 }
  0x92   : > { %409 = vst [vmem:[%s6100_s28 + $0x3f8] sm:$0xff] %v408_v63 }
  0x93   : > { %411 = vst [vmem:[%s6100_s28 + $0x400] sm:$0xff] %v410_v0 }
  0x94   : > { %413 = vst [vmem:[%s6100_s28 + $0x408] sm:$0xff] %v412_v1 }
  0x95   : > { %415 = vst [vmem:[%s6100_s28 + $0x410] sm:$0xff] %v414_v2 }
  0x96   : > { %417 = vst [vmem:[%s6100_s28 + $0x418] sm:$0xff] %v416_v3 }
  0x97   : > { %419 = vst [vmem:[%s6100_s28 + $0x420] sm:$0xff] %v418_v4 }
  0x98   : > { %421 = vst [vmem:[%s6100_s28 + $0x428] sm:$0xff] %v420_v5 }
  0x99   : > { %423 = vst [vmem:[%s6100_s28 + $0x430] sm:$0xff] %v422_v6 }
  0x9a   : > { %425 = vst [vmem:[%s6100_s28 + $0x438] sm:$0xff] %v424_v7 }
  0x9b   : > { %427 = vst [vmem:[%s6100_s28 + $0x440] sm:$0xff] %v426_v8 }
  0x9c   : > { %429 = vst [vmem:[%s6100_s28 + $0x448] sm:$0xff] %v428_v9 }
  0x9d   : > { %431 = vst [vmem:[%s6100_s28 + $0x450] sm:$0xff] %v430_v10 }
  0x9e   : > { %433 = vst [vmem:[%s6100_s28 + $0x458] sm:$0xff] %v432_v11 }
  0x9f   : > { %435 = vst [vmem:[%s6100_s28 + $0x460] sm:$0xff] %v434_v12 }
  0xa0   : > { %437 = vst [vmem:[%s6100_s28 + $0x468] sm:$0xff] %v436_v13 }
  0xa1   : > { %439 = vst [vmem:[%s6100_s28 + $0x470] sm:$0xff] %v438_v14 }
  0xa2   : > { %441 = vst [vmem:[%s6100_s28 + $0x478] sm:$0xff] %v440_v15 }
  0xa3 PF: > { %447 = sbr.rel (!%p6079_p4) target bundleno = 311 (0x137), region = 43  ;;  %s449_s29 = sand.u32 (%p6079_p4), 1, %s6023_s13  }
  0xa4   : > { %s5973_s30 = sshll.u32 (%p6079_p4), %s6027_s14, 5  ;;  %s5976_s4 = smul.u32 (%p6079_p4), 1152, %s449_s29 }
  0xa5   : > { %s6394_s7 = scalar_lea.vmem (%p6079_p4), %s8868_s1, %s5973_s30 }
  0xa6   : > { %v467_v16 = vld [vmem:[%s6394_s7] sm:$0xff] (%p6079_p4)  ;;  %v469_v17 = vld [vmem:[%s6394_s7 + $0x8] sm:$0xff] (%p6079_p4)  ;;  %v471_v18 = vld [vmem:[%s6394_s7 + $0x10] sm:$0xff] (%p6079_p4)  ;;  %s6399_s8 = scalar_lea.vmem (%p6079_p4), [#allocation3], %s5976_s4 }
  0xa7   : > { %468 = vst [vmem:[%s6399_s8] sm:$0xff] (%p6079_p4), %v467_v16  ;;  %v473_v19 = vld [vmem:[%s6394_s7 + $0x18] sm:$0xff] (%p6079_p4)  ;;  %v475_v20 = vld [vmem:[%s6394_s7 + $0x40] sm:$0xff] (%p6079_p4)  ;;  %v477_v21 = vld [vmem:[%s6394_s7 + $0x48] sm:$0xff] (%p6079_p4) }
  0xa8   : > { %470 = vst [vmem:[%s6399_s8 + $0x8] sm:$0xff] %v469_v17  ;;  %v479_v22 = vld [vmem:[%s6394_s7 + $0x50] sm:$0xff]  ;;  %v481_v23 = vld [vmem:[%s6394_s7 + $0x58] sm:$0xff]  ;;  %v483_v24 = vld [vmem:[%s6394_s7 + $0x80] sm:$0xff] }
  0xa9   : > { %472 = vst [vmem:[%s6399_s8 + $0x10] sm:$0xff] %v471_v18  ;;  %v485_v25 = vld [vmem:[%s6394_s7 + $0x88] sm:$0xff]  ;;  %v487_v26 = vld [vmem:[%s6394_s7 + $0x90] sm:$0xff]  ;;  %v489_v27 = vld [vmem:[%s6394_s7 + $0x98] sm:$0xff] }
  0xaa   : > { %474 = vst [vmem:[%s6399_s8 + $0x18] sm:$0xff] %v473_v19  ;;  %v491_v28 = vld [vmem:[%s6394_s7 + $0xc0] sm:$0xff]  ;;  %v493_v29 = vld [vmem:[%s6394_s7 + $0xc8] sm:$0xff]  ;;  %v495_v30 = vld [vmem:[%s6394_s7 + $0xd0] sm:$0xff] }
  0xab   : > { %476 = vst [vmem:[%s6399_s8 + $0x20] sm:$0xff] %v475_v20  ;;  %v497_v31 = vld [vmem:[%s6394_s7 + $0xd8] sm:$0xff]  ;;  %v499_v32 = vld [vmem:[%s6394_s7 + $0x100] sm:$0xff]  ;;  %v501_v33 = vld [vmem:[%s6394_s7 + $0x108] sm:$0xff] }
  0xac   : > { %478 = vst [vmem:[%s6399_s8 + $0x28] sm:$0xff] %v477_v21  ;;  %v503_v34 = vld [vmem:[%s6394_s7 + $0x110] sm:$0xff]  ;;  %v505_v35 = vld [vmem:[%s6394_s7 + $0x118] sm:$0xff]  ;;  %v507_v36 = vld [vmem:[%s6394_s7 + $0x140] sm:$0xff] }
  0xad   : > { %480 = vst [vmem:[%s6399_s8 + $0x30] sm:$0xff] %v479_v22  ;;  %v509_v37 = vld [vmem:[%s6394_s7 + $0x148] sm:$0xff]  ;;  %v511_v38 = vld [vmem:[%s6394_s7 + $0x150] sm:$0xff]  ;;  %v513_v39 = vld [vmem:[%s6394_s7 + $0x158] sm:$0xff] }
  0xae   : > { %482 = vst [vmem:[%s6399_s8 + $0x38] sm:$0xff] %v481_v23  ;;  %v515_v40 = vld [vmem:[%s6394_s7 + $0x180] sm:$0xff]  ;;  %v517_v41 = vld [vmem:[%s6394_s7 + $0x188] sm:$0xff]  ;;  %v519_v42 = vld [vmem:[%s6394_s7 + $0x190] sm:$0xff] }
  0xaf   : > { %484 = vst [vmem:[%s6399_s8 + $0x40] sm:$0xff] %v483_v24  ;;  %v521_v43 = vld [vmem:[%s6394_s7 + $0x198] sm:$0xff]  ;;  %v523_v44 = vld [vmem:[%s6394_s7 + $0x1c0] sm:$0xff]  ;;  %v525_v45 = vld [vmem:[%s6394_s7 + $0x1c8] sm:$0xff] }
  0xb0   : > { %486 = vst [vmem:[%s6399_s8 + $0x48] sm:$0xff] %v485_v25  ;;  %v527_v46 = vld [vmem:[%s6394_s7 + $0x1d0] sm:$0xff]  ;;  %v529_v47 = vld [vmem:[%s6394_s7 + $0x1d8] sm:$0xff]  ;;  %v531_v48 = vld [vmem:[%s6394_s7 + $0x200] sm:$0xff] }
  0xb1   : > { %488 = vst [vmem:[%s6399_s8 + $0x50] sm:$0xff] %v487_v26  ;;  %v533_v49 = vld [vmem:[%s6394_s7 + $0x208] sm:$0xff]  ;;  %v535_v50 = vld [vmem:[%s6394_s7 + $0x210] sm:$0xff]  ;;  %v537_v51 = vld [vmem:[%s6394_s7 + $0x218] sm:$0xff] }
  0xb2   : > { %490 = vst [vmem:[%s6399_s8 + $0x58] sm:$0xff] %v489_v27  ;;  %v539_v52 = vld [vmem:[%s6394_s7 + $0x240] sm:$0xff]  ;;  %v541_v53 = vld [vmem:[%s6394_s7 + $0x248] sm:$0xff]  ;;  %v543_v54 = vld [vmem:[%s6394_s7 + $0x250] sm:$0xff] }
  0xb3   : > { %492 = vst [vmem:[%s6399_s8 + $0x60] sm:$0xff] %v491_v28  ;;  %v545_v55 = vld [vmem:[%s6394_s7 + $0x258] sm:$0xff]  ;;  %v547_v56 = vld [vmem:[%s6394_s7 + $0x280] sm:$0xff]  ;;  %v549_v57 = vld [vmem:[%s6394_s7 + $0x288] sm:$0xff] }
  0xb4   : > { %494 = vst [vmem:[%s6399_s8 + $0x68] sm:$0xff] %v493_v29  ;;  %v551_v58 = vld [vmem:[%s6394_s7 + $0x290] sm:$0xff]  ;;  %v553_v59 = vld [vmem:[%s6394_s7 + $0x298] sm:$0xff]  ;;  %v555_v60 = vld [vmem:[%s6394_s7 + $0x2c0] sm:$0xff] }
  0xb5   : > { %496 = vst [vmem:[%s6399_s8 + $0x70] sm:$0xff] %v495_v30  ;;  %v557_v61 = vld [vmem:[%s6394_s7 + $0x2c8] sm:$0xff]  ;;  %v559_v62 = vld [vmem:[%s6394_s7 + $0x2d0] sm:$0xff]  ;;  %v561_v63 = vld [vmem:[%s6394_s7 + $0x2d8] sm:$0xff] }
  0xb6   : > { %498 = vst [vmem:[%s6399_s8 + $0x78] sm:$0xff] %v497_v31  ;;  %v563_v0 = vld [vmem:[%s6394_s7 + $0x300] sm:$0xff]  ;;  %v565_v1 = vld [vmem:[%s6394_s7 + $0x308] sm:$0xff]  ;;  %v567_v2 = vld [vmem:[%s6394_s7 + $0x310] sm:$0xff] }
  0xb7   : > { %500 = vst [vmem:[%s6399_s8 + $0x80] sm:$0xff] %v499_v32  ;;  %v569_v3 = vld [vmem:[%s6394_s7 + $0x318] sm:$0xff]  ;;  %v571_v4 = vld [vmem:[%s6394_s7 + $0x340] sm:$0xff]  ;;  %v573_v5 = vld [vmem:[%s6394_s7 + $0x348] sm:$0xff] }
  0xb8   : > { %502 = vst [vmem:[%s6399_s8 + $0x88] sm:$0xff] %v501_v33  ;;  %v575_v6 = vld [vmem:[%s6394_s7 + $0x350] sm:$0xff]  ;;  %v577_v7 = vld [vmem:[%s6394_s7 + $0x358] sm:$0xff]  ;;  %v579_v8 = vld [vmem:[%s6394_s7 + $0x380] sm:$0xff] }
  0xb9   : > { %504 = vst [vmem:[%s6399_s8 + $0x90] sm:$0xff] %v503_v34  ;;  %v581_v9 = vld [vmem:[%s6394_s7 + $0x388] sm:$0xff]  ;;  %v583_v10 = vld [vmem:[%s6394_s7 + $0x390] sm:$0xff]  ;;  %v585_v11 = vld [vmem:[%s6394_s7 + $0x398] sm:$0xff] }
  0xba   : > { %506 = vst [vmem:[%s6399_s8 + $0x98] sm:$0xff] %v505_v35  ;;  %v587_v12 = vld [vmem:[%s6394_s7 + $0x3c0] sm:$0xff]  ;;  %v589_v13 = vld [vmem:[%s6394_s7 + $0x3c8] sm:$0xff]  ;;  %v591_v14 = vld [vmem:[%s6394_s7 + $0x3d0] sm:$0xff] }
  0xbb   : > { %508 = vst [vmem:[%s6399_s8 + $0xa0] sm:$0xff] %v507_v36  ;;  %v593_v15 = vld [vmem:[%s6394_s7 + $0x3d8] sm:$0xff]  ;;  %v595_v16 = vld [vmem:[%s6394_s7 + $0x400] sm:$0xff]  ;;  %v597_v17 = vld [vmem:[%s6394_s7 + $0x408] sm:$0xff] }
  0xbc   : > { %510 = vst [vmem:[%s6399_s8 + $0xa8] sm:$0xff] %v509_v37  ;;  %v599_v18 = vld [vmem:[%s6394_s7 + $0x410] sm:$0xff]  ;;  %v601_v19 = vld [vmem:[%s6394_s7 + $0x418] sm:$0xff]  ;;  %v603_v20 = vld [vmem:[%s6394_s7 + $0x440] sm:$0xff] }
  0xbd   : > { %512 = vst [vmem:[%s6399_s8 + $0xb0] sm:$0xff] %v511_v38  ;;  %v605_v21 = vld [vmem:[%s6394_s7 + $0x448] sm:$0xff]  ;;  %v607_v22 = vld [vmem:[%s6394_s7 + $0x450] sm:$0xff]  ;;  %v609_v23 = vld [vmem:[%s6394_s7 + $0x458] sm:$0xff] }
  0xbe   : > { %514 = vst [vmem:[%s6399_s8 + $0xb8] sm:$0xff] %v513_v39  ;;  %v611_v24 = vld [vmem:[%s6394_s7 + $0x480] sm:$0xff]  ;;  %v613_v25 = vld [vmem:[%s6394_s7 + $0x488] sm:$0xff]  ;;  %v615_v26 = vld [vmem:[%s6394_s7 + $0x490] sm:$0xff] }
  0xbf   : > { %516 = vst [vmem:[%s6399_s8 + $0xc0] sm:$0xff] %v515_v40  ;;  %v617_v27 = vld [vmem:[%s6394_s7 + $0x498] sm:$0xff]  ;;  %v619_v28 = vld [vmem:[%s6394_s7 + $0x4c0] sm:$0xff]  ;;  %v621_v29 = vld [vmem:[%s6394_s7 + $0x4c8] sm:$0xff] }
  0xc0   : > { %518 = vst [vmem:[%s6399_s8 + $0xc8] sm:$0xff] %v517_v41  ;;  %v623_v30 = vld [vmem:[%s6394_s7 + $0x4d0] sm:$0xff]  ;;  %v625_v31 = vld [vmem:[%s6394_s7 + $0x4d8] sm:$0xff]  ;;  %v627_v32 = vld [vmem:[%s6394_s7 + $0x500] sm:$0xff] }
  0xc1   : > { %520 = vst [vmem:[%s6399_s8 + $0xd0] sm:$0xff] %v519_v42  ;;  %v629_v33 = vld [vmem:[%s6394_s7 + $0x508] sm:$0xff]  ;;  %v631_v34 = vld [vmem:[%s6394_s7 + $0x510] sm:$0xff]  ;;  %v633_v35 = vld [vmem:[%s6394_s7 + $0x518] sm:$0xff] }
  0xc2   : > { %522 = vst [vmem:[%s6399_s8 + $0xd8] sm:$0xff] %v521_v43  ;;  %v635_v36 = vld [vmem:[%s6394_s7 + $0x540] sm:$0xff]  ;;  %v637_v37 = vld [vmem:[%s6394_s7 + $0x548] sm:$0xff]  ;;  %v639_v38 = vld [vmem:[%s6394_s7 + $0x550] sm:$0xff] }
  0xc3   : > { %524 = vst [vmem:[%s6399_s8 + $0xe0] sm:$0xff] %v523_v44  ;;  %v641_v39 = vld [vmem:[%s6394_s7 + $0x558] sm:$0xff]  ;;  %v643_v40 = vld [vmem:[%s6394_s7 + $0x580] sm:$0xff]  ;;  %v645_v41 = vld [vmem:[%s6394_s7 + $0x588] sm:$0xff] }
  0xc4   : > { %526 = vst [vmem:[%s6399_s8 + $0xe8] sm:$0xff] %v525_v45  ;;  %v647_v42 = vld [vmem:[%s6394_s7 + $0x590] sm:$0xff]  ;;  %v649_v43 = vld [vmem:[%s6394_s7 + $0x598] sm:$0xff]  ;;  %v651_v44 = vld [vmem:[%s6394_s7 + $0x5c0] sm:$0xff] }
  0xc5   : > { %528 = vst [vmem:[%s6399_s8 + $0xf0] sm:$0xff] %v527_v46  ;;  %v653_v45 = vld [vmem:[%s6394_s7 + $0x5c8] sm:$0xff]  ;;  %v655_v46 = vld [vmem:[%s6394_s7 + $0x5d0] sm:$0xff] }
  0xc6   : > { %530 = vst [vmem:[%s6399_s8 + $0xf8] sm:$0xff] %v529_v47  ;;  %v657_v47 = vld [vmem:[%s6394_s7 + $0x5d8] sm:$0xff] }
  0xc7   : > { %532 = vst [vmem:[%s6399_s8 + $0x100] sm:$0xff] %v531_v48  ;;  %v659_v48 = vld [vmem:[%s6394_s7 + $0x600] sm:$0xff] }
  0xc8   : > { %534 = vst [vmem:[%s6399_s8 + $0x108] sm:$0xff] %v533_v49  ;;  %v661_v49 = vld [vmem:[%s6394_s7 + $0x608] sm:$0xff] }
  0xc9   : > { %536 = vst [vmem:[%s6399_s8 + $0x110] sm:$0xff] %v535_v50  ;;  %v663_v50 = vld [vmem:[%s6394_s7 + $0x610] sm:$0xff] }
  0xca   : > { %538 = vst [vmem:[%s6399_s8 + $0x118] sm:$0xff] %v537_v51  ;;  %v665_v51 = vld [vmem:[%s6394_s7 + $0x618] sm:$0xff] }
  0xcb   : > { %540 = vst [vmem:[%s6399_s8 + $0x120] sm:$0xff] %v539_v52  ;;  %v667_v52 = vld [vmem:[%s6394_s7 + $0x640] sm:$0xff] }
  0xcc   : > { %542 = vst [vmem:[%s6399_s8 + $0x128] sm:$0xff] %v541_v53  ;;  %v669_v53 = vld [vmem:[%s6394_s7 + $0x648] sm:$0xff] }
  0xcd   : > { %544 = vst [vmem:[%s6399_s8 + $0x130] sm:$0xff] %v543_v54  ;;  %v671_v54 = vld [vmem:[%s6394_s7 + $0x650] sm:$0xff] }
  0xce   : > { %546 = vst [vmem:[%s6399_s8 + $0x138] sm:$0xff] %v545_v55  ;;  %v673_v55 = vld [vmem:[%s6394_s7 + $0x658] sm:$0xff] }
  0xcf   : > { %548 = vst [vmem:[%s6399_s8 + $0x140] sm:$0xff] %v547_v56  ;;  %v675_v56 = vld [vmem:[%s6394_s7 + $0x680] sm:$0xff] }
  0xd0   : > { %550 = vst [vmem:[%s6399_s8 + $0x148] sm:$0xff] %v549_v57  ;;  %v677_v57 = vld [vmem:[%s6394_s7 + $0x688] sm:$0xff] }
  0xd1   : > { %552 = vst [vmem:[%s6399_s8 + $0x150] sm:$0xff] %v551_v58  ;;  %v679_v58 = vld [vmem:[%s6394_s7 + $0x690] sm:$0xff] }
  0xd2   : > { %554 = vst [vmem:[%s6399_s8 + $0x158] sm:$0xff] %v553_v59  ;;  %v681_v59 = vld [vmem:[%s6394_s7 + $0x698] sm:$0xff] }
  0xd3   : > { %556 = vst [vmem:[%s6399_s8 + $0x160] sm:$0xff] %v555_v60  ;;  %v683_v60 = vld [vmem:[%s6394_s7 + $0x6c0] sm:$0xff] }
  0xd4   : > { %558 = vst [vmem:[%s6399_s8 + $0x168] sm:$0xff] %v557_v61  ;;  %v685_v61 = vld [vmem:[%s6394_s7 + $0x6c8] sm:$0xff] }
  0xd5   : > { %560 = vst [vmem:[%s6399_s8 + $0x170] sm:$0xff] %v559_v62  ;;  %v687_v62 = vld [vmem:[%s6394_s7 + $0x6d0] sm:$0xff] }
  0xd6   : > { %562 = vst [vmem:[%s6399_s8 + $0x178] sm:$0xff] %v561_v63  ;;  %v689_v63 = vld [vmem:[%s6394_s7 + $0x6d8] sm:$0xff] }
  0xd7   : > { %564 = vst [vmem:[%s6399_s8 + $0x180] sm:$0xff] %v563_v0  ;;  %v691_v0 = vld [vmem:[%s6394_s7 + $0x700] sm:$0xff] }
  0xd8   : > { %566 = vst [vmem:[%s6399_s8 + $0x188] sm:$0xff] %v565_v1  ;;  %v693_v1 = vld [vmem:[%s6394_s7 + $0x708] sm:$0xff] }
  0xd9   : > { %568 = vst [vmem:[%s6399_s8 + $0x190] sm:$0xff] %v567_v2  ;;  %v695_v2 = vld [vmem:[%s6394_s7 + $0x710] sm:$0xff] }
  0xda   : > { %570 = vst [vmem:[%s6399_s8 + $0x198] sm:$0xff] %v569_v3  ;;  %v697_v3 = vld [vmem:[%s6394_s7 + $0x718] sm:$0xff] }
  0xdb   : > { %572 = vst [vmem:[%s6399_s8 + $0x1a0] sm:$0xff] %v571_v4  ;;  %v699_v4 = vld [vmem:[%s6394_s7 + $0x740] sm:$0xff] }
  0xdc   : > { %574 = vst [vmem:[%s6399_s8 + $0x1a8] sm:$0xff] %v573_v5  ;;  %v701_v5 = vld [vmem:[%s6394_s7 + $0x748] sm:$0xff] }
  0xdd   : > { %576 = vst [vmem:[%s6399_s8 + $0x1b0] sm:$0xff] %v575_v6  ;;  %v703_v6 = vld [vmem:[%s6394_s7 + $0x750] sm:$0xff] }
  0xde   : > { %578 = vst [vmem:[%s6399_s8 + $0x1b8] sm:$0xff] %v577_v7  ;;  %v705_v7 = vld [vmem:[%s6394_s7 + $0x758] sm:$0xff] }
  0xdf   : > { %580 = vst [vmem:[%s6399_s8 + $0x1c0] sm:$0xff] %v579_v8  ;;  %v707_v8 = vld [vmem:[%s6394_s7 + $0x780] sm:$0xff] }
  0xe0   : > { %582 = vst [vmem:[%s6399_s8 + $0x1c8] sm:$0xff] %v581_v9  ;;  %v709_v9 = vld [vmem:[%s6394_s7 + $0x788] sm:$0xff] }
  0xe1   : > { %584 = vst [vmem:[%s6399_s8 + $0x1d0] sm:$0xff] %v583_v10  ;;  %v711_v10 = vld [vmem:[%s6394_s7 + $0x790] sm:$0xff] }
  0xe2   : > { %586 = vst [vmem:[%s6399_s8 + $0x1d8] sm:$0xff] %v585_v11  ;;  %v713_v11 = vld [vmem:[%s6394_s7 + $0x798] sm:$0xff] }
  0xe3   : > { %588 = vst [vmem:[%s6399_s8 + $0x1e0] sm:$0xff] %v587_v12  ;;  %v715_v12 = vld [vmem:[%s6394_s7 + $0x7c0] sm:$0xff] }
  0xe4   : > { %590 = vst [vmem:[%s6399_s8 + $0x1e8] sm:$0xff] %v589_v13  ;;  %v717_v13 = vld [vmem:[%s6394_s7 + $0x7c8] sm:$0xff] }
  0xe5   : > { %592 = vst [vmem:[%s6399_s8 + $0x1f0] sm:$0xff] %v591_v14  ;;  %v719_v14 = vld [vmem:[%s6394_s7 + $0x7d0] sm:$0xff] }
  0xe6   : > { %594 = vst [vmem:[%s6399_s8 + $0x1f8] sm:$0xff] %v593_v15  ;;  %v721_v15 = vld [vmem:[%s6394_s7 + $0x7d8] sm:$0xff] }
  0xe7   : > { %596 = vst [vmem:[%s6399_s8 + $0x200] sm:$0xff] %v595_v16  ;;  %v723_v16 = vld [vmem:[%s6394_s7 + $0x800] sm:$0xff] }
  0xe8   : > { %598 = vst [vmem:[%s6399_s8 + $0x208] sm:$0xff] %v597_v17  ;;  %v725_v17 = vld [vmem:[%s6394_s7 + $0x808] sm:$0xff] }
  0xe9   : > { %600 = vst [vmem:[%s6399_s8 + $0x210] sm:$0xff] %v599_v18  ;;  %v727_v18 = vld [vmem:[%s6394_s7 + $0x810] sm:$0xff] }
  0xea   : > { %602 = vst [vmem:[%s6399_s8 + $0x218] sm:$0xff] %v601_v19  ;;  %v729_v19 = vld [vmem:[%s6394_s7 + $0x818] sm:$0xff] }
  0xeb   : > { %604 = vst [vmem:[%s6399_s8 + $0x220] sm:$0xff] %v603_v20  ;;  %v731_v20 = vld [vmem:[%s6394_s7 + $0x840] sm:$0xff] }
  0xec   : > { %606 = vst [vmem:[%s6399_s8 + $0x228] sm:$0xff] %v605_v21  ;;  %v733_v21 = vld [vmem:[%s6394_s7 + $0x848] sm:$0xff] }
  0xed   : > { %608 = vst [vmem:[%s6399_s8 + $0x230] sm:$0xff] %v607_v22  ;;  %v735_v22 = vld [vmem:[%s6394_s7 + $0x850] sm:$0xff] }
  0xee   : > { %610 = vst [vmem:[%s6399_s8 + $0x238] sm:$0xff] %v609_v23  ;;  %v737_v23 = vld [vmem:[%s6394_s7 + $0x858] sm:$0xff] }
  0xef   : > { %612 = vst [vmem:[%s6399_s8 + $0x240] sm:$0xff] %v611_v24  ;;  %v739_v24 = vld [vmem:[%s6394_s7 + $0x880] sm:$0xff] }
  0xf0   : > { %614 = vst [vmem:[%s6399_s8 + $0x248] sm:$0xff] %v613_v25  ;;  %v741_v25 = vld [vmem:[%s6394_s7 + $0x888] sm:$0xff] }
  0xf1   : > { %616 = vst [vmem:[%s6399_s8 + $0x250] sm:$0xff] %v615_v26  ;;  %v743_v26 = vld [vmem:[%s6394_s7 + $0x890] sm:$0xff] }
  0xf2   : > { %618 = vst [vmem:[%s6399_s8 + $0x258] sm:$0xff] %v617_v27  ;;  %v745_v27 = vld [vmem:[%s6394_s7 + $0x898] sm:$0xff] }
  0xf3   : > { %620 = vst [vmem:[%s6399_s8 + $0x260] sm:$0xff] %v619_v28  ;;  %v747_v28 = vld [vmem:[%s6394_s7 + $0x8c0] sm:$0xff] }
  0xf4   : > { %622 = vst [vmem:[%s6399_s8 + $0x268] sm:$0xff] %v621_v29  ;;  %v749_v29 = vld [vmem:[%s6394_s7 + $0x8c8] sm:$0xff] }
  0xf5   : > { %624 = vst [vmem:[%s6399_s8 + $0x270] sm:$0xff] %v623_v30  ;;  %v751_v30 = vld [vmem:[%s6394_s7 + $0x8d0] sm:$0xff] }
  0xf6   : > { %626 = vst [vmem:[%s6399_s8 + $0x278] sm:$0xff] %v625_v31  ;;  %v753_v31 = vld [vmem:[%s6394_s7 + $0x8d8] sm:$0xff] }
  0xf7   : > { %628 = vst [vmem:[%s6399_s8 + $0x280] sm:$0xff] %v627_v32 }
  0xf8   : > { %630 = vst [vmem:[%s6399_s8 + $0x288] sm:$0xff] %v629_v33 }
  0xf9   : > { %632 = vst [vmem:[%s6399_s8 + $0x290] sm:$0xff] %v631_v34 }
  0xfa   : > { %634 = vst [vmem:[%s6399_s8 + $0x298] sm:$0xff] %v633_v35 }
  0xfb   : > { %636 = vst [vmem:[%s6399_s8 + $0x2a0] sm:$0xff] %v635_v36 }
  0xfc   : > { %638 = vst [vmem:[%s6399_s8 + $0x2a8] sm:$0xff] %v637_v37 }
  0xfd   : > { %640 = vst [vmem:[%s6399_s8 + $0x2b0] sm:$0xff] %v639_v38 }
  0xfe   : > { %642 = vst [vmem:[%s6399_s8 + $0x2b8] sm:$0xff] %v641_v39 }
  0xff   : > { %644 = vst [vmem:[%s6399_s8 + $0x2c0] sm:$0xff] %v643_v40 }
 0x100   : > { %646 = vst [vmem:[%s6399_s8 + $0x2c8] sm:$0xff] %v645_v41 }
 0x101   : > { %648 = vst [vmem:[%s6399_s8 + $0x2d0] sm:$0xff] %v647_v42 }
 0x102   : > { %650 = vst [vmem:[%s6399_s8 + $0x2d8] sm:$0xff] %v649_v43 }
 0x103   : > { %652 = vst [vmem:[%s6399_s8 + $0x2e0] sm:$0xff] %v651_v44 }
 0x104   : > { %654 = vst [vmem:[%s6399_s8 + $0x2e8] sm:$0xff] %v653_v45 }
 0x105   : > { %656 = vst [vmem:[%s6399_s8 + $0x2f0] sm:$0xff] %v655_v46 }
 0x106   : > { %658 = vst [vmem:[%s6399_s8 + $0x2f8] sm:$0xff] %v657_v47 }
 0x107   : > { %660 = vst [vmem:[%s6399_s8 + $0x300] sm:$0xff] %v659_v48 }
 0x108   : > { %662 = vst [vmem:[%s6399_s8 + $0x308] sm:$0xff] %v661_v49 }
 0x109   : > { %664 = vst [vmem:[%s6399_s8 + $0x310] sm:$0xff] %v663_v50 }
 0x10a   : > { %666 = vst [vmem:[%s6399_s8 + $0x318] sm:$0xff] %v665_v51 }
 0x10b   : > { %668 = vst [vmem:[%s6399_s8 + $0x320] sm:$0xff] %v667_v52 }
 0x10c   : > { %670 = vst [vmem:[%s6399_s8 + $0x328] sm:$0xff] %v669_v53 }
 0x10d   : > { %672 = vst [vmem:[%s6399_s8 + $0x330] sm:$0xff] %v671_v54 }
 0x10e   : > { %674 = vst [vmem:[%s6399_s8 + $0x338] sm:$0xff] %v673_v55 }
 0x10f   : > { %676 = vst [vmem:[%s6399_s8 + $0x340] sm:$0xff] %v675_v56 }
 0x110   : > { %678 = vst [vmem:[%s6399_s8 + $0x348] sm:$0xff] %v677_v57 }
 0x111   : > { %680 = vst [vmem:[%s6399_s8 + $0x350] sm:$0xff] %v679_v58 }
 0x112   : > { %682 = vst [vmem:[%s6399_s8 + $0x358] sm:$0xff] %v681_v59 }
 0x113   : > { %684 = vst [vmem:[%s6399_s8 + $0x360] sm:$0xff] %v683_v60 }
 0x114   : > { %686 = vst [vmem:[%s6399_s8 + $0x368] sm:$0xff] %v685_v61 }
 0x115   : > { %688 = vst [vmem:[%s6399_s8 + $0x370] sm:$0xff] %v687_v62 }
 0x116   : > { %690 = vst [vmem:[%s6399_s8 + $0x378] sm:$0xff] %v689_v63 }
 0x117   : > { %692 = vst [vmem:[%s6399_s8 + $0x380] sm:$0xff] %v691_v0 }
 0x118   : > { %694 = vst [vmem:[%s6399_s8 + $0x388] sm:$0xff] %v693_v1 }
 0x119   : > { %696 = vst [vmem:[%s6399_s8 + $0x390] sm:$0xff] %v695_v2 }
 0x11a   : > { %698 = vst [vmem:[%s6399_s8 + $0x398] sm:$0xff] %v697_v3 }
 0x11b   : > { %700 = vst [vmem:[%s6399_s8 + $0x3a0] sm:$0xff] %v699_v4 }
 0x11c   : > { %702 = vst [vmem:[%s6399_s8 + $0x3a8] sm:$0xff] %v701_v5 }
 0x11d   : > { %704 = vst [vmem:[%s6399_s8 + $0x3b0] sm:$0xff] %v703_v6 }
 0x11e   : > { %706 = vst [vmem:[%s6399_s8 + $0x3b8] sm:$0xff] %v705_v7 }
 0x11f   : > { %708 = vst [vmem:[%s6399_s8 + $0x3c0] sm:$0xff] %v707_v8 }
 0x120   : > { %710 = vst [vmem:[%s6399_s8 + $0x3c8] sm:$0xff] %v709_v9 }
 0x121   : > { %712 = vst [vmem:[%s6399_s8 + $0x3d0] sm:$0xff] %v711_v10 }
 0x122   : > { %714 = vst [vmem:[%s6399_s8 + $0x3d8] sm:$0xff] %v713_v11 }
 0x123   : > { %716 = vst [vmem:[%s6399_s8 + $0x3e0] sm:$0xff] %v715_v12 }
 0x124   : > { %718 = vst [vmem:[%s6399_s8 + $0x3e8] sm:$0xff] %v717_v13 }
 0x125   : > { %720 = vst [vmem:[%s6399_s8 + $0x3f0] sm:$0xff] %v719_v14 }
 0x126   : > { %722 = vst [vmem:[%s6399_s8 + $0x3f8] sm:$0xff] %v721_v15 }
 0x127   : > { %724 = vst [vmem:[%s6399_s8 + $0x400] sm:$0xff] %v723_v16 }
 0x128   : > { %726 = vst [vmem:[%s6399_s8 + $0x408] sm:$0xff] %v725_v17 }
 0x129   : > { %728 = vst [vmem:[%s6399_s8 + $0x410] sm:$0xff] %v727_v18 }
 0x12a   : > { %730 = vst [vmem:[%s6399_s8 + $0x418] sm:$0xff] %v729_v19 }
 0x12b   : > { %732 = vst [vmem:[%s6399_s8 + $0x420] sm:$0xff] %v731_v20 }
 0x12c   : > { %734 = vst [vmem:[%s6399_s8 + $0x428] sm:$0xff] %v733_v21 }
 0x12d   : > { %736 = vst [vmem:[%s6399_s8 + $0x430] sm:$0xff] %v735_v22 }
 0x12e   : > { %738 = vst [vmem:[%s6399_s8 + $0x438] sm:$0xff] %v737_v23 }
 0x12f   : > { %740 = vst [vmem:[%s6399_s8 + $0x440] sm:$0xff] %v739_v24 }
 0x130   : > { %742 = vst [vmem:[%s6399_s8 + $0x448] sm:$0xff] %v741_v25 }
 0x131   : > { %744 = vst [vmem:[%s6399_s8 + $0x450] sm:$0xff] %v743_v26 }
 0x132   : > { %746 = vst [vmem:[%s6399_s8 + $0x458] sm:$0xff] %v745_v27 }
 0x133   : > { %748 = vst [vmem:[%s6399_s8 + $0x460] sm:$0xff] %v747_v28 }
 0x134   : > { %750 = vst [vmem:[%s6399_s8 + $0x468] sm:$0xff] %v749_v29 }
 0x135   : > { %752 = vst [vmem:[%s6399_s8 + $0x470] sm:$0xff] %v751_v30 }
 0x136   : > { %754 = vst [vmem:[%s6399_s8 + $0x478] sm:$0xff] %v753_v31 }
 0x137 PF: > { %760 = sbr.rel (!%p6079_p4) target bundleno = 341 (0x155), region = 66  ;;  %s762_s9 = sand.u32 (%p6079_p4), 1, %s6023_s13  }
 0x138   : > { %s5318_s10 = sshll.u32 (%p6079_p4), %s6027_s14, 2  ;;  %s5977_s11 = smul.u32 (%p6079_p4), 100, %s762_s9 }
 0x139   : > { %s6693_s22 = scalar_lea.vmem (%p6079_p4), %s8869_s2, %s5318_s10 }
 0x13a   : > { %v783_v32 = vld [vmem:[%s6693_s22] sm:$0xf] (%p6079_p4)  ;;  %v785_v33 = vld [vmem:[%s6693_s22 + $0x8] sm:$0xf] (%p6079_p4)  ;;  %v787_v34 = vld [vmem:[%s6693_s22 + $0x10] sm:$0xf] (%p6079_p4) }
 0x13b   : > { %s6698_s20 = scalar_lea.vmem (%p6079_p4), [#allocation4], %s5977_s11  ;;  %v789_v35 = vld [vmem:[%s6693_s22 + $0x18] sm:$0xf] (%p6079_p4)  ;;  %v791_v36 = vld [vmem:[%s6693_s22 + $0x20] sm:$0xf] (%p6079_p4) }
 0x13c   : > { %784 = vst [vmem:[%s6698_s20] sm:$0xf] %v783_v32  ;;  %v793_v37 = vld [vmem:[%s6693_s22 + $0x28] sm:$0xf]  ;;  %v795_v38 = vld [vmem:[%s6693_s22 + $0x30] sm:$0xf] }
 0x13d   : > { %786 = vst [vmem:[%s6698_s20 + $0x4] sm:$0xf] %v785_v33  ;;  %v797_v39 = vld [vmem:[%s6693_s22 + $0x38] sm:$0xf]  ;;  %v799_v40 = vld [vmem:[%s6693_s22 + $0x40] sm:$0xf] }
 0x13e   : > { %788 = vst [vmem:[%s6698_s20 + $0x8] sm:$0xf] %v787_v34  ;;  %v801_v41 = vld [vmem:[%s6693_s22 + $0x48] sm:$0xf]  ;;  %v803_v42 = vld [vmem:[%s6693_s22 + $0x50] sm:$0xf] }
 0x13f   : > { %790 = vst [vmem:[%s6698_s20 + $0xc] sm:$0xf] %v789_v35  ;;  %v805_v43 = vld [vmem:[%s6693_s22 + $0x58] sm:$0xf]  ;;  %v807_v44 = vld [vmem:[%s6693_s22 + $0x60] sm:$0xf] }
 0x140   : > { %792 = vst [vmem:[%s6698_s20 + $0x10] sm:$0xf] %v791_v36  ;;  %v809_v45 = vld [vmem:[%s6693_s22 + $0x68] sm:$0xf]  ;;  %v811_v46 = vld [vmem:[%s6693_s22 + $0x70] sm:$0xf] }
 0x141   : > { %794 = vst [vmem:[%s6698_s20 + $0x14] sm:$0xf] %v793_v37  ;;  %v813_v47 = vld [vmem:[%s6693_s22 + $0x78] sm:$0xf]  ;;  %v815_v48 = vld [vmem:[%s6693_s22 + $0x80] sm:$0xf] }
 0x142   : > { %796 = vst [vmem:[%s6698_s20 + $0x18] sm:$0xf] %v795_v38  ;;  %v817_v49 = vld [vmem:[%s6693_s22 + $0x88] sm:$0xf]  ;;  %v819_v50 = vld [vmem:[%s6693_s22 + $0x90] sm:$0xf] }
 0x143   : > { %798 = vst [vmem:[%s6698_s20 + $0x1c] sm:$0xf] %v797_v39  ;;  %v821_v51 = vld [vmem:[%s6693_s22 + $0x98] sm:$0xf]  ;;  %v823_v52 = vld [vmem:[%s6693_s22 + $0xa0] sm:$0xf] }
 0x144   : > { %800 = vst [vmem:[%s6698_s20 + $0x20] sm:$0xf] %v799_v40  ;;  %v825_v53 = vld [vmem:[%s6693_s22 + $0xa8] sm:$0xf]  ;;  %v827_v54 = vld [vmem:[%s6693_s22 + $0xb0] sm:$0xf] }
 0x145   : > { %802 = vst [vmem:[%s6698_s20 + $0x24] sm:$0xf] %v801_v41  ;;  %v829_v55 = vld [vmem:[%s6693_s22 + $0xb8] sm:$0xf]  ;;  %v831_v56 = vld [vmem:[%s6693_s22 + $0xc0] sm:$0xf] }
 0x146   : > { %804 = vst [vmem:[%s6698_s20 + $0x28] sm:$0xf] %v803_v42 }
 0x147   : > { %806 = vst [vmem:[%s6698_s20 + $0x2c] sm:$0xf] %v805_v43 }
 0x148   : > { %808 = vst [vmem:[%s6698_s20 + $0x30] sm:$0xf] %v807_v44 }
 0x149   : > { %810 = vst [vmem:[%s6698_s20 + $0x34] sm:$0xf] %v809_v45 }
 0x14a   : > { %812 = vst [vmem:[%s6698_s20 + $0x38] sm:$0xf] %v811_v46 }
 0x14b   : > { %814 = vst [vmem:[%s6698_s20 + $0x3c] sm:$0xf] %v813_v47 }
 0x14c   : > { %816 = vst [vmem:[%s6698_s20 + $0x40] sm:$0xf] %v815_v48 }
 0x14d   : > { %818 = vst [vmem:[%s6698_s20 + $0x44] sm:$0xf] %v817_v49 }
 0x14e   : > { %820 = vst [vmem:[%s6698_s20 + $0x48] sm:$0xf] %v819_v50 }
 0x14f   : > { %822 = vst [vmem:[%s6698_s20 + $0x4c] sm:$0xf] %v821_v51 }
 0x150   : > { %824 = vst [vmem:[%s6698_s20 + $0x50] sm:$0xf] %v823_v52 }
 0x151   : > { %826 = vst [vmem:[%s6698_s20 + $0x54] sm:$0xf] %v825_v53 }
 0x152   : > { %828 = vst [vmem:[%s6698_s20 + $0x58] sm:$0xf] %v827_v54 }
 0x153   : > { %830 = vst [vmem:[%s6698_s20 + $0x5c] sm:$0xf] %v829_v55 }
 0x154   : > { %832 = vst [vmem:[%s6698_s20 + $0x60] sm:$0xf] %v831_v56 }
 0x155 PF: > { %p5319_p7 = scmp.ge.s32.totalorder %s6027_s14, 1  ;;  %p905_p8 = scmp.lt.s32.totalorder %s6027_s14, 3 }
 0x157   : > { %p906_p9 = pnand %p5319_p7, %p905_p8 }
 0x158   : > { %s6750_s23 = sand.u32 (!%p906_p9), 1, %s6019_s12  }
 0x159   : > { %909 = sbr.rel (%p906_p9) target bundleno = 952 (0x3b8), region = 107 }
 0x15a   : > { %s5978_s24 = smul.u32 (!%p906_p9), 1152, %s6750_s23 }
 0x15b   : > { %s5979_s25 = smul.u32 (!%p906_p9), 100, %s6750_s23 }
 0x15c   : > { %s6754_s26 = scalar_lea.vmem (!%p906_p9), [#allocation2], %s5978_s24  ;;  %s6757_s27 = scalar_lea.vmem (!%p906_p9), [#allocation3], %s5978_s24 }
 0x15d   : > { %s6760_s28 = scalar_lea.vmem (!%p906_p9), [#allocation4], %s5979_s25  ;;  %s5980_s12 = smul.u32 (!%p906_p9), 224, %s6750_s23 }
 0x15e   : > { %v1014_v57 = vld [vmem:[%s6754_s26] sm:$0xff]  ;;  %v6769_v61 = vld [vmem:[%s6760_s28 + $0x8] sm:$0xf]  ;;  %v6782_v2 = vld [vmem:[%s6760_s28 + $0xc] sm:$0xf]  ;;  %vm1094_vm0 = vcmask 1045504  }
 0x15f   : > { %v1022_v58 = vld [vmem:[%s6757_s27] sm:$0xff]  ;;  %v6779_v1 = vperm.slane %v6769_v61, 0  ;;  %v6785_v3 = vperm.slane %v6782_v2, 0  ;;  %v6788_v4 = vld [vmem:[%s6760_s28 + $0x10] sm:$0xf]  ;;  %v6797_v7 = vperm.slane %v6769_v61, 1 }
 0x160   : > { %v6763_v59 = vld [vmem:[%s6760_s28] sm:$0xf]  ;;  %v6766_v60 = vld [vmem:[%s6760_s28 + $0x4] sm:$0xf]  ;;  %v6800_v8 = vperm.slane %v6788_v4, 0  ;;  %v6809_v15 = vperm.slane %v6782_v2, 1 }
 0x161   : > { %v1018_v62 = vld [vmem:[%s6754_s26 + $0x20] sm:$0x1]  ;;  %v6773_v63 = vperm.slane %v6763_v59, 0  ;;  %v6776_v0 = vperm.slane %v6766_v60, 0  ;;  %v6791_v5 = vperm.slane %v6763_v59, 1  ;;  %v6794_v6 = vperm.slane %v6766_v60, 1 }
 0x162   : > { %v1038_v11 = vmul.f32 %v1014_v57, %v6779_v1  ;;  %v1015_v12 = vld [vmem:[%s6754_s26 + $0x8] sm:$0xff]  ;;  %v1058_v14 = vmul.f32 %v1022_v58, %v6785_v3  ;;  %v6812_v16 = vperm.slane %v6788_v4, 1  ;;  %v1078_v20 = vmul.f32 %v1014_v57, %v6800_v8  ;;  %v1016_v35 = vld [vmem:[%s6754_s26 + $0x10] sm:$0xff]  ;;  %s6849_s29 = scalar_lea.vmem [#allocation5], %s5980_s12  ;;  %s5974_s30 = sshll.u32 (%p6083_p5), %s5310_s15, 5 }
 0x163   : > { %v1026_v9 = vmul.f32 %v1014_v57, %v6773_v63  ;;  %v1030_v10 = vmul.f32 %v1022_v58, %v6776_v0  ;;  %v1023_v13 = vld [vmem:[%s6757_s27 + $0x8] sm:$0xff]  ;;  %v1027_v17 = vmul.f32 %v1015_v12, %v6791_v5  ;;  %v1082_v21 = vmul.f32 %v1018_v62, %v6800_v8  ;;  %v1024_v40 = vld [vmem:[%s6757_s27 + $0x10] sm:$0xff]  ;;  %v1017_v58 = vld [vmem:[%s6754_s26 + $0x18] sm:$0xff]  ;;  %s8801_s21 = scalar_lea.vmem (%p6083_p5), %s8870_s3, %s5974_s30 }
 0x164   : > { %v1046_v19 = vrot.slane %v1038_v11, 1  ;;  %v1019_v22 = vld [vmem:[%s6754_s26 + $0x28] sm:$0x1]  ;;  %v1066_v23 = vrot.slane %v1058_v14, 1  ;;  %v1031_v24 = vmul.f32 %v1023_v13, %v6794_v6  ;;  %v1039_v25 = vmul.f32 %v1015_v12, %v6797_v7  ;;  %v1020_v45 = vld [vmem:[%s6754_s26 + $0x30] sm:$0x1] }
 0x165   : > { %v1034_v18 = vadd.f32 %v1030_v10, %v1026_v9  ;;  %v1059_v26 = vmul.f32 %v1023_v13, %v6809_v15  ;;  %v1095_v28 = vrot.slane %v1078_v20, 2  ;;  %v1096_v29 = vrot.slane %v1082_v21, 2  ;;  %v5324_v13 = vld [vmem:[%s6754_s26 + $0x80] sm:$0xff]  ;;  %v1021_v20 = vld [vmem:[%s6754_s26 + $0x38] sm:$0x1] }
 0x166   : > { %v1079_v30 = vmul.f32 %v1015_v12, %v6812_v16  ;;  %v1035_v31 = vadd.f32 %v1031_v24, %v1027_v17  ;;  %v1047_v32 = vrot.slane %v1039_v25, 1  ;;  %v1083_v34 = vmul.f32 %v1019_v22, %v6812_v16  ;;  %v1025_v12 = vld [vmem:[%s6757_s27 + $0x18] sm:$0xff] }
 0x167   : > { %v1054_v27 = vadd.f32 %v1046_v19, %v1034_v18  ;;  %v1067_v33 = vrot.slane %v1059_v26, 1  ;;  %v1097_v37 = vsel %vm1094_vm0, %v1095_v28, %v1096_v29  ;;  %v6827_v39 = vperm.slane %v6763_v59, 2 }
 0x168   : > { %v1098_v38 = vrot.slane %v1079_v30, 2  ;;  %v1055_v41 = vadd.f32 %v1047_v32, %v1035_v31  ;;  %v1099_v42 = vrot.slane %v1083_v34, 2  ;;  %v6831_v43 = vperm.slane %v6766_v60, 2  ;;  %v5328_v31 = vld [vmem:[%s6754_s26 + $0xa0] sm:$0x1]  ;;  %v5325_v34 = vld [vmem:[%s6754_s26 + $0x88] sm:$0xff] }
 0x169   : > { %v1074_v36 = vadd.f32 %v1066_v23, %v1054_v27  ;;  %v6834_v44 = vperm.slane %v6769_v61, 2  ;;  %v6838_v47 = vperm.slane %v6782_v2, 2  ;;  %v6841_v48 = vperm.slane %v6788_v4, 2  ;;  %v5332_v23 = vld [vmem:[%s6757_s27 + $0x80] sm:$0xff] }
 0x16a   : > { %v1028_v49 = vmul.f32 %v1016_v35, %v6827_v39  ;;  %v1075_v50 = vadd.f32 %v1067_v33, %v1055_v41  ;;  %v1100_v51 = vsel %vm1094_vm0, %v1098_v38, %v1099_v42  ;;  %v1032_v52 = vmul.f32 %v1024_v40, %v6831_v43 }
 0x16b   : > { %v1111_v46 = vadd.f32 %v1097_v37, %v1074_v36  ;;  %v1040_v53 = vmul.f32 %v1016_v35, %v6834_v44  ;;  %v1060_v54 = vmul.f32 %v1024_v40, %v6838_v47  ;;  %v1080_v55 = vmul.f32 %v1016_v35, %v6841_v48  ;;  %v5333_v40 = vld [vmem:[%s6757_s27 + $0x88] sm:$0xff] }
 0x16c   : > { %v1084_v56 = vmul.f32 %v1020_v45, %v6841_v48  ;;  %v6856_v57 = vperm.slane %v6763_v59, 3  ;;  %v1112_v62 = vadd.f32 %v1100_v51, %v1075_v50  ;;  %v1036_v9 = vadd.f32 %v1032_v52, %v1028_v49 }
 0x16d   : > { %1115 = vst [vmem:[%s6849_s29] sm:$0x7f] %v1111_v46  ;;  %v1048_v10 = vrot.slane %v1040_v53, 1  ;;  %v6860_v11 = vperm.slane %v6766_v60, 3  ;;  %v1068_v14 = vrot.slane %v1060_v54, 1  ;;  %v1101_v17 = vrot.slane %v1080_v55, 2 }
 0x16e   : > { %v1102_v18 = vrot.slane %v1084_v56, 2  ;;  %v6865_v19 = vperm.slane %v6769_v61, 3  ;;  %1116 = vst [vmem:[%s6849_s29 + $0x8] sm:$0x7f] %v1112_v62  ;;  %v6870_v21 = vperm.slane %v6782_v2, 3  ;;  %v6873_v22 = vperm.slane %v6788_v4, 3 }
 0x16f   : > { %v1056_v59 = vadd.f32 %v1048_v10, %v1036_v9  ;;  %v1029_v60 = vmul.f32 %v1017_v58, %v6856_v57  ;;  %v1033_v25 = vmul.f32 %v1025_v12, %v6860_v11  ;;  %v1133_v26 = vmul.f32 %v5324_v13, %v6773_v63  ;;  %v5329_v56 = vld [vmem:[%s6754_s26 + $0xa8] sm:$0x1] }
 0x170   : > { %v1103_v24 = vsel %vm1094_vm0, %v1101_v17, %v1102_v18  ;;  %v1041_v61 = vmul.f32 %v1017_v58, %v6865_v19  ;;  %v1061_v2 = vmul.f32 %v1025_v12, %v6870_v21  ;;  %v1081_v28 = vmul.f32 %v1017_v58, %v6873_v22 }
 0x171   : > { %v1076_v27 = vadd.f32 %v1068_v14, %v1056_v59  ;;  %v1085_v4 = vmul.f32 %v1021_v20, %v6873_v22  ;;  %v1037_v29 = vadd.f32 %v1033_v25, %v1029_v60  ;;  %v1137_v32 = vmul.f32 %v5332_v23, %v6776_v0  ;;  %v5334_v14 = vld [vmem:[%s6757_s27 + $0x90] sm:$0xff] }
 0x172   : > { %v1049_v30 = vrot.slane %v1041_v61, 1  ;;  %v1145_v33 = vmul.f32 %v5324_v13, %v6779_v1  ;;  %v1069_v36 = vrot.slane %v1061_v2, 1  ;;  %v1104_v37 = vrot.slane %v1081_v28, 2  ;;  %v5330_v61 = vld [vmem:[%s6754_s26 + $0xb0] sm:$0x1] }
 0x173   : > { %v1113_v35 = vadd.f32 %v1103_v24, %v1076_v27  ;;  %v1105_v38 = vrot.slane %v1085_v4, 2  ;;  %v1141_v42 = vadd.f32 %v1137_v32, %v1133_v26  ;;  %v1165_v46 = vmul.f32 %v5332_v23, %v6785_v3  ;;  %v5327_v26 = vld [vmem:[%s6754_s26 + $0x98] sm:$0xff] }
 0x174   : > { %v1057_v41 = vadd.f32 %v1049_v30, %v1037_v29  ;;  %v1153_v45 = vrot.slane %v1145_v33, 1  ;;  %v1185_v50 = vmul.f32 %v5324_v13, %v6800_v8  ;;  %v1189_v51 = vmul.f32 %v5328_v31, %v6800_v8  ;;  %v5326_v13 = vld [vmem:[%s6754_s26 + $0x90] sm:$0xff]  ;;  %v5335_v33 = vld [vmem:[%s6757_s27 + $0x98] sm:$0xff] }
 0x175   : > { %1117 = vst [vmem:[%s6849_s29 + $0x10] sm:$0x7f] %v1113_v35  ;;  %v1106_v49 = vsel %vm1094_vm0, %v1104_v37, %v1105_v38  ;;  %v1134_v52 = vmul.f32 %v5325_v34, %v6791_v5  ;;  %v1173_v55 = vrot.slane %v1165_v46, 1  ;;  %v1138_v58 = vmul.f32 %v5333_v40, %v6794_v6 }
 0x176   : > { %v1077_v53 = vadd.f32 %v1069_v36, %v1057_v41  ;;  %v1161_v54 = vadd.f32 %v1153_v45, %v1141_v42  ;;  %v1201_v62 = vrot.slane %v1185_v50, 2  ;;  %v1202_v9 = vrot.slane %v1189_v51, 2  ;;  %v5331_v45 = vld [vmem:[%s6754_s26 + $0xb8] sm:$0x1] }
 0x177   : > { %v1146_v10 = vmul.f32 %v5325_v34, %v6797_v7  ;;  %v1166_v12 = vmul.f32 %v5333_v40, %v6809_v15  ;;  %v1142_v20 = vadd.f32 %v1138_v58, %v1134_v52  ;;  %v1186_v59 = vmul.f32 %v5325_v34, %v6812_v16  ;;  %v5340_v52 = vld [vmem:[%s6754_s26 + $0x100] sm:$0xff] }
 0x178   : > { %v1114_v17 = vadd.f32 %v1106_v49, %v1077_v53  ;;  %v1181_v18 = vadd.f32 %v1173_v55, %v1161_v54  ;;  %v1203_v60 = vsel %vm1094_vm0, %v1201_v62, %v1202_v9  ;;  %v1190_v25 = vmul.f32 %v5329_v56, %v6812_v16  ;;  %v5348_v58 = vld [vmem:[%s6757_s27 + $0x100] sm:$0xff] }
 0x179   : > { %v1154_v23 = vrot.slane %v1146_v10, 1  ;;  %v1174_v24 = vrot.slane %v1166_v12, 1  ;;  %v1204_v2 = vrot.slane %v1186_v59, 2  ;;  %v1135_v28 = vmul.f32 %v5326_v13, %v6827_v39 }
 0x17a   : > { %1118 = vst [vmem:[%s6849_s29 + $0x18] sm:$0x7f] %v1114_v17  ;;  %v1217_v27 = vadd.f32 %v1203_v60, %v1181_v18  ;;  %v1139_v4 = vmul.f32 %v5334_v14, %v6831_v43  ;;  %v1205_v30 = vrot.slane %v1190_v25, 2  ;;  %v1147_v31 = vmul.f32 %v5326_v13, %v6834_v44  ;;  %v5341_v25 = vld [vmem:[%s6754_s26 + $0x108] sm:$0xff] }
 0x17b   : > { %v1162_v29 = vadd.f32 %v1154_v23, %v1142_v20  ;;  %v1167_v32 = vmul.f32 %v5334_v14, %v6838_v47  ;;  %v1187_v35 = vmul.f32 %v5326_v13, %v6841_v48  ;;  %v1191_v36 = vmul.f32 %v5330_v61, %v6841_v48  ;;  %v5344_v13 = vld [vmem:[%s6754_s26 + $0x120] sm:$0x1] }
 0x17c   : > { %5336 = vst [vmem:[%s6849_s29 + $0x20] sm:$0x7f] %v1217_v27  ;;  %v1143_v34 = vadd.f32 %v1139_v4, %v1135_v28  ;;  %v1136_v37 = vmul.f32 %v5327_v26, %v6856_v57  ;;  %v1206_v40 = vsel %vm1094_vm0, %v1204_v2, %v1205_v30  ;;  %v1155_v41 = vrot.slane %v1147_v31, 1  ;;  %v5349_v28 = vld [vmem:[%s6757_s27 + $0x108] sm:$0xff] }
 0x17d   : > { %v1182_v38 = vadd.f32 %v1174_v24, %v1162_v29  ;;  %v1175_v42 = vrot.slane %v1167_v32, 1  ;;  %v1207_v46 = vrot.slane %v1187_v35, 2  ;;  %v1208_v49 = vrot.slane %v1191_v36, 2  ;;  %v5345_v32 = vld [vmem:[%s6754_s26 + $0x128] sm:$0x1] }
 0x17e   : > { %v1140_v50 = vmul.f32 %v5335_v33, %v6860_v11  ;;  %v1148_v51 = vmul.f32 %v5327_v26, %v6865_v19  ;;  %v1163_v54 = vadd.f32 %v1155_v41, %v1143_v34  ;;  %v1168_v55 = vmul.f32 %v5335_v33, %v6870_v21 }
 0x17f   : > { %v1218_v53 = vadd.f32 %v1206_v40, %v1182_v38  ;;  %v1188_v56 = vmul.f32 %v5327_v26, %v6873_v22  ;;  %v1209_v62 = vsel %vm1094_vm0, %v1207_v46, %v1208_v49  ;;  %v1192_v12 = vmul.f32 %v5331_v45, %v6873_v22  ;;  %v5350_v45 = vld [vmem:[%s6757_s27 + $0x110] sm:$0xff] }
 0x180   : > { %v1144_v9 = vadd.f32 %v1140_v50, %v1136_v37  ;;  %v1156_v10 = vrot.slane %v1148_v51, 1  ;;  %v1183_v14 = vadd.f32 %v1175_v42, %v1163_v54  ;;  %v1176_v17 = vrot.slane %v1168_v55, 1  ;;  %v5342_v37 = vld [vmem:[%s6754_s26 + $0x110] sm:$0xff] }
 0x181   : > { %5337 = vst [vmem:[%s6849_s29 + $0x28] sm:$0x7f] %v1218_v53  ;;  %v1210_v18 = vrot.slane %v1188_v56, 2  ;;  %v1240_v20 = vmul.f32 %v5340_v52, %v6773_v63  ;;  %v1211_v60 = vrot.slane %v1192_v12, 2  ;;  %v1244_v23 = vmul.f32 %v5348_v58, %v6776_v0  ;;  %v5346_v55 = vld [vmem:[%s6754_s26 + $0x130] sm:$0x1] }
 0x182   : > { %v1164_v59 = vadd.f32 %v1156_v10, %v1144_v9  ;;  %v1252_v24 = vmul.f32 %v5340_v52, %v6779_v1  ;;  %v1219_v61 = vadd.f32 %v1209_v62, %v1183_v14  ;;  %v1272_v26 = vmul.f32 %v5348_v58, %v6785_v3  ;;  %v5343_v12 = vld [vmem:[%s6754_s26 + $0x118] sm:$0xff] }
 0x183   : > { %v1292_v27 = vmul.f32 %v5340_v52, %v6800_v8  ;;  %v1296_v2 = vmul.f32 %v5344_v13, %v6800_v8  ;;  %v1212_v29 = vsel %vm1094_vm0, %v1210_v18, %v1211_v60  ;;  %v1248_v30 = vadd.f32 %v1244_v23, %v1240_v20  ;;  %v5351_v20 = vld [vmem:[%s6757_s27 + $0x118] sm:$0xff] }
 0x184   : > { %v1184_v4 = vadd.f32 %v1176_v17, %v1164_v59  ;;  %v1260_v31 = vrot.slane %v1252_v24, 1  ;;  %5338 = vst [vmem:[%s6849_s29 + $0x30] sm:$0x7f] %v1219_v61  ;;  %v1280_v33 = vrot.slane %v1272_v26, 1  ;;  %v1241_v36 = vmul.f32 %v5341_v25, %v6791_v5 }
 0x185   : > { %v1308_v34 = vrot.slane %v1292_v27, 2  ;;  %v1309_v35 = vrot.slane %v1296_v2, 2  ;;  %v1245_v41 = vmul.f32 %v5349_v28, %v6794_v6  ;;  %v1253_v42 = vmul.f32 %v5341_v25, %v6797_v7  ;;  %v5347_v27 = vld [vmem:[%s6754_s26 + $0x138] sm:$0x1] }
 0x186   : > { %v1220_v38 = vadd.f32 %v1212_v29, %v1184_v4  ;;  %v1268_v40 = vadd.f32 %v1260_v31, %v1248_v30  ;;  %v1273_v49 = vmul.f32 %v5349_v28, %v6809_v15  ;;  %v1293_v50 = vmul.f32 %v5341_v25, %v6812_v16  ;;  %v5356_v31 = vld [vmem:[%s6754_s26 + $0x180] sm:$0xff] }
 0x187   : > { %v1310_v46 = vsel %vm1094_vm0, %v1308_v34, %v1309_v35  ;;  %v1297_v51 = vmul.f32 %v5345_v32, %v6812_v16  ;;  %v1249_v53 = vadd.f32 %v1245_v41, %v1241_v36  ;;  %v1261_v54 = vrot.slane %v1253_v42, 1  ;;  %v5364_v36 = vld [vmem:[%s6757_s27 + $0x180] sm:$0xff] }
 0x188   : > { %5339 = vst [vmem:[%s6849_s29 + $0x38] sm:$0x7f] %v1220_v38  ;;  %v1288_v52 = vadd.f32 %v1280_v33, %v1268_v40  ;;  %v1242_v56 = vmul.f32 %v5342_v37, %v6827_v39  ;;  %v1281_v58 = vrot.slane %v1273_v49, 1  ;;  %v1311_v62 = vrot.slane %v1293_v50, 2  ;;  %v5360_v42 = vld [vmem:[%s6754_s26 + $0x1a0] sm:$0x1] }
 0x189   : > { %v1312_v9 = vrot.slane %v1297_v51, 2  ;;  %v1246_v10 = vmul.f32 %v5350_v45, %v6831_v43  ;;  %v1269_v14 = vadd.f32 %v1261_v54, %v1249_v53  ;;  %v1254_v17 = vmul.f32 %v5342_v37, %v6834_v44 }
 0x18a   : > { %v1324_v13 = vadd.f32 %v1310_v46, %v1288_v52  ;;  %v1274_v18 = vmul.f32 %v5350_v45, %v6838_v47  ;;  %v1294_v23 = vmul.f32 %v5342_v37, %v6841_v48  ;;  %v1298_v24 = vmul.f32 %v5346_v55, %v6841_v48  ;;  %v5357_v55 = vld [vmem:[%s6754_s26 + $0x188] sm:$0xff] }
 0x18b   : > { %v1313_v59 = vsel %vm1094_vm0, %v1311_v62, %v1312_v9  ;;  %v1250_v60 = vadd.f32 %v1246_v10, %v1242_v56  ;;  %v1289_v25 = vadd.f32 %v1281_v58, %v1269_v14  ;;  %v1262_v61 = vrot.slane %v1254_v17, 1  ;;  %v5365_v10 = vld [vmem:[%s6757_s27 + $0x188] sm:$0xff] }
 0x18c   : > { %5352 = vst [vmem:[%s6849_s29 + $0x40] sm:$0x7f] %v1324_v13  ;;  %v1282_v26 = vrot.slane %v1274_v18, 1  ;;  %v1243_v2 = vmul.f32 %v5343_v12, %v6856_v57  ;;  %v1314_v28 = vrot.slane %v1294_v23, 2  ;;  %v1315_v4 = vrot.slane %v1298_v24, 2  ;;  %v5358_v24 = vld [vmem:[%s6754_s26 + $0x190] sm:$0xff] }
 0x18d   : > { %v1247_v29 = vmul.f32 %v5351_v20, %v6860_v11  ;;  %v1255_v30 = vmul.f32 %v5343_v12, %v6865_v19  ;;  %v1325_v32 = vadd.f32 %v1313_v59, %v1289_v25  ;;  %v1270_v33 = vadd.f32 %v1262_v61, %v1250_v60  ;;  %v5361_v18 = vld [vmem:[%s6754_s26 + $0x1a8] sm:$0x1] }
 0x18e   : > { %v1275_v34 = vmul.f32 %v5351_v20, %v6870_v21  ;;  %v1295_v35 = vmul.f32 %v5343_v12, %v6873_v22  ;;  %v1316_v37 = vsel %vm1094_vm0, %v1314_v28, %v1315_v4  ;;  %v1299_v41 = vmul.f32 %v5347_v27, %v6873_v22 }
 0x18f   : > { %v1251_v38 = vadd.f32 %v1247_v29, %v1243_v2  ;;  %v1263_v40 = vrot.slane %v1255_v30, 1  ;;  %5353 = vst [vmem:[%s6849_s29 + $0x48] sm:$0x7f] %v1325_v32  ;;  %v1290_v45 = vadd.f32 %v1282_v26, %v1270_v33  ;;  %v1347_v50 = vmul.f32 %v5356_v31, %v6773_v63  ;;  %v5366_v2 = vld [vmem:[%s6757_s27 + $0x190] sm:$0xff] }
 0x190   : > { %v1283_v46 = vrot.slane %v1275_v34, 1  ;;  %v1317_v49 = vrot.slane %v1295_v35, 2  ;;  %v1318_v52 = vrot.slane %v1299_v41, 2  ;;  %v1351_v53 = vmul.f32 %v5364_v36, %v6776_v0  ;;  %v5362_v34 = vld [vmem:[%s6754_s26 + $0x1b0] sm:$0x1]  ;;  %v5359_v41 = vld [vmem:[%s6754_s26 + $0x198] sm:$0xff] }
 0x191   : > { %v1271_v51 = vadd.f32 %v1263_v40, %v1251_v38  ;;  %v1359_v54 = vmul.f32 %v5356_v31, %v6779_v1  ;;  %v1326_v56 = vadd.f32 %v1316_v37, %v1290_v45  ;;  %v1379_v58 = vmul.f32 %v5364_v36, %v6785_v3 }
 0x192   : > { %v1399_v62 = vmul.f32 %v5356_v31, %v6800_v8  ;;  %v1403_v9 = vmul.f32 %v5360_v42, %v6800_v8  ;;  %v1319_v13 = vsel %vm1094_vm0, %v1317_v49, %v1318_v52  ;;  %v1355_v14 = vadd.f32 %v1351_v53, %v1347_v50  ;;  %v5367_v50 = vld [vmem:[%s6757_s27 + $0x198] sm:$0xff] }
 0x193   : > { %v1291_v12 = vadd.f32 %v1283_v46, %v1271_v51  ;;  %v1367_v17 = vrot.slane %v1359_v54, 1  ;;  %5354 = vst [vmem:[%s6849_s29 + $0x50] sm:$0x7f] %v1326_v56  ;;  %v1387_v20 = vrot.slane %v1379_v58, 1  ;;  %v1348_v23 = vmul.f32 %v5357_v55, %v6791_v5 }
 0x194   : > { %v1415_v59 = vrot.slane %v1399_v62, 2  ;;  %v1416_v60 = vrot.slane %v1403_v9, 2  ;;  %v1352_v26 = vmul.f32 %v5365_v10, %v6794_v6  ;;  %v1360_v27 = vmul.f32 %v5357_v55, %v6797_v7  ;;  %v5363_v62 = vld [vmem:[%s6754_s26 + $0x1b8] sm:$0x1] }
 0x195   : > { %v1327_v25 = vadd.f32 %v1319_v13, %v1291_v12  ;;  %v1375_v61 = vadd.f32 %v1367_v17, %v1355_v14  ;;  %v1380_v4 = vmul.f32 %v5365_v10, %v6809_v15  ;;  %v1400_v29 = vmul.f32 %v5357_v55, %v6812_v16  ;;  %v5372_v17 = vld [vmem:[%s6754_s26 + $0x200] sm:$0xff] }
 0x196   : > { %v1417_v28 = vsel %vm1094_vm0, %v1415_v59, %v1416_v60  ;;  %v1404_v30 = vmul.f32 %v5361_v18, %v6812_v16  ;;  %v1356_v32 = vadd.f32 %v1352_v26, %v1348_v23  ;;  %v1368_v33 = vrot.slane %v1360_v27, 1  ;;  %v5380_v23 = vld [vmem:[%s6757_s27 + $0x200] sm:$0xff] }
 0x197   : > { %5355 = vst [vmem:[%s6849_s29 + $0x58] sm:$0x7f] %v1327_v25  ;;  %v1395_v31 = vadd.f32 %v1387_v20, %v1375_v61  ;;  %v1349_v35 = vmul.f32 %v5358_v24, %v6827_v39  ;;  %v1388_v36 = vrot.slane %v1380_v4, 1  ;;  %v1418_v37 = vrot.slane %v1400_v29, 2  ;;  %v5376_v27 = vld [vmem:[%s6754_s26 + $0x220] sm:$0x1] }
 0x198   : > { %v1419_v38 = vrot.slane %v1404_v30, 2  ;;  %v1353_v40 = vmul.f32 %v5366_v2, %v6831_v43  ;;  %v1376_v45 = vadd.f32 %v1368_v33, %v1356_v32  ;;  %v1361_v46 = vmul.f32 %v5358_v24, %v6834_v44 }
 0x199   : > { %v1431_v42 = vadd.f32 %v1417_v28, %v1395_v31  ;;  %v1381_v49 = vmul.f32 %v5366_v2, %v6838_v47  ;;  %v1401_v53 = vmul.f32 %v5358_v24, %v6841_v48  ;;  %v1405_v54 = vmul.f32 %v5362_v34, %v6841_v48  ;;  %v5373_v34 = vld [vmem:[%s6754_s26 + $0x208] sm:$0xff] }
 0x19a   : > { %v1420_v51 = vsel %vm1094_vm0, %v1418_v37, %v1419_v38  ;;  %v1357_v52 = vadd.f32 %v1353_v40, %v1349_v35  ;;  %v1396_v55 = vadd.f32 %v1388_v36, %v1376_v45  ;;  %v1369_v56 = vrot.slane %v1361_v46, 1  ;;  %v5381_v40 = vld [vmem:[%s6757_s27 + $0x208] sm:$0xff] }
 0x19b   : > { %5368 = vst [vmem:[%s6849_s29 + $0x60] sm:$0x7f] %v1431_v42  ;;  %v1389_v58 = vrot.slane %v1381_v49, 1  ;;  %v1350_v9 = vmul.f32 %v5359_v41, %v6856_v57  ;;  %v1421_v10 = vrot.slane %v1401_v53, 2  ;;  %v1422_v12 = vrot.slane %v1405_v54, 2  ;;  %v5374_v54 = vld [vmem:[%s6754_s26 + $0x210] sm:$0xff] }
 0x19c   : > { %v1354_v13 = vmul.f32 %v5367_v50, %v6860_v11  ;;  %v1362_v14 = vmul.f32 %v5359_v41, %v6865_v19  ;;  %v1432_v18 = vadd.f32 %v1420_v51, %v1396_v55  ;;  %v1377_v20 = vadd.f32 %v1369_v56, %v1357_v52  ;;  %v5377_v49 = vld [vmem:[%s6754_s26 + $0x228] sm:$0x1] }
 0x19d   : > { %v1382_v59 = vmul.f32 %v5367_v50, %v6870_v21  ;;  %v1402_v60 = vmul.f32 %v5359_v41, %v6873_v22  ;;  %v1423_v24 = vsel %vm1094_vm0, %v1421_v10, %v1422_v12  ;;  %v1406_v26 = vmul.f32 %v5363_v62, %v6873_v22 }
 0x19e   : > { %v1358_v25 = vadd.f32 %v1354_v13, %v1350_v9  ;;  %v1370_v61 = vrot.slane %v1362_v14, 1  ;;  %5369 = vst [vmem:[%s6849_s29 + $0x68] sm:$0x7f] %v1432_v18  ;;  %v1397_v2 = vadd.f32 %v1389_v58, %v1377_v20  ;;  %v1454_v29 = vmul.f32 %v5372_v17, %v6773_v63  ;;  %v5382_v9 = vld [vmem:[%s6757_s27 + $0x210] sm:$0xff] }
 0x19f   : > { %v1390_v28 = vrot.slane %v1382_v59, 1  ;;  %v1424_v4 = vrot.slane %v1402_v60, 2  ;;  %v1425_v31 = vrot.slane %v1406_v26, 2  ;;  %v1458_v32 = vmul.f32 %v5380_v23, %v6776_v0  ;;  %v5378_v59 = vld [vmem:[%s6754_s26 + $0x230] sm:$0x1]  ;;  %v5375_v26 = vld [vmem:[%s6754_s26 + $0x218] sm:$0xff] }
 0x1a0   : > { %v1378_v30 = vadd.f32 %v1370_v61, %v1358_v25  ;;  %v1466_v33 = vmul.f32 %v5372_v17, %v6779_v1  ;;  %v1433_v35 = vadd.f32 %v1423_v24, %v1397_v2  ;;  %v1486_v36 = vmul.f32 %v5380_v23, %v6785_v3 }
 0x1a1   : > { %v1506_v37 = vmul.f32 %v5372_v17, %v6800_v8  ;;  %v1510_v38 = vmul.f32 %v5376_v27, %v6800_v8  ;;  %v1426_v42 = vsel %vm1094_vm0, %v1424_v4, %v1425_v31  ;;  %v1462_v45 = vadd.f32 %v1458_v32, %v1454_v29  ;;  %v5383_v29 = vld [vmem:[%s6757_s27 + $0x218] sm:$0xff] }
 0x1a2   : > { %v1398_v41 = vadd.f32 %v1390_v28, %v1378_v30  ;;  %v1474_v46 = vrot.slane %v1466_v33, 1  ;;  %5370 = vst [vmem:[%s6849_s29 + $0x70] sm:$0x7f] %v1433_v35  ;;  %v1494_v50 = vrot.slane %v1486_v36, 1  ;;  %v1455_v53 = vmul.f32 %v5373_v34, %v6791_v5 }
 0x1a3   : > { %v1522_v51 = vrot.slane %v1506_v37, 2  ;;  %v1523_v52 = vrot.slane %v1510_v38, 2  ;;  %v1459_v58 = vmul.f32 %v5381_v40, %v6794_v6  ;;  %v1467_v62 = vmul.f32 %v5373_v34, %v6797_v7  ;;  %v5379_v37 = vld [vmem:[%s6754_s26 + $0x238] sm:$0x1] }
 0x1a4   : > { %v1434_v55 = vadd.f32 %v1426_v42, %v1398_v41  ;;  %v1482_v56 = vadd.f32 %v1474_v46, %v1462_v45  ;;  %v1487_v12 = vmul.f32 %v5381_v40, %v6809_v15  ;;  %v1507_v13 = vmul.f32 %v5373_v34, %v6812_v16  ;;  %v5388_v46 = vld [vmem:[%s6754_s26 + $0x280] sm:$0xff] }
 0x1a5   : > { %v1524_v10 = vsel %vm1094_vm0, %v1522_v51, %v1523_v52  ;;  %v1511_v14 = vmul.f32 %v5377_v49, %v6812_v16  ;;  %v1463_v18 = vadd.f32 %v1459_v58, %v1455_v53  ;;  %v1475_v20 = vrot.slane %v1467_v62, 1  ;;  %v5396_v53 = vld [vmem:[%s6757_s27 + $0x280] sm:$0xff] }
 0x1a6   : > { %5371 = vst [vmem:[%s6849_s29 + $0x78] sm:$0x7f] %v1434_v55  ;;  %v1502_v17 = vadd.f32 %v1494_v50, %v1482_v56  ;;  %v1456_v60 = vmul.f32 %v5374_v54, %v6827_v39  ;;  %v1495_v23 = vrot.slane %v1487_v12, 1  ;;  %v1525_v24 = vrot.slane %v1507_v13, 2  ;;  %v5392_v62 = vld [vmem:[%s6754_s26 + $0x2a0] sm:$0x1] }
 0x1a7   : > { %v1526_v25 = vrot.slane %v1511_v14, 2  ;;  %v1460_v61 = vmul.f32 %v5382_v9, %v6831_v43  ;;  %v1483_v2 = vadd.f32 %v1475_v20, %v1463_v18  ;;  %v1468_v28 = vmul.f32 %v5374_v54, %v6834_v44 }
 0x1a8   : > { %v1538_v27 = vadd.f32 %v1524_v10, %v1502_v17  ;;  %v1488_v4 = vmul.f32 %v5382_v9, %v6838_v47  ;;  %v1508_v32 = vmul.f32 %v5374_v54, %v6841_v48  ;;  %v1512_v33 = vmul.f32 %v5378_v59, %v6841_v48  ;;  %v5389_v59 = vld [vmem:[%s6754_s26 + $0x288] sm:$0xff] }
 0x1a9   : > { %v1527_v30 = vsel %vm1094_vm0, %v1525_v24, %v1526_v25  ;;  %v1464_v31 = vadd.f32 %v1460_v61, %v1456_v60  ;;  %v1503_v34 = vadd.f32 %v1495_v23, %v1483_v2  ;;  %v1476_v35 = vrot.slane %v1468_v28, 1  ;;  %v5397_v61 = vld [vmem:[%s6757_s27 + $0x288] sm:$0xff] }
 0x1aa   : > { %5384 = vst [vmem:[%s6849_s29 + $0x80] sm:$0x7f] %v1538_v27  ;;  %v1496_v36 = vrot.slane %v1488_v4, 1  ;;  %v1457_v38 = vmul.f32 %v5375_v26, %v6856_v57  ;;  %v1528_v40 = vrot.slane %v1508_v32, 2  ;;  %v1529_v41 = vrot.slane %v1512_v33, 2  ;;  %v5390_v33 = vld [vmem:[%s6754_s26 + $0x290] sm:$0xff] }
 0x1ab   : > { %v1461_v42 = vmul.f32 %v5383_v29, %v6860_v11  ;;  %v1469_v45 = vmul.f32 %v5375_v26, %v6865_v19  ;;  %v1539_v49 = vadd.f32 %v1527_v30, %v1503_v34  ;;  %v1484_v50 = vadd.f32 %v1476_v35, %v1464_v31  ;;  %v5393_v4 = vld [vmem:[%s6754_s26 + $0x2a8] sm:$0x1] }
 0x1ac   : > { %v1489_v51 = vmul.f32 %v5383_v29, %v6870_v21  ;;  %v1509_v52 = vmul.f32 %v5375_v26, %v6873_v22  ;;  %v1530_v54 = vsel %vm1094_vm0, %v1528_v40, %v1529_v41  ;;  %v1513_v58 = vmul.f32 %v5379_v37, %v6873_v22 }
 0x1ad   : > { %v1465_v55 = vadd.f32 %v1461_v42, %v1457_v38  ;;  %v1477_v56 = vrot.slane %v1469_v45, 1  ;;  %5385 = vst [vmem:[%s6849_s29 + $0x88] sm:$0x7f] %v1539_v49  ;;  %v1504_v9 = vadd.f32 %v1496_v36, %v1484_v50  ;;  %v1561_v13 = vmul.f32 %v5388_v46, %v6773_v63  ;;  %v5398_v38 = vld [vmem:[%s6757_s27 + $0x290] sm:$0xff] }
 0x1ae   : > { %v1497_v10 = vrot.slane %v1489_v51, 1  ;;  %v1531_v12 = vrot.slane %v1509_v52, 2  ;;  %v1532_v17 = vrot.slane %v1513_v58, 2  ;;  %v1565_v18 = vmul.f32 %v5396_v53, %v6776_v0  ;;  %v5394_v51 = vld [vmem:[%s6754_s26 + $0x2b0] sm:$0x1]  ;;  %v5391_v58 = vld [vmem:[%s6754_s26 + $0x298] sm:$0xff] }
 0x1af   : > { %v1485_v14 = vadd.f32 %v1477_v56, %v1465_v55  ;;  %v1573_v20 = vmul.f32 %v5388_v46, %v6779_v1  ;;  %v1540_v60 = vadd.f32 %v1530_v54, %v1504_v9  ;;  %v1593_v23 = vmul.f32 %v5396_v53, %v6785_v3 }
 0x1b0   : > { %v1613_v24 = vmul.f32 %v5388_v46, %v6800_v8  ;;  %v1617_v25 = vmul.f32 %v5392_v62, %v6800_v8  ;;  %v1533_v27 = vsel %vm1094_vm0, %v1531_v12, %v1532_v17  ;;  %v1569_v2 = vadd.f32 %v1565_v18, %v1561_v13  ;;  %v5399_v13 = vld [vmem:[%s6757_s27 + $0x298] sm:$0xff] }
 0x1b1   : > { %v1505_v26 = vadd.f32 %v1497_v10, %v1485_v14  ;;  %v1581_v28 = vrot.slane %v1573_v20, 1  ;;  %5386 = vst [vmem:[%s6849_s29 + $0x90] sm:$0x7f] %v1540_v60  ;;  %v1601_v29 = vrot.slane %v1593_v23, 1  ;;  %v1562_v32 = vmul.f32 %v5389_v59, %v6791_v5 }
 0x1b2   : > { %v1629_v30 = vrot.slane %v1613_v24, 2  ;;  %v1630_v31 = vrot.slane %v1617_v25, 2  ;;  %v1566_v36 = vmul.f32 %v5397_v61, %v6794_v6  ;;  %v1574_v37 = vmul.f32 %v5389_v59, %v6797_v7  ;;  %v5395_v24 = vld [vmem:[%s6754_s26 + $0x2b8] sm:$0x1] }
 0x1b3   : > { %v1541_v34 = vadd.f32 %v1533_v27, %v1505_v26  ;;  %v1589_v35 = vadd.f32 %v1581_v28, %v1569_v2  ;;  %v1594_v41 = vmul.f32 %v5397_v61, %v6809_v15  ;;  %v1614_v42 = vmul.f32 %v5389_v59, %v6812_v16  ;;  %v5404_v28 = vld [vmem:[%s6754_s26 + $0x300] sm:$0xff] }
 0x1b4   : > { %v1631_v40 = vsel %vm1094_vm0, %v1629_v30, %v1630_v31  ;;  %v1618_v45 = vmul.f32 %v5393_v4, %v6812_v16  ;;  %v1570_v49 = vadd.f32 %v1566_v36, %v1562_v32  ;;  %v1582_v50 = vrot.slane %v1574_v37, 1  ;;  %v5412_v32 = vld [vmem:[%s6757_s27 + $0x300] sm:$0xff] }
 0x1b5   : > { %5387 = vst [vmem:[%s6849_s29 + $0x98] sm:$0x7f] %v1541_v34  ;;  %v1609_v46 = vadd.f32 %v1601_v29, %v1589_v35  ;;  %v1563_v52 = vmul.f32 %v5390_v33, %v6827_v39  ;;  %v1602_v53 = vrot.slane %v1594_v41, 1  ;;  %v1632_v54 = vrot.slane %v1614_v42, 2  ;;  %v5408_v37 = vld [vmem:[%s6754_s26 + $0x320] sm:$0x1] }
 0x1b6   : > { %v1633_v55 = vrot.slane %v1618_v45, 2  ;;  %v1567_v56 = vmul.f32 %v5398_v38, %v6831_v43  ;;  %v1590_v9 = vadd.f32 %v1582_v50, %v1570_v49  ;;  %v1575_v10 = vmul.f32 %v5390_v33, %v6834_v44 }
 0x1b7   : > { %v1645_v62 = vadd.f32 %v1631_v40, %v1609_v46  ;;  %v1595_v12 = vmul.f32 %v5398_v38, %v6838_v47  ;;  %v1615_v18 = vmul.f32 %v5390_v33, %v6841_v48  ;;  %v1619_v20 = vmul.f32 %v5394_v51, %v6841_v48  ;;  %v5405_v51 = vld [vmem:[%s6754_s26 + $0x308] sm:$0xff] }
 0x1b8   : > { %v1634_v14 = vsel %vm1094_vm0, %v1632_v54, %v1633_v55  ;;  %v1571_v17 = vadd.f32 %v1567_v56, %v1563_v52  ;;  %v1610_v59 = vadd.f32 %v1602_v53, %v1590_v9  ;;  %v1583_v60 = vrot.slane %v1575_v10, 1  ;;  %v5413_v56 = vld [vmem:[%s6757_s27 + $0x308] sm:$0xff] }
 0x1b9   : > { %5400 = vst [vmem:[%s6849_s29 + $0xa0] sm:$0x7f] %v1645_v62  ;;  %v1603_v23 = vrot.slane %v1595_v12, 1  ;;  %v1564_v25 = vmul.f32 %v5391_v58, %v6856_v57  ;;  %v1635_v61 = vrot.slane %v1615_v18, 2  ;;  %v1636_v26 = vrot.slane %v1619_v20, 2  ;;  %v5414_v20 = vld [vmem:[%s6757_s27 + $0x310] sm:$0xff] }
 0x1ba   : > { %v1568_v27 = vmul.f32 %v5399_v13, %v6860_v11  ;;  %v1576_v2 = vmul.f32 %v5391_v58, %v6865_v19  ;;  %v1646_v4 = vadd.f32 %v1634_v14, %v1610_v59  ;;  %v1591_v29 = vadd.f32 %v1583_v60, %v1571_v17  ;;  %v5409_v10 = vld [vmem:[%s6754_s26 + $0x328] sm:$0x1] }
 0x1bb   : > { %v1596_v30 = vmul.f32 %v5399_v13, %v6870_v21  ;;  %v1616_v31 = vmul.f32 %v5391_v58, %v6873_v22  ;;  %v1637_v33 = vsel %vm1094_vm0, %v1635_v61, %v1636_v26  ;;  %v1620_v36 = vmul.f32 %v5395_v24, %v6873_v22  ;;  %v5406_v13 = vld [vmem:[%s6754_s26 + $0x310] sm:$0xff] }
 0x1bc   : > { %v1572_v34 = vadd.f32 %v1568_v27, %v1564_v25  ;;  %v1584_v35 = vrot.slane %v1576_v2, 1  ;;  %5401 = vst [vmem:[%s6849_s29 + $0xa8] sm:$0x7f] %v1646_v4  ;;  %v1611_v38 = vadd.f32 %v1603_v23, %v1591_v29  ;;  %v1668_v42 = vmul.f32 %v5404_v28, %v6773_v63  ;;  %v5410_v26 = vld [vmem:[%s6754_s26 + $0x330] sm:$0x1] }
 0x1bd   : > { %v1604_v40 = vrot.slane %v1596_v30, 1  ;;  %v1638_v41 = vrot.slane %v1616_v31, 2  ;;  %v1639_v46 = vrot.slane %v1620_v36, 2  ;;  %v1672_v49 = vmul.f32 %v5412_v32, %v6776_v0  ;;  %v5415_v31 = vld [vmem:[%s6757_s27 + $0x318] sm:$0xff] }
 0x1be   : > { %v1592_v45 = vadd.f32 %v1584_v35, %v1572_v34  ;;  %v1680_v50 = vmul.f32 %v5404_v28, %v6779_v1  ;;  %v1647_v52 = vadd.f32 %v1637_v33, %v1611_v38  ;;  %v1700_v53 = vmul.f32 %v5412_v32, %v6785_v3 }
 0x1bf   : > { %v1720_v54 = vmul.f32 %v5404_v28, %v6800_v8  ;;  %v1724_v55 = vmul.f32 %v5408_v37, %v6800_v8  ;;  %v1640_v63 = vsel %vm1094_vm0, %v1638_v41, %v1639_v46  ;;  %v1676_v62 = vadd.f32 %v1672_v49, %v1668_v42  ;;  %v5411_v37 = vld [vmem:[%s6754_s26 + $0x338] sm:$0x1] }
 0x1c0   : > { %v1612_v58 = vadd.f32 %v1604_v40, %v1592_v45  ;;  %v1688_v9 = vrot.slane %v1680_v50, 1  ;;  %5402 = vst [vmem:[%s6849_s29 + $0xb0] sm:$0x7f] %v1647_v52  ;;  %v1708_v0 = vrot.slane %v1700_v53, 1  ;;  %v1669_v3 = vmul.f32 %v5405_v51, %v6791_v5  ;;  %v7149_v50 = vld [vmem:[%s6760_s28 + $0x1c] sm:$0xf] }
 0x1c1   : > { %v1736_v1 = vrot.slane %v1720_v54, 2  ;;  %v1737_v12 = vrot.slane %v1724_v55, 2  ;;  %v1673_v8 = vmul.f32 %v5413_v56, %v6794_v6  ;;  %v1681_v18 = vmul.f32 %v5405_v51, %v6797_v7  ;;  %v7154_v53 = vld [vmem:[%s6760_s28 + $0x20] sm:$0xf]  ;;  %v7157_v54 = vld [vmem:[%s6760_s28 + $0x24] sm:$0xf] }
 0x1c2   : > { %v1648_v14 = vadd.f32 %v1640_v63, %v1612_v58  ;;  %v1696_v17 = vadd.f32 %v1688_v9, %v1676_v62  ;;  %v1701_v60 = vmul.f32 %v5413_v56, %v6809_v15  ;;  %v1721_v23 = vmul.f32 %v5405_v51, %v6812_v16  ;;  %v5407_v15 = vld [vmem:[%s6754_s26 + $0x318] sm:$0xff]  ;;  %v5425_v55 = vld [vmem:[%s6754_s26 + $0x40] sm:$0xff] }
 0x1c3   : > { %v1738_v59 = vsel %vm1094_vm0, %v1736_v1, %v1737_v12  ;;  %v1725_v24 = vmul.f32 %v5409_v10, %v6812_v16  ;;  %v1677_v25 = vadd.f32 %v1673_v8, %v1669_v3  ;;  %v1689_v61 = vrot.slane %v1681_v18, 1  ;;  %v5433_v62 = vld [vmem:[%s6757_s27 + $0x40] sm:$0xff] }
 0x1c4   : > { %5403 = vst [vmem:[%s6849_s29 + $0xb8] sm:$0x7f] %v1648_v14  ;;  %v1716_v5 = vadd.f32 %v1708_v0, %v1696_v17  ;;  %v1670_v6 = vmul.f32 %v5406_v13, %v6827_v39  ;;  %v1709_v7 = vrot.slane %v1701_v60, 1  ;;  %v1739_v27 = vrot.slane %v1721_v23, 2  ;;  %v5429_v1 = vld [vmem:[%s6754_s26 + $0x60] sm:$0x1] }
 0x1c5   : > { %v1740_v2 = vrot.slane %v1725_v24, 2  ;;  %v1674_v28 = vmul.f32 %v5414_v20, %v6831_v43  ;;  %v1697_v29 = vadd.f32 %v1689_v61, %v1677_v25  ;;  %v1682_v16 = vmul.f32 %v5406_v13, %v6834_v44 }
 0x1c6   : > { %v1752_v4 = vadd.f32 %v1738_v59, %v1716_v5  ;;  %v1702_v30 = vmul.f32 %v5414_v20, %v6838_v47  ;;  %v1722_v39 = vmul.f32 %v5406_v13, %v6841_v48  ;;  %v1726_v34 = vmul.f32 %v5410_v26, %v6841_v48  ;;  %v7141_v48 = vld [vmem:[%s6760_s28 + $0x14] sm:$0xf]  ;;  %v5426_v5 = vld [vmem:[%s6754_s26 + $0x48] sm:$0xff] }
 0x1c7   : > { %v1741_v32 = vsel %vm1094_vm0, %v1739_v27, %v1740_v2  ;;  %v1678_v33 = vadd.f32 %v1674_v28, %v1670_v6  ;;  %v1717_v43 = vadd.f32 %v1709_v7, %v1697_v29  ;;  %v1690_v35 = vrot.slane %v1682_v16, 1  ;;  %v5434_v7 = vld [vmem:[%s6757_s27 + $0x48] sm:$0xff] }
 0x1c8   : > { %5416 = vst [vmem:[%s6849_s29 + $0xc0] sm:$0x7f] %v1752_v4  ;;  %v1710_v36 = vrot.slane %v1702_v30, 1  ;;  %v1671_v44 = vmul.f32 %v5407_v15, %v6856_v57  ;;  %v1742_v47 = vrot.slane %v1722_v39, 2  ;;  %v1743_v38 = vrot.slane %v1726_v34, 2 }
 0x1c9   : > { %v1675_v40 = vmul.f32 %v5415_v31, %v6860_v11  ;;  %v1683_v41 = vmul.f32 %v5407_v15, %v6865_v19  ;;  %v1753_v42 = vadd.f32 %v1741_v32, %v1717_v43  ;;  %v1698_v45 = vadd.f32 %v1690_v35, %v1678_v33  ;;  %v7146_v57 = vld [vmem:[%s6760_s28 + $0x18] sm:$0xf]  ;;  %v5430_v4 = vld [vmem:[%s6754_s26 + $0x68] sm:$0x1] }
 0x1ca   : > { %v1703_v46 = vmul.f32 %v5415_v31, %v6870_v21  ;;  %v1723_v49 = vmul.f32 %v5407_v15, %v6873_v22  ;;  %v1744_v51 = vsel %vm1094_vm0, %v1742_v47, %v1743_v38  ;;  %v1727_v19 = vmul.f32 %v5411_v37, %v6873_v22  ;;  %v1918_v47 = vld [vmem:[%s6849_s29] sm:$0x7f] }
 0x1cb   : > { %v1679_v52 = vadd.f32 %v1675_v40, %v1671_v44  ;;  %v1691_v11 = vrot.slane %v1683_v41, 1  ;;  %5417 = vst [vmem:[%s6849_s29 + $0xc8] sm:$0x7f] %v1753_v42  ;;  %v1718_v21 = vadd.f32 %v1710_v36, %v1698_v45  ;;  %v7162_v63 = vperm.slane %v7141_v48, 0  ;;  %v5427_v44 = vld [vmem:[%s6754_s26 + $0x50] sm:$0xff] }
 0x1cc   : > { %v1711_v56 = vrot.slane %v1703_v46, 1  ;;  %v1745_v58 = vrot.slane %v1723_v49, 2  ;;  %v1746_v10 = vrot.slane %v1727_v19, 2  ;;  %v7166_v0 = vperm.slane %v7146_v57, 0  ;;  %v5435_v45 = vld [vmem:[%s6757_s27 + $0x50] sm:$0xff] }
 0x1cd   : > { %v1699_v9 = vadd.f32 %v1691_v11, %v1679_v52  ;;  %v7169_v22 = vperm.slane %v7149_v50, 0  ;;  %v1754_v12 = vadd.f32 %v1744_v51, %v1718_v21  ;;  %v7173_v3 = vperm.slane %v7154_v53, 0  ;;  %v5431_v11 = vld [vmem:[%s6754_s26 + $0x70] sm:$0x1] }
 0x1ce   : > { %v7176_v13 = vperm.slane %v7157_v54, 0  ;;  %v1830_v14 = vmul.f32 %v5425_v55, %v7162_v63  ;;  %v1747_v8 = vsel %vm1094_vm0, %v1745_v58, %v1746_v10  ;;  %v1834_v18 = vmul.f32 %v5433_v62, %v7166_v0 }
 0x1cf   : > { %v1719_v17 = vadd.f32 %v1711_v56, %v1699_v9  ;;  %v1842_v20 = vmul.f32 %v5425_v55, %v7169_v22  ;;  %5418 = vst [vmem:[%s6849_s29 + $0xd0] sm:$0x7f] %v1754_v12  ;;  %v1862_v59 = vmul.f32 %v5433_v62, %v7173_v3  ;;  %v7187_v24 = vperm.slane %v7141_v48, 1  ;;  %v1919_v12 = vld [vmem:[%s6849_s29 + $0x8] sm:$0x7f] }
 0x1d0   : > { %v1882_v60 = vmul.f32 %v5425_v55, %v7176_v13  ;;  %v1886_v23 = vmul.f32 %v5429_v1, %v7176_v13  ;;  %v1838_v61 = vadd.f32 %v1834_v18, %v1830_v14  ;;  %v7191_v6 = vperm.slane %v7146_v57, 1 }
 0x1d1   : > { %v1755_v25 = vadd.f32 %v1747_v8, %v1719_v17  ;;  %v1850_v26 = vrot.slane %v1842_v20, 1  ;;  %v1870_v27 = vrot.slane %v1862_v59, 1  ;;  %v7195_v15 = vperm.slane %v7149_v50, 1 }
 0x1d2   : > { %v1898_v2 = vrot.slane %v1882_v60, 2  ;;  %v1899_v28 = vrot.slane %v1886_v23, 2  ;;  %v7200_v16 = vperm.slane %v7154_v53, 1  ;;  %v7203_v30 = vperm.slane %v7157_v54, 1  ;;  %v5428_v23 = vld [vmem:[%s6754_s26 + $0x58] sm:$0xff] }
 0x1d3   : > { %5419 = vst [vmem:[%s6849_s29 + $0xd8] sm:$0x7f] %v1755_v25  ;;  %v1858_v29 = vadd.f32 %v1850_v26, %v1838_v61  ;;  %v1831_v31 = vmul.f32 %v5426_v5, %v7187_v24  ;;  %v1835_v33 = vmul.f32 %v5434_v7, %v7191_v6  ;;  %v1843_v39 = vmul.f32 %v5426_v5, %v7195_v15 }
 0x1d4   : > { %v1900_v32 = vsel %vm1094_vm0, %v1898_v2, %v1899_v28  ;;  %v7210_v34 = vperm.slane %v7141_v48, 2  ;;  %v1863_v35 = vmul.f32 %v5434_v7, %v7200_v16  ;;  %v1883_v36 = vmul.f32 %v5426_v5, %v7203_v30  ;;  %v5436_v5 = vld [vmem:[%s6757_s27 + $0x58] sm:$0xff] }
 0x1d5   : > { %v1878_v43 = vadd.f32 %v1870_v27, %v1858_v29  ;;  %v1887_v37 = vmul.f32 %v5430_v4, %v7203_v30  ;;  %v1839_v38 = vadd.f32 %v1835_v33, %v1831_v31  ;;  %v1851_v40 = vrot.slane %v1843_v39, 1  ;;  %v5437_v27 = vld [vmem:[%s6754_s26 + $0xc0] sm:$0xff] }
 0x1d6   : > { %v7218_v41 = vperm.slane %v7146_v57, 2  ;;  %v7221_v42 = vperm.slane %v7149_v50, 2  ;;  %v1871_v49 = vrot.slane %v1863_v35, 1  ;;  %v1901_v51 = vrot.slane %v1883_v36, 2  ;;  %v5445_v29 = vld [vmem:[%s6757_s27 + $0xc0] sm:$0xff] }
 0x1d7   : > { %v1914_v46 = vadd.f32 %v1900_v32, %v1878_v43  ;;  %v1902_v52 = vrot.slane %v1887_v37, 2  ;;  %v1859_v19 = vadd.f32 %v1851_v40, %v1839_v38  ;;  %v7226_v55 = vperm.slane %v7154_v53, 2 }
 0x1d8   : > { %v7229_v21 = vperm.slane %v7157_v54, 2  ;;  %v1832_v56 = vmul.f32 %v5427_v44, %v7210_v34  ;;  %v1836_v9 = vmul.f32 %v5435_v45, %v7218_v41  ;;  %v1844_v10 = vmul.f32 %v5427_v44, %v7221_v42 }
 0x1d9   : > { %v1922_v58 = vadd.f32 %v1918_v47, %v1914_v46  ;;  %v1903_v62 = vsel %vm1094_vm0, %v1901_v51, %v1902_v52  ;;  %v1879_v1 = vadd.f32 %v1871_v49, %v1859_v19  ;;  %v1864_v14 = vmul.f32 %v5435_v45, %v7226_v55  ;;  %v5438_v51 = vld [vmem:[%s6754_s26 + $0xc8] sm:$0xff] }
 0x1da   : > { %v1884_v17 = vmul.f32 %v5427_v44, %v7229_v21  ;;  %v1888_v8 = vmul.f32 %v5431_v11, %v7229_v21  ;;  %v1840_v18 = vadd.f32 %v1836_v9, %v1832_v56  ;;  %v1852_v20 = vrot.slane %v1844_v10, 1  ;;  %v5441_v44 = vld [vmem:[%s6754_s26 + $0xe0] sm:$0x1] }
 0x1db   : > { %1926 = vst [vmem:[%s6849_s29] sm:$0x7f] %v1922_v58  ;;  %v7241_v59 = vperm.slane %v7141_v48, 3  ;;  %v7244_v60 = vperm.slane %v7146_v57, 3  ;;  %v1915_v25 = vadd.f32 %v1903_v62, %v1879_v1  ;;  %v1872_v61 = vrot.slane %v1864_v14, 1  ;;  %v5432_v57 = vld [vmem:[%s6754_s26 + $0x78] sm:$0x1] }
 0x1dc   : > { %v1904_v26 = vrot.slane %v1884_v17, 2  ;;  %v1905_v7 = vrot.slane %v1888_v8, 2  ;;  %v1860_v2 = vadd.f32 %v1852_v20, %v1840_v18  ;;  %v7250_v28 = vperm.slane %v7149_v50, 3  ;;  %v5446_v58 = vld [vmem:[%s6757_s27 + $0xc8] sm:$0xff] }
 0x1dd   : > { %v7253_v4 = vperm.slane %v7154_v53, 3  ;;  %v7256_v48 = vperm.slane %v7157_v54, 3  ;;  %v1923_v31 = vadd.f32 %v1919_v12, %v1915_v25  ;;  %v1833_v33 = vmul.f32 %v5428_v23, %v7241_v59  ;;  %v1920_v54 = vld [vmem:[%s6849_s29 + $0x10] sm:$0x7f]  ;;  %v5442_v8 = vld [vmem:[%s6754_s26 + $0xe8] sm:$0x1] }
 0x1de   : > { %v1906_v32 = vsel %vm1094_vm0, %v1904_v26, %v1905_v7  ;;  %v1837_v39 = vmul.f32 %v5436_v5, %v7244_v60  ;;  %v1880_v43 = vadd.f32 %v1872_v61, %v1860_v2  ;;  %v1845_v50 = vmul.f32 %v5428_v23, %v7250_v28  ;;  %v1921_v61 = vld [vmem:[%s6849_s29 + $0x18] sm:$0x7f] }
 0x1df   : > { %v1865_v53 = vmul.f32 %v5436_v5, %v7253_v4  ;;  %v1885_v35 = vmul.f32 %v5428_v23, %v7256_v48  ;;  %1927 = vst [vmem:[%s6849_s29 + $0x8] sm:$0x7f] %v1923_v31  ;;  %v1889_v37 = vmul.f32 %v5432_v57, %v7256_v48  ;;  %v1944_v47 = vmul.f32 %v5437_v27, %v7162_v63  ;;  %v5439_v57 = vld [vmem:[%s6754_s26 + $0xd0] sm:$0xff] }
 0x1e0   : > { %v1841_v36 = vadd.f32 %v1837_v39, %v1833_v33  ;;  %v1948_v38 = vmul.f32 %v5445_v29, %v7166_v0  ;;  %v1916_v40 = vadd.f32 %v1906_v32, %v1880_v43  ;;  %v1853_v45 = vrot.slane %v1845_v50, 1 }
 0x1e1   : > { %v1873_v46 = vrot.slane %v1865_v53, 1  ;;  %v1907_v49 = vrot.slane %v1885_v35, 2  ;;  %v1908_v52 = vrot.slane %v1889_v37, 2  ;;  %v1956_v19 = vmul.f32 %v5437_v27, %v7169_v22  ;;  %v5449_v37 = vld [vmem:[%s6849_s29 + $0x20] sm:$0x7f] }
 0x1e2   : > { %v1952_v11 = vadd.f32 %v1948_v38, %v1944_v47  ;;  %v1976_v56 = vmul.f32 %v5445_v29, %v7173_v3  ;;  %v1924_v62 = vadd.f32 %v1920_v54, %v1916_v40  ;;  %v1861_v9 = vadd.f32 %v1853_v45, %v1841_v36  ;;  %v5447_v29 = vld [vmem:[%s6757_s27 + $0xd0] sm:$0xff] }
 0x1e3   : > { %v1996_v10 = vmul.f32 %v5437_v27, %v7176_v13  ;;  %v2000_v1 = vmul.f32 %v5441_v44, %v7176_v13  ;;  %v1909_v12 = vsel %vm1094_vm0, %v1907_v49, %v1908_v52  ;;  %v1964_v14 = vrot.slane %v1956_v19, 1  ;;  %v5443_v54 = vld [vmem:[%s6754_s26 + $0xf0] sm:$0x1]  ;;  %v5448_v52 = vld [vmem:[%s6757_s27 + $0xd8] sm:$0xff] }
 0x1e4   : > { %v1984_v17 = vrot.slane %v1976_v56, 1  ;;  %v1945_v18 = vmul.f32 %v5438_v51, %v7187_v24  ;;  %1928 = vst [vmem:[%s6849_s29 + $0x10] sm:$0x7f] %v1924_v62  ;;  %v1881_v20 = vadd.f32 %v1873_v46, %v1861_v9  ;;  %v1949_v25 = vmul.f32 %v5446_v58, %v7191_v6 }
 0x1e5   : > { %v2012_v23 = vrot.slane %v1996_v10, 2  ;;  %v2013_v5 = vrot.slane %v2000_v1, 2  ;;  %v1972_v26 = vadd.f32 %v1964_v14, %v1952_v11  ;;  %v1957_v7 = vmul.f32 %v5438_v51, %v7195_v15  ;;  %v5450_v14 = vld [vmem:[%s6849_s29 + $0x28] sm:$0x7f] }
 0x1e6   : > { %v1977_v27 = vmul.f32 %v5446_v58, %v7200_v16  ;;  %v1997_v2 = vmul.f32 %v5438_v51, %v7203_v30  ;;  %v1917_v31 = vadd.f32 %v1909_v12, %v1881_v20  ;;  %v1953_v33 = vadd.f32 %v1949_v25, %v1945_v18  ;;  %v5440_v51 = vld [vmem:[%s6754_s26 + $0xd8] sm:$0xff] }
 0x1e7   : > { %v2014_v32 = vsel %vm1094_vm0, %v2012_v23, %v2013_v5  ;;  %v2001_v39 = vmul.f32 %v5442_v8, %v7203_v30  ;;  %v1992_v43 = vadd.f32 %v1984_v17, %v1972_v26  ;;  %v1965_v50 = vrot.slane %v1957_v7, 1  ;;  %v5444_v12 = vld [vmem:[%s6754_s26 + $0xf8] sm:$0x1]  ;;  %v5457_v26 = vld [vmem:[%s6754_s26 + $0x140] sm:$0xff] }
 0x1e8   : > { %v1985_v53 = vrot.slane %v1977_v27, 1  ;;  %v2015_v35 = vrot.slane %v1997_v2, 2  ;;  %v1925_v36 = vadd.f32 %v1921_v61, %v1917_v31  ;;  %v1946_v47 = vmul.f32 %v5439_v57, %v7210_v34  ;;  %v5465_v7 = vld [vmem:[%s6757_s27 + $0x140] sm:$0xff] }
 0x1e9   : > { %v2016_v44 = vrot.slane %v2001_v39, 2  ;;  %v1950_v38 = vmul.f32 %v5447_v29, %v7218_v41  ;;  %v2028_v40 = vadd.f32 %v2014_v32, %v1992_v43  ;;  %v1973_v45 = vadd.f32 %v1965_v50, %v1953_v33  ;;  %v5461_v43 = vld [vmem:[%s6754_s26 + $0x160] sm:$0x1]  ;;  %v5451_v50 = vld [vmem:[%s6849_s29 + $0x30] sm:$0x7f] }
 0x1ea   : > { %v1958_v46 = vmul.f32 %v5439_v57, %v7221_v42  ;;  %v1978_v49 = vmul.f32 %v5447_v29, %v7226_v55  ;;  %1929 = vst [vmem:[%s6849_s29 + $0x18] sm:$0x7f] %v1925_v36  ;;  %v1998_v56 = vmul.f32 %v5439_v57, %v7229_v21  ;;  %v2002_v58 = vmul.f32 %v5443_v54, %v7229_v21 }
 0x1eb   : > { %v2017_v11 = vsel %vm1094_vm0, %v2015_v35, %v2016_v44  ;;  %v1954_v19 = vadd.f32 %v1950_v38, %v1946_v47  ;;  %v2036_v62 = vadd.f32 %v5449_v37, %v2028_v40  ;;  %v1993_v9 = vadd.f32 %v1985_v53, %v1973_v45  ;;  %v5458_v40 = vld [vmem:[%s6754_s26 + $0x148] sm:$0xff] }
 0x1ec   : > { %v1966_v10 = vrot.slane %v1958_v46, 1  ;;  %v1986_v1 = vrot.slane %v1978_v49, 1  ;;  %v2018_v17 = vrot.slane %v1998_v56, 2  ;;  %v2019_v8 = vrot.slane %v2002_v58, 2  ;;  %v5466_v45 = vld [vmem:[%s6757_s27 + $0x148] sm:$0xff] }
 0x1ed   : > { %v1947_v18 = vmul.f32 %v5440_v51, %v7241_v59  ;;  %v1951_v20 = vmul.f32 %v5448_v52, %v7244_v60  ;;  %5453 = vst [vmem:[%s6849_s29 + $0x20] sm:$0x7f] %v2036_v62  ;;  %v2029_v23 = vadd.f32 %v2017_v11, %v1993_v9  ;;  %v1959_v25 = vmul.f32 %v5440_v51, %v7250_v28  ;;  %v5462_v62 = vld [vmem:[%s6754_s26 + $0x168] sm:$0x1]  ;;  %v5452_v9 = vld [vmem:[%s6849_s29 + $0x38] sm:$0x7f] }
 0x1ee   : > { %v1974_v5 = vadd.f32 %v1966_v10, %v1954_v19  ;;  %v1979_v61 = vmul.f32 %v5448_v52, %v7253_v4  ;;  %v2020_v27 = vsel %vm1094_vm0, %v2018_v17, %v2019_v8  ;;  %v1999_v57 = vmul.f32 %v5440_v51, %v7256_v48 }
 0x1ef   : > { %v1955_v2 = vadd.f32 %v1951_v20, %v1947_v18  ;;  %v2003_v29 = vmul.f32 %v5444_v12, %v7256_v48  ;;  %v2037_v31 = vadd.f32 %v5450_v14, %v2029_v23  ;;  %v1967_v33 = vrot.slane %v1959_v25, 1  ;;  %v5459_v23 = vld [vmem:[%s6754_s26 + $0x150] sm:$0xff] }
 0x1f0   : > { %v1994_v32 = vadd.f32 %v1986_v1, %v1974_v5  ;;  %v1987_v39 = vrot.slane %v1979_v61, 1  ;;  %v2021_v53 = vrot.slane %v1999_v57, 2  ;;  %v2058_v54 = vmul.f32 %v5457_v26, %v7162_v63  ;;  %v5467_v5 = vld [vmem:[%s6757_s27 + $0x150] sm:$0xff] }
 0x1f1   : > { %v2022_v35 = vrot.slane %v2003_v29, 2  ;;  %v2062_v36 = vmul.f32 %v5465_v7, %v7166_v0  ;;  %5454 = vst [vmem:[%s6849_s29 + $0x28] sm:$0x7f] %v2037_v31  ;;  %v1975_v44 = vadd.f32 %v1967_v33, %v1955_v2  ;;  %v2070_v47 = vmul.f32 %v5457_v26, %v7169_v22  ;;  %v5463_v31 = vld [vmem:[%s6754_s26 + $0x170] sm:$0x1] }
 0x1f2   : > { %v2030_v37 = vadd.f32 %v2020_v27, %v1994_v32  ;;  %v2090_v38 = vmul.f32 %v5465_v7, %v7173_v3  ;;  %v2110_v51 = vmul.f32 %v5457_v26, %v7176_v13  ;;  %v2114_v52 = vmul.f32 %v5461_v43, %v7176_v13  ;;  %v5469_v32 = vld [vmem:[%s6849_s29 + $0x40] sm:$0x7f] }
 0x1f3   : > { %v2023_v46 = vsel %vm1094_vm0, %v2021_v53, %v2022_v35  ;;  %v2066_v49 = vadd.f32 %v2062_v36, %v2058_v54  ;;  %v1995_v19 = vadd.f32 %v1987_v39, %v1975_v44  ;;  %v2078_v56 = vrot.slane %v2070_v47, 1  ;;  %v5468_v44 = vld [vmem:[%s6757_s27 + $0x158] sm:$0xff] }
 0x1f4   : > { %v2038_v11 = vadd.f32 %v5451_v50, %v2030_v37  ;;  %v2098_v58 = vrot.slane %v2090_v38, 1  ;;  %v2126_v10 = vrot.slane %v2110_v51, 2  ;;  %v2127_v1 = vrot.slane %v2114_v52, 2  ;;  %v5460_v37 = vld [vmem:[%s6754_s26 + $0x158] sm:$0xff] }
 0x1f5   : > { %v2059_v12 = vmul.f32 %v5458_v40, %v7187_v24  ;;  %v2063_v14 = vmul.f32 %v5466_v45, %v7191_v6  ;;  %v2031_v17 = vadd.f32 %v2023_v46, %v1995_v19  ;;  %v2086_v8 = vadd.f32 %v2078_v56, %v2066_v49  ;;  %v5470_v19 = vld [vmem:[%s6849_s29 + $0x48] sm:$0x7f] }
 0x1f6   : > { %5455 = vst [vmem:[%s6849_s29 + $0x30] sm:$0x7f] %v2038_v11  ;;  %v2071_v18 = vmul.f32 %v5458_v40, %v7195_v15  ;;  %v2091_v20 = vmul.f32 %v5466_v45, %v7200_v16  ;;  %v2128_v25 = vsel %vm1094_vm0, %v2126_v10, %v2127_v1  ;;  %v2111_v26 = vmul.f32 %v5458_v40, %v7203_v30  ;;  %v5464_v11 = vld [vmem:[%s6754_s26 + $0x178] sm:$0x1] }
 0x1f7   : > { %v2067_v61 = vadd.f32 %v2063_v14, %v2059_v12  ;;  %v2115_v7 = vmul.f32 %v5462_v62, %v7203_v30  ;;  %v2039_v27 = vadd.f32 %v5452_v9, %v2031_v17  ;;  %v2106_v2 = vadd.f32 %v2098_v58, %v2086_v8  ;;  %v5477_v17 = vld [vmem:[%s6754_s26 + $0x1c0] sm:$0xff] }
 0x1f8   : > { %v2079_v57 = vrot.slane %v2071_v18, 1  ;;  %v2099_v29 = vrot.slane %v2091_v20, 1  ;;  %v2129_v33 = vrot.slane %v2111_v26, 2  ;;  %v2060_v43 = vmul.f32 %v5459_v23, %v7210_v34  ;;  %v5485_v8 = vld [vmem:[%s6757_s27 + $0x1c0] sm:$0xff] }
 0x1f9   : > { %v2130_v39 = vrot.slane %v2115_v7, 2  ;;  %v2064_v50 = vmul.f32 %v5467_v5, %v7218_v41  ;;  %5456 = vst [vmem:[%s6849_s29 + $0x38] sm:$0x7f] %v2039_v27  ;;  %v2142_v53 = vadd.f32 %v2128_v25, %v2106_v2  ;;  %v2072_v54 = vmul.f32 %v5459_v23, %v7221_v42  ;;  %v5481_v27 = vld [vmem:[%s6754_s26 + $0x1e0] sm:$0x1] }
 0x1fa   : > { %v2087_v35 = vadd.f32 %v2079_v57, %v2067_v61  ;;  %v2092_v36 = vmul.f32 %v5467_v5, %v7226_v55  ;;  %v2112_v40 = vmul.f32 %v5459_v23, %v7229_v21  ;;  %v2116_v45 = vmul.f32 %v5463_v31, %v7229_v21  ;;  %v5471_v2 = vld [vmem:[%s6849_s29 + $0x50] sm:$0x7f] }
 0x1fb   : > { %v2131_v47 = vsel %vm1094_vm0, %v2129_v33, %v2130_v39  ;;  %v2068_v38 = vadd.f32 %v2064_v50, %v2060_v43  ;;  %v2150_v46 = vadd.f32 %v5469_v32, %v2142_v53  ;;  %v2080_v51 = vrot.slane %v2072_v54, 1  ;;  %v5478_v53 = vld [vmem:[%s6754_s26 + $0x1c8] sm:$0xff] }
 0x1fc   : > { %v2107_v49 = vadd.f32 %v2099_v29, %v2087_v35  ;;  %v2100_v52 = vrot.slane %v2092_v36, 1  ;;  %v2132_v56 = vrot.slane %v2112_v40, 2  ;;  %v2133_v58 = vrot.slane %v2116_v45, 2  ;;  %v5486_v35 = vld [vmem:[%s6757_s27 + $0x1c8] sm:$0xff] }
 0x1fd   : > { %v2061_v62 = vmul.f32 %v5460_v37, %v7241_v59  ;;  %v2065_v9 = vmul.f32 %v5468_v44, %v7244_v60  ;;  %5473 = vst [vmem:[%s6849_s29 + $0x40] sm:$0x7f] %v2150_v46  ;;  %v2088_v1 = vadd.f32 %v2080_v51, %v2068_v38  ;;  %v2073_v12 = vmul.f32 %v5460_v37, %v7250_v28  ;;  %v5482_v46 = vld [vmem:[%s6754_s26 + $0x1e8] sm:$0x1] }
 0x1fe   : > { %v2143_v10 = vadd.f32 %v2131_v47, %v2107_v49  ;;  %v2093_v14 = vmul.f32 %v5468_v44, %v7253_v4  ;;  %v2134_v18 = vsel %vm1094_vm0, %v2132_v56, %v2133_v58  ;;  %v2113_v23 = vmul.f32 %v5460_v37, %v7256_v48  ;;  %v5472_v49 = vld [vmem:[%s6849_s29 + $0x58] sm:$0x7f] }
 0x1ff   : > { %v2069_v20 = vadd.f32 %v2065_v9, %v2061_v62  ;;  %v2117_v5 = vmul.f32 %v5464_v11, %v7256_v48  ;;  %v2108_v61 = vadd.f32 %v2100_v52, %v2088_v1  ;;  %v2081_v26 = vrot.slane %v2073_v12, 1  ;;  %v5487_v1 = vld [vmem:[%s6757_s27 + $0x1d0] sm:$0xff] }
 0x200   : > { %v2151_v25 = vadd.f32 %v5470_v19, %v2143_v10  ;;  %v2101_v7 = vrot.slane %v2093_v14, 1  ;;  %v2135_v57 = vrot.slane %v2113_v23, 2  ;;  %v2172_v31 = vmul.f32 %v5477_v17, %v7162_v63  ;;  %v5479_v10 = vld [vmem:[%s6754_s26 + $0x1d0] sm:$0xff] }
 0x201   : > { %v2136_v29 = vrot.slane %v2117_v5, 2  ;;  %v2176_v32 = vmul.f32 %v5485_v8, %v7166_v0  ;;  %v2144_v33 = vadd.f32 %v2134_v18, %v2108_v61  ;;  %v2089_v39 = vadd.f32 %v2081_v26, %v2069_v20  ;;  %v5489_v61 = vld [vmem:[%s6849_s29 + $0x60] sm:$0x7f] }
 0x202   : > { %5474 = vst [vmem:[%s6849_s29 + $0x48] sm:$0x7f] %v2151_v25  ;;  %v2184_v43 = vmul.f32 %v5477_v17, %v7169_v22  ;;  %v2204_v50 = vmul.f32 %v5485_v8, %v7173_v3  ;;  %v2224_v37 = vmul.f32 %v5477_v17, %v7176_v13  ;;  %v2228_v44 = vmul.f32 %v5481_v27, %v7176_v13  ;;  %v5483_v25 = vld [vmem:[%s6754_s26 + $0x1f0] sm:$0x1] }
 0x203   : > { %v2137_v54 = vsel %vm1094_vm0, %v2135_v57, %v2136_v29  ;;  %v2180_v36 = vadd.f32 %v2176_v32, %v2172_v31  ;;  %v2152_v47 = vadd.f32 %v5471_v2, %v2144_v33  ;;  %v2109_v38 = vadd.f32 %v2101_v7, %v2089_v39  ;;  %v5480_v33 = vld [vmem:[%s6754_s26 + $0x1d8] sm:$0xff] }
 0x204   : > { %v2192_v40 = vrot.slane %v2184_v43, 1  ;;  %v2212_v45 = vrot.slane %v2204_v50, 1  ;;  %v2240_v51 = vrot.slane %v2224_v37, 2  ;;  %v2241_v52 = vrot.slane %v2228_v44, 2  ;;  %v5488_v39 = vld [vmem:[%s6757_s27 + $0x1d8] sm:$0xff] }
 0x205   : > { %v2173_v11 = vmul.f32 %v5478_v53, %v7187_v24  ;;  %v2177_v19 = vmul.f32 %v5486_v35, %v7191_v6  ;;  %5475 = vst [vmem:[%s6849_s29 + $0x50] sm:$0x7f] %v2152_v47  ;;  %v2145_v56 = vadd.f32 %v2137_v54, %v2109_v38  ;;  %v2185_v62 = vmul.f32 %v5478_v53, %v7195_v15  ;;  %v5484_v47 = vld [vmem:[%s6754_s26 + $0x1f8] sm:$0x1]  ;;  %v5490_v38 = vld [vmem:[%s6849_s29 + $0x68] sm:$0x7f] }
 0x206   : > { %v2200_v58 = vadd.f32 %v2192_v40, %v2180_v36  ;;  %v2205_v9 = vmul.f32 %v5486_v35, %v7200_v16  ;;  %v2242_v12 = vsel %vm1094_vm0, %v2240_v51, %v2241_v52  ;;  %v2225_v17 = vmul.f32 %v5478_v53, %v7203_v30 }
 0x207   : > { %v2181_v14 = vadd.f32 %v2177_v19, %v2173_v11  ;;  %v2229_v8 = vmul.f32 %v5482_v46, %v7203_v30  ;;  %v2153_v18 = vadd.f32 %v5472_v49, %v2145_v56  ;;  %v2193_v23 = vrot.slane %v2185_v62, 1  ;;  %v5497_v56 = vld [vmem:[%s6754_s26 + $0x240] sm:$0xff] }
 0x208   : > { %v2220_v20 = vadd.f32 %v2212_v45, %v2200_v58  ;;  %v2213_v5 = vrot.slane %v2205_v9, 1  ;;  %v2243_v26 = vrot.slane %v2225_v17, 2  ;;  %v2174_v27 = vmul.f32 %v5479_v10, %v7210_v34  ;;  %v5505_v58 = vld [vmem:[%s6757_s27 + $0x240] sm:$0xff] }
 0x209   : > { %v2244_v7 = vrot.slane %v2229_v8, 2  ;;  %v2178_v2 = vmul.f32 %v5487_v1, %v7218_v41  ;;  %5476 = vst [vmem:[%s6849_s29 + $0x58] sm:$0x7f] %v2153_v18  ;;  %v2201_v29 = vadd.f32 %v2193_v23, %v2181_v14  ;;  %v2186_v31 = vmul.f32 %v5479_v10, %v7221_v42  ;;  %v5501_v18 = vld [vmem:[%s6754_s26 + $0x260] sm:$0x1] }
 0x20a   : > { %v2256_v57 = vadd.f32 %v2242_v12, %v2220_v20  ;;  %v2206_v32 = vmul.f32 %v5487_v1, %v7226_v55  ;;  %v2226_v53 = vmul.f32 %v5479_v10, %v7229_v21  ;;  %v2230_v35 = vmul.f32 %v5483_v25, %v7229_v21  ;;  %v5491_v20 = vld [vmem:[%s6849_s29 + $0x70] sm:$0x7f] }
 0x20b   : > { %v2245_v43 = vsel %vm1094_vm0, %v2243_v26, %v2244_v7  ;;  %v2182_v50 = vadd.f32 %v2178_v2, %v2174_v27  ;;  %v2221_v36 = vadd.f32 %v2213_v5, %v2201_v29  ;;  %v2194_v37 = vrot.slane %v2186_v31, 1  ;;  %v5506_v29 = vld [vmem:[%s6757_s27 + $0x248] sm:$0xff] }
 0x20c   : > { %v2264_v54 = vadd.f32 %v5489_v61, %v2256_v57  ;;  %v2214_v44 = vrot.slane %v2206_v32, 1  ;;  %v2246_v40 = vrot.slane %v2226_v53, 2  ;;  %v2247_v45 = vrot.slane %v2230_v35, 2  ;;  %v5498_v57 = vld [vmem:[%s6754_s26 + $0x248] sm:$0xff] }
 0x20d   : > { %v2175_v46 = vmul.f32 %v5480_v33, %v7241_v59  ;;  %v2179_v49 = vmul.f32 %v5488_v39, %v7244_v60  ;;  %v2257_v51 = vadd.f32 %v2245_v43, %v2221_v36  ;;  %v2202_v52 = vadd.f32 %v2194_v37, %v2182_v50  ;;  %v5492_v36 = vld [vmem:[%s6849_s29 + $0x78] sm:$0x7f] }
 0x20e   : > { %5493 = vst [vmem:[%s6849_s29 + $0x60] sm:$0x7f] %v2264_v54  ;;  %v2187_v11 = vmul.f32 %v5480_v33, %v7250_v28  ;;  %v2207_v19 = vmul.f32 %v5488_v39, %v7253_v4  ;;  %v2248_v62 = vsel %vm1094_vm0, %v2246_v40, %v2247_v45  ;;  %v2227_v10 = vmul.f32 %v5480_v33, %v7256_v48  ;;  %v5502_v54 = vld [vmem:[%s6754_s26 + $0x268] sm:$0x1] }
 0x20f   : > { %v2183_v9 = vadd.f32 %v2179_v49, %v2175_v46  ;;  %v2231_v1 = vmul.f32 %v5484_v47, %v7256_v48  ;;  %v2265_v12 = vadd.f32 %v5490_v38, %v2257_v51  ;;  %v2222_v14 = vadd.f32 %v2214_v44, %v2202_v52  ;;  %v5499_v51 = vld [vmem:[%s6754_s26 + $0x250] sm:$0xff] }
 0x210   : > { %v2195_v17 = vrot.slane %v2187_v11, 1  ;;  %v2215_v8 = vrot.slane %v2207_v19, 1  ;;  %v2249_v23 = vrot.slane %v2227_v10, 2  ;;  %v2286_v25 = vmul.f32 %v5497_v56, %v7162_v63  ;;  %v5507_v52 = vld [vmem:[%s6757_s27 + $0x250] sm:$0xff] }
 0x211   : > { %v2250_v5 = vrot.slane %v2231_v1, 2  ;;  %v2290_v61 = vmul.f32 %v5505_v58, %v7166_v0  ;;  %5494 = vst [vmem:[%s6849_s29 + $0x68] sm:$0x7f] %v2265_v12  ;;  %v2258_v26 = vadd.f32 %v2248_v62, %v2222_v14  ;;  %v2298_v27 = vmul.f32 %v5497_v56, %v7169_v22  ;;  %v5503_v12 = vld [vmem:[%s6754_s26 + $0x270] sm:$0x1] }
 0x212   : > { %v2203_v7 = vadd.f32 %v2195_v17, %v2183_v9  ;;  %v2318_v2 = vmul.f32 %v5505_v58, %v7173_v3  ;;  %v2338_v33 = vmul.f32 %v5497_v56, %v7176_v13  ;;  %v2342_v39 = vmul.f32 %v5501_v18, %v7176_v13  ;;  %v5509_v14 = vld [vmem:[%s6849_s29 + $0x80] sm:$0x7f] }
 0x213   : > { %v2251_v31 = vsel %vm1094_vm0, %v2249_v23, %v2250_v5  ;;  %v2294_v32 = vadd.f32 %v2290_v61, %v2286_v25  ;;  %v2266_v43 = vadd.f32 %v5491_v20, %v2258_v26  ;;  %v2306_v53 = vrot.slane %v2298_v27, 1  ;;  %v5500_v26 = vld [vmem:[%s6754_s26 + $0x258] sm:$0xff] }
 0x214   : > { %v2223_v50 = vadd.f32 %v2215_v8, %v2203_v7  ;;  %v2326_v35 = vrot.slane %v2318_v2, 1  ;;  %v2354_v37 = vrot.slane %v2338_v33, 2  ;;  %v2355_v44 = vrot.slane %v2342_v39, 2  ;;  %v5508_v7 = vld [vmem:[%s6757_s27 + $0x258] sm:$0xff] }
 0x215   : > { %v2287_v47 = vmul.f32 %v5498_v57, %v7187_v24  ;;  %v2291_v38 = vmul.f32 %v5506_v29, %v7191_v6  ;;  %5495 = vst [vmem:[%s6849_s29 + $0x70] sm:$0x7f] %v2266_v43  ;;  %v2314_v45 = vadd.f32 %v2306_v53, %v2294_v32  ;;  %v2299_v46 = vmul.f32 %v5498_v57, %v7195_v15  ;;  %v5504_v43 = vld [vmem:[%s6754_s26 + $0x278] sm:$0x1] }
 0x216   : > { %v2259_v40 = vadd.f32 %v2251_v31, %v2223_v50  ;;  %v2319_v49 = vmul.f32 %v5506_v29, %v7200_v16  ;;  %v2356_v11 = vsel %vm1094_vm0, %v2354_v37, %v2355_v44  ;;  %v2339_v56 = vmul.f32 %v5498_v57, %v7203_v30  ;;  %v5510_v50 = vld [vmem:[%s6849_s29 + $0x88] sm:$0x7f] }
 0x217   : > { %v2295_v19 = vadd.f32 %v2291_v38, %v2287_v47  ;;  %v2343_v58 = vmul.f32 %v5502_v54, %v7203_v30  ;;  %v2334_v9 = vadd.f32 %v2326_v35, %v2314_v45  ;;  %v2307_v10 = vrot.slane %v2299_v46, 1  ;;  %v5525_v45 = vld [vmem:[%s6757_s27 + $0x2c0] sm:$0xff] }
 0x218   : > { %v2267_v62 = vadd.f32 %v5492_v36, %v2259_v40  ;;  %v2327_v1 = vrot.slane %v2319_v49, 1  ;;  %v2357_v17 = vrot.slane %v2339_v56, 2  ;;  %v2288_v18 = vmul.f32 %v5499_v51, %v7210_v34  ;;  %v5517_v40 = vld [vmem:[%s6754_s26 + $0x2c0] sm:$0xff] }
 0x219   : > { %v2358_v8 = vrot.slane %v2343_v58, 2  ;;  %v2292_v20 = vmul.f32 %v5507_v52, %v7218_v41  ;;  %v2370_v23 = vadd.f32 %v2356_v11, %v2334_v9  ;;  %v2315_v5 = vadd.f32 %v2307_v10, %v2295_v19  ;;  %v5511_v9 = vld [vmem:[%s6849_s29 + $0x90] sm:$0x7f] }
 0x21a   : > { %5496 = vst [vmem:[%s6849_s29 + $0x78] sm:$0x7f] %v2267_v62  ;;  %v2300_v25 = vmul.f32 %v5499_v51, %v7221_v42  ;;  %v2320_v61 = vmul.f32 %v5507_v52, %v7226_v55  ;;  %v2340_v57 = vmul.f32 %v5499_v51, %v7229_v21  ;;  %v2344_v29 = vmul.f32 %v5503_v12, %v7229_v21  ;;  %v5521_v62 = vld [vmem:[%s6754_s26 + $0x2e0] sm:$0x1] }
 0x21b   : > { %v2359_v27 = vsel %vm1094_vm0, %v2357_v17, %v2358_v8  ;;  %v2296_v2 = vadd.f32 %v2292_v20, %v2288_v18  ;;  %v2378_v31 = vadd.f32 %v5509_v14, %v2370_v23  ;;  %v2335_v32 = vadd.f32 %v2327_v1, %v2315_v5  ;;  %v5518_v23 = vld [vmem:[%s6754_s26 + $0x2c8] sm:$0xff] }
 0x21c   : > { %v2308_v33 = vrot.slane %v2300_v25, 1  ;;  %v2328_v39 = vrot.slane %v2320_v61, 1  ;;  %v2360_v53 = vrot.slane %v2340_v57, 2  ;;  %v2361_v35 = vrot.slane %v2344_v29, 2  ;;  %v5526_v5 = vld [vmem:[%s6757_s27 + $0x2c8] sm:$0xff] }
 0x21d   : > { %v2289_v54 = vmul.f32 %v5500_v26, %v7241_v59  ;;  %v2293_v36 = vmul.f32 %v5508_v7, %v7244_v60  ;;  %5513 = vst [vmem:[%s6849_s29 + $0x80] sm:$0x7f] %v2378_v31  ;;  %v2371_v37 = vadd.f32 %v2359_v27, %v2335_v32  ;;  %v2301_v47 = vmul.f32 %v5500_v26, %v7250_v28  ;;  %v5522_v31 = vld [vmem:[%s6754_s26 + $0x2e8] sm:$0x1]  ;;  %v5512_v32 = vld [vmem:[%s6849_s29 + $0x98] sm:$0x7f] }
 0x21e   : > { %v2316_v44 = vadd.f32 %v2308_v33, %v2296_v2  ;;  %v2321_v38 = vmul.f32 %v5508_v7, %v7253_v4  ;;  %v2362_v46 = vsel %vm1094_vm0, %v2360_v53, %v2361_v35  ;;  %v2341_v51 = vmul.f32 %v5500_v26, %v7256_v48 }
 0x21f   : > { %v2297_v49 = vadd.f32 %v2293_v36, %v2289_v54  ;;  %v2345_v52 = vmul.f32 %v5504_v43, %v7256_v48  ;;  %v2379_v11 = vadd.f32 %v5510_v50, %v2371_v37  ;;  %v2309_v56 = vrot.slane %v2301_v47, 1  ;;  %v5519_v37 = vld [vmem:[%s6754_s26 + $0x2d0] sm:$0xff] }
 0x220   : > { %v2336_v19 = vadd.f32 %v2328_v39, %v2316_v44  ;;  %v2329_v58 = vrot.slane %v2321_v38, 1  ;;  %v2363_v10 = vrot.slane %v2341_v51, 2  ;;  %v2400_v12 = vmul.f32 %v5517_v40, %v7162_v63  ;;  %v5527_v44 = vld [vmem:[%s6757_s27 + $0x2d0] sm:$0xff] }
 0x221   : > { %v2364_v1 = vrot.slane %v2345_v52, 2  ;;  %v2404_v14 = vmul.f32 %v5525_v45, %v7166_v0  ;;  %5514 = vst [vmem:[%s6849_s29 + $0x88] sm:$0x7f] %v2379_v11  ;;  %v2317_v8 = vadd.f32 %v2309_v56, %v2297_v49  ;;  %v2412_v18 = vmul.f32 %v5517_v40, %v7169_v22  ;;  %v5523_v11 = vld [vmem:[%s6754_s26 + $0x2f0] sm:$0x1] }
 0x222   : > { %v2372_v17 = vadd.f32 %v2362_v46, %v2336_v19  ;;  %v2432_v20 = vmul.f32 %v5525_v45, %v7173_v3  ;;  %v2452_v26 = vmul.f32 %v5517_v40, %v7176_v13  ;;  %v2456_v7 = vmul.f32 %v5521_v62, %v7176_v13  ;;  %v5529_v19 = vld [vmem:[%s6849_s29 + $0xa0] sm:$0x7f] }
 0x223   : > { %v2365_v25 = vsel %vm1094_vm0, %v2363_v10, %v2364_v1  ;;  %v2408_v61 = vadd.f32 %v2404_v14, %v2400_v12  ;;  %v2337_v2 = vadd.f32 %v2329_v58, %v2317_v8  ;;  %v2420_v57 = vrot.slane %v2412_v18, 1  ;;  %v5528_v8 = vld [vmem:[%s6757_s27 + $0x2d8] sm:$0xff] }
 0x224   : > { %v2380_v27 = vadd.f32 %v5511_v9, %v2372_v17  ;;  %v2440_v29 = vrot.slane %v2432_v20, 1  ;;  %v2468_v33 = vrot.slane %v2452_v26, 2  ;;  %v2469_v39 = vrot.slane %v2456_v7, 2  ;;  %v5520_v17 = vld [vmem:[%s6754_s26 + $0x2d8] sm:$0xff] }
 0x225   : > { %v2401_v43 = vmul.f32 %v5518_v23, %v7187_v24  ;;  %v2405_v50 = vmul.f32 %v5526_v5, %v7191_v6  ;;  %v2373_v53 = vadd.f32 %v2365_v25, %v2337_v2  ;;  %v2428_v35 = vadd.f32 %v2420_v57, %v2408_v61  ;;  %v5530_v2 = vld [vmem:[%s6849_s29 + $0xa8] sm:$0x7f] }
 0x226   : > { %5515 = vst [vmem:[%s6849_s29 + $0x90] sm:$0x7f] %v2380_v27  ;;  %v2413_v54 = vmul.f32 %v5518_v23, %v7195_v15  ;;  %v2433_v36 = vmul.f32 %v5526_v5, %v7200_v16  ;;  %v2470_v47 = vsel %vm1094_vm0, %v2468_v33, %v2469_v39  ;;  %v2453_v40 = vmul.f32 %v5518_v23, %v7203_v30  ;;  %v5524_v27 = vld [vmem:[%s6754_s26 + $0x2f8] sm:$0x1] }
 0x227   : > { %v2409_v38 = vadd.f32 %v2405_v50, %v2401_v43  ;;  %v2457_v45 = vmul.f32 %v5522_v31, %v7203_v30  ;;  %v2381_v46 = vadd.f32 %v5512_v32, %v2373_v53  ;;  %v2448_v49 = vadd.f32 %v2440_v29, %v2428_v35  ;;  %v5537_v53 = vld [vmem:[%s6754_s26 + $0x340] sm:$0xff] }
 0x228   : > { %v2421_v51 = vrot.slane %v2413_v54, 1  ;;  %v2441_v52 = vrot.slane %v2433_v36, 1  ;;  %v2471_v56 = vrot.slane %v2453_v40, 2  ;;  %v2402_v62 = vmul.f32 %v5519_v37, %v7210_v34  ;;  %v5545_v35 = vld [vmem:[%s6757_s27 + $0x340] sm:$0xff] }
 0x229   : > { %v2472_v58 = vrot.slane %v2457_v45, 2  ;;  %v2406_v9 = vmul.f32 %v5527_v44, %v7218_v41  ;;  %5516 = vst [vmem:[%s6849_s29 + $0x98] sm:$0x7f] %v2381_v46  ;;  %v2484_v10 = vadd.f32 %v2470_v47, %v2448_v49  ;;  %v2414_v12 = vmul.f32 %v5519_v37, %v7221_v42  ;;  %v5541_v46 = vld [vmem:[%s6754_s26 + $0x360] sm:$0x1] }
 0x22a   : > { %v2429_v1 = vadd.f32 %v2421_v51, %v2409_v38  ;;  %v2434_v14 = vmul.f32 %v5527_v44, %v7226_v55  ;;  %v2454_v23 = vmul.f32 %v5519_v37, %v7229_v21  ;;  %v2458_v5 = vmul.f32 %v5523_v11, %v7229_v21  ;;  %v5531_v49 = vld [vmem:[%s6849_s29 + $0xb0] sm:$0x7f] }
 0x22b   : > { %v2473_v18 = vsel %vm1094_vm0, %v2471_v56, %v2472_v58  ;;  %v2410_v20 = vadd.f32 %v2406_v9, %v2402_v62  ;;  %v2492_v25 = vadd.f32 %v5529_v19, %v2484_v10  ;;  %v2422_v26 = vrot.slane %v2414_v12, 1  ;;  %v5538_v10 = vld [vmem:[%s6754_s26 + $0x348] sm:$0xff] }
 0x22c   : > { %v2449_v61 = vadd.f32 %v2441_v52, %v2429_v1  ;;  %v2442_v7 = vrot.slane %v2434_v14, 1  ;;  %v2474_v57 = vrot.slane %v2454_v23, 2  ;;  %v2475_v29 = vrot.slane %v2458_v5, 2  ;;  %v5546_v1 = vld [vmem:[%s6757_s27 + $0x348] sm:$0xff] }
 0x22d   : > { %v2403_v31 = vmul.f32 %v5520_v17, %v7241_v59  ;;  %v2407_v32 = vmul.f32 %v5528_v8, %v7244_v60  ;;  %5533 = vst [vmem:[%s6849_s29 + $0xa0] sm:$0x7f] %v2492_v25  ;;  %v2430_v39 = vadd.f32 %v2422_v26, %v2410_v20  ;;  %v2415_v43 = vmul.f32 %v5520_v17, %v7250_v28  ;;  %v5542_v23 = vld [vmem:[%s6754_s26 + $0x368] sm:$0x1] }
 0x22e   : > { %v2485_v33 = vadd.f32 %v2473_v18, %v2449_v61  ;;  %v2435_v50 = vmul.f32 %v5528_v8, %v7253_v4  ;;  %v2476_v54 = vsel %vm1094_vm0, %v2474_v57, %v2475_v29  ;;  %v2455_v37 = vmul.f32 %v5520_v17, %v7256_v48  ;;  %v5547_v57 = vld [vmem:[%s6757_s27 + $0x350] sm:$0xff] }
 0x22f   : > { %v2411_v36 = vadd.f32 %v2407_v32, %v2403_v31  ;;  %v2459_v44 = vmul.f32 %v5524_v27, %v7256_v48  ;;  %v2450_v38 = vadd.f32 %v2442_v7, %v2430_v39  ;;  %v2423_v40 = vrot.slane %v2415_v43, 1 }
 0x230   : > { %v2493_v47 = vadd.f32 %v5530_v2, %v2485_v33  ;;  %v2443_v45 = vrot.slane %v2435_v50, 1  ;;  %v2477_v51 = vrot.slane %v2455_v37, 2  ;;  %v2514_v11 = vmul.f32 %v5537_v53, %v7162_v63  ;;  %v5539_v2 = vld [vmem:[%s6754_s26 + $0x350] sm:$0xff] }
 0x231   : > { %v2478_v52 = vrot.slane %v2459_v44, 2  ;;  %v2518_v19 = vmul.f32 %v5545_v35, %v7166_v0  ;;  %v2486_v56 = vadd.f32 %v2476_v54, %v2450_v38  ;;  %v2431_v58 = vadd.f32 %v2423_v40, %v2411_v36  ;;  %v5543_v50 = vld [vmem:[%s6754_s26 + $0x370] sm:$0x1]  ;;  %v5548_v38 = vld [vmem:[%s6757_s27 + $0x358] sm:$0xff] }
 0x232   : > { %5534 = vst [vmem:[%s6849_s29 + $0xa8] sm:$0x7f] %v2493_v47  ;;  %v2526_v62 = vmul.f32 %v5537_v53, %v7169_v22  ;;  %v2546_v9 = vmul.f32 %v5545_v35, %v7173_v3  ;;  %v2566_v17 = vmul.f32 %v5537_v53, %v7176_v13  ;;  %v2570_v63 = vmul.f32 %v5541_v46, %v7176_v13  ;;  %v5532_v22 = vld [vmem:[%s6849_s29 + $0xb8] sm:$0x7f]  ;;  %v5540_v47 = vld [vmem:[%s6754_s26 + $0x358] sm:$0xff] }
 0x233   : > { %v2479_v12 = vsel %vm1094_vm0, %v2477_v51, %v2478_v52  ;;  %v2522_v14 = vadd.f32 %v2518_v19, %v2514_v11  ;;  %v2494_v0 = vadd.f32 %v5531_v49, %v2486_v56  ;;  %v2451_v8 = vadd.f32 %v2443_v45, %v2431_v58  ;;  %v5544_v11 = vld [vmem:[%s6754_s26 + $0x378] sm:$0x1] }
 0x234   : > { %v2534_v18 = vrot.slane %v2526_v62, 1  ;;  %v2554_v20 = vrot.slane %v2546_v9, 1  ;;  %v2582_v5 = vrot.slane %v2566_v17, 2  ;;  %v2583_v3 = vrot.slane %v2570_v63, 2  ;;  %v7560_v63 = vld [vmem:[%s6760_s28 + $0x30] sm:$0xf] }
 0x235   : > { %v2515_v25 = vmul.f32 %v5538_v10, %v7187_v24  ;;  %v2519_v61 = vmul.f32 %v5546_v1, %v7191_v6  ;;  %5535 = vst [vmem:[%s6849_s29 + $0xb0] sm:$0x7f] %v2494_v0  ;;  %v2487_v26 = vadd.f32 %v2479_v12, %v2451_v8  ;;  %v2527_v13 = vmul.f32 %v5538_v10, %v7195_v15  ;;  %v5549_v15 = vld [vmem:[%s6849_s29 + $0xc0] sm:$0x7f]  ;;  %v7563_v0 = vld [vmem:[%s6760_s28 + $0x34] sm:$0xf] }
 0x236   : > { %v2542_v7 = vadd.f32 %v2534_v18, %v2522_v14  ;;  %v2547_v27 = vmul.f32 %v5546_v1, %v7200_v16  ;;  %v2584_v29 = vsel %vm1094_vm0, %v2582_v5, %v2583_v3  ;;  %v2567_v32 = vmul.f32 %v5538_v10, %v7203_v30  ;;  %v7551_v1 = vld [vmem:[%s6760_s28 + $0x28] sm:$0xf]  ;;  %v7554_v12 = vld [vmem:[%s6760_s28 + $0x2c] sm:$0xf]  ;;  %v5551_v5 = vld [vmem:[%s6849_s29 + $0xd0] sm:$0x7f] }
 0x237   : > { %v2523_v31 = vadd.f32 %v2519_v61, %v2515_v25  ;;  %v2571_v24 = vmul.f32 %v5542_v23, %v7203_v30  ;;  %v2495_v6 = vadd.f32 %v5532_v22, %v2487_v26  ;;  %v2535_v39 = vrot.slane %v2527_v13, 1  ;;  %v5562_v23 = vld [vmem:[%s6754_s26 + $0x80] sm:$0xff] }
 0x238   : > { %v2562_v33 = vadd.f32 %v2554_v20, %v2542_v7  ;;  %v2555_v43 = vrot.slane %v2547_v27, 1  ;;  %v2585_v53 = vrot.slane %v2567_v32, 2  ;;  %v2516_v35 = vmul.f32 %v5539_v2, %v7210_v34  ;;  %v7566_v20 = vld [vmem:[%s6760_s28 + $0x38] sm:$0xf]  ;;  %v5570_v22 = vld [vmem:[%s6757_s27 + $0x80] sm:$0xff] }
 0x239   : > { %v2586_v16 = vrot.slane %v2571_v24, 2  ;;  %v2520_v54 = vmul.f32 %v5547_v57, %v7218_v41  ;;  %5536 = vst [vmem:[%s6849_s29 + $0xb8] sm:$0x7f] %v2495_v6  ;;  %v2543_v37 = vadd.f32 %v2535_v39, %v2523_v31  ;;  %v2528_v30 = vmul.f32 %v5539_v2, %v7221_v42  ;;  %v5550_v42 = vld [vmem:[%s6849_s29 + $0xc8] sm:$0x7f] }
 0x23a   : > { %v2598_v36 = vadd.f32 %v2584_v29, %v2562_v33  ;;  %v2548_v44 = vmul.f32 %v5547_v57, %v7226_v55  ;;  %v2568_v46 = vmul.f32 %v5539_v2, %v7229_v21  ;;  %v2572_v34 = vmul.f32 %v5543_v50, %v7229_v21  ;;  %v5566_v2 = vld [vmem:[%s6754_s26 + $0xa0] sm:$0x1] }
 0x23b   : > { %v2587_v40 = vsel %vm1094_vm0, %v2585_v53, %v2586_v16  ;;  %v2524_v45 = vadd.f32 %v2520_v54, %v2516_v35  ;;  %v2563_v49 = vadd.f32 %v2555_v43, %v2543_v37  ;;  %v2536_v51 = vrot.slane %v2528_v30, 1  ;;  %v5552_v43 = vld [vmem:[%s6849_s29 + $0xd8] sm:$0x7f]  ;;  %v5563_v35 = vld [vmem:[%s6754_s26 + $0x88] sm:$0xff] }
 0x23c   : > { %v2606_v41 = vadd.f32 %v5549_v15, %v2598_v36  ;;  %v2556_v52 = vrot.slane %v2548_v44, 1  ;;  %v2588_v55 = vrot.slane %v2568_v46, 2  ;;  %v2589_v19 = vrot.slane %v2572_v34, 2  ;;  %v5571_v44 = vld [vmem:[%s6757_s27 + $0x88] sm:$0xff] }
 0x23d   : > { %v2517_v56 = vmul.f32 %v5540_v47, %v7241_v59  ;;  %v2521_v58 = vmul.f32 %v5548_v38, %v7244_v60  ;;  %v2599_v62 = vadd.f32 %v2587_v40, %v2563_v49  ;;  %v2544_v21 = vadd.f32 %v2536_v51, %v2524_v45  ;;  %v5567_v46 = vld [vmem:[%s6754_s26 + $0xa8] sm:$0x1] }
 0x23e   : > { %5553 = vst [vmem:[%s6849_s29 + $0xc0] sm:$0x7f] %v2606_v41  ;;  %v2529_v9 = vmul.f32 %v5540_v47, %v7250_v28  ;;  %v2549_v10 = vmul.f32 %v5548_v38, %v7253_v4  ;;  %v2590_v14 = vsel %vm1094_vm0, %v2588_v55, %v2589_v19  ;;  %v2569_v60 = vmul.f32 %v5540_v47, %v7256_v48 }
 0x23f   : > { %v2525_v59 = vadd.f32 %v2521_v58, %v2517_v56  ;;  %v2573_v17 = vmul.f32 %v5544_v11, %v7256_v48  ;;  %v2607_v28 = vadd.f32 %v5550_v42, %v2599_v62  ;;  %v2564_v8 = vadd.f32 %v2556_v52, %v2544_v21  ;;  %v5564_v21 = vld [vmem:[%s6754_s26 + $0x90] sm:$0xff] }
 0x240   : > { %v2537_v4 = vrot.slane %v2529_v9, 1  ;;  %v2557_v18 = vrot.slane %v2549_v10, 1  ;;  %v2591_v3 = vrot.slane %v2569_v60, 2  ;;  %v7572_v61 = vperm.slane %v7551_v1, 0  ;;  %v2769_v9 = vld [vmem:[%s6849_s29] sm:$0x7f] }
 0x241   : > { %v2592_v25 = vrot.slane %v2573_v17, 2  ;;  %v7575_v48 = vperm.slane %v7554_v12, 0  ;;  %5554 = vst [vmem:[%s6849_s29 + $0xc8] sm:$0x7f] %v2607_v28  ;;  %v2600_v26 = vadd.f32 %v2590_v14, %v2564_v8  ;;  %v7579_v13 = vperm.slane %v7560_v63, 0  ;;  %v5572_v17 = vld [vmem:[%s6757_s27 + $0x90] sm:$0xff] }
 0x242   : > { %v2545_v7 = vadd.f32 %v2537_v4, %v2525_v59  ;;  %v7582_v27 = vperm.slane %v7563_v0, 0  ;;  %v7587_v29 = vperm.slane %v7566_v20, 0  ;;  %v2681_v31 = vmul.f32 %v5562_v23, %v7572_v61 }
 0x243   : > { %v2593_v57 = vsel %vm1094_vm0, %v2591_v3, %v2592_v25  ;;  %v2685_v32 = vmul.f32 %v5570_v22, %v7575_v48  ;;  %v2608_v24 = vadd.f32 %v5551_v5, %v2600_v26  ;;  %v2693_v33 = vmul.f32 %v5562_v23, %v7579_v13 }
 0x244   : > { %v2565_v6 = vadd.f32 %v2557_v18, %v2545_v7  ;;  %v2713_v39 = vmul.f32 %v5570_v22, %v7582_v27  ;;  %v2733_v15 = vmul.f32 %v5562_v23, %v7587_v29  ;;  %v2737_v53 = vmul.f32 %v5566_v2, %v7587_v29  ;;  %v5568_v23 = vld [vmem:[%s6754_s26 + $0xb0] sm:$0x1] }
 0x245   : > { %v2689_v50 = vadd.f32 %v2685_v32, %v2681_v31  ;;  %v7597_v16 = vperm.slane %v7551_v1, 1  ;;  %5555 = vst [vmem:[%s6849_s29 + $0xd0] sm:$0x7f] %v2608_v24  ;;  %v2701_v36 = vrot.slane %v2693_v33, 1  ;;  %v7602_v30 = vperm.slane %v7554_v12, 1 }
 0x246   : > { %v2601_v54 = vadd.f32 %v2593_v57, %v2565_v6  ;;  %v2721_v37 = vrot.slane %v2713_v39, 1  ;;  %v2749_v47 = vrot.slane %v2733_v15, 2  ;;  %v2750_v38 = vrot.slane %v2737_v53, 2  ;;  %v2770_v32 = vld [vmem:[%s6849_s29 + $0x8] sm:$0x7f]  ;;  %v5565_v53 = vld [vmem:[%s6754_s26 + $0x98] sm:$0xff] }
 0x247   : > { %v7606_v40 = vperm.slane %v7560_v63, 1  ;;  %v7609_v45 = vperm.slane %v7563_v0, 1  ;;  %v2709_v41 = vadd.f32 %v2701_v36, %v2689_v50  ;;  %v7613_v49 = vperm.slane %v7566_v20, 1 }
 0x248   : > { %v2609_v34 = vadd.f32 %v5552_v43, %v2601_v54  ;;  %v2682_v51 = vmul.f32 %v5563_v35, %v7597_v16  ;;  %v2751_v52 = vsel %vm1094_vm0, %v2749_v47, %v2750_v38  ;;  %v2686_v11 = vmul.f32 %v5571_v44, %v7602_v30  ;;  %v5574_v47 = vld [vmem:[%s6754_s26 + $0x100] sm:$0xff] }
 0x249   : > { %v2694_v42 = vmul.f32 %v5563_v35, %v7606_v40  ;;  %v2714_v55 = vmul.f32 %v5571_v44, %v7609_v45  ;;  %v2729_v19 = vadd.f32 %v2721_v37, %v2709_v41  ;;  %v2734_v56 = vmul.f32 %v5563_v35, %v7613_v49  ;;  %v5573_v35 = vld [vmem:[%s6757_s27 + $0x98] sm:$0xff]  ;;  %v5582_v41 = vld [vmem:[%s6757_s27 + $0x100] sm:$0xff] }
 0x24a   : > { %5556 = vst [vmem:[%s6849_s29 + $0xd8] sm:$0x7f] %v2609_v34  ;;  %v2738_v58 = vmul.f32 %v5567_v46, %v7613_v49  ;;  %v7624_v62 = vperm.slane %v7551_v1, 2  ;;  %v2690_v10 = vadd.f32 %v2686_v11, %v2682_v51  ;;  %v7629_v60 = vperm.slane %v7554_v12, 2 }
 0x24b   : > { %v2702_v14 = vrot.slane %v2694_v42, 1  ;;  %v2722_v59 = vrot.slane %v2714_v55, 1  ;;  %v2765_v28 = vadd.f32 %v2751_v52, %v2729_v19  ;;  %v2752_v8 = vrot.slane %v2734_v56, 2 }
 0x24c   : > { %v2753_v4 = vrot.slane %v2738_v58, 2  ;;  %v7633_v18 = vperm.slane %v7560_v63, 2  ;;  %v7637_v5 = vperm.slane %v7563_v0, 2  ;;  %v7640_v3 = vperm.slane %v7566_v20, 2 }
 0x24d   : > { %v2710_v22 = vadd.f32 %v2702_v14, %v2690_v10  ;;  %v2683_v25 = vmul.f32 %v5564_v21, %v7624_v62  ;;  %v2773_v26 = vadd.f32 %v2769_v9, %v2765_v28  ;;  %v2687_v2 = vmul.f32 %v5572_v17, %v7629_v60 }
 0x24e   : > { %v2754_v7 = vsel %vm1094_vm0, %v2752_v8, %v2753_v4  ;;  %v2695_v57 = vmul.f32 %v5564_v21, %v7633_v18  ;;  %v2715_v24 = vmul.f32 %v5572_v17, %v7637_v5  ;;  %v2735_v6 = vmul.f32 %v5564_v21, %v7640_v3  ;;  %v5578_v21 = vld [vmem:[%s6754_s26 + $0x120] sm:$0x1]  ;;  %v5575_v8 = vld [vmem:[%s6754_s26 + $0x108] sm:$0xff] }
 0x24f   : > { %v2730_v31 = vadd.f32 %v2722_v59, %v2710_v22  ;;  %v2739_v33 = vmul.f32 %v5568_v23, %v7640_v3  ;;  %2777 = vst [vmem:[%s6849_s29] sm:$0x7f] %v2773_v26  ;;  %v2691_v39 = vadd.f32 %v2687_v2, %v2683_v25  ;;  %v7652_v50 = vperm.slane %v7551_v1, 3  ;;  %v5583_v26 = vld [vmem:[%s6757_s27 + $0x108] sm:$0xff] }
 0x250   : > { %v2703_v43 = vrot.slane %v2695_v57, 1  ;;  %v7655_v15 = vperm.slane %v7554_v12, 3  ;;  %v2723_v36 = vrot.slane %v2715_v24, 1  ;;  %v2755_v37 = vrot.slane %v2735_v6, 2  ;;  %v5569_v12 = vld [vmem:[%s6754_s26 + $0xb8] sm:$0x1] }
 0x251   : > { %v2766_v54 = vadd.f32 %v2754_v7, %v2730_v31  ;;  %v2756_v44 = vrot.slane %v2739_v33, 2  ;;  %v7661_v46 = vperm.slane %v7560_v63, 3  ;;  %v7664_v34 = vperm.slane %v7563_v0, 3  ;;  %v5579_v33 = vld [vmem:[%s6754_s26 + $0x128] sm:$0x1] }
 0x252   : > { %v2711_v38 = vadd.f32 %v2703_v43, %v2691_v39  ;;  %v7667_v1 = vperm.slane %v7566_v20, 3  ;;  %v2684_v11 = vmul.f32 %v5565_v53, %v7652_v50  ;;  %v2688_v42 = vmul.f32 %v5573_v35, %v7655_v15  ;;  %v2771_v20 = vld [vmem:[%s6849_s29 + $0x10] sm:$0x7f] }
 0x253   : > { %v2774_v51 = vadd.f32 %v2770_v32, %v2766_v54  ;;  %v2757_v52 = vsel %vm1094_vm0, %v2755_v37, %v2756_v44  ;;  %v2696_v63 = vmul.f32 %v5565_v53, %v7661_v46  ;;  %v2716_v0 = vmul.f32 %v5573_v35, %v7664_v34 }
 0x254   : > { %v2731_v55 = vadd.f32 %v2723_v36, %v2711_v38  ;;  %v2736_v19 = vmul.f32 %v5565_v53, %v7667_v1  ;;  %v2692_v56 = vadd.f32 %v2688_v42, %v2684_v11  ;;  %v2740_v58 = vmul.f32 %v5569_v12, %v7667_v1  ;;  %v2772_v36 = vld [vmem:[%s6849_s29 + $0x18] sm:$0x7f]  ;;  %v5576_v12 = vld [vmem:[%s6754_s26 + $0x110] sm:$0xff] }
 0x255   : > { %2778 = vst [vmem:[%s6849_s29 + $0x8] sm:$0x7f] %v2774_v51  ;;  %v2793_v9 = vmul.f32 %v5574_v47, %v7572_v61  ;;  %v2797_v10 = vmul.f32 %v5582_v41, %v7575_v48  ;;  %v2704_v59 = vrot.slane %v2696_v63, 1  ;;  %v2724_v17 = vrot.slane %v2716_v0, 1 }
 0x256   : > { %v2767_v14 = vadd.f32 %v2757_v52, %v2731_v55  ;;  %v2758_v28 = vrot.slane %v2736_v19, 2  ;;  %v2759_v4 = vrot.slane %v2740_v58, 2  ;;  %v2805_v22 = vmul.f32 %v5574_v47, %v7579_v13  ;;  %v5586_v58 = vld [vmem:[%s6849_s29 + $0x20] sm:$0x7f] }
 0x257   : > { %v2801_v23 = vadd.f32 %v2797_v10, %v2793_v9  ;;  %v2825_v25 = vmul.f32 %v5582_v41, %v7582_v27  ;;  %v2712_v2 = vadd.f32 %v2704_v59, %v2692_v56  ;;  %v2845_v57 = vmul.f32 %v5574_v47, %v7587_v29  ;;  %v5584_v41 = vld [vmem:[%s6757_s27 + $0x110] sm:$0xff] }
 0x258   : > { %v2775_v7 = vadd.f32 %v2771_v20, %v2767_v14  ;;  %v2849_v31 = vmul.f32 %v5578_v21, %v7587_v29  ;;  %v2760_v32 = vsel %vm1094_vm0, %v2758_v28, %v2759_v4  ;;  %v2813_v24 = vrot.slane %v2805_v22, 1  ;;  %v5580_v20 = vld [vmem:[%s6754_s26 + $0x130] sm:$0x1]  ;;  %v5585_v4 = vld [vmem:[%s6757_s27 + $0x118] sm:$0xff] }
 0x259   : > { %v2833_v6 = vrot.slane %v2825_v25, 1  ;;  %v2794_v39 = vmul.f32 %v5575_v8, %v7597_v16  ;;  %v2732_v43 = vadd.f32 %v2724_v17, %v2712_v2  ;;  %v2861_v53 = vrot.slane %v2845_v57, 2 }
 0x25a   : > { %2779 = vst [vmem:[%s6849_s29 + $0x10] sm:$0x7f] %v2775_v7  ;;  %v2862_v35 = vrot.slane %v2849_v31, 2  ;;  %v2798_v54 = vmul.f32 %v5583_v26, %v7602_v30  ;;  %v2821_v37 = vadd.f32 %v2813_v24, %v2801_v23  ;;  %v2806_v44 = vmul.f32 %v5575_v8, %v7606_v40  ;;  %v5587_v24 = vld [vmem:[%s6849_s29 + $0x28] sm:$0x7f] }
 0x25b   : > { %v2826_v47 = vmul.f32 %v5583_v26, %v7609_v45  ;;  %v2846_v38 = vmul.f32 %v5575_v8, %v7613_v49  ;;  %v2768_v51 = vadd.f32 %v2760_v32, %v2732_v43  ;;  %v2850_v42 = vmul.f32 %v5579_v33, %v7613_v49  ;;  %v5577_v8 = vld [vmem:[%s6754_s26 + $0x118] sm:$0xff] }
 0x25c   : > { %v2863_v52 = vsel %vm1094_vm0, %v2861_v53, %v2862_v35  ;;  %v2802_v11 = vadd.f32 %v2798_v54, %v2794_v39  ;;  %v2841_v55 = vadd.f32 %v2833_v6, %v2821_v37  ;;  %v2814_v63 = vrot.slane %v2806_v44, 1  ;;  %v5581_v32 = vld [vmem:[%s6754_s26 + $0x138] sm:$0x1]  ;;  %v5594_v37 = vld [vmem:[%s6754_s26 + $0x180] sm:$0xff] }
 0x25d   : > { %v2834_v0 = vrot.slane %v2826_v47, 1  ;;  %v2864_v19 = vrot.slane %v2846_v38, 2  ;;  %v2776_v56 = vadd.f32 %v2772_v36, %v2768_v51  ;;  %v2865_v21 = vrot.slane %v2850_v42, 2  ;;  %v5602_v44 = vld [vmem:[%s6757_s27 + $0x180] sm:$0xff] }
 0x25e   : > { %v2795_v9 = vmul.f32 %v5576_v12, %v7624_v62  ;;  %v2799_v10 = vmul.f32 %v5584_v41, %v7629_v60  ;;  %v2877_v14 = vadd.f32 %v2863_v52, %v2841_v55  ;;  %v2822_v59 = vadd.f32 %v2814_v63, %v2802_v11  ;;  %v5598_v55 = vld [vmem:[%s6754_s26 + $0x1a0] sm:$0x1]  ;;  %v5588_v63 = vld [vmem:[%s6849_s29 + $0x30] sm:$0x7f] }
 0x25f   : > { %v2807_v17 = vmul.f32 %v5576_v12, %v7633_v18  ;;  %v2827_v28 = vmul.f32 %v5584_v41, %v7637_v5  ;;  %2780 = vst [vmem:[%s6849_s29 + $0x18] sm:$0x7f] %v2776_v56  ;;  %v2866_v23 = vsel %vm1094_vm0, %v2864_v19, %v2865_v21  ;;  %v2847_v25 = vmul.f32 %v5576_v12, %v7640_v3 }
 0x260   : > { %v2803_v22 = vadd.f32 %v2799_v10, %v2795_v9  ;;  %v2851_v26 = vmul.f32 %v5580_v20, %v7640_v3  ;;  %v2885_v7 = vadd.f32 %v5586_v58, %v2877_v14  ;;  %v2842_v2 = vadd.f32 %v2834_v0, %v2822_v59  ;;  %v5595_v14 = vld [vmem:[%s6754_s26 + $0x188] sm:$0xff] }
 0x261   : > { %v2815_v57 = vrot.slane %v2807_v17, 1  ;;  %v2835_v31 = vrot.slane %v2827_v28, 1  ;;  %v2867_v6 = vrot.slane %v2847_v25, 2  ;;  %v2796_v39 = vmul.f32 %v5577_v8, %v7652_v50  ;;  %v5603_v59 = vld [vmem:[%s6757_s27 + $0x188] sm:$0xff] }
 0x262   : > { %v2868_v33 = vrot.slane %v2851_v26, 2  ;;  %v2800_v43 = vmul.f32 %v5585_v4, %v7655_v15  ;;  %5590 = vst [vmem:[%s6849_s29 + $0x20] sm:$0x7f] %v2885_v7  ;;  %v2878_v53 = vadd.f32 %v2866_v23, %v2842_v2  ;;  %v2808_v54 = vmul.f32 %v5577_v8, %v7661_v46  ;;  %v5599_v7 = vld [vmem:[%s6754_s26 + $0x1a8] sm:$0x1] }
 0x263   : > { %v2823_v35 = vadd.f32 %v2815_v57, %v2803_v22  ;;  %v2828_v36 = vmul.f32 %v5585_v4, %v7664_v34  ;;  %v2848_v12 = vmul.f32 %v5577_v8, %v7667_v1  ;;  %v2852_v41 = vmul.f32 %v5581_v32, %v7667_v1  ;;  %v5589_v2 = vld [vmem:[%s6849_s29 + $0x38] sm:$0x7f] }
 0x264   : > { %v2869_v47 = vsel %vm1094_vm0, %v2867_v6, %v2868_v33  ;;  %v2804_v38 = vadd.f32 %v2800_v43, %v2796_v39  ;;  %v2886_v51 = vadd.f32 %v5587_v24, %v2878_v53  ;;  %v2816_v11 = vrot.slane %v2808_v54, 1  ;;  %v5596_v53 = vld [vmem:[%s6754_s26 + $0x190] sm:$0xff] }
 0x265   : > { %v2843_v52 = vadd.f32 %v2835_v31, %v2823_v35  ;;  %v2836_v42 = vrot.slane %v2828_v36, 1  ;;  %v2870_v0 = vrot.slane %v2848_v12, 2  ;;  %v2871_v19 = vrot.slane %v2852_v41, 2  ;;  %v5604_v35 = vld [vmem:[%s6757_s27 + $0x190] sm:$0xff] }
 0x266   : > { %v2905_v20 = vmul.f32 %v5594_v37, %v7572_v61  ;;  %v2909_v56 = vmul.f32 %v5602_v44, %v7575_v48  ;;  %5591 = vst [vmem:[%s6849_s29 + $0x28] sm:$0x7f] %v2886_v51  ;;  %v2824_v21 = vadd.f32 %v2816_v11, %v2804_v38  ;;  %v2917_v9 = vmul.f32 %v5594_v37, %v7579_v13  ;;  %v5600_v51 = vld [vmem:[%s6754_s26 + $0x1b0] sm:$0x1] }
 0x267   : > { %v2879_v58 = vadd.f32 %v2869_v47, %v2843_v52  ;;  %v2937_v10 = vmul.f32 %v5602_v44, %v7582_v27  ;;  %v2872_v17 = vsel %vm1094_vm0, %v2870_v0, %v2871_v19  ;;  %v2957_v8 = vmul.f32 %v5594_v37, %v7587_v29  ;;  %v5606_v52 = vld [vmem:[%s6849_s29 + $0x40] sm:$0x7f] }
 0x268   : > { %v2913_v28 = vadd.f32 %v2909_v56, %v2905_v20  ;;  %v2961_v4 = vmul.f32 %v5598_v55, %v7587_v29  ;;  %v2844_v22 = vadd.f32 %v2836_v42, %v2824_v21  ;;  %v2925_v25 = vrot.slane %v2917_v9, 1  ;;  %v5605_v21 = vld [vmem:[%s6757_s27 + $0x198] sm:$0xff] }
 0x269   : > { %v2887_v23 = vadd.f32 %v5588_v63, %v2879_v58  ;;  %v2945_v26 = vrot.slane %v2937_v10, 1  ;;  %v2973_v57 = vrot.slane %v2957_v8, 2  ;;  %v2906_v32 = vmul.f32 %v5595_v14, %v7597_v16  ;;  %v5597_v58 = vld [vmem:[%s6754_s26 + $0x198] sm:$0xff] }
 0x26a   : > { %v2974_v31 = vrot.slane %v2961_v4, 2  ;;  %v2910_v24 = vmul.f32 %v5603_v59, %v7602_v30  ;;  %v2880_v6 = vadd.f32 %v2872_v17, %v2844_v22  ;;  %v2933_v33 = vadd.f32 %v2925_v25, %v2913_v28  ;;  %v5607_v22 = vld [vmem:[%s6849_s29 + $0x48] sm:$0x7f] }
 0x26b   : > { %5592 = vst [vmem:[%s6849_s29 + $0x30] sm:$0x7f] %v2887_v23  ;;  %v2918_v39 = vmul.f32 %v5595_v14, %v7606_v40  ;;  %v2938_v43 = vmul.f32 %v5603_v59, %v7609_v45  ;;  %v2958_v37 = vmul.f32 %v5595_v14, %v7613_v49  ;;  %v2962_v44 = vmul.f32 %v5599_v7, %v7613_v49  ;;  %v5601_v23 = vld [vmem:[%s6754_s26 + $0x1b8] sm:$0x1] }
 0x26c   : > { %v2975_v54 = vsel %vm1094_vm0, %v2973_v57, %v2974_v31  ;;  %v2914_v36 = vadd.f32 %v2910_v24, %v2906_v32  ;;  %v2888_v47 = vadd.f32 %v5589_v2, %v2880_v6  ;;  %v2953_v38 = vadd.f32 %v2945_v26, %v2933_v33  ;;  %v5614_v6 = vld [vmem:[%s6754_s26 + $0x200] sm:$0xff] }
 0x26d   : > { %v2926_v12 = vrot.slane %v2918_v39, 1  ;;  %v2946_v41 = vrot.slane %v2938_v43, 1  ;;  %v2976_v11 = vrot.slane %v2958_v37, 2  ;;  %v2977_v42 = vrot.slane %v2962_v44, 2  ;;  %v5622_v33 = vld [vmem:[%s6757_s27 + $0x200] sm:$0xff] }
 0x26e   : > { %v2907_v55 = vmul.f32 %v5596_v53, %v7624_v62  ;;  %v2911_v63 = vmul.f32 %v5604_v35, %v7629_v60  ;;  %5593 = vst [vmem:[%s6849_s29 + $0x38] sm:$0x7f] %v2888_v47  ;;  %v2989_v0 = vadd.f32 %v2975_v54, %v2953_v38  ;;  %v2919_v20 = vmul.f32 %v5596_v53, %v7633_v18  ;;  %v5618_v47 = vld [vmem:[%s6754_s26 + $0x220] sm:$0x1]  ;;  %v5608_v38 = vld [vmem:[%s6849_s29 + $0x50] sm:$0x7f] }
 0x26f   : > { %v2934_v19 = vadd.f32 %v2926_v12, %v2914_v36  ;;  %v2939_v56 = vmul.f32 %v5604_v35, %v7637_v5  ;;  %v2978_v9 = vsel %vm1094_vm0, %v2976_v11, %v2977_v42  ;;  %v2959_v14 = vmul.f32 %v5596_v53, %v7640_v3 }
 0x270   : > { %v2915_v10 = vadd.f32 %v2911_v63, %v2907_v55  ;;  %v2963_v59 = vmul.f32 %v5600_v51, %v7640_v3  ;;  %v2997_v17 = vadd.f32 %v5606_v52, %v2989_v0  ;;  %v2927_v8 = vrot.slane %v2919_v20, 1  ;;  %v5615_v0 = vld [vmem:[%s6754_s26 + $0x208] sm:$0xff] }
 0x271   : > { %v2954_v28 = vadd.f32 %v2946_v41, %v2934_v19  ;;  %v2947_v4 = vrot.slane %v2939_v56, 1  ;;  %v2979_v25 = vrot.slane %v2959_v14, 2  ;;  %v2908_v7 = vmul.f32 %v5597_v58, %v7652_v50  ;;  %v5623_v19 = vld [vmem:[%s6757_s27 + $0x208] sm:$0xff] }
 0x272   : > { %v2980_v26 = vrot.slane %v2963_v59, 2  ;;  %v2912_v2 = vmul.f32 %v5605_v21, %v7655_v15  ;;  %5610 = vst [vmem:[%s6849_s29 + $0x40] sm:$0x7f] %v2997_v17  ;;  %v2935_v31 = vadd.f32 %v2927_v8, %v2915_v10  ;;  %v2920_v32 = vmul.f32 %v5597_v58, %v7661_v46  ;;  %v5619_v17 = vld [vmem:[%s6754_s26 + $0x228] sm:$0x1] }
 0x273   : > { %v2990_v57 = vadd.f32 %v2978_v9, %v2954_v28  ;;  %v2940_v24 = vmul.f32 %v5605_v21, %v7664_v34  ;;  %v2960_v53 = vmul.f32 %v5597_v58, %v7667_v1  ;;  %v2964_v35 = vmul.f32 %v5601_v23, %v7667_v1  ;;  %v5609_v28 = vld [vmem:[%s6849_s29 + $0x58] sm:$0x7f] }
 0x274   : > { %v2981_v39 = vsel %vm1094_vm0, %v2979_v25, %v2980_v26  ;;  %v2916_v43 = vadd.f32 %v2912_v2, %v2908_v7  ;;  %v2955_v36 = vadd.f32 %v2947_v4, %v2935_v31  ;;  %v2928_v37 = vrot.slane %v2920_v32, 1  ;;  %v5624_v31 = vld [vmem:[%s6757_s27 + $0x210] sm:$0xff] }
 0x275   : > { %v2998_v54 = vadd.f32 %v5607_v22, %v2990_v57  ;;  %v2948_v44 = vrot.slane %v2940_v24, 1  ;;  %v2982_v12 = vrot.slane %v2960_v53, 2  ;;  %v2983_v41 = vrot.slane %v2964_v35, 2  ;;  %v5616_v57 = vld [vmem:[%s6754_s26 + $0x210] sm:$0xff] }
 0x276   : > { %v3017_v51 = vmul.f32 %v5614_v6, %v7572_v61  ;;  %v3021_v52 = vmul.f32 %v5622_v33, %v7575_v48  ;;  %v2991_v11 = vadd.f32 %v2981_v39, %v2955_v36  ;;  %v2936_v42 = vadd.f32 %v2928_v37, %v2916_v43  ;;  %v5626_v36 = vld [vmem:[%s6849_s29 + $0x60] sm:$0x7f] }
 0x277   : > { %5611 = vst [vmem:[%s6849_s29 + $0x48] sm:$0x7f] %v2998_v54  ;;  %v3029_v55 = vmul.f32 %v5614_v6, %v7579_v13  ;;  %v3049_v63 = vmul.f32 %v5622_v33, %v7582_v27  ;;  %v2984_v20 = vsel %vm1094_vm0, %v2982_v12, %v2983_v41  ;;  %v3069_v58 = vmul.f32 %v5614_v6, %v7587_v29  ;;  %v5620_v54 = vld [vmem:[%s6754_s26 + $0x230] sm:$0x1] }
 0x278   : > { %v3025_v56 = vadd.f32 %v3021_v52, %v3017_v51  ;;  %v3073_v21 = vmul.f32 %v5618_v47, %v7587_v29  ;;  %v2999_v9 = vadd.f32 %v5608_v38, %v2991_v11  ;;  %v2956_v10 = vadd.f32 %v2948_v44, %v2936_v42  ;;  %v5617_v11 = vld [vmem:[%s6754_s26 + $0x218] sm:$0xff] }
 0x279   : > { %v3037_v14 = vrot.slane %v3029_v55, 1  ;;  %v3057_v59 = vrot.slane %v3049_v63, 1  ;;  %v3085_v8 = vrot.slane %v3069_v58, 2  ;;  %v3018_v23 = vmul.f32 %v5615_v0, %v7597_v16  ;;  %v5625_v42 = vld [vmem:[%s6757_s27 + $0x218] sm:$0xff] }
 0x27a   : > { %v3086_v4 = vrot.slane %v3073_v21, 2  ;;  %v3022_v22 = vmul.f32 %v5623_v19, %v7602_v30  ;;  %5612 = vst [vmem:[%s6849_s29 + $0x50] sm:$0x7f] %v2999_v9  ;;  %v2992_v25 = vadd.f32 %v2984_v20, %v2956_v10  ;;  %v3030_v7 = vmul.f32 %v5615_v0, %v7606_v40  ;;  %v5621_v9 = vld [vmem:[%s6754_s26 + $0x238] sm:$0x1] }
 0x27b   : > { %v3045_v26 = vadd.f32 %v3037_v14, %v3025_v56  ;;  %v3050_v2 = vmul.f32 %v5623_v19, %v7609_v45  ;;  %v3070_v6 = vmul.f32 %v5615_v0, %v7613_v49  ;;  %v3074_v33 = vmul.f32 %v5619_v17, %v7613_v49  ;;  %v5627_v10 = vld [vmem:[%s6849_s29 + $0x68] sm:$0x7f] }
 0x27c   : > { %v3087_v32 = vsel %vm1094_vm0, %v3085_v8, %v3086_v4  ;;  %v3026_v24 = vadd.f32 %v3022_v22, %v3018_v23  ;;  %v3000_v39 = vadd.f32 %v5609_v28, %v2992_v25  ;;  %v3038_v53 = vrot.slane %v3030_v7, 1  ;;  %v5634_v25 = vld [vmem:[%s6754_s26 + $0x280] sm:$0xff] }
 0x27d   : > { %v3065_v43 = vadd.f32 %v3057_v59, %v3045_v26  ;;  %v3058_v35 = vrot.slane %v3050_v2, 1  ;;  %v3088_v37 = vrot.slane %v3070_v6, 2  ;;  %v3089_v44 = vrot.slane %v3074_v33, 2  ;;  %v5642_v26 = vld [vmem:[%s6757_s27 + $0x280] sm:$0xff] }
 0x27e   : > { %v3019_v47 = vmul.f32 %v5616_v57, %v7624_v62  ;;  %v3023_v38 = vmul.f32 %v5624_v31, %v7629_v60  ;;  %5613 = vst [vmem:[%s6849_s29 + $0x58] sm:$0x7f] %v3000_v39  ;;  %v3046_v41 = vadd.f32 %v3038_v53, %v3026_v24  ;;  %v3031_v51 = vmul.f32 %v5616_v57, %v7633_v18  ;;  %v5638_v39 = vld [vmem:[%s6754_s26 + $0x2a0] sm:$0x1] }
 0x27f   : > { %v3101_v12 = vadd.f32 %v3087_v32, %v3065_v43  ;;  %v3051_v52 = vmul.f32 %v5624_v31, %v7637_v5  ;;  %v3090_v55 = vsel %vm1094_vm0, %v3088_v37, %v3089_v44  ;;  %v3071_v0 = vmul.f32 %v5616_v57, %v7640_v3  ;;  %v5628_v43 = vld [vmem:[%s6849_s29 + $0x70] sm:$0x7f] }
 0x280   : > { %v3027_v63 = vadd.f32 %v3023_v38, %v3019_v47  ;;  %v3075_v19 = vmul.f32 %v5620_v54, %v7640_v3  ;;  %v3066_v56 = vadd.f32 %v3058_v35, %v3046_v41  ;;  %v3039_v58 = vrot.slane %v3031_v51, 1  ;;  %v5643_v41 = vld [vmem:[%s6757_s27 + $0x288] sm:$0xff] }
 0x281   : > { %v3109_v20 = vadd.f32 %v5626_v36, %v3101_v12  ;;  %v3059_v21 = vrot.slane %v3051_v52, 1  ;;  %v3091_v14 = vrot.slane %v3071_v0, 2  ;;  %v3020_v17 = vmul.f32 %v5617_v11, %v7652_v50  ;;  %v5635_v12 = vld [vmem:[%s6754_s26 + $0x288] sm:$0xff] }
 0x282   : > { %v3092_v59 = vrot.slane %v3075_v19, 2  ;;  %v3024_v28 = vmul.f32 %v5625_v42, %v7655_v15  ;;  %v3102_v8 = vadd.f32 %v3090_v55, %v3066_v56  ;;  %v3047_v4 = vadd.f32 %v3039_v58, %v3027_v63  ;;  %v5629_v56 = vld [vmem:[%s6849_s29 + $0x78] sm:$0x7f] }
 0x283   : > { %5630 = vst [vmem:[%s6849_s29 + $0x60] sm:$0x7f] %v3109_v20  ;;  %v3032_v23 = vmul.f32 %v5617_v11, %v7661_v46  ;;  %v3052_v22 = vmul.f32 %v5625_v42, %v7664_v34  ;;  %v3072_v57 = vmul.f32 %v5617_v11, %v7667_v1  ;;  %v3076_v31 = vmul.f32 %v5621_v9, %v7667_v1  ;;  %v5639_v20 = vld [vmem:[%s6754_s26 + $0x2a8] sm:$0x1] }
 0x284   : > { %v3093_v7 = vsel %vm1094_vm0, %v3091_v14, %v3092_v59  ;;  %v3028_v2 = vadd.f32 %v3024_v28, %v3020_v17  ;;  %v3110_v32 = vadd.f32 %v5627_v10, %v3102_v8  ;;  %v3067_v24 = vadd.f32 %v3059_v21, %v3047_v4  ;;  %v5636_v8 = vld [vmem:[%s6754_s26 + $0x290] sm:$0xff] }
 0x285   : > { %v3040_v6 = vrot.slane %v3032_v23, 1  ;;  %v3060_v33 = vrot.slane %v3052_v22, 1  ;;  %v3094_v53 = vrot.slane %v3072_v57, 2  ;;  %v3095_v35 = vrot.slane %v3076_v31, 2  ;;  %v5644_v4 = vld [vmem:[%s6757_s27 + $0x290] sm:$0xff] }
 0x286   : > { %v3129_v54 = vmul.f32 %v5634_v25, %v7572_v61  ;;  %v3133_v36 = vmul.f32 %v5642_v26, %v7575_v48  ;;  %5631 = vst [vmem:[%s6849_s29 + $0x68] sm:$0x7f] %v3110_v32  ;;  %v3103_v37 = vadd.f32 %v3093_v7, %v3067_v24  ;;  %v3141_v47 = vmul.f32 %v5634_v25, %v7579_v13  ;;  %v5640_v32 = vld [vmem:[%s6754_s26 + $0x2b0] sm:$0x1]  ;;  %v5646_v24 = vld [vmem:[%s6849_s29 + $0x80] sm:$0x7f] }
 0x287   : > { %v3048_v44 = vadd.f32 %v3040_v6, %v3028_v2  ;;  %v3161_v38 = vmul.f32 %v5642_v26, %v7582_v27  ;;  %v3096_v51 = vsel %vm1094_vm0, %v3094_v53, %v3095_v35  ;;  %v3181_v11 = vmul.f32 %v5634_v25, %v7587_v29 }
 0x288   : > { %v3137_v52 = vadd.f32 %v3133_v36, %v3129_v54  ;;  %v3185_v42 = vmul.f32 %v5638_v39, %v7587_v29  ;;  %v3111_v55 = vadd.f32 %v5628_v43, %v3103_v37  ;;  %v3149_v0 = vrot.slane %v3141_v47, 1  ;;  %v5637_v37 = vld [vmem:[%s6754_s26 + $0x298] sm:$0xff] }
 0x289   : > { %v3068_v63 = vadd.f32 %v3060_v33, %v3048_v44  ;;  %v3169_v19 = vrot.slane %v3161_v38, 1  ;;  %v3197_v58 = vrot.slane %v3181_v11, 2  ;;  %v3130_v9 = vmul.f32 %v5635_v12, %v7597_v16  ;;  %v5645_v44 = vld [vmem:[%s6757_s27 + $0x298] sm:$0xff] }
 0x28a   : > { %v3198_v21 = vrot.slane %v3185_v42, 2  ;;  %v3134_v10 = vmul.f32 %v5643_v41, %v7602_v30  ;;  %5632 = vst [vmem:[%s6849_s29 + $0x70] sm:$0x7f] %v3111_v55  ;;  %v3157_v59 = vadd.f32 %v3149_v0, %v3137_v52  ;;  %v3142_v17 = vmul.f32 %v5635_v12, %v7606_v40  ;;  %v5641_v55 = vld [vmem:[%s6754_s26 + $0x2b8] sm:$0x1] }
 0x28b   : > { %v3104_v14 = vadd.f32 %v3096_v51, %v3068_v63  ;;  %v3162_v28 = vmul.f32 %v5643_v41, %v7609_v45  ;;  %v3182_v25 = vmul.f32 %v5635_v12, %v7613_v49  ;;  %v3186_v26 = vmul.f32 %v5639_v20, %v7613_v49  ;;  %v5647_v63 = vld [vmem:[%s6849_s29 + $0x88] sm:$0x7f] }
 0x28c   : > { %v3199_v23 = vsel %vm1094_vm0, %v3197_v58, %v3198_v21  ;;  %v3138_v22 = vadd.f32 %v3134_v10, %v3130_v9  ;;  %v3177_v2 = vadd.f32 %v3169_v19, %v3157_v59  ;;  %v3150_v57 = vrot.slane %v3142_v17, 1  ;;  %v5662_v59 = vld [vmem:[%s6757_s27 + $0x300] sm:$0xff] }
 0x28d   : > { %v3112_v7 = vadd.f32 %v5629_v56, %v3104_v14  ;;  %v3170_v31 = vrot.slane %v3162_v28, 1  ;;  %v3200_v6 = vrot.slane %v3182_v25, 2  ;;  %v3201_v33 = vrot.slane %v3186_v26, 2  ;;  %v5654_v14 = vld [vmem:[%s6754_s26 + $0x300] sm:$0xff] }
 0x28e   : > { %v3131_v39 = vmul.f32 %v5636_v8, %v7624_v62  ;;  %v3135_v43 = vmul.f32 %v5644_v4, %v7629_v60  ;;  %v3213_v53 = vadd.f32 %v3199_v23, %v3177_v2  ;;  %v3158_v35 = vadd.f32 %v3150_v57, %v3138_v22  ;;  %v5648_v2 = vld [vmem:[%s6849_s29 + $0x90] sm:$0x7f] }
 0x28f   : > { %5633 = vst [vmem:[%s6849_s29 + $0x78] sm:$0x7f] %v3112_v7  ;;  %v3143_v54 = vmul.f32 %v5636_v8, %v7633_v18  ;;  %v3163_v36 = vmul.f32 %v5644_v4, %v7637_v5  ;;  %v3202_v47 = vsel %vm1094_vm0, %v3200_v6, %v3201_v33  ;;  %v3183_v12 = vmul.f32 %v5636_v8, %v7640_v3  ;;  %v5658_v7 = vld [vmem:[%s6754_s26 + $0x320] sm:$0x1] }
 0x290   : > { %v3139_v38 = vadd.f32 %v3135_v43, %v3131_v39  ;;  %v3187_v41 = vmul.f32 %v5640_v32, %v7640_v3  ;;  %v3221_v51 = vadd.f32 %v5646_v24, %v3213_v53  ;;  %v3178_v52 = vadd.f32 %v3170_v31, %v3158_v35  ;;  %v5655_v53 = vld [vmem:[%s6754_s26 + $0x308] sm:$0xff] }
 0x291   : > { %v3151_v11 = vrot.slane %v3143_v54, 1  ;;  %v3171_v42 = vrot.slane %v3163_v36, 1  ;;  %v3203_v0 = vrot.slane %v3183_v12, 2  ;;  %v3132_v20 = vmul.f32 %v5637_v37, %v7652_v50  ;;  %v5663_v35 = vld [vmem:[%s6757_s27 + $0x308] sm:$0xff] }
 0x292   : > { %v3204_v19 = vrot.slane %v3187_v41, 2  ;;  %v3136_v56 = vmul.f32 %v5645_v44, %v7655_v15  ;;  %5650 = vst [vmem:[%s6849_s29 + $0x80] sm:$0x7f] %v3221_v51  ;;  %v3214_v58 = vadd.f32 %v3202_v47, %v3178_v52  ;;  %v3144_v9 = vmul.f32 %v5637_v37, %v7661_v46  ;;  %v5659_v51 = vld [vmem:[%s6754_s26 + $0x328] sm:$0x1] }
 0x293   : > { %v3159_v21 = vadd.f32 %v3151_v11, %v3139_v38  ;;  %v3164_v10 = vmul.f32 %v5645_v44, %v7664_v34  ;;  %v3184_v8 = vmul.f32 %v5637_v37, %v7667_v1  ;;  %v3188_v4 = vmul.f32 %v5641_v55, %v7667_v1  ;;  %v5649_v52 = vld [vmem:[%s6849_s29 + $0x98] sm:$0x7f] }
 0x294   : > { %v3205_v17 = vsel %vm1094_vm0, %v3203_v0, %v3204_v19  ;;  %v3140_v28 = vadd.f32 %v3136_v56, %v3132_v20  ;;  %v3222_v23 = vadd.f32 %v5647_v63, %v3214_v58  ;;  %v3152_v25 = vrot.slane %v3144_v9, 1  ;;  %v5656_v58 = vld [vmem:[%s6754_s26 + $0x310] sm:$0xff] }
 0x295   : > { %v3179_v22 = vadd.f32 %v3171_v42, %v3159_v21  ;;  %v3172_v26 = vrot.slane %v3164_v10, 1  ;;  %v3206_v57 = vrot.slane %v3184_v8, 2  ;;  %v3207_v31 = vrot.slane %v3188_v4, 2  ;;  %v5664_v21 = vld [vmem:[%s6757_s27 + $0x310] sm:$0xff] }
 0x296   : > { %v3241_v32 = vmul.f32 %v5654_v14, %v7572_v61  ;;  %v3245_v24 = vmul.f32 %v5662_v59, %v7575_v48  ;;  %5651 = vst [vmem:[%s6849_s29 + $0x88] sm:$0x7f] %v3222_v23  ;;  %v3160_v33 = vadd.f32 %v3152_v25, %v3140_v28  ;;  %v3253_v39 = vmul.f32 %v5654_v14, %v7579_v13  ;;  %v5660_v23 = vld [vmem:[%s6754_s26 + $0x330] sm:$0x1] }
 0x297   : > { %v3215_v6 = vadd.f32 %v3205_v17, %v3179_v22  ;;  %v3273_v43 = vmul.f32 %v5662_v59, %v7582_v27  ;;  %v3208_v54 = vsel %vm1094_vm0, %v3206_v57, %v3207_v31  ;;  %v3293_v37 = vmul.f32 %v5654_v14, %v7587_v29  ;;  %v5666_v22 = vld [vmem:[%s6849_s29 + $0xa0] sm:$0x7f] }
 0x298   : > { %v3249_v36 = vadd.f32 %v3245_v24, %v3241_v32  ;;  %v3297_v44 = vmul.f32 %v5658_v7, %v7587_v29  ;;  %v3180_v38 = vadd.f32 %v3172_v26, %v3160_v33  ;;  %v3261_v12 = vrot.slane %v3253_v39, 1  ;;  %v5665_v33 = vld [vmem:[%s6757_s27 + $0x318] sm:$0xff] }
 0x299   : > { %v3223_v47 = vadd.f32 %v5648_v2, %v3215_v6  ;;  %v3281_v41 = vrot.slane %v3273_v43, 1  ;;  %v3309_v11 = vrot.slane %v3293_v37, 2  ;;  %v3242_v55 = vmul.f32 %v5655_v53, %v7597_v16  ;;  %v5657_v6 = vld [vmem:[%s6754_s26 + $0x318] sm:$0xff] }
 0x29a   : > { %v3310_v42 = vrot.slane %v3297_v44, 2  ;;  %v3246_v63 = vmul.f32 %v5663_v35, %v7602_v30  ;;  %v3216_v0 = vadd.f32 %v3208_v54, %v3180_v38  ;;  %v3269_v19 = vadd.f32 %v3261_v12, %v3249_v36  ;;  %v5667_v38 = vld [vmem:[%s6849_s29 + $0xa8] sm:$0x7f] }
 0x29b   : > { %5652 = vst [vmem:[%s6849_s29 + $0x90] sm:$0x7f] %v3223_v47  ;;  %v3254_v20 = vmul.f32 %v5655_v53, %v7606_v40  ;;  %v3274_v56 = vmul.f32 %v5663_v35, %v7609_v45  ;;  %v3294_v14 = vmul.f32 %v5655_v53, %v7613_v49  ;;  %v3298_v59 = vmul.f32 %v5659_v51, %v7613_v49  ;;  %v5661_v47 = vld [vmem:[%s6754_s26 + $0x338] sm:$0x1] }
 0x29c   : > { %v3311_v9 = vsel %vm1094_vm0, %v3309_v11, %v3310_v42  ;;  %v3250_v10 = vadd.f32 %v3246_v63, %v3242_v55  ;;  %v3224_v17 = vadd.f32 %v5649_v52, %v3216_v0  ;;  %v3289_v28 = vadd.f32 %v3281_v41, %v3269_v19  ;;  %v5674_v0 = vld [vmem:[%s6754_s26 + $0x380] sm:$0xff] }
 0x29d   : > { %v3262_v8 = vrot.slane %v3254_v20, 1  ;;  %v3282_v4 = vrot.slane %v3274_v56, 1  ;;  %v3312_v25 = vrot.slane %v3294_v14, 2  ;;  %v3313_v26 = vrot.slane %v3298_v59, 2  ;;  %v5682_v19 = vld [vmem:[%s6757_s27 + $0x380] sm:$0xff] }
 0x29e   : > { %v3243_v7 = vmul.f32 %v5656_v58, %v7624_v62  ;;  %v3247_v2 = vmul.f32 %v5664_v21, %v7629_v60  ;;  %5653 = vst [vmem:[%s6849_s29 + $0x98] sm:$0x7f] %v3224_v17  ;;  %v3325_v57 = vadd.f32 %v3311_v9, %v3289_v28  ;;  %v3255_v32 = vmul.f32 %v5656_v58, %v7633_v18  ;;  %v5678_v17 = vld [vmem:[%s6754_s26 + $0x3a0] sm:$0x1]  ;;  %v5668_v28 = vld [vmem:[%s6849_s29 + $0xb0] sm:$0x7f] }
 0x29f   : > { %v3270_v31 = vadd.f32 %v3262_v8, %v3250_v10  ;;  %v3275_v24 = vmul.f32 %v5664_v21, %v7637_v5  ;;  %v3314_v39 = vsel %vm1094_vm0, %v3312_v25, %v3313_v26  ;;  %v3295_v53 = vmul.f32 %v5656_v58, %v7640_v3 }
 0x2a0   : > { %v3251_v43 = vadd.f32 %v3247_v2, %v3243_v7  ;;  %v3299_v35 = vmul.f32 %v5660_v23, %v7640_v3  ;;  %v3333_v54 = vadd.f32 %v5666_v22, %v3325_v57  ;;  %v3263_v37 = vrot.slane %v3255_v32, 1  ;;  %v5675_v57 = vld [vmem:[%s6754_s26 + $0x388] sm:$0xff] }
 0x2a1   : > { %v3290_v36 = vadd.f32 %v3282_v4, %v3270_v31  ;;  %v3283_v44 = vrot.slane %v3275_v24, 1  ;;  %v3315_v12 = vrot.slane %v3295_v53, 2  ;;  %v3244_v51 = vmul.f32 %v5657_v6, %v7652_v50  ;;  %v5683_v31 = vld [vmem:[%s6757_s27 + $0x388] sm:$0xff] }
 0x2a2   : > { %v3316_v41 = vrot.slane %v3299_v35, 2  ;;  %v3248_v52 = vmul.f32 %v5665_v33, %v7655_v15  ;;  %5670 = vst [vmem:[%s6849_s29 + $0xa0] sm:$0x7f] %v3333_v54  ;;  %v3271_v42 = vadd.f32 %v3263_v37, %v3251_v43  ;;  %v3256_v55 = vmul.f32 %v5657_v6, %v7661_v46  ;;  %v5679_v53 = vld [vmem:[%s6754_s26 + $0x3a8] sm:$0x1] }
 0x2a3   : > { %v3326_v11 = vadd.f32 %v3314_v39, %v3290_v36  ;;  %v3276_v63 = vmul.f32 %v5665_v33, %v7664_v34  ;;  %v3296_v58 = vmul.f32 %v5657_v6, %v7667_v1  ;;  %v3300_v21 = vmul.f32 %v5661_v47, %v7667_v1 }
 0x2a4   : > { %v3317_v20 = vsel %vm1094_vm0, %v3315_v12, %v3316_v41  ;;  %v3252_v56 = vadd.f32 %v3248_v52, %v3244_v51  ;;  %v3291_v10 = vadd.f32 %v3283_v44, %v3271_v42  ;;  %v3264_v14 = vrot.slane %v3256_v55, 1  ;;  %v5684_v12 = vld [vmem:[%s6757_s27 + $0x390] sm:$0xff] }
 0x2a5   : > { %v3334_v9 = vadd.f32 %v5667_v38, %v3326_v11  ;;  %v3284_v59 = vrot.slane %v3276_v63, 1  ;;  %v3318_v8 = vrot.slane %v3296_v58, 2  ;;  %v3319_v4 = vrot.slane %v3300_v21, 2  ;;  %v5676_v38 = vld [vmem:[%s6754_s26 + $0x390] sm:$0xff] }
 0x2a6   : > { %v3355_v23 = vmul.f32 %v5674_v0, %v7572_v61  ;;  %v3359_v22 = vmul.f32 %v5682_v19, %v7575_v48  ;;  %v3327_v25 = vadd.f32 %v3317_v20, %v3291_v10  ;;  %v3272_v26 = vadd.f32 %v3264_v14, %v3252_v56  ;;  %v5680_v63 = vld [vmem:[%s6754_s26 + $0x3b0] sm:$0x1]  ;;  %v5685_v10 = vld [vmem:[%s6757_s27 + $0x398] sm:$0xff] }
 0x2a7   : > { %5671 = vst [vmem:[%s6849_s29 + $0xa8] sm:$0x7f] %v3334_v9  ;;  %v3367_v7 = vmul.f32 %v5674_v0, %v7579_v13  ;;  %v3387_v2 = vmul.f32 %v5682_v19, %v7582_v27  ;;  %v3320_v32 = vsel %vm1094_vm0, %v3318_v8, %v3319_v4  ;;  %v3407_v6 = vmul.f32 %v5674_v0, %v7587_v29  ;;  %v5669_v13 = vld [vmem:[%s6849_s29 + $0xb8] sm:$0x7f]  ;;  %v5677_v9 = vld [vmem:[%s6754_s26 + $0x398] sm:$0xff] }
 0x2a8   : > { %v3363_v24 = vadd.f32 %v3359_v22, %v3355_v23  ;;  %v3411_v61 = vmul.f32 %v5678_v17, %v7587_v29  ;;  %v3335_v48 = vadd.f32 %v5668_v28, %v3327_v25  ;;  %v3292_v33 = vadd.f32 %v3284_v59, %v3272_v26  ;;  %v5681_v23 = vld [vmem:[%s6754_s26 + $0x3b8] sm:$0x1] }
 0x2a9   : > { %v3375_v39 = vrot.slane %v3367_v7, 1  ;;  %v3395_v43 = vrot.slane %v3387_v2, 1  ;;  %v3423_v35 = vrot.slane %v3407_v6, 2  ;;  %v3356_v54 = vmul.f32 %v5675_v57, %v7597_v16 }
 0x2aa   : > { %v3424_v27 = vrot.slane %v3411_v61, 2  ;;  %v3360_v36 = vmul.f32 %v5683_v31, %v7602_v30  ;;  %5672 = vst [vmem:[%s6849_s29 + $0xb0] sm:$0x7f] %v3335_v48  ;;  %v3328_v37 = vadd.f32 %v3320_v32, %v3292_v33  ;;  %v3368_v29 = vmul.f32 %v5675_v57, %v7606_v40  ;;  %v5686_v40 = vld [vmem:[%s6849_s29 + $0xc0] sm:$0x7f] }
 0x2ab   : > { %v3383_v44 = vadd.f32 %v3375_v39, %v3363_v24  ;;  %v3388_v47 = vmul.f32 %v5683_v31, %v7609_v45  ;;  %v3408_v52 = vmul.f32 %v5675_v57, %v7613_v49  ;;  %v3412_v16 = vmul.f32 %v5679_v53, %v7613_v49  ;;  %v7962_v31 = vld [vmem:[%s6760_s28 + $0x3c] sm:$0xf]  ;;  %v7965_v32 = vld [vmem:[%s6760_s28 + $0x40] sm:$0xf]  ;;  %v7971_v61 = vld [vmem:[%s6760_s28 + $0x44] sm:$0xf] }
 0x2ac   : > { %v3425_v41 = vsel %vm1094_vm0, %v3423_v35, %v3424_v27  ;;  %v3364_v51 = vadd.f32 %v3360_v36, %v3356_v54  ;;  %v3336_v30 = vadd.f32 %v5669_v13, %v3328_v37  ;;  %v3376_v42 = vrot.slane %v3368_v29, 1  ;;  %v7974_v48 = vld [vmem:[%s6760_s28 + $0x48] sm:$0xf]  ;;  %v5699_v53 = vld [vmem:[%s6754_s26 + $0xc0] sm:$0xff]  ;;  %v5688_v35 = vld [vmem:[%s6849_s29 + $0xd0] sm:$0x7f] }
 0x2ad   : > { %v3403_v11 = vadd.f32 %v3395_v43, %v3383_v44  ;;  %v3396_v55 = vrot.slane %v3388_v47, 1  ;;  %v3426_v0 = vrot.slane %v3408_v52, 2  ;;  %v3427_v45 = vrot.slane %v3412_v16, 2  ;;  %v7977_v43 = vld [vmem:[%s6760_s28 + $0x4c] sm:$0xf]  ;;  %v5707_v13 = vld [vmem:[%s6757_s27 + $0xc0] sm:$0xff] }
 0x2ae   : > { %v3357_v19 = vmul.f32 %v5676_v38, %v7624_v62  ;;  %v3361_v20 = vmul.f32 %v5684_v12, %v7629_v60  ;;  %5673 = vst [vmem:[%s6849_s29 + $0xb8] sm:$0x7f] %v3336_v30  ;;  %v3384_v58 = vadd.f32 %v3376_v42, %v3364_v51  ;;  %v3369_v49 = vmul.f32 %v5676_v38, %v7633_v18  ;;  %v5687_v18 = vld [vmem:[%s6849_s29 + $0xc8] sm:$0x7f] }
 0x2af   : > { %v3439_v56 = vadd.f32 %v3425_v41, %v3403_v11  ;;  %v3389_v21 = vmul.f32 %v5684_v12, %v7637_v5  ;;  %v3428_v14 = vsel %vm1094_vm0, %v3426_v0, %v3427_v45  ;;  %v3409_v17 = vmul.f32 %v5676_v38, %v7640_v3  ;;  %v5703_v38 = vld [vmem:[%s6754_s26 + $0xe0] sm:$0x1] }
 0x2b0   : > { %v3365_v59 = vadd.f32 %v3361_v20, %v3357_v19  ;;  %v3413_v62 = vmul.f32 %v5680_v63, %v7640_v3  ;;  %v3404_v28 = vadd.f32 %v3396_v55, %v3384_v58  ;;  %v3377_v8 = vrot.slane %v3369_v49, 1  ;;  %v5689_v55 = vld [vmem:[%s6849_s29 + $0xd8] sm:$0x7f]  ;;  %v5700_v19 = vld [vmem:[%s6754_s26 + $0xc8] sm:$0xff] }
 0x2b1   : > { %v3447_v60 = vadd.f32 %v5686_v40, %v3439_v56  ;;  %v3397_v4 = vrot.slane %v3389_v21, 1  ;;  %v3429_v5 = vrot.slane %v3409_v17, 2  ;;  %v3358_v25 = vmul.f32 %v5677_v9, %v7652_v50  ;;  %v5708_v21 = vld [vmem:[%s6757_s27 + $0xc8] sm:$0xff] }
 0x2b2   : > { %v3430_v22 = vrot.slane %v3413_v62, 2  ;;  %v3362_v26 = vmul.f32 %v5685_v10, %v7655_v15  ;;  %v3440_v7 = vadd.f32 %v3428_v14, %v3404_v28  ;;  %v3385_v3 = vadd.f32 %v3377_v8, %v3365_v59  ;;  %v5704_v17 = vld [vmem:[%s6754_s26 + $0xe8] sm:$0x1] }
 0x2b3   : > { %5690 = vst [vmem:[%s6849_s29 + $0xc0] sm:$0x7f] %v3447_v60  ;;  %v3370_v2 = vmul.f32 %v5677_v9, %v7661_v46  ;;  %v3390_v57 = vmul.f32 %v5685_v10, %v7664_v34  ;;  %v3410_v15 = vmul.f32 %v5677_v9, %v7667_v1  ;;  %v3414_v6 = vmul.f32 %v5681_v23, %v7667_v1 }
 0x2b4   : > { %v3431_v24 = vsel %vm1094_vm0, %v3429_v5, %v3430_v22  ;;  %v3366_v50 = vadd.f32 %v3362_v26, %v3358_v25  ;;  %v3448_v46 = vadd.f32 %v5687_v18, %v3440_v7  ;;  %v3405_v33 = vadd.f32 %v3397_v4, %v3385_v3  ;;  %v5701_v3 = vld [vmem:[%s6754_s26 + $0xd0] sm:$0xff] }
 0x2b5   : > { %v3378_v34 = vrot.slane %v3370_v2, 1  ;;  %v3398_v39 = vrot.slane %v3390_v57, 1  ;;  %v3432_v27 = vrot.slane %v3410_v15, 2  ;;  %v3433_v54 = vrot.slane %v3414_v6, 2  ;;  %v3610_v2 = vld [vmem:[%s6849_s29] sm:$0x7f] }
 0x2b6   : > { %v7983_v36 = vperm.slane %v7962_v31, 0  ;;  %v7986_v1 = vperm.slane %v7965_v32, 0  ;;  %5691 = vst [vmem:[%s6849_s29 + $0xc8] sm:$0x7f] %v3448_v46  ;;  %v3441_v37 = vadd.f32 %v3431_v24, %v3405_v33  ;;  %v7990_v29 = vperm.slane %v7971_v61, 0  ;;  %v5709_v6 = vld [vmem:[%s6757_s27 + $0xd0] sm:$0xff] }
 0x2b7   : > { %v3386_v44 = vadd.f32 %v3378_v34, %v3366_v50  ;;  %v7993_v47 = vperm.slane %v7974_v48, 0  ;;  %v3434_v12 = vsel %vm1094_vm0, %v3432_v27, %v3433_v54  ;;  %v7998_v41 = vperm.slane %v7977_v43, 0 }
 0x2b8   : > { %v3522_v51 = vmul.f32 %v5699_v53, %v7983_v36  ;;  %v3526_v52 = vmul.f32 %v5707_v13, %v7986_v1  ;;  %v3449_v16 = vadd.f32 %v5688_v35, %v3441_v37  ;;  %v3534_v11 = vmul.f32 %v5699_v53, %v7990_v29 }
 0x2b9   : > { %v3406_v30 = vadd.f32 %v3398_v39, %v3386_v44  ;;  %v3554_v42 = vmul.f32 %v5707_v13, %v7993_v47  ;;  %v3574_v40 = vmul.f32 %v5699_v53, %v7998_v41  ;;  %v3578_v0 = vmul.f32 %v5703_v38, %v7998_v41  ;;  %v5705_v53 = vld [vmem:[%s6754_s26 + $0xf0] sm:$0x1] }
 0x2ba   : > { %v3530_v63 = vadd.f32 %v3526_v52, %v3522_v51  ;;  %v8008_v45 = vperm.slane %v7962_v31, 1  ;;  %5692 = vst [vmem:[%s6849_s29 + $0xd0] sm:$0x7f] %v3449_v16  ;;  %v3542_v56 = vrot.slane %v3534_v11, 1  ;;  %v8013_v49 = vperm.slane %v7965_v32, 1 }
 0x2bb   : > { %v3442_v20 = vadd.f32 %v3434_v12, %v3406_v30  ;;  %v3562_v58 = vrot.slane %v3554_v42, 1  ;;  %v3590_v9 = vrot.slane %v3574_v40, 2  ;;  %v3591_v10 = vrot.slane %v3578_v0, 2  ;;  %v3611_v52 = vld [vmem:[%s6849_s29 + $0x8] sm:$0x7f]  ;;  %v5702_v0 = vld [vmem:[%s6754_s26 + $0xd8] sm:$0xff] }
 0x2bc   : > { %v8017_v14 = vperm.slane %v7971_v61, 1  ;;  %v8020_v59 = vperm.slane %v7974_v48, 1  ;;  %v3550_v60 = vadd.f32 %v3542_v56, %v3530_v63  ;;  %v8024_v28 = vperm.slane %v7977_v43, 1 }
 0x2bd   : > { %v3450_v62 = vadd.f32 %v5689_v55, %v3442_v20  ;;  %v3523_v8 = vmul.f32 %v5700_v19, %v8008_v45  ;;  %v3592_v4 = vsel %vm1094_vm0, %v3590_v9, %v3591_v10  ;;  %v3527_v23 = vmul.f32 %v5708_v21, %v8013_v49  ;;  %v5711_v9 = vld [vmem:[%s6754_s26 + $0x140] sm:$0xff] }
 0x2be   : > { %v3535_v18 = vmul.f32 %v5700_v19, %v8017_v14  ;;  %v3555_v5 = vmul.f32 %v5708_v21, %v8020_v59  ;;  %v3570_v22 = vadd.f32 %v3562_v58, %v3550_v60  ;;  %v3575_v25 = vmul.f32 %v5700_v19, %v8024_v28  ;;  %v5710_v19 = vld [vmem:[%s6757_s27 + $0xd8] sm:$0xff]  ;;  %v5719_v60 = vld [vmem:[%s6757_s27 + $0x140] sm:$0xff] }
 0x2bf   : > { %5693 = vst [vmem:[%s6849_s29 + $0xd8] sm:$0x7f] %v3450_v62  ;;  %v3579_v26 = vmul.f32 %v5704_v17, %v8024_v28  ;;  %v8035_v7 = vperm.slane %v7962_v31, 2  ;;  %v3531_v57 = vadd.f32 %v3527_v23, %v3523_v8  ;;  %v8040_v15 = vperm.slane %v7965_v32, 2 }
 0x2c0   : > { %v3543_v24 = vrot.slane %v3535_v18, 1  ;;  %v3563_v50 = vrot.slane %v3555_v5, 1  ;;  %v3606_v46 = vadd.f32 %v3592_v4, %v3570_v22  ;;  %v3593_v33 = vrot.slane %v3575_v25, 2 }
 0x2c1   : > { %v3594_v34 = vrot.slane %v3579_v26, 2  ;;  %v8044_v39 = vperm.slane %v7971_v61, 2  ;;  %v8048_v35 = vperm.slane %v7974_v48, 2  ;;  %v8051_v27 = vperm.slane %v7977_v43, 2 }
 0x2c2   : > { %v3551_v13 = vadd.f32 %v3543_v24, %v3531_v57  ;;  %v3524_v54 = vmul.f32 %v5701_v3, %v8035_v7  ;;  %v3614_v37 = vadd.f32 %v3610_v2, %v3606_v46  ;;  %v3528_v38 = vmul.f32 %v5709_v6, %v8040_v15 }
 0x2c3   : > { %v3595_v44 = vsel %vm1094_vm0, %v3593_v33, %v3594_v34  ;;  %v3536_v12 = vmul.f32 %v5701_v3, %v8044_v39  ;;  %v3556_v16 = vmul.f32 %v5709_v6, %v8048_v35  ;;  %v3576_v30 = vmul.f32 %v5701_v3, %v8051_v27  ;;  %v5715_v3 = vld [vmem:[%s6754_s26 + $0x160] sm:$0x1]  ;;  %v5712_v33 = vld [vmem:[%s6754_s26 + $0x148] sm:$0xff] }
 0x2c4   : > { %v3571_v51 = vadd.f32 %v3563_v50, %v3551_v13  ;;  %v3580_v11 = vmul.f32 %v5705_v53, %v8051_v27  ;;  %3618 = vst [vmem:[%s6849_s29] sm:$0x7f] %v3614_v37  ;;  %v3532_v42 = vadd.f32 %v3528_v38, %v3524_v54  ;;  %v8063_v63 = vperm.slane %v7962_v31, 3  ;;  %v5720_v37 = vld [vmem:[%s6757_s27 + $0x148] sm:$0xff] }
 0x2c5   : > { %v3544_v55 = vrot.slane %v3536_v12, 1  ;;  %v8066_v40 = vperm.slane %v7965_v32, 3  ;;  %v3564_v56 = vrot.slane %v3556_v16, 1  ;;  %v3596_v58 = vrot.slane %v3576_v30, 2  ;;  %v5706_v32 = vld [vmem:[%s6754_s26 + $0xf8] sm:$0x1] }
 0x2c6   : > { %v3607_v20 = vadd.f32 %v3595_v44, %v3571_v51  ;;  %v3597_v21 = vrot.slane %v3580_v11, 2  ;;  %v8072_v17 = vperm.slane %v7971_v61, 3  ;;  %v8075_v62 = vperm.slane %v7974_v48, 3  ;;  %v5716_v11 = vld [vmem:[%s6754_s26 + $0x168] sm:$0x1] }
 0x2c7   : > { %v3552_v10 = vadd.f32 %v3544_v55, %v3532_v42  ;;  %v8078_v31 = vperm.slane %v7977_v43, 3  ;;  %v3525_v23 = vmul.f32 %v5702_v0, %v8063_v63  ;;  %v3529_v18 = vmul.f32 %v5710_v19, %v8066_v40  ;;  %v3612_v43 = vld [vmem:[%s6849_s29 + $0x10] sm:$0x7f] }
 0x2c8   : > { %v3615_v8 = vadd.f32 %v3611_v52, %v3607_v20  ;;  %v3598_v4 = vsel %vm1094_vm0, %v3596_v58, %v3597_v21  ;;  %v3537_v61 = vmul.f32 %v5702_v0, %v8072_v17  ;;  %v3557_v48 = vmul.f32 %v5710_v19, %v8075_v62 }
 0x2c9   : > { %v3572_v5 = vadd.f32 %v3564_v56, %v3552_v10  ;;  %v3577_v22 = vmul.f32 %v5702_v0, %v8078_v31  ;;  %v3533_v25 = vadd.f32 %v3529_v18, %v3525_v23  ;;  %v3581_v26 = vmul.f32 %v5706_v32, %v8078_v31  ;;  %v3613_v56 = vld [vmem:[%s6849_s29 + $0x18] sm:$0x7f]  ;;  %v5713_v32 = vld [vmem:[%s6754_s26 + $0x150] sm:$0xff] }
 0x2ca   : > { %3619 = vst [vmem:[%s6849_s29 + $0x8] sm:$0x7f] %v3615_v8  ;;  %v3634_v2 = vmul.f32 %v5711_v9, %v7983_v36  ;;  %v3638_v57 = vmul.f32 %v5719_v60, %v7986_v1  ;;  %v3545_v50 = vrot.slane %v3537_v61, 1  ;;  %v3565_v6 = vrot.slane %v3557_v48, 1 }
 0x2cb   : > { %v3608_v24 = vadd.f32 %v3598_v4, %v3572_v5  ;;  %v3599_v46 = vrot.slane %v3577_v22, 2  ;;  %v3600_v34 = vrot.slane %v3581_v26, 2  ;;  %v3646_v13 = vmul.f32 %v5711_v9, %v7990_v29  ;;  %v5723_v26 = vld [vmem:[%s6849_s29 + $0x20] sm:$0x7f] }
 0x2cc   : > { %v3642_v53 = vadd.f32 %v3638_v57, %v3634_v2  ;;  %v3666_v54 = vmul.f32 %v5719_v60, %v7993_v47  ;;  %v3553_v38 = vadd.f32 %v3545_v50, %v3533_v25  ;;  %v3686_v12 = vmul.f32 %v5711_v9, %v7998_v41  ;;  %v5721_v60 = vld [vmem:[%s6757_s27 + $0x150] sm:$0xff] }
 0x2cd   : > { %v3616_v44 = vadd.f32 %v3612_v43, %v3608_v24  ;;  %v3690_v51 = vmul.f32 %v5715_v3, %v7998_v41  ;;  %v3601_v52 = vsel %vm1094_vm0, %v3599_v46, %v3600_v34  ;;  %v3654_v16 = vrot.slane %v3646_v13, 1  ;;  %v5717_v43 = vld [vmem:[%s6754_s26 + $0x170] sm:$0x1]  ;;  %v5722_v34 = vld [vmem:[%s6757_s27 + $0x158] sm:$0xff] }
 0x2ce   : > { %v3674_v30 = vrot.slane %v3666_v54, 1  ;;  %v3635_v42 = vmul.f32 %v5712_v33, %v8008_v45  ;;  %v3573_v55 = vadd.f32 %v3565_v6, %v3553_v38  ;;  %v3702_v0 = vrot.slane %v3686_v12, 2 }
 0x2cf   : > { %3620 = vst [vmem:[%s6849_s29 + $0x10] sm:$0x7f] %v3616_v44  ;;  %v3703_v19 = vrot.slane %v3690_v51, 2  ;;  %v3639_v20 = vmul.f32 %v5720_v37, %v8013_v49  ;;  %v3662_v58 = vadd.f32 %v3654_v16, %v3642_v53  ;;  %v3647_v21 = vmul.f32 %v5712_v33, %v8017_v14  ;;  %v5724_v16 = vld [vmem:[%s6849_s29 + $0x28] sm:$0x7f] }
 0x2d0   : > { %v3667_v9 = vmul.f32 %v5720_v37, %v8020_v59  ;;  %v3687_v10 = vmul.f32 %v5712_v33, %v8024_v28  ;;  %v3609_v8 = vadd.f32 %v3601_v52, %v3573_v55  ;;  %v3691_v18 = vmul.f32 %v5716_v11, %v8024_v28  ;;  %v5714_v33 = vld [vmem:[%s6754_s26 + $0x158] sm:$0xff] }
 0x2d1   : > { %v3704_v4 = vsel %vm1094_vm0, %v3702_v0, %v3703_v19  ;;  %v3643_v23 = vadd.f32 %v3639_v20, %v3635_v42  ;;  %v3682_v5 = vadd.f32 %v3674_v30, %v3662_v58  ;;  %v3655_v61 = vrot.slane %v3647_v21, 1  ;;  %v5718_v52 = vld [vmem:[%s6754_s26 + $0x178] sm:$0x1]  ;;  %v5731_v58 = vld [vmem:[%s6754_s26 + $0x1c0] sm:$0xff] }
 0x2d2   : > { %v3675_v48 = vrot.slane %v3667_v9, 1  ;;  %v3705_v22 = vrot.slane %v3687_v10, 2  ;;  %v3617_v25 = vadd.f32 %v3613_v56, %v3609_v8  ;;  %v3706_v3 = vrot.slane %v3691_v18, 2  ;;  %v5739_v21 = vld [vmem:[%s6757_s27 + $0x1c0] sm:$0xff] }
 0x2d3   : > { %v3636_v2 = vmul.f32 %v5713_v32, %v8035_v7  ;;  %v3640_v57 = vmul.f32 %v5721_v60, %v8040_v15  ;;  %v3718_v24 = vadd.f32 %v3704_v4, %v3682_v5  ;;  %v3663_v50 = vadd.f32 %v3655_v61, %v3643_v23  ;;  %v5735_v5 = vld [vmem:[%s6754_s26 + $0x1e0] sm:$0x1]  ;;  %v5725_v61 = vld [vmem:[%s6849_s29 + $0x30] sm:$0x7f] }
 0x2d4   : > { %v3648_v6 = vmul.f32 %v5713_v32, %v8044_v39  ;;  %v3668_v46 = vmul.f32 %v5721_v60, %v8048_v35  ;;  %3621 = vst [vmem:[%s6849_s29 + $0x18] sm:$0x7f] %v3617_v25  ;;  %v3707_v53 = vsel %vm1094_vm0, %v3705_v22, %v3706_v3  ;;  %v3688_v54 = vmul.f32 %v5713_v32, %v8051_v27 }
 0x2d5   : > { %v3644_v13 = vadd.f32 %v3640_v57, %v3636_v2  ;;  %v3692_v37 = vmul.f32 %v5717_v43, %v8051_v27  ;;  %v3726_v44 = vadd.f32 %v5723_v26, %v3718_v24  ;;  %v3683_v38 = vadd.f32 %v3675_v48, %v3663_v50  ;;  %v5732_v24 = vld [vmem:[%s6754_s26 + $0x1c8] sm:$0xff] }
 0x2d6   : > { %v3656_v12 = vrot.slane %v3648_v6, 1  ;;  %v3676_v51 = vrot.slane %v3668_v46, 1  ;;  %v3708_v30 = vrot.slane %v3688_v54, 2  ;;  %v3637_v42 = vmul.f32 %v5714_v33, %v8063_v63  ;;  %v5740_v50 = vld [vmem:[%s6757_s27 + $0x1c8] sm:$0xff] }
 0x2d7   : > { %v3709_v11 = vrot.slane %v3692_v37, 2  ;;  %v3641_v55 = vmul.f32 %v5722_v34, %v8066_v40  ;;  %5727 = vst [vmem:[%s6849_s29 + $0x20] sm:$0x7f] %v3726_v44  ;;  %v3719_v0 = vadd.f32 %v3707_v53, %v3683_v38  ;;  %v3649_v20 = vmul.f32 %v5714_v33, %v8072_v17  ;;  %v5736_v44 = vld [vmem:[%s6754_s26 + $0x1e8] sm:$0x1] }
 0x2d8   : > { %v3664_v19 = vadd.f32 %v3656_v12, %v3644_v13  ;;  %v3669_v56 = vmul.f32 %v5722_v34, %v8075_v62  ;;  %v3689_v32 = vmul.f32 %v5714_v33, %v8078_v31  ;;  %v3693_v60 = vmul.f32 %v5718_v52, %v8078_v31  ;;  %v5726_v38 = vld [vmem:[%s6849_s29 + $0x38] sm:$0x7f] }
 0x2d9   : > { %v3710_v9 = vsel %vm1094_vm0, %v3708_v30, %v3709_v11  ;;  %v3645_v10 = vadd.f32 %v3641_v55, %v3637_v42  ;;  %v3727_v8 = vadd.f32 %v5724_v16, %v3719_v0  ;;  %v3657_v23 = vrot.slane %v3649_v20, 1  ;;  %v5733_v0 = vld [vmem:[%s6754_s26 + $0x1d0] sm:$0xff] }
 0x2da   : > { %v3684_v4 = vadd.f32 %v3676_v51, %v3664_v19  ;;  %v3677_v18 = vrot.slane %v3669_v56, 1  ;;  %v3711_v48 = vrot.slane %v3689_v32, 2  ;;  %v3712_v22 = vrot.slane %v3693_v60, 2  ;;  %v5741_v19 = vld [vmem:[%s6757_s27 + $0x1d0] sm:$0xff] }
 0x2db   : > { %v3746_v43 = vmul.f32 %v5731_v58, %v7983_v36  ;;  %v3750_v25 = vmul.f32 %v5739_v21, %v7986_v1  ;;  %5728 = vst [vmem:[%s6849_s29 + $0x28] sm:$0x7f] %v3727_v8  ;;  %v3665_v3 = vadd.f32 %v3657_v23, %v3645_v10  ;;  %v3758_v2 = vmul.f32 %v5731_v58, %v7990_v29  ;;  %v5737_v8 = vld [vmem:[%s6754_s26 + $0x1f0] sm:$0x1] }
 0x2dc   : > { %v3720_v26 = vadd.f32 %v3710_v9, %v3684_v4  ;;  %v3778_v57 = vmul.f32 %v5739_v21, %v7993_v47  ;;  %v3713_v6 = vsel %vm1094_vm0, %v3711_v48, %v3712_v22  ;;  %v3798_v33 = vmul.f32 %v5731_v58, %v7998_v41  ;;  %v5743_v4 = vld [vmem:[%s6849_s29 + $0x40] sm:$0x7f] }
 0x2dd   : > { %v3754_v46 = vadd.f32 %v3750_v25, %v3746_v43  ;;  %v3802_v34 = vmul.f32 %v5735_v5, %v7998_v41  ;;  %v3685_v13 = vadd.f32 %v3677_v18, %v3665_v3  ;;  %v3766_v54 = vrot.slane %v3758_v2, 1  ;;  %v5742_v3 = vld [vmem:[%s6757_s27 + $0x1d8] sm:$0xff] }
 0x2de   : > { %v3728_v53 = vadd.f32 %v5725_v61, %v3720_v26  ;;  %v3786_v37 = vrot.slane %v3778_v57, 1  ;;  %v3814_v12 = vrot.slane %v3798_v33, 2  ;;  %v3747_v52 = vmul.f32 %v5732_v24, %v8008_v45  ;;  %v5734_v26 = vld [vmem:[%s6754_s26 + $0x1d8] sm:$0xff] }
 0x2df   : > { %v3815_v51 = vrot.slane %v3802_v34, 2  ;;  %v3751_v16 = vmul.f32 %v5740_v50, %v8013_v49  ;;  %v3721_v30 = vadd.f32 %v3713_v6, %v3685_v13  ;;  %v3774_v11 = vadd.f32 %v3766_v54, %v3754_v46  ;;  %v5744_v13 = vld [vmem:[%s6849_s29 + $0x48] sm:$0x7f] }
 0x2e0   : > { %5729 = vst [vmem:[%s6849_s29 + $0x30] sm:$0x7f] %v3728_v53  ;;  %v3759_v42 = vmul.f32 %v5732_v24, %v8017_v14  ;;  %v3779_v55 = vmul.f32 %v5740_v50, %v8020_v59  ;;  %v3799_v58 = vmul.f32 %v5732_v24, %v8024_v28  ;;  %v3803_v21 = vmul.f32 %v5736_v44, %v8024_v28  ;;  %v5738_v53 = vld [vmem:[%s6754_s26 + $0x1f8] sm:$0x1] }
 0x2e1   : > { %v3816_v20 = vsel %vm1094_vm0, %v3814_v12, %v3815_v51  ;;  %v3755_v56 = vadd.f32 %v3751_v16, %v3747_v52  ;;  %v3729_v9 = vadd.f32 %v5726_v38, %v3721_v30  ;;  %v3794_v10 = vadd.f32 %v3786_v37, %v3774_v11  ;;  %v5751_v30 = vld [vmem:[%s6754_s26 + $0x240] sm:$0xff] }
 0x2e2   : > { %v3767_v32 = vrot.slane %v3759_v42, 1  ;;  %v3787_v60 = vrot.slane %v3779_v55, 1  ;;  %v3817_v23 = vrot.slane %v3799_v58, 2  ;;  %v3818_v18 = vrot.slane %v3803_v21, 2  ;;  %v5759_v11 = vld [vmem:[%s6757_s27 + $0x240] sm:$0xff] }
 0x2e3   : > { %v3748_v5 = vmul.f32 %v5733_v0, %v8035_v7  ;;  %v3752_v61 = vmul.f32 %v5741_v19, %v8040_v15  ;;  %5730 = vst [vmem:[%s6849_s29 + $0x38] sm:$0x7f] %v3729_v9  ;;  %v3830_v48 = vadd.f32 %v3816_v20, %v3794_v10  ;;  %v3760_v43 = vmul.f32 %v5733_v0, %v8044_v39  ;;  %v5755_v9 = vld [vmem:[%s6754_s26 + $0x260] sm:$0x1]  ;;  %v5745_v10 = vld [vmem:[%s6849_s29 + $0x50] sm:$0x7f] }
 0x2e4   : > { %v3775_v22 = vadd.f32 %v3767_v32, %v3755_v56  ;;  %v3780_v25 = vmul.f32 %v5741_v19, %v8048_v35  ;;  %v3819_v2 = vsel %vm1094_vm0, %v3817_v23, %v3818_v18  ;;  %v3800_v24 = vmul.f32 %v5733_v0, %v8051_v27 }
 0x2e5   : > { %v3756_v57 = vadd.f32 %v3752_v61, %v3748_v5  ;;  %v3804_v50 = vmul.f32 %v5737_v8, %v8051_v27  ;;  %v3838_v6 = vadd.f32 %v5743_v4, %v3830_v48  ;;  %v3768_v33 = vrot.slane %v3760_v43, 1  ;;  %v5752_v48 = vld [vmem:[%s6754_s26 + $0x248] sm:$0xff] }
 0x2e6   : > { %v3795_v46 = vadd.f32 %v3787_v60, %v3775_v22  ;;  %v3788_v34 = vrot.slane %v3780_v25, 1  ;;  %v3820_v54 = vrot.slane %v3800_v24, 2  ;;  %v3749_v44 = vmul.f32 %v5734_v26, %v8063_v63  ;;  %v5760_v22 = vld [vmem:[%s6757_s27 + $0x248] sm:$0xff] }
 0x2e7   : > { %v3821_v37 = vrot.slane %v3804_v50, 2  ;;  %v3753_v38 = vmul.f32 %v5742_v3, %v8066_v40  ;;  %5747 = vst [vmem:[%s6849_s29 + $0x40] sm:$0x7f] %v3838_v6  ;;  %v3776_v51 = vadd.f32 %v3768_v33, %v3756_v57  ;;  %v3761_v52 = vmul.f32 %v5734_v26, %v8072_v17  ;;  %v5756_v6 = vld [vmem:[%s6754_s26 + $0x268] sm:$0x1] }
 0x2e8   : > { %v3831_v12 = vadd.f32 %v3819_v2, %v3795_v46  ;;  %v3781_v16 = vmul.f32 %v5742_v3, %v8075_v62  ;;  %v3801_v0 = vmul.f32 %v5734_v26, %v8078_v31  ;;  %v3805_v19 = vmul.f32 %v5738_v53, %v8078_v31  ;;  %v5746_v46 = vld [vmem:[%s6849_s29 + $0x58] sm:$0x7f] }
 0x2e9   : > { %v3822_v42 = vsel %vm1094_vm0, %v3820_v54, %v3821_v37  ;;  %v3757_v55 = vadd.f32 %v3753_v38, %v3749_v44  ;;  %v3796_v56 = vadd.f32 %v3788_v34, %v3776_v51  ;;  %v3769_v58 = vrot.slane %v3761_v52, 1  ;;  %v5761_v51 = vld [vmem:[%s6757_s27 + $0x250] sm:$0xff] }
 0x2ea   : > { %v3839_v20 = vadd.f32 %v5744_v13, %v3831_v12  ;;  %v3789_v21 = vrot.slane %v3781_v16, 1  ;;  %v3823_v32 = vrot.slane %v3801_v0, 2  ;;  %v3824_v60 = vrot.slane %v3805_v19, 2  ;;  %v5753_v12 = vld [vmem:[%s6754_s26 + $0x250] sm:$0xff] }
 0x2eb   : > { %v3858_v8 = vmul.f32 %v5751_v30, %v7983_v36  ;;  %v3862_v4 = vmul.f32 %v5759_v11, %v7986_v1  ;;  %v3832_v23 = vadd.f32 %v3822_v42, %v3796_v56  ;;  %v3777_v18 = vadd.f32 %v3769_v58, %v3757_v55  ;;  %v5763_v56 = vld [vmem:[%s6849_s29 + $0x60] sm:$0x7f] }
 0x2ec   : > { %5748 = vst [vmem:[%s6849_s29 + $0x48] sm:$0x7f] %v3839_v20  ;;  %v3870_v5 = vmul.f32 %v5751_v30, %v7990_v29  ;;  %v3890_v61 = vmul.f32 %v5759_v11, %v7993_v47  ;;  %v3825_v43 = vsel %vm1094_vm0, %v3823_v32, %v3824_v60  ;;  %v3910_v26 = vmul.f32 %v5751_v30, %v7998_v41  ;;  %v5757_v20 = vld [vmem:[%s6754_s26 + $0x270] sm:$0x1] }
 0x2ed   : > { %v3866_v25 = vadd.f32 %v3862_v4, %v3858_v8  ;;  %v3914_v3 = vmul.f32 %v5755_v9, %v7998_v41  ;;  %v3840_v2 = vadd.f32 %v5745_v10, %v3832_v23  ;;  %v3797_v57 = vadd.f32 %v3789_v21, %v3777_v18  ;;  %v5754_v23 = vld [vmem:[%s6754_s26 + $0x258] sm:$0xff] }
 0x2ee   : > { %v3878_v24 = vrot.slane %v3870_v5, 1  ;;  %v3898_v50 = vrot.slane %v3890_v61, 1  ;;  %v3926_v33 = vrot.slane %v3910_v26, 2  ;;  %v3859_v53 = vmul.f32 %v5752_v48, %v8008_v45  ;;  %v5762_v18 = vld [vmem:[%s6757_s27 + $0x258] sm:$0xff] }
 0x2ef   : > { %v3927_v34 = vrot.slane %v3914_v3, 2  ;;  %v3863_v13 = vmul.f32 %v5760_v22, %v8013_v49  ;;  %5749 = vst [vmem:[%s6849_s29 + $0x50] sm:$0x7f] %v3840_v2  ;;  %v3833_v54 = vadd.f32 %v3825_v43, %v3797_v57  ;;  %v3871_v44 = vmul.f32 %v5752_v48, %v8017_v14  ;;  %v5758_v2 = vld [vmem:[%s6754_s26 + $0x278] sm:$0x1] }
 0x2f0   : > { %v3886_v37 = vadd.f32 %v3878_v24, %v3866_v25  ;;  %v3891_v38 = vmul.f32 %v5760_v22, %v8020_v59  ;;  %v3911_v30 = vmul.f32 %v5752_v48, %v8024_v28  ;;  %v3915_v11 = vmul.f32 %v5756_v6, %v8024_v28  ;;  %v5764_v57 = vld [vmem:[%s6849_s29 + $0x68] sm:$0x7f] }
 0x2f1   : > { %v3928_v52 = vsel %vm1094_vm0, %v3926_v33, %v3927_v34  ;;  %v3867_v16 = vadd.f32 %v3863_v13, %v3859_v53  ;;  %v3841_v42 = vadd.f32 %v5746_v46, %v3833_v54  ;;  %v3879_v0 = vrot.slane %v3871_v44, 1  ;;  %v5771_v54 = vld [vmem:[%s6754_s26 + $0x2c0] sm:$0xff] }
 0x2f2   : > { %v3906_v55 = vadd.f32 %v3898_v50, %v3886_v37  ;;  %v3899_v19 = vrot.slane %v3891_v38, 1  ;;  %v3929_v58 = vrot.slane %v3911_v30, 2  ;;  %v3930_v21 = vrot.slane %v3915_v11, 2  ;;  %v5779_v37 = vld [vmem:[%s6757_s27 + $0x2c0] sm:$0xff] }
 0x2f3   : > { %v3860_v9 = vmul.f32 %v5753_v12, %v8035_v7  ;;  %v3864_v10 = vmul.f32 %v5761_v51, %v8040_v15  ;;  %5750 = vst [vmem:[%s6849_s29 + $0x58] sm:$0x7f] %v3841_v42  ;;  %v3887_v60 = vadd.f32 %v3879_v0, %v3867_v16  ;;  %v3872_v8 = vmul.f32 %v5753_v12, %v8044_v39  ;;  %v5775_v42 = vld [vmem:[%s6754_s26 + $0x2e0] sm:$0x1] }
 0x2f4   : > { %v3942_v32 = vadd.f32 %v3928_v52, %v3906_v55  ;;  %v3892_v4 = vmul.f32 %v5761_v51, %v8048_v35  ;;  %v3931_v5 = vsel %vm1094_vm0, %v3929_v58, %v3930_v21  ;;  %v3912_v48 = vmul.f32 %v5753_v12, %v8051_v27  ;;  %v5765_v55 = vld [vmem:[%s6849_s29 + $0x70] sm:$0x7f] }
 0x2f5   : > { %v3868_v61 = vadd.f32 %v3864_v10, %v3860_v9  ;;  %v3916_v22 = vmul.f32 %v5757_v20, %v8051_v27  ;;  %v3907_v25 = vadd.f32 %v3899_v19, %v3887_v60  ;;  %v3880_v26 = vrot.slane %v3872_v8, 1  ;;  %v5780_v60 = vld [vmem:[%s6757_s27 + $0x2c8] sm:$0xff] }
 0x2f6   : > { %v3950_v43 = vadd.f32 %v5763_v56, %v3942_v32  ;;  %v3900_v3 = vrot.slane %v3892_v4, 1  ;;  %v3932_v24 = vrot.slane %v3912_v48, 2  ;;  %v3861_v6 = vmul.f32 %v5754_v23, %v8063_v63  ;;  %v5772_v32 = vld [vmem:[%s6754_s26 + $0x2c8] sm:$0xff] }
 0x2f7   : > { %v3933_v50 = vrot.slane %v3916_v22, 2  ;;  %v3865_v46 = vmul.f32 %v5762_v18, %v8066_v40  ;;  %v3943_v33 = vadd.f32 %v3931_v5, %v3907_v25  ;;  %v3888_v34 = vadd.f32 %v3880_v26, %v3868_v61  ;;  %v5766_v25 = vld [vmem:[%s6849_s29 + $0x78] sm:$0x7f] }
 0x2f8   : > { %5767 = vst [vmem:[%s6849_s29 + $0x60] sm:$0x7f] %v3950_v43  ;;  %v3873_v53 = vmul.f32 %v5754_v23, %v8072_v17  ;;  %v3893_v13 = vmul.f32 %v5762_v18, %v8075_v62  ;;  %v3913_v12 = vmul.f32 %v5754_v23, %v8078_v31  ;;  %v3917_v51 = vmul.f32 %v5758_v2, %v8078_v31  ;;  %v5776_v43 = vld [vmem:[%s6754_s26 + $0x2e8] sm:$0x1] }
 0x2f9   : > { %v3934_v44 = vsel %vm1094_vm0, %v3932_v24, %v3933_v50  ;;  %v3869_v38 = vadd.f32 %v3865_v46, %v3861_v6  ;;  %v3951_v52 = vadd.f32 %v5764_v57, %v3943_v33  ;;  %v3908_v16 = vadd.f32 %v3900_v3, %v3888_v34  ;;  %v5773_v33 = vld [vmem:[%s6754_s26 + $0x2d0] sm:$0xff] }
 0x2fa   : > { %v3881_v30 = vrot.slane %v3873_v53, 1  ;;  %v3901_v11 = vrot.slane %v3893_v13, 1  ;;  %v3935_v0 = vrot.slane %v3913_v12, 2  ;;  %v3936_v19 = vrot.slane %v3917_v51, 2  ;;  %v5781_v34 = vld [vmem:[%s6757_s27 + $0x2d0] sm:$0xff] }
 0x2fb   : > { %v3970_v20 = vmul.f32 %v5771_v54, %v7983_v36  ;;  %v3974_v56 = vmul.f32 %v5779_v37, %v7986_v1  ;;  %5768 = vst [vmem:[%s6849_s29 + $0x68] sm:$0x7f] %v3951_v52  ;;  %v3944_v58 = vadd.f32 %v3934_v44, %v3908_v16  ;;  %v3982_v9 = vmul.f32 %v5771_v54, %v7990_v29  ;;  %v5777_v52 = vld [vmem:[%s6754_s26 + $0x2f0] sm:$0x1]  ;;  %v5783_v16 = vld [vmem:[%s6849_s29 + $0x80] sm:$0x7f] }
 0x2fc   : > { %v3889_v21 = vadd.f32 %v3881_v30, %v3869_v38  ;;  %v4002_v10 = vmul.f32 %v5779_v37, %v7993_v47  ;;  %v3937_v8 = vsel %vm1094_vm0, %v3935_v0, %v3936_v19  ;;  %v4022_v23 = vmul.f32 %v5771_v54, %v7998_v41 }
 0x2fd   : > { %v3978_v4 = vadd.f32 %v3974_v56, %v3970_v20  ;;  %v4026_v18 = vmul.f32 %v5775_v42, %v7998_v41  ;;  %v3952_v5 = vadd.f32 %v5765_v55, %v3944_v58  ;;  %v3990_v48 = vrot.slane %v3982_v9, 1  ;;  %v5774_v58 = vld [vmem:[%s6754_s26 + $0x2d8] sm:$0xff] }
 0x2fe   : > { %v3909_v61 = vadd.f32 %v3901_v11, %v3889_v21  ;;  %v4010_v22 = vrot.slane %v4002_v10, 1  ;;  %v4038_v26 = vrot.slane %v4022_v23, 2  ;;  %v3971_v2 = vmul.f32 %v5772_v32, %v8008_v45  ;;  %v5782_v21 = vld [vmem:[%s6757_s27 + $0x2d8] sm:$0xff] }
 0x2ff   : > { %v4039_v3 = vrot.slane %v4026_v18, 2  ;;  %v3975_v57 = vmul.f32 %v5780_v60, %v8013_v49  ;;  %5769 = vst [vmem:[%s6849_s29 + $0x70] sm:$0x7f] %v3952_v5  ;;  %v3998_v50 = vadd.f32 %v3990_v48, %v3978_v4  ;;  %v3983_v6 = vmul.f32 %v5772_v32, %v8017_v14  ;;  %v5778_v5 = vld [vmem:[%s6754_s26 + $0x2f8] sm:$0x1] }
 0x300   : > { %v3945_v24 = vadd.f32 %v3937_v8, %v3909_v61  ;;  %v4003_v46 = vmul.f32 %v5780_v60, %v8020_v59  ;;  %v4023_v54 = vmul.f32 %v5772_v32, %v8024_v28  ;;  %v4027_v37 = vmul.f32 %v5776_v43, %v8024_v28  ;;  %v5784_v61 = vld [vmem:[%s6849_s29 + $0x88] sm:$0x7f] }
 0x301   : > { %v4040_v53 = vsel %vm1094_vm0, %v4038_v26, %v4039_v3  ;;  %v3979_v13 = vadd.f32 %v3975_v57, %v3971_v2  ;;  %v4018_v38 = vadd.f32 %v4010_v22, %v3998_v50  ;;  %v3991_v12 = vrot.slane %v3983_v6, 1  ;;  %v5799_v50 = vld [vmem:[%s6757_s27 + $0x340] sm:$0xff] }
 0x302   : > { %v3953_v44 = vadd.f32 %v5766_v25, %v3945_v24  ;;  %v4011_v51 = vrot.slane %v4003_v46, 1  ;;  %v4041_v30 = vrot.slane %v4023_v54, 2  ;;  %v4042_v11 = vrot.slane %v4027_v37, 2  ;;  %v5791_v24 = vld [vmem:[%s6754_s26 + $0x340] sm:$0xff] }
 0x303   : > { %v3972_v42 = vmul.f32 %v5773_v33, %v8035_v7  ;;  %v3976_v55 = vmul.f32 %v5781_v34, %v8040_v15  ;;  %v4054_v0 = vadd.f32 %v4040_v53, %v4018_v38  ;;  %v3999_v19 = vadd.f32 %v3991_v12, %v3979_v13  ;;  %v5785_v38 = vld [vmem:[%s6849_s29 + $0x90] sm:$0x7f] }
 0x304   : > { %5770 = vst [vmem:[%s6849_s29 + $0x78] sm:$0x7f] %v3953_v44  ;;  %v3984_v20 = vmul.f32 %v5773_v33, %v8044_v39  ;;  %v4004_v56 = vmul.f32 %v5781_v34, %v8048_v35  ;;  %v4043_v9 = vsel %vm1094_vm0, %v4041_v30, %v4042_v11  ;;  %v4024_v32 = vmul.f32 %v5773_v33, %v8051_v27  ;;  %v5795_v44 = vld [vmem:[%s6754_s26 + $0x360] sm:$0x1] }
 0x305   : > { %v3980_v10 = vadd.f32 %v3976_v55, %v3972_v42  ;;  %v4028_v60 = vmul.f32 %v5777_v52, %v8051_v27  ;;  %v4062_v8 = vadd.f32 %v5783_v16, %v4054_v0  ;;  %v4019_v4 = vadd.f32 %v4011_v51, %v3999_v19  ;;  %v5792_v0 = vld [vmem:[%s6754_s26 + $0x348] sm:$0xff] }
 0x306   : > { %v3992_v23 = vrot.slane %v3984_v20, 1  ;;  %v4012_v18 = vrot.slane %v4004_v56, 1  ;;  %v4044_v48 = vrot.slane %v4024_v32, 2  ;;  %v3973_v43 = vmul.f32 %v5774_v58, %v8063_v63  ;;  %v5800_v19 = vld [vmem:[%s6757_s27 + $0x348] sm:$0xff] }
 0x307   : > { %v4045_v22 = vrot.slane %v4028_v60, 2  ;;  %v3977_v25 = vmul.f32 %v5782_v21, %v8066_v40  ;;  %5787 = vst [vmem:[%s6849_s29 + $0x80] sm:$0x7f] %v4062_v8  ;;  %v4055_v26 = vadd.f32 %v4043_v9, %v4019_v4  ;;  %v3985_v2 = vmul.f32 %v5774_v58, %v8072_v17  ;;  %v5796_v8 = vld [vmem:[%s6754_s26 + $0x368] sm:$0x1] }
 0x308   : > { %v4000_v3 = vadd.f32 %v3992_v23, %v3980_v10  ;;  %v4005_v57 = vmul.f32 %v5782_v21, %v8075_v62  ;;  %v4025_v33 = vmul.f32 %v5774_v58, %v8078_v31  ;;  %v4029_v34 = vmul.f32 %v5778_v5, %v8078_v31  ;;  %v5786_v4 = vld [vmem:[%s6849_s29 + $0x98] sm:$0x7f] }
 0x309   : > { %v4046_v6 = vsel %vm1094_vm0, %v4044_v48, %v4045_v22  ;;  %v3981_v46 = vadd.f32 %v3977_v25, %v3973_v43  ;;  %v4063_v53 = vadd.f32 %v5784_v61, %v4055_v26  ;;  %v3993_v54 = vrot.slane %v3985_v2, 1  ;;  %v5793_v26 = vld [vmem:[%s6754_s26 + $0x350] sm:$0xff] }
 0x30a   : > { %v4020_v13 = vadd.f32 %v4012_v18, %v4000_v3  ;;  %v4013_v37 = vrot.slane %v4005_v57, 1  ;;  %v4047_v12 = vrot.slane %v4025_v33, 2  ;;  %v4048_v51 = vrot.slane %v4029_v34, 2  ;;  %v5801_v3 = vld [vmem:[%s6757_s27 + $0x350] sm:$0xff] }
 0x30b   : > { %v4082_v52 = vmul.f32 %v5791_v24, %v7983_v36  ;;  %v4086_v16 = vmul.f32 %v5799_v50, %v7986_v1  ;;  %5788 = vst [vmem:[%s6849_s29 + $0x88] sm:$0x7f] %v4063_v53  ;;  %v4001_v11 = vadd.f32 %v3993_v54, %v3981_v46  ;;  %v4094_v42 = vmul.f32 %v5791_v24, %v7990_v29  ;;  %v5797_v53 = vld [vmem:[%s6754_s26 + $0x370] sm:$0x1] }
 0x30c   : > { %v4056_v30 = vadd.f32 %v4046_v6, %v4020_v13  ;;  %v4114_v55 = vmul.f32 %v5799_v50, %v7993_v47  ;;  %v4049_v20 = vsel %vm1094_vm0, %v4047_v12, %v4048_v51  ;;  %v4134_v58 = vmul.f32 %v5791_v24, %v7998_v41  ;;  %v5803_v13 = vld [vmem:[%s6849_s29 + $0xa0] sm:$0x7f] }
 0x30d   : > { %v4090_v56 = vadd.f32 %v4086_v16, %v4082_v52  ;;  %v4138_v21 = vmul.f32 %v5795_v44, %v7998_v41  ;;  %v4021_v10 = vadd.f32 %v4013_v37, %v4001_v11  ;;  %v4102_v32 = vrot.slane %v4094_v42, 1  ;;  %v5802_v11 = vld [vmem:[%s6757_s27 + $0x358] sm:$0xff] }
 0x30e   : > { %v4064_v9 = vadd.f32 %v5785_v38, %v4056_v30  ;;  %v4122_v60 = vrot.slane %v4114_v55, 1  ;;  %v4150_v23 = vrot.slane %v4134_v58, 2  ;;  %v4083_v5 = vmul.f32 %v5792_v0, %v8008_v45  ;;  %v5794_v30 = vld [vmem:[%s6754_s26 + $0x358] sm:$0xff] }
 0x30f   : > { %v4151_v18 = vrot.slane %v4138_v21, 2  ;;  %v4087_v61 = vmul.f32 %v5800_v19, %v8013_v49  ;;  %v4057_v48 = vadd.f32 %v4049_v20, %v4021_v10  ;;  %v4110_v22 = vadd.f32 %v4102_v32, %v4090_v56  ;;  %v5804_v10 = vld [vmem:[%s6849_s29 + $0xa8] sm:$0x7f] }
 0x310   : > { %5789 = vst [vmem:[%s6849_s29 + $0x90] sm:$0x7f] %v4064_v9  ;;  %v4095_v43 = vmul.f32 %v5792_v0, %v8017_v14  ;;  %v4115_v25 = vmul.f32 %v5800_v19, %v8020_v59  ;;  %v4135_v24 = vmul.f32 %v5792_v0, %v8024_v28  ;;  %v4139_v50 = vmul.f32 %v5796_v8, %v8024_v28  ;;  %v5798_v9 = vld [vmem:[%s6754_s26 + $0x378] sm:$0x1] }
 0x311   : > { %v4152_v2 = vsel %vm1094_vm0, %v4150_v23, %v4151_v18  ;;  %v4091_v57 = vadd.f32 %v4087_v61, %v4083_v5  ;;  %v4065_v6 = vadd.f32 %v5786_v4, %v4057_v48  ;;  %v4130_v46 = vadd.f32 %v4122_v60, %v4110_v22  ;;  %v5811_v48 = vld [vmem:[%s6754_s26 + $0x3c0] sm:$0xff] }
 0x312   : > { %v4103_v33 = vrot.slane %v4095_v43, 1  ;;  %v4123_v34 = vrot.slane %v4115_v25, 1  ;;  %v4153_v54 = vrot.slane %v4135_v24, 2  ;;  %v4154_v37 = vrot.slane %v4139_v50, 2  ;;  %v5819_v22 = vld [vmem:[%s6757_s27 + $0x3c0] sm:$0xff] }
 0x313   : > { %v4084_v44 = vmul.f32 %v5793_v26, %v8035_v7  ;;  %v4088_v38 = vmul.f32 %v5801_v3, %v8040_v15  ;;  %5790 = vst [vmem:[%s6849_s29 + $0x98] sm:$0x7f] %v4065_v6  ;;  %v4166_v12 = vadd.f32 %v4152_v2, %v4130_v46  ;;  %v4096_v52 = vmul.f32 %v5793_v26, %v8044_v39  ;;  %v5815_v6 = vld [vmem:[%s6754_s26 + $0x3e0] sm:$0x1]  ;;  %v5805_v46 = vld [vmem:[%s6849_s29 + $0xb0] sm:$0x7f] }
 0x314   : > { %v4111_v51 = vadd.f32 %v4103_v33, %v4091_v57  ;;  %v4116_v16 = vmul.f32 %v5801_v3, %v8048_v35  ;;  %v4155_v42 = vsel %vm1094_vm0, %v4153_v54, %v4154_v37  ;;  %v4136_v0 = vmul.f32 %v5793_v26, %v8051_v27 }
 0x315   : > { %v4092_v55 = vadd.f32 %v4088_v38, %v4084_v44  ;;  %v4140_v19 = vmul.f32 %v5797_v53, %v8051_v27  ;;  %v4174_v20 = vadd.f32 %v5803_v13, %v4166_v12  ;;  %v4104_v58 = vrot.slane %v4096_v52, 1  ;;  %v5812_v12 = vld [vmem:[%s6754_s26 + $0x3c8] sm:$0xff] }
 0x316   : > { %v4131_v56 = vadd.f32 %v4123_v34, %v4111_v51  ;;  %v4124_v21 = vrot.slane %v4116_v16, 1  ;;  %v4156_v32 = vrot.slane %v4136_v0, 2  ;;  %v4085_v8 = vmul.f32 %v5794_v30, %v8063_v63  ;;  %v5820_v51 = vld [vmem:[%s6757_s27 + $0x3c8] sm:$0xff] }
 0x317   : > { %v4157_v60 = vrot.slane %v4140_v19, 2  ;;  %v4089_v4 = vmul.f32 %v5802_v11, %v8066_v40  ;;  %5807 = vst [vmem:[%s6849_s29 + $0xa0] sm:$0x7f] %v4174_v20  ;;  %v4112_v18 = vadd.f32 %v4104_v58, %v4092_v55  ;;  %v4097_v5 = vmul.f32 %v5794_v30, %v8072_v17  ;;  %v5816_v0 = vld [vmem:[%s6754_s26 + $0x3e8] sm:$0x1] }
 0x318   : > { %v4167_v23 = vadd.f32 %v4155_v42, %v4131_v56  ;;  %v4117_v61 = vmul.f32 %v5802_v11, %v8075_v62  ;;  %v4137_v26 = vmul.f32 %v5794_v30, %v8078_v31  ;;  %v4141_v3 = vmul.f32 %v5798_v9, %v8078_v31 }
 0x319   : > { %v4158_v43 = vsel %vm1094_vm0, %v4156_v32, %v4157_v60  ;;  %v4093_v25 = vadd.f32 %v4089_v4, %v4085_v8  ;;  %v4132_v57 = vadd.f32 %v4124_v21, %v4112_v18  ;;  %v4105_v24 = vrot.slane %v4097_v5, 1  ;;  %v5821_v32 = vld [vmem:[%s6757_s27 + $0x3d0] sm:$0xff] }
 0x31a   : > { %v4175_v2 = vadd.f32 %v5804_v10, %v4167_v23  ;;  %v4125_v50 = vrot.slane %v4117_v61, 1  ;;  %v4159_v33 = vrot.slane %v4137_v26, 2  ;;  %v4160_v34 = vrot.slane %v4141_v3, 2  ;;  %v5813_v10 = vld [vmem:[%s6754_s26 + $0x3d0] sm:$0xff] }
 0x31b   : > { %v4196_v53 = vmul.f32 %v5811_v48, %v7983_v36  ;;  %v4200_v13 = vmul.f32 %v5819_v22, %v7986_v1  ;;  %v4168_v54 = vadd.f32 %v4158_v43, %v4132_v57  ;;  %v4113_v37 = vadd.f32 %v4105_v24, %v4093_v25  ;;  %v5817_v61 = vld [vmem:[%s6754_s26 + $0x3f0] sm:$0x1]  ;;  %v5822_v57 = vld [vmem:[%s6757_s27 + $0x3d8] sm:$0xff] }
 0x31c   : > { %5808 = vst [vmem:[%s6849_s29 + $0xa8] sm:$0x7f] %v4175_v2  ;;  %v4208_v44 = vmul.f32 %v5811_v48, %v7990_v29  ;;  %v4228_v38 = vmul.f32 %v5819_v22, %v7993_v47  ;;  %v4161_v52 = vsel %vm1094_vm0, %v4159_v33, %v4160_v34  ;;  %v4248_v30 = vmul.f32 %v5811_v48, %v7998_v41  ;;  %v5806_v29 = vld [vmem:[%s6849_s29 + $0xb8] sm:$0x7f]  ;;  %v5814_v2 = vld [vmem:[%s6754_s26 + $0x3d8] sm:$0xff] }
 0x31d   : > { %v4204_v16 = vadd.f32 %v4200_v13, %v4196_v53  ;;  %v4252_v36 = vmul.f32 %v5815_v6, %v7998_v41  ;;  %v4176_v1 = vadd.f32 %v5805_v46, %v4168_v54  ;;  %v4133_v11 = vadd.f32 %v4125_v50, %v4113_v37  ;;  %v5818_v53 = vld [vmem:[%s6754_s26 + $0x3f8] sm:$0x1] }
 0x31e   : > { %v4216_v42 = vrot.slane %v4208_v44, 1  ;;  %v4236_v55 = vrot.slane %v4228_v38, 1  ;;  %v4264_v19 = vrot.slane %v4248_v30, 2  ;;  %v4197_v20 = vmul.f32 %v5812_v12, %v8008_v45 }
 0x31f   : > { %v4265_v47 = vrot.slane %v4252_v36, 2  ;;  %v4201_v56 = vmul.f32 %v5820_v51, %v8013_v49  ;;  %5809 = vst [vmem:[%s6849_s29 + $0xb0] sm:$0x7f] %v4176_v1  ;;  %v4169_v58 = vadd.f32 %v4161_v52, %v4133_v11  ;;  %v4209_v41 = vmul.f32 %v5812_v12, %v8017_v14  ;;  %v5823_v14 = vld [vmem:[%s6849_s29 + $0xc0] sm:$0x7f] }
 0x320   : > { %v4224_v21 = vadd.f32 %v4216_v42, %v4204_v16  ;;  %v4229_v9 = vmul.f32 %v5820_v51, %v8020_v59  ;;  %v4249_v4 = vmul.f32 %v5812_v12, %v8024_v28  ;;  %v4253_v45 = vmul.f32 %v5816_v0, %v8024_v28  ;;  %v8373_v51 = vld [vmem:[%s6760_s28 + $0x50] sm:$0xf]  ;;  %v8376_v52 = vld [vmem:[%s6760_s28 + $0x54] sm:$0xf]  ;;  %v8382_v36 = vld [vmem:[%s6760_s28 + $0x58] sm:$0xf] }
 0x321   : > { %v4266_v60 = vsel %vm1094_vm0, %v4264_v19, %v4265_v47  ;;  %v4205_v8 = vadd.f32 %v4201_v56, %v4197_v20  ;;  %v4177_v49 = vadd.f32 %v5806_v29, %v4169_v58  ;;  %v4217_v18 = vrot.slane %v4209_v41, 1  ;;  %v8385_v1 = vld [vmem:[%s6760_s28 + $0x5c] sm:$0xf] }
 0x322   : > { %v4244_v23 = vadd.f32 %v4236_v55, %v4224_v21  ;;  %v4237_v5 = vrot.slane %v4229_v9, 1  ;;  %v4267_v48 = vrot.slane %v4249_v4, 2  ;;  %v4268_v59 = vrot.slane %v4253_v45, 2  ;;  %v8388_v55 = vld [vmem:[%s6760_s28 + $0x60] sm:$0xf] }
 0x323   : > { %v4198_v22 = vmul.f32 %v5813_v10, %v8035_v7  ;;  %v4202_v43 = vmul.f32 %v5821_v32, %v8040_v15  ;;  %5810 = vst [vmem:[%s6849_s29 + $0xb8] sm:$0x7f] %v4177_v49  ;;  %v4225_v26 = vadd.f32 %v4217_v18, %v4205_v8  ;;  %v4210_v28 = vmul.f32 %v5813_v10, %v8044_v39  ;;  %v5824_v39 = vld [vmem:[%s6849_s29 + $0xc8] sm:$0x7f]  ;;  %v5836_v0 = vld [vmem:[%s6754_s26 + $0x100] sm:$0xff] }
 0x324   : > { %v4280_v25 = vadd.f32 %v4266_v60, %v4244_v23  ;;  %v4230_v3 = vmul.f32 %v5821_v32, %v8048_v35  ;;  %v4269_v24 = vsel %vm1094_vm0, %v4267_v48, %v4268_v59  ;;  %v4250_v6 = vmul.f32 %v5813_v10, %v8051_v27  ;;  %v5844_v29 = vld [vmem:[%s6757_s27 + $0x100] sm:$0xff]  ;;  %v5825_v19 = vld [vmem:[%s6849_s29 + $0xd0] sm:$0x7f] }
 0x325   : > { %v4206_v50 = vadd.f32 %v4202_v43, %v4198_v22  ;;  %v4254_v7 = vmul.f32 %v5817_v61, %v8051_v27  ;;  %v4245_v46 = vadd.f32 %v4237_v5, %v4225_v26  ;;  %v4218_v33 = vrot.slane %v4210_v28, 1  ;;  %v5840_v10 = vld [vmem:[%s6754_s26 + $0x120] sm:$0x1]  ;;  %v5837_v22 = vld [vmem:[%s6754_s26 + $0x108] sm:$0xff] }
 0x326   : > { %v4288_v15 = vadd.f32 %v5823_v14, %v4280_v25  ;;  %v4238_v34 = vrot.slane %v4230_v3, 1  ;;  %v4270_v35 = vrot.slane %v4250_v6, 2  ;;  %v4199_v54 = vmul.f32 %v5814_v2, %v8063_v63  ;;  %v5826_v5 = vld [vmem:[%s6849_s29 + $0xd8] sm:$0x7f]  ;;  %v5845_v3 = vld [vmem:[%s6757_s27 + $0x108] sm:$0xff] }
 0x327   : > { %v4271_v13 = vrot.slane %v4254_v7, 2  ;;  %v4203_v37 = vmul.f32 %v5822_v57, %v8066_v40  ;;  %v4281_v44 = vadd.f32 %v4269_v24, %v4245_v46  ;;  %v4226_v27 = vadd.f32 %v4218_v33, %v4206_v50  ;;  %v5841_v6 = vld [vmem:[%s6754_s26 + $0x128] sm:$0x1] }
 0x328   : > { %5827 = vst [vmem:[%s6849_s29 + $0xc0] sm:$0x7f] %v4288_v15  ;;  %v4211_v38 = vmul.f32 %v5814_v2, %v8072_v17  ;;  %v4231_v12 = vmul.f32 %v5822_v57, %v8075_v62  ;;  %v4251_v40 = vmul.f32 %v5814_v2, %v8078_v31  ;;  %v4255_v30 = vmul.f32 %v5818_v53, %v8078_v31 }
 0x329   : > { %v4272_v16 = vsel %vm1094_vm0, %v4270_v35, %v4271_v13  ;;  %v4207_v63 = vadd.f32 %v4203_v37, %v4199_v54  ;;  %v4289_v17 = vadd.f32 %v5824_v39, %v4281_v44  ;;  %v4246_v11 = vadd.f32 %v4238_v34, %v4226_v27  ;;  %v5838_v27 = vld [vmem:[%s6754_s26 + $0x110] sm:$0xff] }
 0x32a   : > { %v4219_v62 = vrot.slane %v4211_v38, 1  ;;  %v4239_v42 = vrot.slane %v4231_v12, 1  ;;  %v4273_v47 = vrot.slane %v4251_v40, 2  ;;  %v4274_v20 = vrot.slane %v4255_v30, 2  ;;  %v4451_v38 = vld [vmem:[%s6849_s29] sm:$0x7f] }
 0x32b   : > { %v8394_v56 = vperm.slane %v8373_v51, 0  ;;  %v8397_v31 = vperm.slane %v8376_v52, 0  ;;  %5828 = vst [vmem:[%s6849_s29 + $0xc8] sm:$0x7f] %v4289_v17  ;;  %v4282_v58 = vadd.f32 %v4272_v16, %v4246_v11  ;;  %v8401_v41 = vperm.slane %v8382_v36, 0  ;;  %v5846_v30 = vld [vmem:[%s6757_s27 + $0x110] sm:$0xff] }
 0x32c   : > { %v4227_v21 = vadd.f32 %v4219_v62, %v4207_v63  ;;  %v8404_v9 = vperm.slane %v8385_v1, 0  ;;  %v4275_v32 = vsel %vm1094_vm0, %v4273_v47, %v4274_v20  ;;  %v8409_v60 = vperm.slane %v8388_v55, 0 }
 0x32d   : > { %v4363_v8 = vmul.f32 %v5836_v0, %v8394_v56  ;;  %v4367_v4 = vmul.f32 %v5844_v29, %v8397_v31  ;;  %v4290_v45 = vadd.f32 %v5825_v19, %v4282_v58  ;;  %v4375_v23 = vmul.f32 %v5836_v0, %v8401_v41 }
 0x32e   : > { %v4247_v49 = vadd.f32 %v4239_v42, %v4227_v21  ;;  %v4395_v18 = vmul.f32 %v5844_v29, %v8404_v9  ;;  %v4415_v14 = vmul.f32 %v5836_v0, %v8409_v60  ;;  %v4419_v48 = vmul.f32 %v5840_v10, %v8409_v60  ;;  %v5842_v0 = vld [vmem:[%s6754_s26 + $0x130] sm:$0x1] }
 0x32f   : > { %v4371_v61 = vadd.f32 %v4367_v4, %v4363_v8  ;;  %v8419_v59 = vperm.slane %v8373_v51, 1  ;;  %5829 = vst [vmem:[%s6849_s29 + $0xd0] sm:$0x7f] %v4290_v45  ;;  %v4383_v25 = vrot.slane %v4375_v23, 1  ;;  %v8424_v28 = vperm.slane %v8376_v52, 1 }
 0x330   : > { %v4283_v43 = vadd.f32 %v4275_v32, %v4247_v49  ;;  %v4403_v26 = vrot.slane %v4395_v18, 1  ;;  %v4431_v2 = vrot.slane %v4415_v14, 2  ;;  %v4432_v57 = vrot.slane %v4419_v48, 2  ;;  %v4452_v4 = vld [vmem:[%s6849_s29 + $0x8] sm:$0x7f]  ;;  %v5839_v48 = vld [vmem:[%s6754_s26 + $0x118] sm:$0xff] }
 0x331   : > { %v8428_v24 = vperm.slane %v8382_v36, 1  ;;  %v8431_v50 = vperm.slane %v8385_v1, 1  ;;  %v4391_v15 = vadd.f32 %v4383_v25, %v4371_v61  ;;  %v8435_v46 = vperm.slane %v8388_v55, 1 }
 0x332   : > { %v4291_v7 = vadd.f32 %v5826_v5, %v4283_v43  ;;  %v4364_v33 = vmul.f32 %v5837_v22, %v8419_v59  ;;  %v4433_v34 = vsel %vm1094_vm0, %v4431_v2, %v4432_v57  ;;  %v4368_v53 = vmul.f32 %v5845_v3, %v8424_v28  ;;  %v5848_v2 = vld [vmem:[%s6754_s26 + $0x180] sm:$0xff] }
 0x333   : > { %v4376_v39 = vmul.f32 %v5837_v22, %v8428_v24  ;;  %v4396_v35 = vmul.f32 %v5845_v3, %v8431_v50  ;;  %v4411_v13 = vadd.f32 %v4403_v26, %v4391_v15  ;;  %v4416_v54 = vmul.f32 %v5837_v22, %v8435_v46  ;;  %v5847_v22 = vld [vmem:[%s6757_s27 + $0x118] sm:$0xff]  ;;  %v5856_v15 = vld [vmem:[%s6757_s27 + $0x180] sm:$0xff] }
 0x334   : > { %5830 = vst [vmem:[%s6849_s29 + $0xd8] sm:$0x7f] %v4291_v7  ;;  %v4420_v37 = vmul.f32 %v5841_v6, %v8435_v46  ;;  %v8446_v44 = vperm.slane %v8373_v51, 2  ;;  %v4372_v12 = vadd.f32 %v4368_v53, %v4364_v33  ;;  %v8451_v40 = vperm.slane %v8376_v52, 2 }
 0x335   : > { %v4384_v16 = vrot.slane %v4376_v39, 1  ;;  %v4404_v63 = vrot.slane %v4396_v35, 1  ;;  %v4447_v17 = vadd.f32 %v4433_v34, %v4411_v13  ;;  %v4434_v11 = vrot.slane %v4416_v54, 2 }
 0x336   : > { %v4435_v62 = vrot.slane %v4420_v37, 2  ;;  %v8455_v42 = vperm.slane %v8382_v36, 2  ;;  %v8459_v19 = vperm.slane %v8385_v1, 2  ;;  %v8462_v47 = vperm.slane %v8388_v55, 2 }
 0x337   : > { %v4392_v29 = vadd.f32 %v4384_v16, %v4372_v12  ;;  %v4365_v20 = vmul.f32 %v5838_v27, %v8446_v44  ;;  %v4455_v58 = vadd.f32 %v4451_v38, %v4447_v17  ;;  %v4369_v10 = vmul.f32 %v5846_v30, %v8451_v40 }
 0x338   : > { %v4436_v21 = vsel %vm1094_vm0, %v4434_v11, %v4435_v62  ;;  %v4377_v32 = vmul.f32 %v5838_v27, %v8455_v42  ;;  %v4397_v45 = vmul.f32 %v5846_v30, %v8459_v19  ;;  %v4417_v49 = vmul.f32 %v5838_v27, %v8462_v47  ;;  %v5852_v27 = vld [vmem:[%s6754_s26 + $0x1a0] sm:$0x1]  ;;  %v5849_v11 = vld [vmem:[%s6754_s26 + $0x188] sm:$0xff] }
 0x339   : > { %v4412_v8 = vadd.f32 %v4404_v63, %v4392_v29  ;;  %v4421_v23 = vmul.f32 %v5842_v0, %v8462_v47  ;;  %4459 = vst [vmem:[%s6849_s29] sm:$0x7f] %v4455_v58  ;;  %v4373_v18 = vadd.f32 %v4369_v10, %v4365_v20  ;;  %v8474_v61 = vperm.slane %v8373_v51, 3  ;;  %v5857_v58 = vld [vmem:[%s6757_s27 + $0x188] sm:$0xff] }
 0x33a   : > { %v4385_v5 = vrot.slane %v4377_v32, 1  ;;  %v8477_v14 = vperm.slane %v8376_v52, 3  ;;  %v4405_v25 = vrot.slane %v4397_v45, 1  ;;  %v4437_v26 = vrot.slane %v4417_v49, 2  ;;  %v5843_v52 = vld [vmem:[%s6754_s26 + $0x138] sm:$0x1] }
 0x33b   : > { %v4448_v43 = vadd.f32 %v4436_v21, %v4412_v8  ;;  %v4438_v3 = vrot.slane %v4421_v23, 2  ;;  %v8483_v6 = vperm.slane %v8382_v36, 3  ;;  %v8486_v7 = vperm.slane %v8385_v1, 3  ;;  %v5853_v23 = vld [vmem:[%s6754_s26 + $0x1a8] sm:$0x1] }
 0x33c   : > { %v4393_v57 = vadd.f32 %v4385_v5, %v4373_v18  ;;  %v8489_v51 = vperm.slane %v8388_v55, 3  ;;  %v4366_v53 = vmul.f32 %v5839_v48, %v8474_v61  ;;  %v4370_v39 = vmul.f32 %v5847_v22, %v8477_v14  ;;  %v4453_v55 = vld [vmem:[%s6849_s29 + $0x10] sm:$0x7f] }
 0x33d   : > { %v4456_v33 = vadd.f32 %v4452_v4, %v4448_v43  ;;  %v4439_v34 = vsel %vm1094_vm0, %v4437_v26, %v4438_v3  ;;  %v4378_v36 = vmul.f32 %v5839_v48, %v8483_v6  ;;  %v4398_v1 = vmul.f32 %v5847_v22, %v8486_v7 }
 0x33e   : > { %v4413_v35 = vadd.f32 %v4405_v25, %v4393_v57  ;;  %v4418_v13 = vmul.f32 %v5839_v48, %v8489_v51  ;;  %v4374_v54 = vadd.f32 %v4370_v39, %v4366_v53  ;;  %v4422_v37 = vmul.f32 %v5843_v52, %v8489_v51  ;;  %v4454_v25 = vld [vmem:[%s6849_s29 + $0x18] sm:$0x7f]  ;;  %v5850_v52 = vld [vmem:[%s6754_s26 + $0x190] sm:$0xff] }
 0x33f   : > { %4460 = vst [vmem:[%s6849_s29 + $0x8] sm:$0x7f] %v4456_v33  ;;  %v4475_v38 = vmul.f32 %v5848_v2, %v8394_v56  ;;  %v4479_v12 = vmul.f32 %v5856_v15, %v8397_v31  ;;  %v4386_v63 = vrot.slane %v4378_v36, 1  ;;  %v4406_v30 = vrot.slane %v4398_v1, 1 }
 0x340   : > { %v4449_v16 = vadd.f32 %v4439_v34, %v4413_v35  ;;  %v4440_v17 = vrot.slane %v4418_v13, 2  ;;  %v4441_v62 = vrot.slane %v4422_v37, 2  ;;  %v4487_v29 = vmul.f32 %v5848_v2, %v8401_v41  ;;  %v5860_v37 = vld [vmem:[%s6849_s29 + $0x20] sm:$0x7f] }
 0x341   : > { %v4483_v0 = vadd.f32 %v4479_v12, %v4475_v38  ;;  %v4507_v20 = vmul.f32 %v5856_v15, %v8404_v9  ;;  %v4394_v10 = vadd.f32 %v4386_v63, %v4374_v54  ;;  %v4527_v32 = vmul.f32 %v5848_v2, %v8409_v60  ;;  %v5858_v15 = vld [vmem:[%s6757_s27 + $0x190] sm:$0xff] }
 0x342   : > { %v4457_v21 = vadd.f32 %v4453_v55, %v4449_v16  ;;  %v4531_v8 = vmul.f32 %v5852_v27, %v8409_v60  ;;  %v4442_v4 = vsel %vm1094_vm0, %v4440_v17, %v4441_v62  ;;  %v4495_v45 = vrot.slane %v4487_v29, 1  ;;  %v5854_v55 = vld [vmem:[%s6754_s26 + $0x1b0] sm:$0x1]  ;;  %v5859_v62 = vld [vmem:[%s6757_s27 + $0x198] sm:$0xff] }
 0x343   : > { %v4515_v49 = vrot.slane %v4507_v20, 1  ;;  %v4476_v18 = vmul.f32 %v5849_v11, %v8419_v59  ;;  %v4414_v5 = vadd.f32 %v4406_v30, %v4394_v10  ;;  %v4543_v48 = vrot.slane %v4527_v32, 2 }
 0x344   : > { %4461 = vst [vmem:[%s6849_s29 + $0x10] sm:$0x7f] %v4457_v21  ;;  %v4544_v22 = vrot.slane %v4531_v8, 2  ;;  %v4480_v43 = vmul.f32 %v5857_v58, %v8424_v28  ;;  %v4503_v26 = vadd.f32 %v4495_v45, %v4483_v0  ;;  %v4488_v3 = vmul.f32 %v5849_v11, %v8428_v24  ;;  %v5861_v45 = vld [vmem:[%s6849_s29 + $0x28] sm:$0x7f] }
 0x345   : > { %v4508_v2 = vmul.f32 %v5857_v58, %v8431_v50  ;;  %v4528_v57 = vmul.f32 %v5849_v11, %v8435_v46  ;;  %v4450_v33 = vadd.f32 %v4442_v4, %v4414_v5  ;;  %v4532_v39 = vmul.f32 %v5853_v23, %v8435_v46  ;;  %v5851_v11 = vld [vmem:[%s6754_s26 + $0x198] sm:$0xff] }
 0x346   : > { %v4545_v34 = vsel %vm1094_vm0, %v4543_v48, %v4544_v22  ;;  %v4484_v53 = vadd.f32 %v4480_v43, %v4476_v18  ;;  %v4523_v35 = vadd.f32 %v4515_v49, %v4503_v26  ;;  %v4496_v36 = vrot.slane %v4488_v3, 1  ;;  %v5855_v4 = vld [vmem:[%s6754_s26 + $0x1b8] sm:$0x1]  ;;  %v5868_v26 = vld [vmem:[%s6754_s26 + $0x200] sm:$0xff] }
 0x347   : > { %v4516_v1 = vrot.slane %v4508_v2, 1  ;;  %v4546_v13 = vrot.slane %v4528_v57, 2  ;;  %v4458_v54 = vadd.f32 %v4454_v25, %v4450_v33  ;;  %v4547_v27 = vrot.slane %v4532_v39, 2  ;;  %v5876_v3 = vld [vmem:[%s6757_s27 + $0x200] sm:$0xff] }
 0x348   : > { %v4477_v38 = vmul.f32 %v5850_v52, %v8446_v44  ;;  %v4481_v12 = vmul.f32 %v5858_v15, %v8451_v40  ;;  %v4559_v16 = vadd.f32 %v4545_v34, %v4523_v35  ;;  %v4504_v63 = vadd.f32 %v4496_v36, %v4484_v53  ;;  %v5872_v35 = vld [vmem:[%s6754_s26 + $0x220] sm:$0x1]  ;;  %v5862_v36 = vld [vmem:[%s6849_s29 + $0x30] sm:$0x7f] }
 0x349   : > { %v4489_v30 = vmul.f32 %v5850_v52, %v8455_v42  ;;  %v4509_v17 = vmul.f32 %v5858_v15, %v8459_v19  ;;  %4462 = vst [vmem:[%s6849_s29 + $0x18] sm:$0x7f] %v4458_v54  ;;  %v4548_v0 = vsel %vm1094_vm0, %v4546_v13, %v4547_v27  ;;  %v4529_v20 = vmul.f32 %v5850_v52, %v8462_v47 }
 0x34a   : > { %v4485_v29 = vadd.f32 %v4481_v12, %v4477_v38  ;;  %v4533_v58 = vmul.f32 %v5854_v55, %v8462_v47  ;;  %v4567_v21 = vadd.f32 %v5860_v37, %v4559_v16  ;;  %v4524_v10 = vadd.f32 %v4516_v1, %v4504_v63  ;;  %v5869_v16 = vld [vmem:[%s6754_s26 + $0x208] sm:$0xff] }
 0x34b   : > { %v4497_v32 = vrot.slane %v4489_v30, 1  ;;  %v4517_v8 = vrot.slane %v4509_v17, 1  ;;  %v4549_v49 = vrot.slane %v4529_v20, 2  ;;  %v4478_v18 = vmul.f32 %v5851_v11, %v8474_v61  ;;  %v5877_v63 = vld [vmem:[%s6757_s27 + $0x208] sm:$0xff] }
 0x34c   : > { %v4550_v23 = vrot.slane %v4533_v58, 2  ;;  %v4482_v5 = vmul.f32 %v5859_v62, %v8477_v14  ;;  %5864 = vst [vmem:[%s6849_s29 + $0x20] sm:$0x7f] %v4567_v21  ;;  %v4560_v48 = vadd.f32 %v4548_v0, %v4524_v10  ;;  %v4490_v43 = vmul.f32 %v5851_v11, %v8483_v6  ;;  %v5873_v21 = vld [vmem:[%s6754_s26 + $0x228] sm:$0x1] }
 0x34d   : > { %v4505_v22 = vadd.f32 %v4497_v32, %v4485_v29  ;;  %v4510_v25 = vmul.f32 %v5859_v62, %v8486_v7  ;;  %v4530_v52 = vmul.f32 %v5851_v11, %v8489_v51  ;;  %v4534_v15 = vmul.f32 %v5855_v4, %v8489_v51  ;;  %v5863_v10 = vld [vmem:[%s6849_s29 + $0x38] sm:$0x7f] }
 0x34e   : > { %v4551_v2 = vsel %vm1094_vm0, %v4549_v49, %v4550_v23  ;;  %v4486_v57 = vadd.f32 %v4482_v5, %v4478_v18  ;;  %v4568_v33 = vadd.f32 %v5861_v45, %v4560_v48  ;;  %v4498_v53 = vrot.slane %v4490_v43, 1  ;;  %v5870_v48 = vld [vmem:[%s6754_s26 + $0x210] sm:$0xff] }
 0x34f   : > { %v4525_v34 = vadd.f32 %v4517_v8, %v4505_v22  ;;  %v4518_v39 = vrot.slane %v4510_v25, 1  ;;  %v4552_v1 = vrot.slane %v4530_v52, 2  ;;  %v4553_v13 = vrot.slane %v4534_v15, 2  ;;  %v5878_v22 = vld [vmem:[%s6757_s27 + $0x210] sm:$0xff] }
 0x350   : > { %v4587_v55 = vmul.f32 %v5868_v26, %v8394_v56  ;;  %v4591_v54 = vmul.f32 %v5876_v3, %v8397_v31  ;;  %5865 = vst [vmem:[%s6849_s29 + $0x28] sm:$0x7f] %v4568_v33  ;;  %v4506_v27 = vadd.f32 %v4498_v53, %v4486_v57  ;;  %v4599_v38 = vmul.f32 %v5868_v26, %v8401_v41  ;;  %v5874_v33 = vld [vmem:[%s6754_s26 + $0x230] sm:$0x1] }
 0x351   : > { %v4561_v37 = vadd.f32 %v4551_v2, %v4525_v34  ;;  %v4619_v12 = vmul.f32 %v5876_v3, %v8404_v9  ;;  %v4554_v30 = vsel %vm1094_vm0, %v4552_v1, %v4553_v13  ;;  %v4639_v11 = vmul.f32 %v5868_v26, %v8409_v60  ;;  %v5880_v34 = vld [vmem:[%s6849_s29 + $0x40] sm:$0x7f] }
 0x352   : > { %v4595_v17 = vadd.f32 %v4591_v54, %v4587_v55  ;;  %v4643_v62 = vmul.f32 %v5872_v35, %v8409_v60  ;;  %v4526_v29 = vadd.f32 %v4518_v39, %v4506_v27  ;;  %v4607_v20 = vrot.slane %v4599_v38, 1  ;;  %v5879_v27 = vld [vmem:[%s6757_s27 + $0x218] sm:$0xff] }
 0x353   : > { %v4569_v0 = vadd.f32 %v5862_v36, %v4561_v37  ;;  %v4627_v58 = vrot.slane %v4619_v12, 1  ;;  %v4655_v32 = vrot.slane %v4639_v11, 2  ;;  %v4588_v4 = vmul.f32 %v5869_v16, %v8419_v59  ;;  %v5871_v37 = vld [vmem:[%s6754_s26 + $0x218] sm:$0xff] }
 0x354   : > { %v4656_v8 = vrot.slane %v4643_v62, 2  ;;  %v4592_v45 = vmul.f32 %v5877_v63, %v8424_v28  ;;  %v4562_v49 = vadd.f32 %v4554_v30, %v4526_v29  ;;  %v4615_v23 = vadd.f32 %v4607_v20, %v4595_v17  ;;  %v5881_v29 = vld [vmem:[%s6849_s29 + $0x48] sm:$0x7f] }
 0x355   : > { %5866 = vst [vmem:[%s6849_s29 + $0x30] sm:$0x7f] %v4569_v0  ;;  %v4600_v18 = vmul.f32 %v5869_v16, %v8428_v24  ;;  %v4620_v5 = vmul.f32 %v5877_v63, %v8431_v50  ;;  %v4640_v26 = vmul.f32 %v5869_v16, %v8435_v46  ;;  %v4644_v3 = vmul.f32 %v5873_v21, %v8435_v46  ;;  %v5875_v0 = vld [vmem:[%s6754_s26 + $0x238] sm:$0x1] }
 0x356   : > { %v4657_v43 = vsel %vm1094_vm0, %v4655_v32, %v4656_v8  ;;  %v4596_v25 = vadd.f32 %v4592_v45, %v4588_v4  ;;  %v4570_v2 = vadd.f32 %v5863_v10, %v4562_v49  ;;  %v4635_v57 = vadd.f32 %v4627_v58, %v4615_v23  ;;  %v5888_v49 = vld [vmem:[%s6754_s26 + $0x280] sm:$0xff] }
 0x357   : > { %v4608_v52 = vrot.slane %v4600_v18, 1  ;;  %v4628_v15 = vrot.slane %v4620_v5, 1  ;;  %v4658_v53 = vrot.slane %v4640_v26, 2  ;;  %v4659_v39 = vrot.slane %v4644_v3, 2  ;;  %v5896_v23 = vld [vmem:[%s6757_s27 + $0x280] sm:$0xff] }
 0x358   : > { %v4589_v35 = vmul.f32 %v5870_v48, %v8446_v44  ;;  %v4593_v36 = vmul.f32 %v5878_v22, %v8451_v40  ;;  %5867 = vst [vmem:[%s6849_s29 + $0x38] sm:$0x7f] %v4570_v2  ;;  %v4671_v1 = vadd.f32 %v4657_v43, %v4635_v57  ;;  %v4601_v55 = vmul.f32 %v5870_v48, %v8455_v42  ;;  %v5892_v2 = vld [vmem:[%s6754_s26 + $0x2a0] sm:$0x1]  ;;  %v5882_v57 = vld [vmem:[%s6849_s29 + $0x50] sm:$0x7f] }
 0x359   : > { %v4616_v13 = vadd.f32 %v4608_v52, %v4596_v25  ;;  %v4621_v54 = vmul.f32 %v5878_v22, %v8459_v19  ;;  %v4660_v38 = vsel %vm1094_vm0, %v4658_v53, %v4659_v39  ;;  %v4641_v16 = vmul.f32 %v5870_v48, %v8462_v47 }
 0x35a   : > { %v4597_v12 = vadd.f32 %v4593_v36, %v4589_v35  ;;  %v4645_v63 = vmul.f32 %v5874_v33, %v8462_v47  ;;  %v4679_v30 = vadd.f32 %v5880_v34, %v4671_v1  ;;  %v4609_v11 = vrot.slane %v4601_v55, 1  ;;  %v5889_v1 = vld [vmem:[%s6754_s26 + $0x288] sm:$0xff] }
 0x35b   : > { %v4636_v17 = vadd.f32 %v4628_v15, %v4616_v13  ;;  %v4629_v62 = vrot.slane %v4621_v54, 1  ;;  %v4661_v20 = vrot.slane %v4641_v16, 2  ;;  %v4590_v21 = vmul.f32 %v5871_v37, %v8474_v61  ;;  %v5897_v13 = vld [vmem:[%s6757_s27 + $0x288] sm:$0xff] }
 0x35c   : > { %v4662_v58 = vrot.slane %v4645_v63, 2  ;;  %v4594_v10 = vmul.f32 %v5879_v27, %v8477_v14  ;;  %5884 = vst [vmem:[%s6849_s29 + $0x40] sm:$0x7f] %v4679_v30  ;;  %v4617_v8 = vadd.f32 %v4609_v11, %v4597_v12  ;;  %v4602_v4 = vmul.f32 %v5871_v37, %v8483_v6  ;;  %v5893_v30 = vld [vmem:[%s6754_s26 + $0x2a8] sm:$0x1] }
 0x35d   : > { %v4672_v32 = vadd.f32 %v4660_v38, %v4636_v17  ;;  %v4622_v45 = vmul.f32 %v5879_v27, %v8486_v7  ;;  %v4642_v48 = vmul.f32 %v5871_v37, %v8489_v51  ;;  %v4646_v22 = vmul.f32 %v5875_v0, %v8489_v51  ;;  %v5883_v17 = vld [vmem:[%s6849_s29 + $0x58] sm:$0x7f] }
 0x35e   : > { %v4663_v18 = vsel %vm1094_vm0, %v4661_v20, %v4662_v58  ;;  %v4598_v5 = vadd.f32 %v4594_v10, %v4590_v21  ;;  %v4637_v25 = vadd.f32 %v4629_v62, %v4617_v8  ;;  %v4610_v26 = vrot.slane %v4602_v4, 1  ;;  %v5898_v8 = vld [vmem:[%s6757_s27 + $0x290] sm:$0xff] }
 0x35f   : > { %v4680_v43 = vadd.f32 %v5881_v29, %v4672_v32  ;;  %v4630_v3 = vrot.slane %v4622_v45, 1  ;;  %v4664_v52 = vrot.slane %v4642_v48, 2  ;;  %v4665_v15 = vrot.slane %v4646_v22, 2  ;;  %v5890_v32 = vld [vmem:[%s6754_s26 + $0x290] sm:$0xff] }
 0x360   : > { %v4699_v33 = vmul.f32 %v5888_v49, %v8394_v56  ;;  %v4703_v34 = vmul.f32 %v5896_v23, %v8397_v31  ;;  %v4673_v53 = vadd.f32 %v4663_v18, %v4637_v25  ;;  %v4618_v39 = vadd.f32 %v4610_v26, %v4598_v5  ;;  %v5900_v25 = vld [vmem:[%s6849_s29 + $0x60] sm:$0x7f] }
 0x361   : > { %5885 = vst [vmem:[%s6849_s29 + $0x48] sm:$0x7f] %v4680_v43  ;;  %v4711_v35 = vmul.f32 %v5888_v49, %v8401_v41  ;;  %v4731_v36 = vmul.f32 %v5896_v23, %v8404_v9  ;;  %v4666_v55 = vsel %vm1094_vm0, %v4664_v52, %v4665_v15  ;;  %v4751_v37 = vmul.f32 %v5888_v49, %v8409_v60  ;;  %v5894_v43 = vld [vmem:[%s6754_s26 + $0x2b0] sm:$0x1] }
 0x362   : > { %v4707_v54 = vadd.f32 %v4703_v34, %v4699_v33  ;;  %v4755_v27 = vmul.f32 %v5892_v2, %v8409_v60  ;;  %v4681_v38 = vadd.f32 %v5882_v57, %v4673_v53  ;;  %v4638_v12 = vadd.f32 %v4630_v3, %v4618_v39  ;;  %v5891_v53 = vld [vmem:[%s6754_s26 + $0x298] sm:$0xff] }
 0x363   : > { %v4719_v16 = vrot.slane %v4711_v35, 1  ;;  %v4739_v63 = vrot.slane %v4731_v36, 1  ;;  %v4767_v11 = vrot.slane %v4751_v37, 2  ;;  %v4700_v0 = vmul.f32 %v5889_v1, %v8419_v59  ;;  %v5899_v39 = vld [vmem:[%s6757_s27 + $0x298] sm:$0xff] }
 0x364   : > { %v4768_v62 = vrot.slane %v4755_v27, 2  ;;  %v4704_v29 = vmul.f32 %v5897_v13, %v8424_v28  ;;  %5886 = vst [vmem:[%s6849_s29 + $0x50] sm:$0x7f] %v4681_v38  ;;  %v4674_v20 = vadd.f32 %v4666_v55, %v4638_v12  ;;  %v4712_v21 = vmul.f32 %v5889_v1, %v8428_v24  ;;  %v5895_v38 = vld [vmem:[%s6754_s26 + $0x2b8] sm:$0x1] }
 0x365   : > { %v4727_v58 = vadd.f32 %v4719_v16, %v4707_v54  ;;  %v4732_v10 = vmul.f32 %v5897_v13, %v8431_v50  ;;  %v4752_v49 = vmul.f32 %v5889_v1, %v8435_v46  ;;  %v4756_v23 = vmul.f32 %v5893_v30, %v8435_v46  ;;  %v5901_v12 = vld [vmem:[%s6849_s29 + $0x68] sm:$0x7f] }
 0x366   : > { %v4769_v4 = vsel %vm1094_vm0, %v4767_v11, %v4768_v62  ;;  %v4708_v45 = vadd.f32 %v4704_v29, %v4700_v0  ;;  %v4682_v18 = vadd.f32 %v5883_v17, %v4674_v20  ;;  %v4720_v48 = vrot.slane %v4712_v21, 1  ;;  %v5908_v20 = vld [vmem:[%s6754_s26 + $0x300] sm:$0xff] }
 0x367   : > { %v4747_v5 = vadd.f32 %v4739_v63, %v4727_v58  ;;  %v4740_v22 = vrot.slane %v4732_v10, 1  ;;  %v4770_v26 = vrot.slane %v4752_v49, 2  ;;  %v4771_v3 = vrot.slane %v4756_v23, 2  ;;  %v5916_v58 = vld [vmem:[%s6757_s27 + $0x300] sm:$0xff] }
 0x368   : > { %v4701_v2 = vmul.f32 %v5890_v32, %v8446_v44  ;;  %v4705_v57 = vmul.f32 %v5898_v8, %v8451_v40  ;;  %5887 = vst [vmem:[%s6849_s29 + $0x58] sm:$0x7f] %v4682_v18  ;;  %v4728_v15 = vadd.f32 %v4720_v48, %v4708_v45  ;;  %v4713_v33 = vmul.f32 %v5890_v32, %v8455_v42  ;;  %v5912_v18 = vld [vmem:[%s6754_s26 + $0x320] sm:$0x1] }
 0x369   : > { %v4783_v52 = vadd.f32 %v4769_v4, %v4747_v5  ;;  %v4733_v34 = vmul.f32 %v5898_v8, %v8459_v19  ;;  %v4772_v35 = vsel %vm1094_vm0, %v4770_v26, %v4771_v3  ;;  %v4753_v1 = vmul.f32 %v5890_v32, %v8462_v47  ;;  %v5902_v5 = vld [vmem:[%s6849_s29 + $0x70] sm:$0x7f] }
 0x36a   : > { %v4709_v36 = vadd.f32 %v4705_v57, %v4701_v2  ;;  %v4757_v13 = vmul.f32 %v5894_v43, %v8462_v47  ;;  %v4748_v54 = vadd.f32 %v4740_v22, %v4728_v15  ;;  %v4721_v37 = vrot.slane %v4713_v33, 1  ;;  %v5917_v15 = vld [vmem:[%s6757_s27 + $0x308] sm:$0xff] }
 0x36b   : > { %v4791_v55 = vadd.f32 %v5900_v25, %v4783_v52  ;;  %v4741_v27 = vrot.slane %v4733_v34, 1  ;;  %v4773_v16 = vrot.slane %v4753_v1, 2  ;;  %v4702_v30 = vmul.f32 %v5891_v53, %v8474_v61  ;;  %v5909_v52 = vld [vmem:[%s6754_s26 + $0x308] sm:$0xff] }
 0x36c   : > { %v4774_v63 = vrot.slane %v4757_v13, 2  ;;  %v4706_v17 = vmul.f32 %v5899_v39, %v8477_v14  ;;  %v4784_v11 = vadd.f32 %v4772_v35, %v4748_v54  ;;  %v4729_v62 = vadd.f32 %v4721_v37, %v4709_v36  ;;  %v5903_v54 = vld [vmem:[%s6849_s29 + $0x78] sm:$0x7f] }
 0x36d   : > { %5904 = vst [vmem:[%s6849_s29 + $0x60] sm:$0x7f] %v4791_v55  ;;  %v4714_v0 = vmul.f32 %v5891_v53, %v8483_v6  ;;  %v4734_v29 = vmul.f32 %v5899_v39, %v8486_v7  ;;  %v4754_v32 = vmul.f32 %v5891_v53, %v8489_v51  ;;  %v4758_v8 = vmul.f32 %v5895_v38, %v8489_v51  ;;  %v5913_v55 = vld [vmem:[%s6754_s26 + $0x328] sm:$0x1] }
 0x36e   : > { %v4775_v21 = vsel %vm1094_vm0, %v4773_v16, %v4774_v63  ;;  %v4710_v10 = vadd.f32 %v4706_v17, %v4702_v30  ;;  %v4792_v4 = vadd.f32 %v5901_v12, %v4784_v11  ;;  %v4749_v45 = vadd.f32 %v4741_v27, %v4729_v62  ;;  %v5910_v11 = vld [vmem:[%s6754_s26 + $0x310] sm:$0xff] }
 0x36f   : > { %v4722_v49 = vrot.slane %v4714_v0, 1  ;;  %v4742_v23 = vrot.slane %v4734_v29, 1  ;;  %v4776_v48 = vrot.slane %v4754_v32, 2  ;;  %v4777_v22 = vrot.slane %v4758_v8, 2  ;;  %v5918_v62 = vld [vmem:[%s6757_s27 + $0x310] sm:$0xff] }
 0x370   : > { %v4811_v43 = vmul.f32 %v5908_v20, %v8394_v56  ;;  %v4815_v25 = vmul.f32 %v5916_v58, %v8397_v31  ;;  %5905 = vst [vmem:[%s6849_s29 + $0x68] sm:$0x7f] %v4792_v4  ;;  %v4785_v26 = vadd.f32 %v4775_v21, %v4749_v45  ;;  %v4823_v2 = vmul.f32 %v5908_v20, %v8401_v41  ;;  %v5914_v4 = vld [vmem:[%s6754_s26 + $0x330] sm:$0x1]  ;;  %v5920_v45 = vld [vmem:[%s6849_s29 + $0x80] sm:$0x7f] }
 0x371   : > { %v4730_v3 = vadd.f32 %v4722_v49, %v4710_v10  ;;  %v4843_v57 = vmul.f32 %v5916_v58, %v8404_v9  ;;  %v4778_v33 = vsel %vm1094_vm0, %v4776_v48, %v4777_v22  ;;  %v4863_v53 = vmul.f32 %v5908_v20, %v8409_v60 }
 0x372   : > { %v4819_v34 = vadd.f32 %v4815_v25, %v4811_v43  ;;  %v4867_v39 = vmul.f32 %v5912_v18, %v8409_v60  ;;  %v4793_v35 = vadd.f32 %v5902_v5, %v4785_v26  ;;  %v4831_v1 = vrot.slane %v4823_v2, 1  ;;  %v5911_v26 = vld [vmem:[%s6754_s26 + $0x318] sm:$0xff] }
 0x373   : > { %v4750_v36 = vadd.f32 %v4742_v23, %v4730_v3  ;;  %v4851_v13 = vrot.slane %v4843_v57, 1  ;;  %v4879_v37 = vrot.slane %v4863_v53, 2  ;;  %v4812_v38 = vmul.f32 %v5909_v52, %v8419_v59  ;;  %v5919_v3 = vld [vmem:[%s6757_s27 + $0x318] sm:$0xff] }
 0x374   : > { %v4880_v27 = vrot.slane %v4867_v39, 2  ;;  %v4816_v12 = vmul.f32 %v5917_v15, %v8424_v28  ;;  %5906 = vst [vmem:[%s6849_s29 + $0x70] sm:$0x7f] %v4793_v35  ;;  %v4839_v63 = vadd.f32 %v4831_v1, %v4819_v34  ;;  %v4824_v30 = vmul.f32 %v5909_v52, %v8428_v24  ;;  %v5915_v35 = vld [vmem:[%s6754_s26 + $0x338] sm:$0x1] }
 0x375   : > { %v4786_v16 = vadd.f32 %v4778_v33, %v4750_v36  ;;  %v4844_v17 = vmul.f32 %v5917_v15, %v8431_v50  ;;  %v4864_v20 = vmul.f32 %v5909_v52, %v8435_v46  ;;  %v4868_v58 = vmul.f32 %v5913_v55, %v8435_v46  ;;  %v5921_v36 = vld [vmem:[%s6849_s29 + $0x88] sm:$0x7f] }
 0x376   : > { %v4881_v0 = vsel %vm1094_vm0, %v4879_v37, %v4880_v27  ;;  %v4820_v29 = vadd.f32 %v4816_v12, %v4812_v38  ;;  %v4859_v10 = vadd.f32 %v4851_v13, %v4839_v63  ;;  %v4832_v32 = vrot.slane %v4824_v30, 1  ;;  %v5936_v63 = vld [vmem:[%s6757_s27 + $0x380] sm:$0xff] }
 0x377   : > { %v4794_v21 = vadd.f32 %v5903_v54, %v4786_v16  ;;  %v4852_v8 = vrot.slane %v4844_v17, 1  ;;  %v4882_v49 = vrot.slane %v4864_v20, 2  ;;  %v4883_v23 = vrot.slane %v4868_v58, 2  ;;  %v5928_v16 = vld [vmem:[%s6754_s26 + $0x380] sm:$0xff] }
 0x378   : > { %v4813_v18 = vmul.f32 %v5910_v11, %v8446_v44  ;;  %v4817_v5 = vmul.f32 %v5918_v62, %v8451_v40  ;;  %v4895_v48 = vadd.f32 %v4881_v0, %v4859_v10  ;;  %v4840_v22 = vadd.f32 %v4832_v32, %v4820_v29  ;;  %v5922_v10 = vld [vmem:[%s6849_s29 + $0x90] sm:$0x7f] }
 0x379   : > { %5907 = vst [vmem:[%s6849_s29 + $0x78] sm:$0x7f] %v4794_v21  ;;  %v4825_v43 = vmul.f32 %v5910_v11, %v8455_v42  ;;  %v4845_v25 = vmul.f32 %v5918_v62, %v8459_v19  ;;  %v4884_v2 = vsel %vm1094_vm0, %v4882_v49, %v4883_v23  ;;  %v4865_v52 = vmul.f32 %v5910_v11, %v8462_v47  ;;  %v5932_v21 = vld [vmem:[%s6754_s26 + $0x3a0] sm:$0x1] }
 0x37a   : > { %v4821_v57 = vadd.f32 %v4817_v5, %v4813_v18  ;;  %v4869_v15 = vmul.f32 %v5914_v4, %v8462_v47  ;;  %v4903_v33 = vadd.f32 %v5920_v45, %v4895_v48  ;;  %v4860_v34 = vadd.f32 %v4852_v8, %v4840_v22  ;;  %v5929_v48 = vld [vmem:[%s6754_s26 + $0x388] sm:$0xff] }
 0x37b   : > { %v4833_v53 = vrot.slane %v4825_v43, 1  ;;  %v4853_v39 = vrot.slane %v4845_v25, 1  ;;  %v4885_v1 = vrot.slane %v4865_v52, 2  ;;  %v4814_v55 = vmul.f32 %v5911_v26, %v8474_v61  ;;  %v5937_v22 = vld [vmem:[%s6757_s27 + $0x388] sm:$0xff] }
 0x37c   : > { %v4886_v13 = vrot.slane %v4869_v15, 2  ;;  %v4818_v54 = vmul.f32 %v5919_v3, %v8477_v14  ;;  %5924 = vst [vmem:[%s6849_s29 + $0x80] sm:$0x7f] %v4903_v33  ;;  %v4896_v37 = vadd.f32 %v4884_v2, %v4860_v34  ;;  %v4826_v38 = vmul.f32 %v5911_v26, %v8483_v6  ;;  %v5933_v33 = vld [vmem:[%s6754_s26 + $0x3a8] sm:$0x1] }
 0x37d   : > { %v4841_v27 = vadd.f32 %v4833_v53, %v4821_v57  ;;  %v4846_v12 = vmul.f32 %v5919_v3, %v8486_v7  ;;  %v4866_v11 = vmul.f32 %v5911_v26, %v8489_v51  ;;  %v4870_v62 = vmul.f32 %v5915_v35, %v8489_v51  ;;  %v5923_v34 = vld [vmem:[%s6849_s29 + $0x98] sm:$0x7f] }
 0x37e   : > { %v4887_v30 = vsel %vm1094_vm0, %v4885_v1, %v4886_v13  ;;  %v4822_v17 = vadd.f32 %v4818_v54, %v4814_v55  ;;  %v4904_v0 = vadd.f32 %v5921_v36, %v4896_v37  ;;  %v4834_v20 = vrot.slane %v4826_v38, 1  ;;  %v5930_v37 = vld [vmem:[%s6754_s26 + $0x390] sm:$0xff] }
 0x37f   : > { %v4861_v29 = vadd.f32 %v4853_v39, %v4841_v27  ;;  %v4854_v58 = vrot.slane %v4846_v12, 1  ;;  %v4888_v32 = vrot.slane %v4866_v11, 2  ;;  %v4889_v8 = vrot.slane %v4870_v62, 2  ;;  %v5938_v27 = vld [vmem:[%s6757_s27 + $0x390] sm:$0xff] }
 0x380   : > { %v4923_v4 = vmul.f32 %v5928_v16, %v8394_v56  ;;  %v4927_v45 = vmul.f32 %v5936_v63, %v8397_v31  ;;  %5925 = vst [vmem:[%s6849_s29 + $0x88] sm:$0x7f] %v4904_v0  ;;  %v4842_v23 = vadd.f32 %v4834_v20, %v4822_v17  ;;  %v4935_v18 = vmul.f32 %v5928_v16, %v8401_v41  ;;  %v5934_v0 = vld [vmem:[%s6754_s26 + $0x3b0] sm:$0x1] }
 0x381   : > { %v4897_v49 = vadd.f32 %v4887_v30, %v4861_v29  ;;  %v4955_v5 = vmul.f32 %v5936_v63, %v8404_v9  ;;  %v4890_v43 = vsel %vm1094_vm0, %v4888_v32, %v4889_v8  ;;  %v4975_v26 = vmul.f32 %v5928_v16, %v8409_v60  ;;  %v5940_v29 = vld [vmem:[%s6849_s29 + $0xa0] sm:$0x7f] }
 0x382   : > { %v4931_v25 = vadd.f32 %v4927_v45, %v4923_v4  ;;  %v4979_v3 = vmul.f32 %v5932_v21, %v8409_v60  ;;  %v4862_v57 = vadd.f32 %v4854_v58, %v4842_v23  ;;  %v4943_v52 = vrot.slane %v4935_v18, 1  ;;  %v5939_v23 = vld [vmem:[%s6757_s27 + $0x398] sm:$0xff] }
 0x383   : > { %v4905_v2 = vadd.f32 %v5922_v10, %v4897_v49  ;;  %v4963_v15 = vrot.slane %v4955_v5, 1  ;;  %v4991_v53 = vrot.slane %v4975_v26, 2  ;;  %v4924_v35 = vmul.f32 %v5929_v48, %v8419_v59  ;;  %v5931_v49 = vld [vmem:[%s6754_s26 + $0x398] sm:$0xff] }
 0x384   : > { %v4992_v39 = vrot.slane %v4979_v3, 2  ;;  %v4928_v36 = vmul.f32 %v5937_v22, %v8424_v28  ;;  %v4898_v1 = vadd.f32 %v4890_v43, %v4862_v57  ;;  %v4951_v13 = vadd.f32 %v4943_v52, %v4931_v25  ;;  %v5941_v57 = vld [vmem:[%s6849_s29 + $0xa8] sm:$0x7f] }
 0x385   : > { %5926 = vst [vmem:[%s6849_s29 + $0x90] sm:$0x7f] %v4905_v2  ;;  %v4936_v55 = vmul.f32 %v5929_v48, %v8428_v24  ;;  %v4956_v54 = vmul.f32 %v5937_v22, %v8431_v50  ;;  %v4976_v16 = vmul.f32 %v5929_v48, %v8435_v46  ;;  %v4980_v63 = vmul.f32 %v5933_v33, %v8435_v46  ;;  %v5935_v2 = vld [vmem:[%s6754_s26 + $0x3b8] sm:$0x1] }
 0x386   : > { %v4993_v38 = vsel %vm1094_vm0, %v4991_v53, %v4992_v39  ;;  %v4932_v12 = vadd.f32 %v4928_v36, %v4924_v35  ;;  %v4906_v30 = vadd.f32 %v5923_v34, %v4898_v1  ;;  %v4971_v17 = vadd.f32 %v4963_v15, %v4951_v13  ;;  %v5948_v1 = vld [vmem:[%s6754_s26 + $0x400] sm:$0xff] }
 0x387   : > { %v4944_v11 = vrot.slane %v4936_v55, 1  ;;  %v4964_v62 = vrot.slane %v4956_v54, 1  ;;  %v4994_v20 = vrot.slane %v4976_v16, 2  ;;  %v4995_v58 = vrot.slane %v4980_v63, 2  ;;  %v5956_v13 = vld [vmem:[%s6757_s27 + $0x400] sm:$0xff] }
 0x388   : > { %v4925_v21 = vmul.f32 %v5930_v37, %v8446_v44  ;;  %v4929_v10 = vmul.f32 %v5938_v27, %v8451_v40  ;;  %5927 = vst [vmem:[%s6849_s29 + $0x98] sm:$0x7f] %v4906_v30  ;;  %v5007_v32 = vadd.f32 %v4993_v38, %v4971_v17  ;;  %v4937_v4 = vmul.f32 %v5930_v37, %v8455_v42  ;;  %v5952_v30 = vld [vmem:[%s6754_s26 + $0x420] sm:$0x1]  ;;  %v5942_v17 = vld [vmem:[%s6849_s29 + $0xb0] sm:$0x7f] }
 0x389   : > { %v4952_v8 = vadd.f32 %v4944_v11, %v4932_v12  ;;  %v4957_v45 = vmul.f32 %v5938_v27, %v8459_v19  ;;  %v4996_v18 = vsel %vm1094_vm0, %v4994_v20, %v4995_v58  ;;  %v4977_v48 = vmul.f32 %v5930_v37, %v8462_v47 }
 0x38a   : > { %v4933_v5 = vadd.f32 %v4929_v10, %v4925_v21  ;;  %v4981_v22 = vmul.f32 %v5934_v0, %v8462_v47  ;;  %v5015_v43 = vadd.f32 %v5940_v29, %v5007_v32  ;;  %v4945_v26 = vrot.slane %v4937_v4, 1  ;;  %v5949_v32 = vld [vmem:[%s6754_s26 + $0x408] sm:$0xff] }
 0x38b   : > { %v4972_v25 = vadd.f32 %v4964_v62, %v4952_v8  ;;  %v4965_v3 = vrot.slane %v4957_v45, 1  ;;  %v4997_v52 = vrot.slane %v4977_v48, 2  ;;  %v4926_v33 = vmul.f32 %v5931_v49, %v8474_v61  ;;  %v5957_v8 = vld [vmem:[%s6757_s27 + $0x408] sm:$0xff] }
 0x38c   : > { %v4998_v15 = vrot.slane %v4981_v22, 2  ;;  %v4930_v34 = vmul.f32 %v5939_v23, %v8477_v14  ;;  %5944 = vst [vmem:[%s6849_s29 + $0xa0] sm:$0x7f] %v5015_v43  ;;  %v4953_v39 = vadd.f32 %v4945_v26, %v4933_v5  ;;  %v4938_v35 = vmul.f32 %v5931_v49, %v8483_v6  ;;  %v5953_v48 = vld [vmem:[%s6754_s26 + $0x428] sm:$0x1] }
 0x38d   : > { %v5008_v53 = vadd.f32 %v4996_v18, %v4972_v25  ;;  %v4958_v36 = vmul.f32 %v5939_v23, %v8486_v7  ;;  %v4978_v37 = vmul.f32 %v5931_v49, %v8489_v51  ;;  %v4982_v27 = vmul.f32 %v5935_v2, %v8489_v51 }
 0x38e   : > { %v4999_v55 = vsel %vm1094_vm0, %v4997_v52, %v4998_v15  ;;  %v4934_v54 = vadd.f32 %v4930_v34, %v4926_v33  ;;  %v4973_v12 = vadd.f32 %v4965_v3, %v4953_v39  ;;  %v4946_v16 = vrot.slane %v4938_v35, 1  ;;  %v5958_v52 = vld [vmem:[%s6757_s27 + $0x410] sm:$0xff] }
 0x38f   : > { %v5016_v38 = vadd.f32 %v5941_v57, %v5008_v53  ;;  %v4966_v63 = vrot.slane %v4958_v36, 1  ;;  %v5000_v11 = vrot.slane %v4978_v37, 2  ;;  %v5001_v62 = vrot.slane %v4982_v27, 2  ;;  %v5950_v57 = vld [vmem:[%s6754_s26 + $0x410] sm:$0xff] }
 0x390   : > { %v5037_v0 = vmul.f32 %v5948_v1, %v8394_v56  ;;  %v5041_v29 = vmul.f32 %v5956_v13, %v8397_v31  ;;  %v5009_v20 = vadd.f32 %v4999_v55, %v4973_v12  ;;  %v4954_v58 = vadd.f32 %v4946_v16, %v4934_v54  ;;  %v5954_v36 = vld [vmem:[%s6754_s26 + $0x430] sm:$0x1]  ;;  %v5959_v12 = vld [vmem:[%s6757_s27 + $0x418] sm:$0xff] }
 0x391   : > { %5945 = vst [vmem:[%s6849_s29 + $0xa8] sm:$0x7f] %v5016_v38  ;;  %v5049_v21 = vmul.f32 %v5948_v1, %v8401_v41  ;;  %v5069_v10 = vmul.f32 %v5956_v13, %v8404_v9  ;;  %v5002_v4 = vsel %vm1094_vm0, %v5000_v11, %v5001_v62  ;;  %v5089_v49 = vmul.f32 %v5948_v1, %v8409_v60  ;;  %v5943_v41 = vld [vmem:[%s6849_s29 + $0xb8] sm:$0x7f]  ;;  %v5951_v38 = vld [vmem:[%s6754_s26 + $0x418] sm:$0xff] }
 0x392   : > { %v5045_v45 = vadd.f32 %v5041_v29, %v5037_v0  ;;  %v5093_v56 = vmul.f32 %v5952_v30, %v8409_v60  ;;  %v5017_v31 = vadd.f32 %v5942_v17, %v5009_v20  ;;  %v4974_v23 = vadd.f32 %v4966_v63, %v4954_v58  ;;  %v5955_v0 = vld [vmem:[%s6754_s26 + $0x438] sm:$0x1]  ;;  %v5961_v29 = vld [vmem:[%s6849_s29 + $0xc8] sm:$0x7f] }
 0x393   : > { %v5057_v18 = vrot.slane %v5049_v21, 1  ;;  %v5077_v5 = vrot.slane %v5069_v10, 1  ;;  %v5105_v22 = vrot.slane %v5089_v49, 2  ;;  %v5038_v43 = vmul.f32 %v5949_v32, %v8419_v59 }
 0x394   : > { %v5106_v9 = vrot.slane %v5093_v56, 2  ;;  %v5042_v25 = vmul.f32 %v5957_v8, %v8424_v28  ;;  %5946 = vst [vmem:[%s6849_s29 + $0xb0] sm:$0x7f] %v5017_v31  ;;  %v5010_v26 = vadd.f32 %v5002_v4, %v4974_v23  ;;  %v5050_v60 = vmul.f32 %v5949_v32, %v8428_v24  ;;  %v5960_v24 = vld [vmem:[%s6849_s29 + $0xc0] sm:$0x7f] }
 0x395   : > { %v5065_v3 = vadd.f32 %v5057_v18, %v5045_v45  ;;  %v5070_v2 = vmul.f32 %v5957_v8, %v8431_v50  ;;  %v5090_v34 = vmul.f32 %v5949_v32, %v8435_v46  ;;  %v5094_v59 = vmul.f32 %v5953_v48, %v8435_v46  ;;  %v5962_v23 = vld [vmem:[%s6849_s29 + $0xd0] sm:$0x7f] }
 0x396   : > { %v5107_v15 = vsel %vm1094_vm0, %v5105_v22, %v5106_v9  ;;  %v5046_v33 = vadd.f32 %v5042_v25, %v5038_v43  ;;  %v5018_v28 = vadd.f32 %v5943_v41, %v5010_v26  ;;  %v5058_v39 = vrot.slane %v5050_v60, 1  ;;  %v5963_v9 = vld [vmem:[%s6849_s29 + $0xd8] sm:$0x7f]  ;;  %v5161_v26 = vld [vmem:[%s6849_s29 + $0x8] sm:$0xff] (%p6083_p5) }
 0x397   : > { %v5085_v53 = vadd.f32 %v5077_v5, %v5065_v3  ;;  %v5078_v35 = vrot.slane %v5070_v2, 1  ;;  %v5108_v1 = vrot.slane %v5090_v34, 2  ;;  %v5109_v50 = vrot.slane %v5094_v59, 2  ;;  %v5163_v3 = vld [vmem:[%s6849_s29 + $0x10] sm:$0xff] (%p6083_p5)  ;;  %v5165_v60 = vld [vmem:[%s6849_s29 + $0x18] sm:$0xff] (%p6083_p5)  ;;  %5162 = vst [vmem:[%s8801_s21 + $0x8] sm:$0xff] (%p6083_p5), %v5161_v26 }
 0x398   : > { %v5039_v13 = vmul.f32 %v5950_v57, %v8446_v44  ;;  %v5043_v55 = vmul.f32 %v5958_v52, %v8451_v40  ;;  %5947 = vst [vmem:[%s6849_s29 + $0xb8] sm:$0x7f] %v5018_v28  ;;  %v5066_v37 = vadd.f32 %v5058_v39, %v5046_v33  ;;  %v5051_v46 = vmul.f32 %v5950_v57, %v8455_v42  ;;  %v5167_v2 = vld [vmem:[%s6849_s29 + $0x20] sm:$0xff] (%p6083_p5)  ;;  %v5177_v34 = vld [vmem:[%s6849_s29 + $0x48] sm:$0xff] (%p6083_p5)  ;;  %v5179_v59 = vld [vmem:[%s6849_s29 + $0x50] sm:$0xff] (%p6083_p5) }
 0x399   : > { %v5121_v54 = vadd.f32 %v5107_v15, %v5085_v53  ;;  %v5071_v27 = vmul.f32 %v5958_v52, %v8459_v19  ;;  %v5110_v16 = vsel %vm1094_vm0, %v5108_v1, %v5109_v50  ;;  %v5091_v30 = vmul.f32 %v5950_v57, %v8462_v47  ;;  %5164 = vst [vmem:[%s8801_s21 + $0x10] sm:$0xff] (%p6083_p5), %v5163_v3  ;;  %v5169_v57 = vld [vmem:[%s6849_s29 + $0x28] sm:$0xff] (%p6083_p5)  ;;  %v5171_v52 = vld [vmem:[%s6849_s29 + $0x30] sm:$0xff] (%p6083_p5)  ;;  %v5173_v15 = vld [vmem:[%s6849_s29 + $0x38] sm:$0xff] (%p6083_p5) }
 0x39a   : > { %v5047_v63 = vadd.f32 %v5043_v55, %v5039_v13  ;;  %v5095_v44 = vmul.f32 %v5954_v36, %v8462_v47  ;;  %v5086_v17 = vadd.f32 %v5078_v35, %v5066_v37  ;;  %v5059_v11 = vrot.slane %v5051_v46, 1  ;;  %5166 = vst [vmem:[%s8801_s21 + $0x18] sm:$0xff] (%p6083_p5), %v5165_v60  ;;  %v5175_v33 = vld [vmem:[%s6849_s29 + $0x40] sm:$0xff] (%p6083_p5)  ;;  %v5181_v28 = vld [vmem:[%s6849_s29 + $0x58] sm:$0xff] (%p6083_p5)  ;;  %v5185_v39 = vld [vmem:[%s6849_s29 + $0x68] sm:$0xff] (%p6083_p5) }
 0x39b   : > { %v5129_v40 = vadd.f32 %v5960_v24, %v5121_v54  ;;  %v5079_v62 = vrot.slane %v5071_v27, 1  ;;  %v5111_v20 = vrot.slane %v5091_v30, 2  ;;  %v5040_v19 = vmul.f32 %v5951_v38, %v8474_v61  ;;  %5168 = vst [vmem:[%s8801_s21 + $0x40] sm:$0xff] (%p6083_p5), %v5167_v2  ;;  %v5183_v53 = vld [vmem:[%s6849_s29 + $0x60] sm:$0xff] (%p6083_p5)  ;;  %v5187_v35 = vld [vmem:[%s6849_s29 + $0x70] sm:$0xff] (%p6083_p5)  ;;  %v5189_v36 = vld [vmem:[%s6849_s29 + $0x78] sm:$0xff] (%p6083_p5) }
 0x39c   : > { %v5112_v42 = vrot.slane %v5095_v44, 2  ;;  %v5044_v58 = vmul.f32 %v5959_v12, %v8477_v14  ;;  %v5122_v21 = vadd.f32 %v5110_v16, %v5086_v17  ;;  %v5067_v10 = vadd.f32 %v5059_v11, %v5047_v63  ;;  %5170 = vst [vmem:[%s8801_s21 + $0x48] sm:$0xff] (%p6083_p5), %v5169_v57  ;;  %v5191_v24 = vld [vmem:[%s6849_s29 + $0x80] sm:$0xff] (%p6083_p5)  ;;  %v5193_v1 = vld [vmem:[%s6849_s29 + $0x88] sm:$0xff] (%p6083_p5)  ;;  %v5195_v50 = vld [vmem:[%s6849_s29 + $0x90] sm:$0xff] (%p6083_p5) }
 0x39d   : > { %5964 = vst [vmem:[%s6849_s29 + $0xc0] sm:$0x7f] %v5129_v40  ;;  %v5052_v32 = vmul.f32 %v5951_v38, %v8483_v6  ;;  %v5072_v47 = vmul.f32 %v5959_v12, %v8486_v7  ;;  %v5092_v45 = vmul.f32 %v5951_v38, %v8489_v51  ;;  %v5096_v49 = vmul.f32 %v5955_v0, %v8489_v51  ;;  %v5159_v51 = vld [vmem:[%s6849_s29] sm:$0xff] (%p6083_p5)  ;;  %v5197_v13 = vld [vmem:[%s6849_s29 + $0x98] sm:$0xff] (%p6083_p5)  ;;  %v5201_v54 = vld [vmem:[%s6849_s29 + $0xa8] sm:$0xff] (%p6083_p5) }
 0x39e   : > { %v5113_v8 = vsel %vm1094_vm0, %v5111_v20, %v5112_v42  ;;  %v5048_v4 = vadd.f32 %v5044_v58, %v5040_v19  ;;  %v5130_v61 = vadd.f32 %v5961_v29, %v5122_v21  ;;  %v5087_v56 = vadd.f32 %v5079_v62, %v5067_v10  ;;  %5160 = vst [vmem:[%s8801_s21] sm:$0xff] (%p6083_p5), %v5159_v51  ;;  %v5199_v55 = vld [vmem:[%s6849_s29 + $0xa0] sm:$0xff] (%p6083_p5)  ;;  %v5203_v37 = vld [vmem:[%s6849_s29 + $0xb0] sm:$0xff] (%p6083_p5) }
 0x39f   : > { %v5060_v14 = vrot.slane %v5052_v32, 1  ;;  %v5080_v31 = vrot.slane %v5072_v47, 1  ;;  %v5114_v18 = vrot.slane %v5092_v45, 2  ;;  %v5115_v5 = vrot.slane %v5096_v49, 2  ;;  %5172 = vst [vmem:[%s8801_s21 + $0x50] sm:$0xff] (%p6083_p5), %v5171_v52  ;;  %v5205_v46 = vld [vmem:[%s6849_s29 + $0xb8] sm:$0xff] (%p6083_p5) }
 0x3a0   : > { %5965 = vst [vmem:[%s6849_s29 + $0xc8] sm:$0x7f] %v5130_v61  ;;  %v5123_v6 = vadd.f32 %v5113_v8, %v5087_v56 }
 0x3a1   : > { %v5068_v7 = vadd.f32 %v5060_v14, %v5048_v4  ;;  %v5116_v48 = vsel %vm1094_vm0, %v5114_v18, %v5115_v5  ;;  %5174 = vst [vmem:[%s8801_s21 + $0x58] sm:$0xff] (%p6083_p5), %v5173_v15 }
 0x3a2   : > { %v5131_v41 = vadd.f32 %v5962_v23, %v5123_v6  ;;  %5176 = vst [vmem:[%s8801_s21 + $0x80] sm:$0xff] (%p6083_p5), %v5175_v33 }
 0x3a3   : > { %v5088_v22 = vadd.f32 %v5080_v31, %v5068_v7  ;;  %5178 = vst [vmem:[%s8801_s21 + $0x88] sm:$0xff] (%p6083_p5), %v5177_v34 }
 0x3a4   : > { %5966 = vst [vmem:[%s6849_s29 + $0xd0] sm:$0x7f] %v5131_v41  ;;  %v5207_v27 = vld [vmem:[%s6849_s29 + $0xc0] sm:$0xff] (%p6083_p5) }
 0x3a5   : > { %v5124_v43 = vadd.f32 %v5116_v48, %v5088_v22  ;;  %5143 = sbr.rel (!%p6083_p5) target bundleno = 952 (0x3b8), region = 123  ;;  %5180 = vst [vmem:[%s8801_s21 + $0x90] sm:$0xff] (%p6083_p5), %v5179_v59 }
 0x3a6   : > { %5182 = vst [vmem:[%s8801_s21 + $0x98] sm:$0xff] (%p6083_p5), %v5181_v28 }
 0x3a7   : > { %v5132_v25 = vadd.f32 %v5963_v9, %v5124_v43  ;;  %5184 = vst [vmem:[%s8801_s21 + $0xc0] sm:$0xff] (%p6083_p5), %v5183_v53  ;;  %v5209_v38 = vld [vmem:[%s6849_s29 + $0xc8] sm:$0xff] (%p6083_p5) }
 0x3a8   : > { %5186 = vst [vmem:[%s8801_s21 + $0xc8] sm:$0xff] (%p6083_p5), %v5185_v39 }
 0x3a9   : > { %5967 = vst [vmem:[%s6849_s29 + $0xd8] sm:$0x7f] %v5132_v25 }
 0x3aa   : > { %5188 = vst [vmem:[%s8801_s21 + $0xd0] sm:$0xff] %v5187_v35 }
 0x3ab   : > { %5190 = vst [vmem:[%s8801_s21 + $0xd8] sm:$0xff] %v5189_v36  ;;  %v5211_v12 = vld [vmem:[%s6849_s29 + $0xd0] sm:$0xff] }
 0x3ac   : > { %5192 = vst [vmem:[%s8801_s21 + $0x100] sm:$0xff] %v5191_v24 }
 0x3ad   : > { %5194 = vst [vmem:[%s8801_s21 + $0x108] sm:$0xff] %v5193_v1 }
 0x3ae   : > { %5196 = vst [vmem:[%s8801_s21 + $0x110] sm:$0xff] %v5195_v50 }
 0x3af   : > { %5198 = vst [vmem:[%s8801_s21 + $0x118] sm:$0xff] %v5197_v13 }
 0x3b0   : > { %5200 = vst [vmem:[%s8801_s21 + $0x140] sm:$0xff] %v5199_v55  ;;  %v5213_v16 = vld [vmem:[%s6849_s29 + $0xd8] sm:$0xff] }
 0x3b1   : > { %5202 = vst [vmem:[%s8801_s21 + $0x148] sm:$0xff] %v5201_v54 }
 0x3b2   : > { %5204 = vst [vmem:[%s8801_s21 + $0x150] sm:$0xff] %v5203_v37 }
 0x3b3   : > { %5206 = vst [vmem:[%s8801_s21 + $0x158] sm:$0xff] %v5205_v46 }
 0x3b4   : > { %5208 = vst [vmem:[%s8801_s21 + $0x180] sm:$0xff] %v5207_v27 }
 0x3b5   : > { %5210 = vst [vmem:[%s8801_s21 + $0x188] sm:$0xff] %v5209_v38 }
 0x3b6   : > { %5212 = vst [vmem:[%s8801_s21 + $0x190] sm:$0xff] %v5211_v12 }
 0x3b7   : > { %5214 = vst [vmem:[%s8801_s21 + $0x198] sm:$0xff] %v5213_v16 }
 0x3b8 PF: > { %p10_p10 = scmp.ge.s32.totalorder %s6066_s16, 4   ;;  %s8873_s12 = smov %s6023_s13 }
 0x3b9   : > { %s8874_s13 = smov %s6077_s19  ;;  %s8875_s14 = smov %s6066_s16 }
 0x3ba   :  { %12 = sbr.rel (!%p10_p10) target bundleno = 2 (0x2), region = 255 }

</bundles_post_ra>
